<compile_context>
chip_gen: v7x
topology: tpu7x:2x2x1
jax: 0.10.0
libtpu: 0.0.40
codegen_flags: <defaults>
</compile_context>

<pallas_src>
import functools
import math

import jax
import jax.numpy as jnp
from jax.experimental import pallas as pl

D_MODEL = 32
FFN_HIDDEN = 64
NUM_HEADS = 4
NUM_LAYERS = 6
EPS = 1e-5


def _layer_norm(x, gamma, beta):
    # x: (B*S, D); gamma/beta: (1, D)
    mean = jnp.mean(x, axis=-1, keepdims=True)
    var = jnp.mean((x - mean) ** 2, axis=-1, keepdims=True)
    return (x - mean) * jax.lax.rsqrt(var + EPS) * gamma + beta


# -----------------------------------------------------------------------------
# Kernel: the whole 6-layer encoder in one invocation (no grid).
# -----------------------------------------------------------------------------
def encoder_stack_kernel(x_ref,
                         wqkv_ref, bqkv_ref, wo_ref, bo_ref,
                         g1_ref, be1_ref,
                         w1_ref, b1_ref, w2_ref, b2_ref,
                         g2_ref, be2_ref,
                         o_ref,
                         *, num_layers, num_heads, batch, seq):
    B, S, H = batch, seq, num_heads
    BS, D = x_ref.shape
    hd = D // H

    # Activation stays 2-D (B*S, D) and VMEM-resident across all layers.
    x = x_ref[...]

    for l in range(num_layers):
        # --- Multi-head attention -------------------------------------------
        # ONE fused QKV projection per layer; the 1/sqrt(hd) scale is folded
        # into the q columns wrapper-side.
        qkv = jnp.dot(x, wqkv_ref[l],
                      preferred_element_type=jnp.float32) + bqkv_ref[l]  # (BS, 3D)
        qkv3 = qkv.reshape(B, S, 3 * D)         # leading-dim split only

        # TODO(synk): additive attention mask not wired in (Encoder runs mask=None).
        attn = None
        wo_l = wo_ref[l]                        # (H, hd, D): torch Wo row blocks
        for h in range(H):
            off = 3 * hd * h                    # torch chunking: per-head [q|k|v]
            qh = qkv3[..., off:off + hd]                 # (B, S, hd), pre-scaled
            kh = qkv3[..., off + hd:off + 2 * hd]
            vh = qkv3[..., off + 2 * hd:off + 3 * hd]
            s = jnp.einsum('bqd,bkd->bqk', qh, kh,
                           preferred_element_type=jnp.float32)    # (B, S, S)
            s = s - jnp.max(s, axis=-1, keepdims=True)
            p = jnp.exp(s)
            p = p / jnp.sum(p, axis=-1, keepdims=True)            # exact softmax
            ctx = jnp.einsum('bqk,bkd->bqd', p, vh,
                             preferred_element_type=jnp.float32)  # (B, S, hd)
            # Head-concat folded into the output projection: ctx_h @ Wo[h].
            oh = jnp.dot(ctx.reshape(BS, hd), wo_l[h],
                         preferred_element_type=jnp.float32)      # (BS, D)
            attn = oh if attn is None else attn + oh
        attn = attn + bo_ref[l]

        # dropout1 (p=0.1): identity in eval mode.
        x1 = _layer_norm(attn + x, g1_ref[l], be1_ref[l])

        # --- Position-wise feed-forward ---------------------------------------
        h1 = jnp.maximum(
            jnp.dot(x1, w1_ref[l], preferred_element_type=jnp.float32) + b1_ref[l],
            0.0)                                # ReLU; inner dropout = identity
        ffn = jnp.dot(h1, w2_ref[l], preferred_element_type=jnp.float32) + b2_ref[l]

        # dropout2: identity in eval mode.
        x = _layer_norm(ffn + x1, g2_ref[l], be2_ref[l])

    o_ref[...] = x.astype(o_ref.dtype)


def encoder_forward(x, stacked_params, mask=None):
    """Encoder.forward: the whole stack fused into ONE pallas_call invocation."""
    assert mask is None  # TODO(synk): only the mask=None path is implemented.
    B, S, D = x.shape
    num_layers = stacked_params[0].shape[0]
    kernel = functools.partial(encoder_stack_kernel,
                               num_layers=num_layers, num_heads=NUM_HEADS,
                               batch=B, seq=S)
    # No grid: every operand is a whole-array VMEM block (total well under the
    # scoped VMEM limit), so there is no per-step DMA / grid overhead at all.
    out2d = pl.pallas_call(
        kernel,
        out_shape=jax.ShapeDtypeStruct((B * S, D), x.dtype),
    )(x.reshape(B * S, D), *stacked_params)
    return out2d.reshape(B, S, D)


# -----------------------------------------------------------------------------
# Parameter construction (torch-style raw params) + kernel-layout transform
# -----------------------------------------------------------------------------
def init_layer_params(key, d_model, ffn_hidden):
    """One EncoderLayer's parameters in the torch-style (x @ W + b) layout."""
    ks = jax.random.split(key, 8)
    s = 0.05
    w_qkv = jax.random.normal(ks[0], (d_model, 3 * d_model), jnp.float32) * s
    b_qkv = jax.random.normal(ks[1], (3 * d_model,), jnp.float32) * s
    wo = jax.random.normal(ks[2], (d_model, d_model), jnp.float32) * s
    bo = jax.random.normal(ks[3], (d_model,), jnp.float32) * s
    g1 = jnp.ones((d_model,), jnp.float32)
    be1 = jnp.zeros((d_model,), jnp.float32)
    w1 = jax.random.normal(ks[4], (d_model, ffn_hidden), jnp.float32) * s
    b1 = jax.random.normal(ks[5], (ffn_hidden,), jnp.float32) * s
    w2 = jax.random.normal(ks[6], (ffn_hidden, d_model), jnp.float32) * s
    b2 = jax.random.normal(ks[7], (d_model,), jnp.float32) * s
    return (w_qkv, b_qkv, wo, bo, g1, be1, w1, b1, w2, b2, g2 := jnp.ones((d_model,), jnp.float32), be2 := jnp.zeros((d_model,), jnp.float32))


def to_kernel_layout(raw, num_heads):
    """Rearrange one layer's raw params into the kernel layout (no replication)."""
    (w_qkv, b_qkv, wo, bo, g1, be1, w1, b1, w2, b2, g2, be2) = raw
    D = w_qkv.shape[0]
    H = num_heads
    hd = D // H
    scale = 1.0 / math.sqrt(hd)

    # torch semantics: qkv.reshape(B,S,H,3*hd) then chunk -> per-head q|k|v,
    # i.e. columns [h*3hd, h*3hd+hd) are q for head h.  Fold the 1/sqrt(hd)
    # attention scale into those q columns (exact transform).
    w_s = w_qkv.reshape(D, H, 3 * hd)
    w_s = w_s.at[:, :, :hd].multiply(scale).reshape(D, 3 * D)
    b_s = b_qkv.reshape(H, 3 * hd)
    b_s = b_s.at[:, :hd].multiply(scale).reshape(1, 3 * D)

    return (w_s, b_s,
            wo.reshape(H, hd, D),            # per-head Wo row block (head concat fold)
            bo.reshape(1, D),
            g1.reshape(1, D), be1.reshape(1, D),
            w1, b1.reshape(1, -1), w2, b2.reshape(1, -1),
            g2.reshape(1, D), be2.reshape(1, D))


def stack_layers(raw_layers, num_heads):
    per_layer = [to_kernel_layout(r, num_heads) for r in raw_layers]
    return tuple(jnp.stack(arrs, axis=0) for arrs in zip(*per_layer))


# -----------------------------------------------------------------------------
# Pure-JAX reference (torch-equivalent math) for a correctness check
# -----------------------------------------------------------------------------
def _ref_mha(x, w_qkv, b_qkv, wo, bo, num_heads):
    B, S, D = x.shape
    H = num_heads
    hd = D // H
    qkv = x @ w_qkv + b_qkv                                     # (B, S, 3D)
    qkv = qkv.reshape(B, S, H, 3 * hd).transpose(0, 2, 1, 3)    # (B, H, S, 3hd)
    q, k, v = qkv[..., :hd], qkv[..., hd:2 * hd], qkv[..., 2 * hd:]
    s = jnp.einsum('bhqd,bhkd->bhqk', q, k) / math.sqrt(hd)
    p = jax.nn.softmax(s, axis=-1)
    ctx = jnp.einsum('bhqk,bhkd->bhqd', p, v)
    vals = ctx.transpose(0, 2, 1, 3).reshape(B, S, D)
    return vals @ wo + bo


def _ref_layer_norm(x, gamma, beta):
    mean = x.mean(-1, keepdims=True)
    var = ((x - mean) ** 2).mean(-1, keepdims=True)
    return gamma * ((x - mean) / jnp.sqrt(var + EPS)) + beta


def _ref_encoder(x, raw_layers):
    for (w_qkv, b_qkv, wo, bo, g1, be1, w1, b1, w2, b2, g2, be2) in raw_layers:
        a = _ref_mha(x, w_qkv, b_qkv, wo, bo, NUM_HEADS)
        x = _ref_layer_norm(a + x, g1, be1)
        h = jax.nn.relu(x @ w1 + b1)
        f = h @ w2 + b2
        x = _ref_layer_norm(f + x, g2, be2)
    return x


if __name__ == "__main__":
    key = jax.random.PRNGKey(0)
    k_x, k_p = jax.random.split(key)

    B, S = 2, 8
    x = jax.random.normal(k_x, (B, S, D_MODEL), jnp.float32)

    raw_layers = [init_layer_params(k, D_MODEL, FFN_HIDDEN)
                  for k in jax.random.split(k_p, NUM_LAYERS)]
    stacked = stack_layers(raw_layers, NUM_HEADS)

    out = encoder_forward(x, stacked, mask=None)
    out = jax.block_until_ready(out)
    assert out.shape == (B, S, D_MODEL) and out.dtype == jnp.float32

    # Correctness check against a pure-JAX reference (tolerance covers MXU
    # default-precision differences accumulated over 6 layers; the approx
    # softmax reciprocal from the previous version has been removed).
    ref = _ref_encoder(x, raw_layers)
    max_err = float(jnp.max(jnp.abs(out - ref)))
    assert max_err < 3e-2, f"kernel/reference mismatch: max abs err {max_err}"

    print("KERNEL_OK")
</pallas_src>

<mosaic_0001>
module attributes {stable_mosaic.version = 11 : i64} {
  func.func @encoder_stack_kernel(%arg0: memref<16x32xf32, #tpu.memory_space<vmem>>, %arg1: memref<6x32x96xf32, #tpu.memory_space<vmem>>, %arg2: memref<6x1x96xf32, #tpu.memory_space<vmem>>, %arg3: memref<6x4x8x32xf32, #tpu.memory_space<vmem>>, %arg4: memref<6x1x32xf32, #tpu.memory_space<vmem>>, %arg5: memref<6x1x32xf32, #tpu.memory_space<vmem>>, %arg6: memref<6x1x32xf32, #tpu.memory_space<vmem>>, %arg7: memref<6x32x64xf32, #tpu.memory_space<vmem>>, %arg8: memref<6x1x64xf32, #tpu.memory_space<vmem>>, %arg9: memref<6x64x32xf32, #tpu.memory_space<vmem>>, %arg10: memref<6x1x32xf32, #tpu.memory_space<vmem>>, %arg11: memref<6x1x32xf32, #tpu.memory_space<vmem>>, %arg12: memref<6x1x32xf32, #tpu.memory_space<vmem>>, %arg13: memref<16x32xf32, #tpu.memory_space<vmem>>) attributes {dimension_semantics = [], scalar_prefetch = 0 : i64, scratch_operands = 0 : i64, tpu.core_type = #tpu.core_type<tc>} {
    %c0 = arith.constant 0 : index
    %c0_0 = arith.constant 0 : index
    %0 = vector.load %arg0[%c0, %c0_0] : memref<16x32xf32, #tpu.memory_space<vmem>>, vector<16x32xf32>
    %c0_1 = arith.constant 0 : index
    %c0_2 = arith.constant 0 : index
    %c0_3 = arith.constant 0 : index
    %1 = vector.load %arg1[%c0_1, %c0_2, %c0_3] : memref<6x32x96xf32, #tpu.memory_space<vmem>>, vector<1x32x96xf32>
    %2 = vector.shape_cast %1 : vector<1x32x96xf32> to vector<32x96xf32>
    %cst = arith.constant dense<0.000000e+00> : vector<16x96xf32>
    %3 = tpu.matmul %0, %2, %cst {dimension_numbers = #tpu.dot_dimension_numbers<[1], [0], [0], [1], [0, 0, 1, 1], [], []>} : vector<16x32xf32>, vector<32x96xf32>, vector<16x96xf32> -> vector<16x96xf32>
    %c0_4 = arith.constant 0 : index
    %c0_5 = arith.constant 0 : index
    %c0_6 = arith.constant 0 : index
    %4 = vector.load %arg2[%c0_4, %c0_5, %c0_6] : memref<6x1x96xf32, #tpu.memory_space<vmem>>, vector<1x1x96xf32>
    %5 = vector.shape_cast %4 : vector<1x1x96xf32> to vector<1x96xf32>
    %6 = vector.broadcast %5 : vector<1x96xf32> to vector<16x96xf32>
    %7 = arith.addf %3, %6 : vector<16x96xf32>
    %8 = vector.shape_cast %7 : vector<16x96xf32> to vector<2x8x96xf32>
    %c0_7 = arith.constant 0 : index
    %c0_8 = arith.constant 0 : index
    %c0_9 = arith.constant 0 : index
    %c0_10 = arith.constant 0 : index
    %9 = vector.load %arg3[%c0_7, %c0_8, %c0_9, %c0_10] : memref<6x4x8x32xf32, #tpu.memory_space<vmem>>, vector<1x4x8x32xf32>
    %10 = vector.shape_cast %9 : vector<1x4x8x32xf32> to vector<4x8x32xf32>
    %11 = vector.extract_strided_slice %8 {offsets = [0, 0, 0], sizes = [2, 8, 8], strides = [1, 1, 1]} : vector<2x8x96xf32> to vector<2x8x8xf32>
    %12 = vector.extract_strided_slice %8 {offsets = [0, 0, 8], sizes = [2, 8, 8], strides = [1, 1, 1]} : vector<2x8x96xf32> to vector<2x8x8xf32>
    %13 = vector.extract_strided_slice %8 {offsets = [0, 0, 16], sizes = [2, 8, 8], strides = [1, 1, 1]} : vector<2x8x96xf32> to vector<2x8x8xf32>
    "tpu.trace_start"() <{level = 10 : i32, message = "bqd,bkd->bqk"}> : () -> ()
    %cst_11 = arith.constant dense<0.000000e+00> : vector<2x8x8xf32>
    %14 = tpu.matmul %11, %12, %cst_11 {dimension_numbers = #tpu.dot_dimension_numbers<[2], [2], [1], [1], [0, 0, 0, 1, 1, 1], [0], [0]>} : vector<2x8x8xf32>, vector<2x8x8xf32>, vector<2x8x8xf32> -> vector<2x8x8xf32>
    "tpu.trace_stop"() : () -> ()
    %cst_12 = arith.constant dense<0xFF800000> : vector<2x8xf32>
    %15 = vector.multi_reduction <maximumf>, %14, %cst_12 [2] : vector<2x8x8xf32> to vector<2x8xf32>
    %16 = vector.shape_cast %15 : vector<2x8xf32> to vector<2x8x1xf32>
    %17 = vector.broadcast %16 : vector<2x8x1xf32> to vector<2x8x8xf32>
    %18 = arith.subf %14, %17 : vector<2x8x8xf32>
    %19 = math.exp %18 : vector<2x8x8xf32>
    %cst_13 = arith.constant dense<0.000000e+00> : vector<2x8xf32>
    %20 = vector.multi_reduction <add>, %19, %cst_13 [2] : vector<2x8x8xf32> to vector<2x8xf32>
    %21 = vector.shape_cast %20 : vector<2x8xf32> to vector<2x8x1xf32>
    %22 = vector.broadcast %21 : vector<2x8x1xf32> to vector<2x8x8xf32>
    %23 = arith.divf %19, %22 : vector<2x8x8xf32>
    "tpu.trace_start"() <{level = 10 : i32, message = "bqk,bkd->bqd"}> : () -> ()
    %cst_14 = arith.constant dense<0.000000e+00> : vector<2x8x8xf32>
    %24 = tpu.matmul %23, %13, %cst_14 {dimension_numbers = #tpu.dot_dimension_numbers<[2], [1], [1], [2], [0, 0, 0, 1, 1, 2], [0], [0]>} : vector<2x8x8xf32>, vector<2x8x8xf32>, vector<2x8x8xf32> -> vector<2x8x8xf32>
    "tpu.trace_stop"() : () -> ()
    %25 = vector.shape_cast %24 : vector<2x8x8xf32> to vector<16x8xf32>
    %26 = vector.extract_strided_slice %10 {offsets = [0, 0, 0], sizes = [1, 8, 32], strides = [1, 1, 1]} : vector<4x8x32xf32> to vector<1x8x32xf32>
    %27 = vector.shape_cast %26 : vector<1x8x32xf32> to vector<8x32xf32>
    %cst_15 = arith.constant dense<0.000000e+00> : vector<16x32xf32>
    %28 = tpu.matmul %25, %27, %cst_15 {dimension_numbers = #tpu.dot_dimension_numbers<[1], [0], [0], [1], [0, 0, 1, 1], [], []>} : vector<16x8xf32>, vector<8x32xf32>, vector<16x32xf32> -> vector<16x32xf32>
    %29 = vector.extract_strided_slice %8 {offsets = [0, 0, 24], sizes = [2, 8, 8], strides = [1, 1, 1]} : vector<2x8x96xf32> to vector<2x8x8xf32>
    %30 = vector.extract_strided_slice %8 {offsets = [0, 0, 32], sizes = [2, 8, 8], strides = [1, 1, 1]} : vector<2x8x96xf32> to vector<2x8x8xf32>
    %31 = vector.extract_strided_slice %8 {offsets = [0, 0, 40], sizes = [2, 8, 8], strides = [1, 1, 1]} : vector<2x8x96xf32> to vector<2x8x8xf32>
    "tpu.trace_start"() <{level = 10 : i32, message = "bqd,bkd->bqk"}> : () -> ()
    %cst_16 = arith.constant dense<0.000000e+00> : vector<2x8x8xf32>
    %32 = tpu.matmul %29, %30, %cst_16 {dimension_numbers = #tpu.dot_dimension_numbers<[2], [2], [1], [1], [0, 0, 0, 1, 1, 1], [0], [0]>} : vector<2x8x8xf32>, vector<2x8x8xf32>, vector<2x8x8xf32> -> vector<2x8x8xf32>
    "tpu.trace_stop"() : () -> ()
    %cst_17 = arith.constant dense<0xFF800000> : vector<2x8xf32>
    %33 = vector.multi_reduction <maximumf>, %32, %cst_17 [2] : vector<2x8x8xf32> to vector<2x8xf32>
    %34 = vector.shape_cast %33 : vector<2x8xf32> to vector<2x8x1xf32>
    %35 = vector.broadcast %34 : vector<2x8x1xf32> to vector<2x8x8xf32>
    %36 = arith.subf %32, %35 : vector<2x8x8xf32>
    %37 = math.exp %36 : vector<2x8x8xf32>
    %cst_18 = arith.constant dense<0.000000e+00> : vector<2x8xf32>
    %38 = vector.multi_reduction <add>, %37, %cst_18 [2] : vector<2x8x8xf32> to vector<2x8xf32>
    %39 = vector.shape_cast %38 : vector<2x8xf32> to vector<2x8x1xf32>
    %40 = vector.broadcast %39 : vector<2x8x1xf32> to vector<2x8x8xf32>
    %41 = arith.divf %37, %40 : vector<2x8x8xf32>
    "tpu.trace_start"() <{level = 10 : i32, message = "bqk,bkd->bqd"}> : () -> ()
    %cst_19 = arith.constant dense<0.000000e+00> : vector<2x8x8xf32>
    %42 = tpu.matmul %41, %31, %cst_19 {dimension_numbers = #tpu.dot_dimension_numbers<[2], [1], [1], [2], [0, 0, 0, 1, 1, 2], [0], [0]>} : vector<2x8x8xf32>, vector<2x8x8xf32>, vector<2x8x8xf32> -> vector<2x8x8xf32>
    "tpu.trace_stop"() : () -> ()
    %43 = vector.shape_cast %42 : vector<2x8x8xf32> to vector<16x8xf32>
    %44 = vector.extract_strided_slice %10 {offsets = [1, 0, 0], sizes = [1, 8, 32], strides = [1, 1, 1]} : vector<4x8x32xf32> to vector<1x8x32xf32>
    %45 = vector.shape_cast %44 : vector<1x8x32xf32> to vector<8x32xf32>
    %cst_20 = arith.constant dense<0.000000e+00> : vector<16x32xf32>
    %46 = tpu.matmul %43, %45, %cst_20 {dimension_numbers = #tpu.dot_dimension_numbers<[1], [0], [0], [1], [0, 0, 1, 1], [], []>} : vector<16x8xf32>, vector<8x32xf32>, vector<16x32xf32> -> vector<16x32xf32>
    %47 = arith.addf %28, %46 : vector<16x32xf32>
    %48 = vector.extract_strided_slice %8 {offsets = [0, 0, 48], sizes = [2, 8, 8], strides = [1, 1, 1]} : vector<2x8x96xf32> to vector<2x8x8xf32>
    %49 = vector.extract_strided_slice %8 {offsets = [0, 0, 56], sizes = [2, 8, 8], strides = [1, 1, 1]} : vector<2x8x96xf32> to vector<2x8x8xf32>
    %50 = vector.extract_strided_slice %8 {offsets = [0, 0, 64], sizes = [2, 8, 8], strides = [1, 1, 1]} : vector<2x8x96xf32> to vector<2x8x8xf32>
    "tpu.trace_start"() <{level = 10 : i32, message = "bqd,bkd->bqk"}> : () -> ()
    %cst_21 = arith.constant dense<0.000000e+00> : vector<2x8x8xf32>
    %51 = tpu.matmul %48, %49, %cst_21 {dimension_numbers = #tpu.dot_dimension_numbers<[2], [2], [1], [1], [0, 0, 0, 1, 1, 1], [0], [0]>} : vector<2x8x8xf32>, vector<2x8x8xf32>, vector<2x8x8xf32> -> vector<2x8x8xf32>
    "tpu.trace_stop"() : () -> ()
    %cst_22 = arith.constant dense<0xFF800000> : vector<2x8xf32>
    %52 = vector.multi_reduction <maximumf>, %51, %cst_22 [2] : vector<2x8x8xf32> to vector<2x8xf32>
    %53 = vector.shape_cast %52 : vector<2x8xf32> to vector<2x8x1xf32>
    %54 = vector.broadcast %53 : vector<2x8x1xf32> to vector<2x8x8xf32>
    %55 = arith.subf %51, %54 : vector<2x8x8xf32>
    %56 = math.exp %55 : vector<2x8x8xf32>
    %cst_23 = arith.constant dense<0.000000e+00> : vector<2x8xf32>
    %57 = vector.multi_reduction <add>, %56, %cst_23 [2] : vector<2x8x8xf32> to vector<2x8xf32>
    %58 = vector.shape_cast %57 : vector<2x8xf32> to vector<2x8x1xf32>
    %59 = vector.broadcast %58 : vector<2x8x1xf32> to vector<2x8x8xf32>
    %60 = arith.divf %56, %59 : vector<2x8x8xf32>
    "tpu.trace_start"() <{level = 10 : i32, message = "bqk,bkd->bqd"}> : () -> ()
    %cst_24 = arith.constant dense<0.000000e+00> : vector<2x8x8xf32>
    %61 = tpu.matmul %60, %50, %cst_24 {dimension_numbers = #tpu.dot_dimension_numbers<[2], [1], [1], [2], [0, 0, 0, 1, 1, 2], [0], [0]>} : vector<2x8x8xf32>, vector<2x8x8xf32>, vector<2x8x8xf32> -> vector<2x8x8xf32>
    "tpu.trace_stop"() : () -> ()
    %62 = vector.shape_cast %61 : vector<2x8x8xf32> to vector<16x8xf32>
    %63 = vector.extract_strided_slice %10 {offsets = [2, 0, 0], sizes = [1, 8, 32], strides = [1, 1, 1]} : vector<4x8x32xf32> to vector<1x8x32xf32>
    %64 = vector.shape_cast %63 : vector<1x8x32xf32> to vector<8x32xf32>
    %cst_25 = arith.constant dense<0.000000e+00> : vector<16x32xf32>
    %65 = tpu.matmul %62, %64, %cst_25 {dimension_numbers = #tpu.dot_dimension_numbers<[1], [0], [0], [1], [0, 0, 1, 1], [], []>} : vector<16x8xf32>, vector<8x32xf32>, vector<16x32xf32> -> vector<16x32xf32>
    %66 = arith.addf %47, %65 : vector<16x32xf32>
    %67 = vector.extract_strided_slice %8 {offsets = [0, 0, 72], sizes = [2, 8, 8], strides = [1, 1, 1]} : vector<2x8x96xf32> to vector<2x8x8xf32>
    %68 = vector.extract_strided_slice %8 {offsets = [0, 0, 80], sizes = [2, 8, 8], strides = [1, 1, 1]} : vector<2x8x96xf32> to vector<2x8x8xf32>
    %69 = vector.extract_strided_slice %8 {offsets = [0, 0, 88], sizes = [2, 8, 8], strides = [1, 1, 1]} : vector<2x8x96xf32> to vector<2x8x8xf32>
    "tpu.trace_start"() <{level = 10 : i32, message = "bqd,bkd->bqk"}> : () -> ()
    %cst_26 = arith.constant dense<0.000000e+00> : vector<2x8x8xf32>
    %70 = tpu.matmul %67, %68, %cst_26 {dimension_numbers = #tpu.dot_dimension_numbers<[2], [2], [1], [1], [0, 0, 0, 1, 1, 1], [0], [0]>} : vector<2x8x8xf32>, vector<2x8x8xf32>, vector<2x8x8xf32> -> vector<2x8x8xf32>
    "tpu.trace_stop"() : () -> ()
    %cst_27 = arith.constant dense<0xFF800000> : vector<2x8xf32>
    %71 = vector.multi_reduction <maximumf>, %70, %cst_27 [2] : vector<2x8x8xf32> to vector<2x8xf32>
    %72 = vector.shape_cast %71 : vector<2x8xf32> to vector<2x8x1xf32>
    %73 = vector.broadcast %72 : vector<2x8x1xf32> to vector<2x8x8xf32>
    %74 = arith.subf %70, %73 : vector<2x8x8xf32>
    %75 = math.exp %74 : vector<2x8x8xf32>
    %cst_28 = arith.constant dense<0.000000e+00> : vector<2x8xf32>
    %76 = vector.multi_reduction <add>, %75, %cst_28 [2] : vector<2x8x8xf32> to vector<2x8xf32>
    %77 = vector.shape_cast %76 : vector<2x8xf32> to vector<2x8x1xf32>
    %78 = vector.broadcast %77 : vector<2x8x1xf32> to vector<2x8x8xf32>
    %79 = arith.divf %75, %78 : vector<2x8x8xf32>
    "tpu.trace_start"() <{level = 10 : i32, message = "bqk,bkd->bqd"}> : () -> ()
    %cst_29 = arith.constant dense<0.000000e+00> : vector<2x8x8xf32>
    %80 = tpu.matmul %79, %69, %cst_29 {dimension_numbers = #tpu.dot_dimension_numbers<[2], [1], [1], [2], [0, 0, 0, 1, 1, 2], [0], [0]>} : vector<2x8x8xf32>, vector<2x8x8xf32>, vector<2x8x8xf32> -> vector<2x8x8xf32>
    "tpu.trace_stop"() : () -> ()
    %81 = vector.shape_cast %80 : vector<2x8x8xf32> to vector<16x8xf32>
    %82 = vector.extract_strided_slice %10 {offsets = [3, 0, 0], sizes = [1, 8, 32], strides = [1, 1, 1]} : vector<4x8x32xf32> to vector<1x8x32xf32>
    %83 = vector.shape_cast %82 : vector<1x8x32xf32> to vector<8x32xf32>
    %cst_30 = arith.constant dense<0.000000e+00> : vector<16x32xf32>
    %84 = tpu.matmul %81, %83, %cst_30 {dimension_numbers = #tpu.dot_dimension_numbers<[1], [0], [0], [1], [0, 0, 1, 1], [], []>} : vector<16x8xf32>, vector<8x32xf32>, vector<16x32xf32> -> vector<16x32xf32>
    %85 = arith.addf %66, %84 : vector<16x32xf32>
    %c0_31 = arith.constant 0 : index
    %c0_32 = arith.constant 0 : index
    %c0_33 = arith.constant 0 : index
    %86 = vector.load %arg4[%c0_31, %c0_32, %c0_33] : memref<6x1x32xf32, #tpu.memory_space<vmem>>, vector<1x1x32xf32>
    %87 = vector.shape_cast %86 : vector<1x1x32xf32> to vector<1x32xf32>
    %88 = vector.broadcast %87 : vector<1x32xf32> to vector<16x32xf32>
    %89 = arith.addf %85, %88 : vector<16x32xf32>
    %90 = arith.addf %89, %0 : vector<16x32xf32>
    %c0_34 = arith.constant 0 : index
    %c0_35 = arith.constant 0 : index
    %c0_36 = arith.constant 0 : index
    %91 = vector.load %arg5[%c0_34, %c0_35, %c0_36] : memref<6x1x32xf32, #tpu.memory_space<vmem>>, vector<1x1x32xf32>
    %92 = vector.shape_cast %91 : vector<1x1x32xf32> to vector<1x32xf32>
    %c0_37 = arith.constant 0 : index
    %c0_38 = arith.constant 0 : index
    %c0_39 = arith.constant 0 : index
    %93 = vector.load %arg6[%c0_37, %c0_38, %c0_39] : memref<6x1x32xf32, #tpu.memory_space<vmem>>, vector<1x1x32xf32>
    %94 = vector.shape_cast %93 : vector<1x1x32xf32> to vector<1x32xf32>
    %cst_40 = arith.constant dense<0.000000e+00> : vector<16xf32>
    %95 = vector.multi_reduction <add>, %90, %cst_40 [1] : vector<16x32xf32> to vector<16xf32>
    %96 = vector.shape_cast %95 : vector<16xf32> to vector<16x1xf32>
    %cst_41 = arith.constant 3.200000e+01 : f32
    %97 = vector.broadcast %cst_41 : f32 to vector<16x1xf32>
    %98 = arith.divf %96, %97 : vector<16x1xf32>
    %99 = vector.broadcast %98 : vector<16x1xf32> to vector<16x32xf32>
    %100 = arith.subf %90, %99 : vector<16x32xf32>
    %101 = arith.mulf %100, %100 : vector<16x32xf32>
    %cst_42 = arith.constant dense<0.000000e+00> : vector<16xf32>
    %102 = vector.multi_reduction <add>, %101, %cst_42 [1] : vector<16x32xf32> to vector<16xf32>
    %103 = vector.shape_cast %102 : vector<16xf32> to vector<16x1xf32>
    %cst_43 = arith.constant 3.200000e+01 : f32
    %104 = vector.broadcast %cst_43 : f32 to vector<16x1xf32>
    %105 = arith.divf %103, %104 : vector<16x1xf32>
    %106 = vector.broadcast %98 : vector<16x1xf32> to vector<16x32xf32>
    %107 = arith.subf %90, %106 : vector<16x32xf32>
    %cst_44 = arith.constant 9.99999974E-6 : f32
    %108 = vector.broadcast %cst_44 : f32 to vector<16x1xf32>
    %109 = arith.addf %105, %108 : vector<16x1xf32>
    %110 = math.rsqrt %109 : vector<16x1xf32>
    %111 = vector.broadcast %110 : vector<16x1xf32> to vector<16x32xf32>
    %112 = arith.mulf %107, %111 : vector<16x32xf32>
    %113 = vector.broadcast %92 : vector<1x32xf32> to vector<16x32xf32>
    %114 = arith.mulf %112, %113 : vector<16x32xf32>
    %115 = vector.broadcast %94 : vector<1x32xf32> to vector<16x32xf32>
    %116 = arith.addf %114, %115 : vector<16x32xf32>
    %c0_45 = arith.constant 0 : index
    %c0_46 = arith.constant 0 : index
    %c0_47 = arith.constant 0 : index
    %117 = vector.load %arg7[%c0_45, %c0_46, %c0_47] : memref<6x32x64xf32, #tpu.memory_space<vmem>>, vector<1x32x64xf32>
    %118 = vector.shape_cast %117 : vector<1x32x64xf32> to vector<32x64xf32>
    %cst_48 = arith.constant dense<0.000000e+00> : vector<16x64xf32>
    %119 = tpu.matmul %116, %118, %cst_48 {dimension_numbers = #tpu.dot_dimension_numbers<[1], [0], [0], [1], [0, 0, 1, 1], [], []>} : vector<16x32xf32>, vector<32x64xf32>, vector<16x64xf32> -> vector<16x64xf32>
    %c0_49 = arith.constant 0 : index
    %c0_50 = arith.constant 0 : index
    %c0_51 = arith.constant 0 : index
    %120 = vector.load %arg8[%c0_49, %c0_50, %c0_51] : memref<6x1x64xf32, #tpu.memory_space<vmem>>, vector<1x1x64xf32>
    %121 = vector.shape_cast %120 : vector<1x1x64xf32> to vector<1x64xf32>
    %122 = vector.broadcast %121 : vector<1x64xf32> to vector<16x64xf32>
    %123 = arith.addf %119, %122 : vector<16x64xf32>
    %cst_52 = arith.constant 0.000000e+00 : f32
    %124 = vector.broadcast %cst_52 : f32 to vector<16x64xf32>
    %125 = arith.maximumf %123, %124 : vector<16x64xf32>
    %c0_53 = arith.constant 0 : index
    %c0_54 = arith.constant 0 : index
    %c0_55 = arith.constant 0 : index
    %126 = vector.load %arg9[%c0_53, %c0_54, %c0_55] : memref<6x64x32xf32, #tpu.memory_space<vmem>>, vector<1x64x32xf32>
    %127 = vector.shape_cast %126 : vector<1x64x32xf32> to vector<64x32xf32>
    %cst_56 = arith.constant dense<0.000000e+00> : vector<16x32xf32>
    %128 = tpu.matmul %125, %127, %cst_56 {dimension_numbers = #tpu.dot_dimension_numbers<[1], [0], [0], [1], [0, 0, 1, 1], [], []>} : vector<16x64xf32>, vector<64x32xf32>, vector<16x32xf32> -> vector<16x32xf32>
    %c0_57 = arith.constant 0 : index
    %c0_58 = arith.constant 0 : index
    %c0_59 = arith.constant 0 : index
    %129 = vector.load %arg10[%c0_57, %c0_58, %c0_59] : memref<6x1x32xf32, #tpu.memory_space<vmem>>, vector<1x1x32xf32>
    %130 = vector.shape_cast %129 : vector<1x1x32xf32> to vector<1x32xf32>
    %131 = vector.broadcast %130 : vector<1x32xf32> to vector<16x32xf32>
    %132 = arith.addf %128, %131 : vector<16x32xf32>
    %133 = arith.addf %132, %116 : vector<16x32xf32>
    %c0_60 = arith.constant 0 : index
    %c0_61 = arith.constant 0 : index
    %c0_62 = arith.constant 0 : index
    %134 = vector.load %arg11[%c0_60, %c0_61, %c0_62] : memref<6x1x32xf32, #tpu.memory_space<vmem>>, vector<1x1x32xf32>
    %135 = vector.shape_cast %134 : vector<1x1x32xf32> to vector<1x32xf32>
    %c0_63 = arith.constant 0 : index
    %c0_64 = arith.constant 0 : index
    %c0_65 = arith.constant 0 : index
    %136 = vector.load %arg12[%c0_63, %c0_64, %c0_65] : memref<6x1x32xf32, #tpu.memory_space<vmem>>, vector<1x1x32xf32>
    %137 = vector.shape_cast %136 : vector<1x1x32xf32> to vector<1x32xf32>
    %cst_66 = arith.constant dense<0.000000e+00> : vector<16xf32>
    %138 = vector.multi_reduction <add>, %133, %cst_66 [1] : vector<16x32xf32> to vector<16xf32>
    %139 = vector.shape_cast %138 : vector<16xf32> to vector<16x1xf32>
    %cst_67 = arith.constant 3.200000e+01 : f32
    %140 = vector.broadcast %cst_67 : f32 to vector<16x1xf32>
    %141 = arith.divf %139, %140 : vector<16x1xf32>
    %142 = vector.broadcast %141 : vector<16x1xf32> to vector<16x32xf32>
    %143 = arith.subf %133, %142 : vector<16x32xf32>
    %144 = arith.mulf %143, %143 : vector<16x32xf32>
    %cst_68 = arith.constant dense<0.000000e+00> : vector<16xf32>
    %145 = vector.multi_reduction <add>, %144, %cst_68 [1] : vector<16x32xf32> to vector<16xf32>
    %146 = vector.shape_cast %145 : vector<16xf32> to vector<16x1xf32>
    %cst_69 = arith.constant 3.200000e+01 : f32
    %147 = vector.broadcast %cst_69 : f32 to vector<16x1xf32>
    %148 = arith.divf %146, %147 : vector<16x1xf32>
    %149 = vector.broadcast %141 : vector<16x1xf32> to vector<16x32xf32>
    %150 = arith.subf %133, %149 : vector<16x32xf32>
    %cst_70 = arith.constant 9.99999974E-6 : f32
    %151 = vector.broadcast %cst_70 : f32 to vector<16x1xf32>
    %152 = arith.addf %148, %151 : vector<16x1xf32>
    %153 = math.rsqrt %152 : vector<16x1xf32>
    %154 = vector.broadcast %153 : vector<16x1xf32> to vector<16x32xf32>
    %155 = arith.mulf %150, %154 : vector<16x32xf32>
    %156 = vector.broadcast %135 : vector<1x32xf32> to vector<16x32xf32>
    %157 = arith.mulf %155, %156 : vector<16x32xf32>
    %158 = vector.broadcast %137 : vector<1x32xf32> to vector<16x32xf32>
    %159 = arith.addf %157, %158 : vector<16x32xf32>
    %c1 = arith.constant 1 : index
    %c0_71 = arith.constant 0 : index
    %c0_72 = arith.constant 0 : index
    %160 = vector.load %arg1[%c1, %c0_71, %c0_72] : memref<6x32x96xf32, #tpu.memory_space<vmem>>, vector<1x32x96xf32>
    %161 = vector.shape_cast %160 : vector<1x32x96xf32> to vector<32x96xf32>
    %cst_73 = arith.constant dense<0.000000e+00> : vector<16x96xf32>
    %162 = tpu.matmul %159, %161, %cst_73 {dimension_numbers = #tpu.dot_dimension_numbers<[1], [0], [0], [1], [0, 0, 1, 1], [], []>} : vector<16x32xf32>, vector<32x96xf32>, vector<16x96xf32> -> vector<16x96xf32>
    %c1_74 = arith.constant 1 : index
    %c0_75 = arith.constant 0 : index
    %c0_76 = arith.constant 0 : index
    %163 = vector.load %arg2[%c1_74, %c0_75, %c0_76] : memref<6x1x96xf32, #tpu.memory_space<vmem>>, vector<1x1x96xf32>
    %164 = vector.shape_cast %163 : vector<1x1x96xf32> to vector<1x96xf32>
    %165 = vector.broadcast %164 : vector<1x96xf32> to vector<16x96xf32>
    %166 = arith.addf %162, %165 : vector<16x96xf32>
    %167 = vector.shape_cast %166 : vector<16x96xf32> to vector<2x8x96xf32>
    %c1_77 = arith.constant 1 : index
    %c0_78 = arith.constant 0 : index
    %c0_79 = arith.constant 0 : index
    %c0_80 = arith.constant 0 : index
    %168 = vector.load %arg3[%c1_77, %c0_78, %c0_79, %c0_80] : memref<6x4x8x32xf32, #tpu.memory_space<vmem>>, vector<1x4x8x32xf32>
    %169 = vector.shape_cast %168 : vector<1x4x8x32xf32> to vector<4x8x32xf32>
    %170 = vector.extract_strided_slice %167 {offsets = [0, 0, 0], sizes = [2, 8, 8], strides = [1, 1, 1]} : vector<2x8x96xf32> to vector<2x8x8xf32>
    %171 = vector.extract_strided_slice %167 {offsets = [0, 0, 8], sizes = [2, 8, 8], strides = [1, 1, 1]} : vector<2x8x96xf32> to vector<2x8x8xf32>
    %172 = vector.extract_strided_slice %167 {offsets = [0, 0, 16], sizes = [2, 8, 8], strides = [1, 1, 1]} : vector<2x8x96xf32> to vector<2x8x8xf32>
    "tpu.trace_start"() <{level = 10 : i32, message = "bqd,bkd->bqk"}> : () -> ()
    %cst_81 = arith.constant dense<0.000000e+00> : vector<2x8x8xf32>
    %173 = tpu.matmul %170, %171, %cst_81 {dimension_numbers = #tpu.dot_dimension_numbers<[2], [2], [1], [1], [0, 0, 0, 1, 1, 1], [0], [0]>} : vector<2x8x8xf32>, vector<2x8x8xf32>, vector<2x8x8xf32> -> vector<2x8x8xf32>
    "tpu.trace_stop"() : () -> ()
    %cst_82 = arith.constant dense<0xFF800000> : vector<2x8xf32>
    %174 = vector.multi_reduction <maximumf>, %173, %cst_82 [2] : vector<2x8x8xf32> to vector<2x8xf32>
    %175 = vector.shape_cast %174 : vector<2x8xf32> to vector<2x8x1xf32>
    %176 = vector.broadcast %175 : vector<2x8x1xf32> to vector<2x8x8xf32>
    %177 = arith.subf %173, %176 : vector<2x8x8xf32>
    %178 = math.exp %177 : vector<2x8x8xf32>
    %cst_83 = arith.constant dense<0.000000e+00> : vector<2x8xf32>
    %179 = vector.multi_reduction <add>, %178, %cst_83 [2] : vector<2x8x8xf32> to vector<2x8xf32>
    %180 = vector.shape_cast %179 : vector<2x8xf32> to vector<2x8x1xf32>
    %181 = vector.broadcast %180 : vector<2x8x1xf32> to vector<2x8x8xf32>
    %182 = arith.divf %178, %181 : vector<2x8x8xf32>
    "tpu.trace_start"() <{level = 10 : i32, message = "bqk,bkd->bqd"}> : () -> ()
    %cst_84 = arith.constant dense<0.000000e+00> : vector<2x8x8xf32>
    %183 = tpu.matmul %182, %172, %cst_84 {dimension_numbers = #tpu.dot_dimension_numbers<[2], [1], [1], [2], [0, 0, 0, 1, 1, 2], [0], [0]>} : vector<2x8x8xf32>, vector<2x8x8xf32>, vector<2x8x8xf32> -> vector<2x8x8xf32>
    "tpu.trace_stop"() : () -> ()
    %184 = vector.shape_cast %183 : vector<2x8x8xf32> to vector<16x8xf32>
    %185 = vector.extract_strided_slice %169 {offsets = [0, 0, 0], sizes = [1, 8, 32], strides = [1, 1, 1]} : vector<4x8x32xf32> to vector<1x8x32xf32>
    %186 = vector.shape_cast %185 : vector<1x8x32xf32> to vector<8x32xf32>
    %cst_85 = arith.constant dense<0.000000e+00> : vector<16x32xf32>
    %187 = tpu.matmul %184, %186, %cst_85 {dimension_numbers = #tpu.dot_dimension_numbers<[1], [0], [0], [1], [0, 0, 1, 1], [], []>} : vector<16x8xf32>, vector<8x32xf32>, vector<16x32xf32> -> vector<16x32xf32>
    %188 = vector.extract_strided_slice %167 {offsets = [0, 0, 24], sizes = [2, 8, 8], strides = [1, 1, 1]} : vector<2x8x96xf32> to vector<2x8x8xf32>
    %189 = vector.extract_strided_slice %167 {offsets = [0, 0, 32], sizes = [2, 8, 8], strides = [1, 1, 1]} : vector<2x8x96xf32> to vector<2x8x8xf32>
    %190 = vector.extract_strided_slice %167 {offsets = [0, 0, 40], sizes = [2, 8, 8], strides = [1, 1, 1]} : vector<2x8x96xf32> to vector<2x8x8xf32>
    "tpu.trace_start"() <{level = 10 : i32, message = "bqd,bkd->bqk"}> : () -> ()
    %cst_86 = arith.constant dense<0.000000e+00> : vector<2x8x8xf32>
    %191 = tpu.matmul %188, %189, %cst_86 {dimension_numbers = #tpu.dot_dimension_numbers<[2], [2], [1], [1], [0, 0, 0, 1, 1, 1], [0], [0]>} : vector<2x8x8xf32>, vector<2x8x8xf32>, vector<2x8x8xf32> -> vector<2x8x8xf32>
    "tpu.trace_stop"() : () -> ()
    %cst_87 = arith.constant dense<0xFF800000> : vector<2x8xf32>
    %192 = vector.multi_reduction <maximumf>, %191, %cst_87 [2] : vector<2x8x8xf32> to vector<2x8xf32>
    %193 = vector.shape_cast %192 : vector<2x8xf32> to vector<2x8x1xf32>
    %194 = vector.broadcast %193 : vector<2x8x1xf32> to vector<2x8x8xf32>
    %195 = arith.subf %191, %194 : vector<2x8x8xf32>
    %196 = math.exp %195 : vector<2x8x8xf32>
    %cst_88 = arith.constant dense<0.000000e+00> : vector<2x8xf32>
    %197 = vector.multi_reduction <add>, %196, %cst_88 [2] : vector<2x8x8xf32> to vector<2x8xf32>
    %198 = vector.shape_cast %197 : vector<2x8xf32> to vector<2x8x1xf32>
    %199 = vector.broadcast %198 : vector<2x8x1xf32> to vector<2x8x8xf32>
    %200 = arith.divf %196, %199 : vector<2x8x8xf32>
    "tpu.trace_start"() <{level = 10 : i32, message = "bqk,bkd->bqd"}> : () -> ()
    %cst_89 = arith.constant dense<0.000000e+00> : vector<2x8x8xf32>
    %201 = tpu.matmul %200, %190, %cst_89 {dimension_numbers = #tpu.dot_dimension_numbers<[2], [1], [1], [2], [0, 0, 0, 1, 1, 2], [0], [0]>} : vector<2x8x8xf32>, vector<2x8x8xf32>, vector<2x8x8xf32> -> vector<2x8x8xf32>
    "tpu.trace_stop"() : () -> ()
    %202 = vector.shape_cast %201 : vector<2x8x8xf32> to vector<16x8xf32>
    %203 = vector.extract_strided_slice %169 {offsets = [1, 0, 0], sizes = [1, 8, 32], strides = [1, 1, 1]} : vector<4x8x32xf32> to vector<1x8x32xf32>
    %204 = vector.shape_cast %203 : vector<1x8x32xf32> to vector<8x32xf32>
    %cst_90 = arith.constant dense<0.000000e+00> : vector<16x32xf32>
    %205 = tpu.matmul %202, %204, %cst_90 {dimension_numbers = #tpu.dot_dimension_numbers<[1], [0], [0], [1], [0, 0, 1, 1], [], []>} : vector<16x8xf32>, vector<8x32xf32>, vector<16x32xf32> -> vector<16x32xf32>
    %206 = arith.addf %187, %205 : vector<16x32xf32>
    %207 = vector.extract_strided_slice %167 {offsets = [0, 0, 48], sizes = [2, 8, 8], strides = [1, 1, 1]} : vector<2x8x96xf32> to vector<2x8x8xf32>
    %208 = vector.extract_strided_slice %167 {offsets = [0, 0, 56], sizes = [2, 8, 8], strides = [1, 1, 1]} : vector<2x8x96xf32> to vector<2x8x8xf32>
    %209 = vector.extract_strided_slice %167 {offsets = [0, 0, 64], sizes = [2, 8, 8], strides = [1, 1, 1]} : vector<2x8x96xf32> to vector<2x8x8xf32>
    "tpu.trace_start"() <{level = 10 : i32, message = "bqd,bkd->bqk"}> : () -> ()
    %cst_91 = arith.constant dense<0.000000e+00> : vector<2x8x8xf32>
    %210 = tpu.matmul %207, %208, %cst_91 {dimension_numbers = #tpu.dot_dimension_numbers<[2], [2], [1], [1], [0, 0, 0, 1, 1, 1], [0], [0]>} : vector<2x8x8xf32>, vector<2x8x8xf32>, vector<2x8x8xf32> -> vector<2x8x8xf32>
    "tpu.trace_stop"() : () -> ()
    %cst_92 = arith.constant dense<0xFF800000> : vector<2x8xf32>
    %211 = vector.multi_reduction <maximumf>, %210, %cst_92 [2] : vector<2x8x8xf32> to vector<2x8xf32>
    %212 = vector.shape_cast %211 : vector<2x8xf32> to vector<2x8x1xf32>
    %213 = vector.broadcast %212 : vector<2x8x1xf32> to vector<2x8x8xf32>
    %214 = arith.subf %210, %213 : vector<2x8x8xf32>
    %215 = math.exp %214 : vector<2x8x8xf32>
    %cst_93 = arith.constant dense<0.000000e+00> : vector<2x8xf32>
    %216 = vector.multi_reduction <add>, %215, %cst_93 [2] : vector<2x8x8xf32> to vector<2x8xf32>
    %217 = vector.shape_cast %216 : vector<2x8xf32> to vector<2x8x1xf32>
    %218 = vector.broadcast %217 : vector<2x8x1xf32> to vector<2x8x8xf32>
    %219 = arith.divf %215, %218 : vector<2x8x8xf32>
    "tpu.trace_start"() <{level = 10 : i32, message = "bqk,bkd->bqd"}> : () -> ()
    %cst_94 = arith.constant dense<0.000000e+00> : vector<2x8x8xf32>
    %220 = tpu.matmul %219, %209, %cst_94 {dimension_numbers = #tpu.dot_dimension_numbers<[2], [1], [1], [2], [0, 0, 0, 1, 1, 2], [0], [0]>} : vector<2x8x8xf32>, vector<2x8x8xf32>, vector<2x8x8xf32> -> vector<2x8x8xf32>
    "tpu.trace_stop"() : () -> ()
    %221 = vector.shape_cast %220 : vector<2x8x8xf32> to vector<16x8xf32>
    %222 = vector.extract_strided_slice %169 {offsets = [2, 0, 0], sizes = [1, 8, 32], strides = [1, 1, 1]} : vector<4x8x32xf32> to vector<1x8x32xf32>
    %223 = vector.shape_cast %222 : vector<1x8x32xf32> to vector<8x32xf32>
    %cst_95 = arith.constant dense<0.000000e+00> : vector<16x32xf32>
    %224 = tpu.matmul %221, %223, %cst_95 {dimension_numbers = #tpu.dot_dimension_numbers<[1], [0], [0], [1], [0, 0, 1, 1], [], []>} : vector<16x8xf32>, vector<8x32xf32>, vector<16x32xf32> -> vector<16x32xf32>
    %225 = arith.addf %206, %224 : vector<16x32xf32>
    %226 = vector.extract_strided_slice %167 {offsets = [0, 0, 72], sizes = [2, 8, 8], strides = [1, 1, 1]} : vector<2x8x96xf32> to vector<2x8x8xf32>
    %227 = vector.extract_strided_slice %167 {offsets = [0, 0, 80], sizes = [2, 8, 8], strides = [1, 1, 1]} : vector<2x8x96xf32> to vector<2x8x8xf32>
    %228 = vector.extract_strided_slice %167 {offsets = [0, 0, 88], sizes = [2, 8, 8], strides = [1, 1, 1]} : vector<2x8x96xf32> to vector<2x8x8xf32>
    "tpu.trace_start"() <{level = 10 : i32, message = "bqd,bkd->bqk"}> : () -> ()
    %cst_96 = arith.constant dense<0.000000e+00> : vector<2x8x8xf32>
    %229 = tpu.matmul %226, %227, %cst_96 {dimension_numbers = #tpu.dot_dimension_numbers<[2], [2], [1], [1], [0, 0, 0, 1, 1, 1], [0], [0]>} : vector<2x8x8xf32>, vector<2x8x8xf32>, vector<2x8x8xf32> -> vector<2x8x8xf32>
    "tpu.trace_stop"() : () -> ()
    %cst_97 = arith.constant dense<0xFF800000> : vector<2x8xf32>
    %230 = vector.multi_reduction <maximumf>, %229, %cst_97 [2] : vector<2x8x8xf32> to vector<2x8xf32>
    %231 = vector.shape_cast %230 : vector<2x8xf32> to vector<2x8x1xf32>
    %232 = vector.broadcast %231 : vector<2x8x1xf32> to vector<2x8x8xf32>
    %233 = arith.subf %229, %232 : vector<2x8x8xf32>
    %234 = math.exp %233 : vector<2x8x8xf32>
    %cst_98 = arith.constant dense<0.000000e+00> : vector<2x8xf32>
    %235 = vector.multi_reduction <add>, %234, %cst_98 [2] : vector<2x8x8xf32> to vector<2x8xf32>
    %236 = vector.shape_cast %235 : vector<2x8xf32> to vector<2x8x1xf32>
    %237 = vector.broadcast %236 : vector<2x8x1xf32> to vector<2x8x8xf32>
    %238 = arith.divf %234, %237 : vector<2x8x8xf32>
    "tpu.trace_start"() <{level = 10 : i32, message = "bqk,bkd->bqd"}> : () -> ()
    %cst_99 = arith.constant dense<0.000000e+00> : vector<2x8x8xf32>
    %239 = tpu.matmul %238, %228, %cst_99 {dimension_numbers = #tpu.dot_dimension_numbers<[2], [1], [1], [2], [0, 0, 0, 1, 1, 2], [0], [0]>} : vector<2x8x8xf32>, vector<2x8x8xf32>, vector<2x8x8xf32> -> vector<2x8x8xf32>
    "tpu.trace_stop"() : () -> ()
    %240 = vector.shape_cast %239 : vector<2x8x8xf32> to vector<16x8xf32>
    %241 = vector.extract_strided_slice %169 {offsets = [3, 0, 0], sizes = [1, 8, 32], strides = [1, 1, 1]} : vector<4x8x32xf32> to vector<1x8x32xf32>
    %242 = vector.shape_cast %241 : vector<1x8x32xf32> to vector<8x32xf32>
    %cst_100 = arith.constant dense<0.000000e+00> : vector<16x32xf32>
    %243 = tpu.matmul %240, %242, %cst_100 {dimension_numbers = #tpu.dot_dimension_numbers<[1], [0], [0], [1], [0, 0, 1, 1], [], []>} : vector<16x8xf32>, vector<8x32xf32>, vector<16x32xf32> -> vector<16x32xf32>
    %244 = arith.addf %225, %243 : vector<16x32xf32>
    %c1_101 = arith.constant 1 : index
    %c0_102 = arith.constant 0 : index
    %c0_103 = arith.constant 0 : index
    %245 = vector.load %arg4[%c1_101, %c0_102, %c0_103] : memref<6x1x32xf32, #tpu.memory_space<vmem>>, vector<1x1x32xf32>
    %246 = vector.shape_cast %245 : vector<1x1x32xf32> to vector<1x32xf32>
    %247 = vector.broadcast %246 : vector<1x32xf32> to vector<16x32xf32>
    %248 = arith.addf %244, %247 : vector<16x32xf32>
    %249 = arith.addf %248, %159 : vector<16x32xf32>
    %c1_104 = arith.constant 1 : index
    %c0_105 = arith.constant 0 : index
    %c0_106 = arith.constant 0 : index
    %250 = vector.load %arg5[%c1_104, %c0_105, %c0_106] : memref<6x1x32xf32, #tpu.memory_space<vmem>>, vector<1x1x32xf32>
    %251 = vector.shape_cast %250 : vector<1x1x32xf32> to vector<1x32xf32>
    %c1_107 = arith.constant 1 : index
    %c0_108 = arith.constant 0 : index
    %c0_109 = arith.constant 0 : index
    %252 = vector.load %arg6[%c1_107, %c0_108, %c0_109] : memref<6x1x32xf32, #tpu.memory_space<vmem>>, vector<1x1x32xf32>
    %253 = vector.shape_cast %252 : vector<1x1x32xf32> to vector<1x32xf32>
    %cst_110 = arith.constant dense<0.000000e+00> : vector<16xf32>
    %254 = vector.multi_reduction <add>, %249, %cst_110 [1] : vector<16x32xf32> to vector<16xf32>
    %255 = vector.shape_cast %254 : vector<16xf32> to vector<16x1xf32>
    %cst_111 = arith.constant 3.200000e+01 : f32
    %256 = vector.broadcast %cst_111 : f32 to vector<16x1xf32>
    %257 = arith.divf %255, %256 : vector<16x1xf32>
    %258 = vector.broadcast %257 : vector<16x1xf32> to vector<16x32xf32>
    %259 = arith.subf %249, %258 : vector<16x32xf32>
    %260 = arith.mulf %259, %259 : vector<16x32xf32>
    %cst_112 = arith.constant dense<0.000000e+00> : vector<16xf32>
    %261 = vector.multi_reduction <add>, %260, %cst_112 [1] : vector<16x32xf32> to vector<16xf32>
    %262 = vector.shape_cast %261 : vector<16xf32> to vector<16x1xf32>
    %cst_113 = arith.constant 3.200000e+01 : f32
    %263 = vector.broadcast %cst_113 : f32 to vector<16x1xf32>
    %264 = arith.divf %262, %263 : vector<16x1xf32>
    %265 = vector.broadcast %257 : vector<16x1xf32> to vector<16x32xf32>
    %266 = arith.subf %249, %265 : vector<16x32xf32>
    %cst_114 = arith.constant 9.99999974E-6 : f32
    %267 = vector.broadcast %cst_114 : f32 to vector<16x1xf32>
    %268 = arith.addf %264, %267 : vector<16x1xf32>
    %269 = math.rsqrt %268 : vector<16x1xf32>
    %270 = vector.broadcast %269 : vector<16x1xf32> to vector<16x32xf32>
    %271 = arith.mulf %266, %270 : vector<16x32xf32>
    %272 = vector.broadcast %251 : vector<1x32xf32> to vector<16x32xf32>
    %273 = arith.mulf %271, %272 : vector<16x32xf32>
    %274 = vector.broadcast %253 : vector<1x32xf32> to vector<16x32xf32>
    %275 = arith.addf %273, %274 : vector<16x32xf32>
    %c1_115 = arith.constant 1 : index
    %c0_116 = arith.constant 0 : index
    %c0_117 = arith.constant 0 : index
    %276 = vector.load %arg7[%c1_115, %c0_116, %c0_117] : memref<6x32x64xf32, #tpu.memory_space<vmem>>, vector<1x32x64xf32>
    %277 = vector.shape_cast %276 : vector<1x32x64xf32> to vector<32x64xf32>
    %cst_118 = arith.constant dense<0.000000e+00> : vector<16x64xf32>
    %278 = tpu.matmul %275, %277, %cst_118 {dimension_numbers = #tpu.dot_dimension_numbers<[1], [0], [0], [1], [0, 0, 1, 1], [], []>} : vector<16x32xf32>, vector<32x64xf32>, vector<16x64xf32> -> vector<16x64xf32>
    %c1_119 = arith.constant 1 : index
    %c0_120 = arith.constant 0 : index
    %c0_121 = arith.constant 0 : index
    %279 = vector.load %arg8[%c1_119, %c0_120, %c0_121] : memref<6x1x64xf32, #tpu.memory_space<vmem>>, vector<1x1x64xf32>
    %280 = vector.shape_cast %279 : vector<1x1x64xf32> to vector<1x64xf32>
    %281 = vector.broadcast %280 : vector<1x64xf32> to vector<16x64xf32>
    %282 = arith.addf %278, %281 : vector<16x64xf32>
    %cst_122 = arith.constant 0.000000e+00 : f32
    %283 = vector.broadcast %cst_122 : f32 to vector<16x64xf32>
    %284 = arith.maximumf %282, %283 : vector<16x64xf32>
    %c1_123 = arith.constant 1 : index
    %c0_124 = arith.constant 0 : index
    %c0_125 = arith.constant 0 : index
    %285 = vector.load %arg9[%c1_123, %c0_124, %c0_125] : memref<6x64x32xf32, #tpu.memory_space<vmem>>, vector<1x64x32xf32>
    %286 = vector.shape_cast %285 : vector<1x64x32xf32> to vector<64x32xf32>
    %cst_126 = arith.constant dense<0.000000e+00> : vector<16x32xf32>
    %287 = tpu.matmul %284, %286, %cst_126 {dimension_numbers = #tpu.dot_dimension_numbers<[1], [0], [0], [1], [0, 0, 1, 1], [], []>} : vector<16x64xf32>, vector<64x32xf32>, vector<16x32xf32> -> vector<16x32xf32>
    %c1_127 = arith.constant 1 : index
    %c0_128 = arith.constant 0 : index
    %c0_129 = arith.constant 0 : index
    %288 = vector.load %arg10[%c1_127, %c0_128, %c0_129] : memref<6x1x32xf32, #tpu.memory_space<vmem>>, vector<1x1x32xf32>
    %289 = vector.shape_cast %288 : vector<1x1x32xf32> to vector<1x32xf32>
    %290 = vector.broadcast %289 : vector<1x32xf32> to vector<16x32xf32>
    %291 = arith.addf %287, %290 : vector<16x32xf32>
    %292 = arith.addf %291, %275 : vector<16x32xf32>
    %c1_130 = arith.constant 1 : index
    %c0_131 = arith.constant 0 : index
    %c0_132 = arith.constant 0 : index
    %293 = vector.load %arg11[%c1_130, %c0_131, %c0_132] : memref<6x1x32xf32, #tpu.memory_space<vmem>>, vector<1x1x32xf32>
    %294 = vector.shape_cast %293 : vector<1x1x32xf32> to vector<1x32xf32>
    %c1_133 = arith.constant 1 : index
    %c0_134 = arith.constant 0 : index
    %c0_135 = arith.constant 0 : index
    %295 = vector.load %arg12[%c1_133, %c0_134, %c0_135] : memref<6x1x32xf32, #tpu.memory_space<vmem>>, vector<1x1x32xf32>
    %296 = vector.shape_cast %295 : vector<1x1x32xf32> to vector<1x32xf32>
    %cst_136 = arith.constant dense<0.000000e+00> : vector<16xf32>
    %297 = vector.multi_reduction <add>, %292, %cst_136 [1] : vector<16x32xf32> to vector<16xf32>
    %298 = vector.shape_cast %297 : vector<16xf32> to vector<16x1xf32>
    %cst_137 = arith.constant 3.200000e+01 : f32
    %299 = vector.broadcast %cst_137 : f32 to vector<16x1xf32>
    %300 = arith.divf %298, %299 : vector<16x1xf32>
    %301 = vector.broadcast %300 : vector<16x1xf32> to vector<16x32xf32>
    %302 = arith.subf %292, %301 : vector<16x32xf32>
    %303 = arith.mulf %302, %302 : vector<16x32xf32>
    %cst_138 = arith.constant dense<0.000000e+00> : vector<16xf32>
    %304 = vector.multi_reduction <add>, %303, %cst_138 [1] : vector<16x32xf32> to vector<16xf32>
    %305 = vector.shape_cast %304 : vector<16xf32> to vector<16x1xf32>
    %cst_139 = arith.constant 3.200000e+01 : f32
    %306 = vector.broadcast %cst_139 : f32 to vector<16x1xf32>
    %307 = arith.divf %305, %306 : vector<16x1xf32>
    %308 = vector.broadcast %300 : vector<16x1xf32> to vector<16x32xf32>
    %309 = arith.subf %292, %308 : vector<16x32xf32>
    %cst_140 = arith.constant 9.99999974E-6 : f32
    %310 = vector.broadcast %cst_140 : f32 to vector<16x1xf32>
    %311 = arith.addf %307, %310 : vector<16x1xf32>
    %312 = math.rsqrt %311 : vector<16x1xf32>
    %313 = vector.broadcast %312 : vector<16x1xf32> to vector<16x32xf32>
    %314 = arith.mulf %309, %313 : vector<16x32xf32>
    %315 = vector.broadcast %294 : vector<1x32xf32> to vector<16x32xf32>
    %316 = arith.mulf %314, %315 : vector<16x32xf32>
    %317 = vector.broadcast %296 : vector<1x32xf32> to vector<16x32xf32>
    %318 = arith.addf %316, %317 : vector<16x32xf32>
    %c2 = arith.constant 2 : index
    %c0_141 = arith.constant 0 : index
    %c0_142 = arith.constant 0 : index
    %319 = vector.load %arg1[%c2, %c0_141, %c0_142] : memref<6x32x96xf32, #tpu.memory_space<vmem>>, vector<1x32x96xf32>
    %320 = vector.shape_cast %319 : vector<1x32x96xf32> to vector<32x96xf32>
    %cst_143 = arith.constant dense<0.000000e+00> : vector<16x96xf32>
    %321 = tpu.matmul %318, %320, %cst_143 {dimension_numbers = #tpu.dot_dimension_numbers<[1], [0], [0], [1], [0, 0, 1, 1], [], []>} : vector<16x32xf32>, vector<32x96xf32>, vector<16x96xf32> -> vector<16x96xf32>
    %c2_144 = arith.constant 2 : index
    %c0_145 = arith.constant 0 : index
    %c0_146 = arith.constant 0 : index
    %322 = vector.load %arg2[%c2_144, %c0_145, %c0_146] : memref<6x1x96xf32, #tpu.memory_space<vmem>>, vector<1x1x96xf32>
    %323 = vector.shape_cast %322 : vector<1x1x96xf32> to vector<1x96xf32>
    %324 = vector.broadcast %323 : vector<1x96xf32> to vector<16x96xf32>
    %325 = arith.addf %321, %324 : vector<16x96xf32>
    %326 = vector.shape_cast %325 : vector<16x96xf32> to vector<2x8x96xf32>
    %c2_147 = arith.constant 2 : index
    %c0_148 = arith.constant 0 : index
    %c0_149 = arith.constant 0 : index
    %c0_150 = arith.constant 0 : index
    %327 = vector.load %arg3[%c2_147, %c0_148, %c0_149, %c0_150] : memref<6x4x8x32xf32, #tpu.memory_space<vmem>>, vector<1x4x8x32xf32>
    %328 = vector.shape_cast %327 : vector<1x4x8x32xf32> to vector<4x8x32xf32>
    %329 = vector.extract_strided_slice %326 {offsets = [0, 0, 0], sizes = [2, 8, 8], strides = [1, 1, 1]} : vector<2x8x96xf32> to vector<2x8x8xf32>
    %330 = vector.extract_strided_slice %326 {offsets = [0, 0, 8], sizes = [2, 8, 8], strides = [1, 1, 1]} : vector<2x8x96xf32> to vector<2x8x8xf32>
    %331 = vector.extract_strided_slice %326 {offsets = [0, 0, 16], sizes = [2, 8, 8], strides = [1, 1, 1]} : vector<2x8x96xf32> to vector<2x8x8xf32>
    "tpu.trace_start"() <{level = 10 : i32, message = "bqd,bkd->bqk"}> : () -> ()
    %cst_151 = arith.constant dense<0.000000e+00> : vector<2x8x8xf32>
    %332 = tpu.matmul %329, %330, %cst_151 {dimension_numbers = #tpu.dot_dimension_numbers<[2], [2], [1], [1], [0, 0, 0, 1, 1, 1], [0], [0]>} : vector<2x8x8xf32>, vector<2x8x8xf32>, vector<2x8x8xf32> -> vector<2x8x8xf32>
    "tpu.trace_stop"() : () -> ()
    %cst_152 = arith.constant dense<0xFF800000> : vector<2x8xf32>
    %333 = vector.multi_reduction <maximumf>, %332, %cst_152 [2] : vector<2x8x8xf32> to vector<2x8xf32>
    %334 = vector.shape_cast %333 : vector<2x8xf32> to vector<2x8x1xf32>
    %335 = vector.broadcast %334 : vector<2x8x1xf32> to vector<2x8x8xf32>
    %336 = arith.subf %332, %335 : vector<2x8x8xf32>
    %337 = math.exp %336 : vector<2x8x8xf32>
    %cst_153 = arith.constant dense<0.000000e+00> : vector<2x8xf32>
    %338 = vector.multi_reduction <add>, %337, %cst_153 [2] : vector<2x8x8xf32> to vector<2x8xf32>
    %339 = vector.shape_cast %338 : vector<2x8xf32> to vector<2x8x1xf32>
    %340 = vector.broadcast %339 : vector<2x8x1xf32> to vector<2x8x8xf32>
    %341 = arith.divf %337, %340 : vector<2x8x8xf32>
    "tpu.trace_start"() <{level = 10 : i32, message = "bqk,bkd->bqd"}> : () -> ()
    %cst_154 = arith.constant dense<0.000000e+00> : vector<2x8x8xf32>
    %342 = tpu.matmul %341, %331, %cst_154 {dimension_numbers = #tpu.dot_dimension_numbers<[2], [1], [1], [2], [0, 0, 0, 1, 1, 2], [0], [0]>} : vector<2x8x8xf32>, vector<2x8x8xf32>, vector<2x8x8xf32> -> vector<2x8x8xf32>
    "tpu.trace_stop"() : () -> ()
    %343 = vector.shape_cast %342 : vector<2x8x8xf32> to vector<16x8xf32>
    %344 = vector.extract_strided_slice %328 {offsets = [0, 0, 0], sizes = [1, 8, 32], strides = [1, 1, 1]} : vector<4x8x32xf32> to vector<1x8x32xf32>
    %345 = vector.shape_cast %344 : vector<1x8x32xf32> to vector<8x32xf32>
    %cst_155 = arith.constant dense<0.000000e+00> : vector<16x32xf32>
    %346 = tpu.matmul %343, %345, %cst_155 {dimension_numbers = #tpu.dot_dimension_numbers<[1], [0], [0], [1], [0, 0, 1, 1], [], []>} : vector<16x8xf32>, vector<8x32xf32>, vector<16x32xf32> -> vector<16x32xf32>
    %347 = vector.extract_strided_slice %326 {offsets = [0, 0, 24], sizes = [2, 8, 8], strides = [1, 1, 1]} : vector<2x8x96xf32> to vector<2x8x8xf32>
    %348 = vector.extract_strided_slice %326 {offsets = [0, 0, 32], sizes = [2, 8, 8], strides = [1, 1, 1]} : vector<2x8x96xf32> to vector<2x8x8xf32>
    %349 = vector.extract_strided_slice %326 {offsets = [0, 0, 40], sizes = [2, 8, 8], strides = [1, 1, 1]} : vector<2x8x96xf32> to vector<2x8x8xf32>
    "tpu.trace_start"() <{level = 10 : i32, message = "bqd,bkd->bqk"}> : () -> ()
    %cst_156 = arith.constant dense<0.000000e+00> : vector<2x8x8xf32>
    %350 = tpu.matmul %347, %348, %cst_156 {dimension_numbers = #tpu.dot_dimension_numbers<[2], [2], [1], [1], [0, 0, 0, 1, 1, 1], [0], [0]>} : vector<2x8x8xf32>, vector<2x8x8xf32>, vector<2x8x8xf32> -> vector<2x8x8xf32>
    "tpu.trace_stop"() : () -> ()
    %cst_157 = arith.constant dense<0xFF800000> : vector<2x8xf32>
    %351 = vector.multi_reduction <maximumf>, %350, %cst_157 [2] : vector<2x8x8xf32> to vector<2x8xf32>
    %352 = vector.shape_cast %351 : vector<2x8xf32> to vector<2x8x1xf32>
    %353 = vector.broadcast %352 : vector<2x8x1xf32> to vector<2x8x8xf32>
    %354 = arith.subf %350, %353 : vector<2x8x8xf32>
    %355 = math.exp %354 : vector<2x8x8xf32>
    %cst_158 = arith.constant dense<0.000000e+00> : vector<2x8xf32>
    %356 = vector.multi_reduction <add>, %355, %cst_158 [2] : vector<2x8x8xf32> to vector<2x8xf32>
    %357 = vector.shape_cast %356 : vector<2x8xf32> to vector<2x8x1xf32>
    %358 = vector.broadcast %357 : vector<2x8x1xf32> to vector<2x8x8xf32>
    %359 = arith.divf %355, %358 : vector<2x8x8xf32>
    "tpu.trace_start"() <{level = 10 : i32, message = "bqk,bkd->bqd"}> : () -> ()
    %cst_159 = arith.constant dense<0.000000e+00> : vector<2x8x8xf32>
    %360 = tpu.matmul %359, %349, %cst_159 {dimension_numbers = #tpu.dot_dimension_numbers<[2], [1], [1], [2], [0, 0, 0, 1, 1, 2], [0], [0]>} : vector<2x8x8xf32>, vector<2x8x8xf32>, vector<2x8x8xf32> -> vector<2x8x8xf32>
    "tpu.trace_stop"() : () -> ()
    %361 = vector.shape_cast %360 : vector<2x8x8xf32> to vector<16x8xf32>
    %362 = vector.extract_strided_slice %328 {offsets = [1, 0, 0], sizes = [1, 8, 32], strides = [1, 1, 1]} : vector<4x8x32xf32> to vector<1x8x32xf32>
    %363 = vector.shape_cast %362 : vector<1x8x32xf32> to vector<8x32xf32>
    %cst_160 = arith.constant dense<0.000000e+00> : vector<16x32xf32>
    %364 = tpu.matmul %361, %363, %cst_160 {dimension_numbers = #tpu.dot_dimension_numbers<[1], [0], [0], [1], [0, 0, 1, 1], [], []>} : vector<16x8xf32>, vector<8x32xf32>, vector<16x32xf32> -> vector<16x32xf32>
    %365 = arith.addf %346, %364 : vector<16x32xf32>
    %366 = vector.extract_strided_slice %326 {offsets = [0, 0, 48], sizes = [2, 8, 8], strides = [1, 1, 1]} : vector<2x8x96xf32> to vector<2x8x8xf32>
    %367 = vector.extract_strided_slice %326 {offsets = [0, 0, 56], sizes = [2, 8, 8], strides = [1, 1, 1]} : vector<2x8x96xf32> to vector<2x8x8xf32>
    %368 = vector.extract_strided_slice %326 {offsets = [0, 0, 64], sizes = [2, 8, 8], strides = [1, 1, 1]} : vector<2x8x96xf32> to vector<2x8x8xf32>
    "tpu.trace_start"() <{level = 10 : i32, message = "bqd,bkd->bqk"}> : () -> ()
    %cst_161 = arith.constant dense<0.000000e+00> : vector<2x8x8xf32>
    %369 = tpu.matmul %366, %367, %cst_161 {dimension_numbers = #tpu.dot_dimension_numbers<[2], [2], [1], [1], [0, 0, 0, 1, 1, 1], [0], [0]>} : vector<2x8x8xf32>, vector<2x8x8xf32>, vector<2x8x8xf32> -> vector<2x8x8xf32>
    "tpu.trace_stop"() : () -> ()
    %cst_162 = arith.constant dense<0xFF800000> : vector<2x8xf32>
    %370 = vector.multi_reduction <maximumf>, %369, %cst_162 [2] : vector<2x8x8xf32> to vector<2x8xf32>
    %371 = vector.shape_cast %370 : vector<2x8xf32> to vector<2x8x1xf32>
    %372 = vector.broadcast %371 : vector<2x8x1xf32> to vector<2x8x8xf32>
    %373 = arith.subf %369, %372 : vector<2x8x8xf32>
    %374 = math.exp %373 : vector<2x8x8xf32>
    %cst_163 = arith.constant dense<0.000000e+00> : vector<2x8xf32>
    %375 = vector.multi_reduction <add>, %374, %cst_163 [2] : vector<2x8x8xf32> to vector<2x8xf32>
    %376 = vector.shape_cast %375 : vector<2x8xf32> to vector<2x8x1xf32>
    %377 = vector.broadcast %376 : vector<2x8x1xf32> to vector<2x8x8xf32>
    %378 = arith.divf %374, %377 : vector<2x8x8xf32>
    "tpu.trace_start"() <{level = 10 : i32, message = "bqk,bkd->bqd"}> : () -> ()
    %cst_164 = arith.constant dense<0.000000e+00> : vector<2x8x8xf32>
    %379 = tpu.matmul %378, %368, %cst_164 {dimension_numbers = #tpu.dot_dimension_numbers<[2], [1], [1], [2], [0, 0, 0, 1, 1, 2], [0], [0]>} : vector<2x8x8xf32>, vector<2x8x8xf32>, vector<2x8x8xf32> -> vector<2x8x8xf32>
    "tpu.trace_stop"() : () -> ()
    %380 = vector.shape_cast %379 : vector<2x8x8xf32> to vector<16x8xf32>
    %381 = vector.extract_strided_slice %328 {offsets = [2, 0, 0], sizes = [1, 8, 32], strides = [1, 1, 1]} : vector<4x8x32xf32> to vector<1x8x32xf32>
    %382 = vector.shape_cast %381 : vector<1x8x32xf32> to vector<8x32xf32>
    %cst_165 = arith.constant dense<0.000000e+00> : vector<16x32xf32>
    %383 = tpu.matmul %380, %382, %cst_165 {dimension_numbers = #tpu.dot_dimension_numbers<[1], [0], [0], [1], [0, 0, 1, 1], [], []>} : vector<16x8xf32>, vector<8x32xf32>, vector<16x32xf32> -> vector<16x32xf32>
    %384 = arith.addf %365, %383 : vector<16x32xf32>
    %385 = vector.extract_strided_slice %326 {offsets = [0, 0, 72], sizes = [2, 8, 8], strides = [1, 1, 1]} : vector<2x8x96xf32> to vector<2x8x8xf32>
    %386 = vector.extract_strided_slice %326 {offsets = [0, 0, 80], sizes = [2, 8, 8], strides = [1, 1, 1]} : vector<2x8x96xf32> to vector<2x8x8xf32>
    %387 = vector.extract_strided_slice %326 {offsets = [0, 0, 88], sizes = [2, 8, 8], strides = [1, 1, 1]} : vector<2x8x96xf32> to vector<2x8x8xf32>
    "tpu.trace_start"() <{level = 10 : i32, message = "bqd,bkd->bqk"}> : () -> ()
    %cst_166 = arith.constant dense<0.000000e+00> : vector<2x8x8xf32>
    %388 = tpu.matmul %385, %386, %cst_166 {dimension_numbers = #tpu.dot_dimension_numbers<[2], [2], [1], [1], [0, 0, 0, 1, 1, 1], [0], [0]>} : vector<2x8x8xf32>, vector<2x8x8xf32>, vector<2x8x8xf32> -> vector<2x8x8xf32>
    "tpu.trace_stop"() : () -> ()
    %cst_167 = arith.constant dense<0xFF800000> : vector<2x8xf32>
    %389 = vector.multi_reduction <maximumf>, %388, %cst_167 [2] : vector<2x8x8xf32> to vector<2x8xf32>
    %390 = vector.shape_cast %389 : vector<2x8xf32> to vector<2x8x1xf32>
    %391 = vector.broadcast %390 : vector<2x8x1xf32> to vector<2x8x8xf32>
    %392 = arith.subf %388, %391 : vector<2x8x8xf32>
    %393 = math.exp %392 : vector<2x8x8xf32>
    %cst_168 = arith.constant dense<0.000000e+00> : vector<2x8xf32>
    %394 = vector.multi_reduction <add>, %393, %cst_168 [2] : vector<2x8x8xf32> to vector<2x8xf32>
    %395 = vector.shape_cast %394 : vector<2x8xf32> to vector<2x8x1xf32>
    %396 = vector.broadcast %395 : vector<2x8x1xf32> to vector<2x8x8xf32>
    %397 = arith.divf %393, %396 : vector<2x8x8xf32>
    "tpu.trace_start"() <{level = 10 : i32, message = "bqk,bkd->bqd"}> : () -> ()
    %cst_169 = arith.constant dense<0.000000e+00> : vector<2x8x8xf32>
    %398 = tpu.matmul %397, %387, %cst_169 {dimension_numbers = #tpu.dot_dimension_numbers<[2], [1], [1], [2], [0, 0, 0, 1, 1, 2], [0], [0]>} : vector<2x8x8xf32>, vector<2x8x8xf32>, vector<2x8x8xf32> -> vector<2x8x8xf32>
    "tpu.trace_stop"() : () -> ()
    %399 = vector.shape_cast %398 : vector<2x8x8xf32> to vector<16x8xf32>
    %400 = vector.extract_strided_slice %328 {offsets = [3, 0, 0], sizes = [1, 8, 32], strides = [1, 1, 1]} : vector<4x8x32xf32> to vector<1x8x32xf32>
    %401 = vector.shape_cast %400 : vector<1x8x32xf32> to vector<8x32xf32>
    %cst_170 = arith.constant dense<0.000000e+00> : vector<16x32xf32>
    %402 = tpu.matmul %399, %401, %cst_170 {dimension_numbers = #tpu.dot_dimension_numbers<[1], [0], [0], [1], [0, 0, 1, 1], [], []>} : vector<16x8xf32>, vector<8x32xf32>, vector<16x32xf32> -> vector<16x32xf32>
    %403 = arith.addf %384, %402 : vector<16x32xf32>
    %c2_171 = arith.constant 2 : index
    %c0_172 = arith.constant 0 : index
    %c0_173 = arith.constant 0 : index
    %404 = vector.load %arg4[%c2_171, %c0_172, %c0_173] : memref<6x1x32xf32, #tpu.memory_space<vmem>>, vector<1x1x32xf32>
    %405 = vector.shape_cast %404 : vector<1x1x32xf32> to vector<1x32xf32>
    %406 = vector.broadcast %405 : vector<1x32xf32> to vector<16x32xf32>
    %407 = arith.addf %403, %406 : vector<16x32xf32>
    %408 = arith.addf %407, %318 : vector<16x32xf32>
    %c2_174 = arith.constant 2 : index
    %c0_175 = arith.constant 0 : index
    %c0_176 = arith.constant 0 : index
    %409 = vector.load %arg5[%c2_174, %c0_175, %c0_176] : memref<6x1x32xf32, #tpu.memory_space<vmem>>, vector<1x1x32xf32>
    %410 = vector.shape_cast %409 : vector<1x1x32xf32> to vector<1x32xf32>
    %c2_177 = arith.constant 2 : index
    %c0_178 = arith.constant 0 : index
    %c0_179 = arith.constant 0 : index
    %411 = vector.load %arg6[%c2_177, %c0_178, %c0_179] : memref<6x1x32xf32, #tpu.memory_space<vmem>>, vector<1x1x32xf32>
    %412 = vector.shape_cast %411 : vector<1x1x32xf32> to vector<1x32xf32>
    %cst_180 = arith.constant dense<0.000000e+00> : vector<16xf32>
    %413 = vector.multi_reduction <add>, %408, %cst_180 [1] : vector<16x32xf32> to vector<16xf32>
    %414 = vector.shape_cast %413 : vector<16xf32> to vector<16x1xf32>
    %cst_181 = arith.constant 3.200000e+01 : f32
    %415 = vector.broadcast %cst_181 : f32 to vector<16x1xf32>
    %416 = arith.divf %414, %415 : vector<16x1xf32>
    %417 = vector.broadcast %416 : vector<16x1xf32> to vector<16x32xf32>
    %418 = arith.subf %408, %417 : vector<16x32xf32>
    %419 = arith.mulf %418, %418 : vector<16x32xf32>
    %cst_182 = arith.constant dense<0.000000e+00> : vector<16xf32>
    %420 = vector.multi_reduction <add>, %419, %cst_182 [1] : vector<16x32xf32> to vector<16xf32>
    %421 = vector.shape_cast %420 : vector<16xf32> to vector<16x1xf32>
    %cst_183 = arith.constant 3.200000e+01 : f32
    %422 = vector.broadcast %cst_183 : f32 to vector<16x1xf32>
    %423 = arith.divf %421, %422 : vector<16x1xf32>
    %424 = vector.broadcast %416 : vector<16x1xf32> to vector<16x32xf32>
    %425 = arith.subf %408, %424 : vector<16x32xf32>
    %cst_184 = arith.constant 9.99999974E-6 : f32
    %426 = vector.broadcast %cst_184 : f32 to vector<16x1xf32>
    %427 = arith.addf %423, %426 : vector<16x1xf32>
    %428 = math.rsqrt %427 : vector<16x1xf32>
    %429 = vector.broadcast %428 : vector<16x1xf32> to vector<16x32xf32>
    %430 = arith.mulf %425, %429 : vector<16x32xf32>
    %431 = vector.broadcast %410 : vector<1x32xf32> to vector<16x32xf32>
    %432 = arith.mulf %430, %431 : vector<16x32xf32>
    %433 = vector.broadcast %412 : vector<1x32xf32> to vector<16x32xf32>
    %434 = arith.addf %432, %433 : vector<16x32xf32>
    %c2_185 = arith.constant 2 : index
    %c0_186 = arith.constant 0 : index
    %c0_187 = arith.constant 0 : index
    %435 = vector.load %arg7[%c2_185, %c0_186, %c0_187] : memref<6x32x64xf32, #tpu.memory_space<vmem>>, vector<1x32x64xf32>
    %436 = vector.shape_cast %435 : vector<1x32x64xf32> to vector<32x64xf32>
    %cst_188 = arith.constant dense<0.000000e+00> : vector<16x64xf32>
    %437 = tpu.matmul %434, %436, %cst_188 {dimension_numbers = #tpu.dot_dimension_numbers<[1], [0], [0], [1], [0, 0, 1, 1], [], []>} : vector<16x32xf32>, vector<32x64xf32>, vector<16x64xf32> -> vector<16x64xf32>
    %c2_189 = arith.constant 2 : index
    %c0_190 = arith.constant 0 : index
    %c0_191 = arith.constant 0 : index
    %438 = vector.load %arg8[%c2_189, %c0_190, %c0_191] : memref<6x1x64xf32, #tpu.memory_space<vmem>>, vector<1x1x64xf32>
    %439 = vector.shape_cast %438 : vector<1x1x64xf32> to vector<1x64xf32>
    %440 = vector.broadcast %439 : vector<1x64xf32> to vector<16x64xf32>
    %441 = arith.addf %437, %440 : vector<16x64xf32>
    %cst_192 = arith.constant 0.000000e+00 : f32
    %442 = vector.broadcast %cst_192 : f32 to vector<16x64xf32>
    %443 = arith.maximumf %441, %442 : vector<16x64xf32>
    %c2_193 = arith.constant 2 : index
    %c0_194 = arith.constant 0 : index
    %c0_195 = arith.constant 0 : index
    %444 = vector.load %arg9[%c2_193, %c0_194, %c0_195] : memref<6x64x32xf32, #tpu.memory_space<vmem>>, vector<1x64x32xf32>
    %445 = vector.shape_cast %444 : vector<1x64x32xf32> to vector<64x32xf32>
    %cst_196 = arith.constant dense<0.000000e+00> : vector<16x32xf32>
    %446 = tpu.matmul %443, %445, %cst_196 {dimension_numbers = #tpu.dot_dimension_numbers<[1], [0], [0], [1], [0, 0, 1, 1], [], []>} : vector<16x64xf32>, vector<64x32xf32>, vector<16x32xf32> -> vector<16x32xf32>
    %c2_197 = arith.constant 2 : index
    %c0_198 = arith.constant 0 : index
    %c0_199 = arith.constant 0 : index
    %447 = vector.load %arg10[%c2_197, %c0_198, %c0_199] : memref<6x1x32xf32, #tpu.memory_space<vmem>>, vector<1x1x32xf32>
    %448 = vector.shape_cast %447 : vector<1x1x32xf32> to vector<1x32xf32>
    %449 = vector.broadcast %448 : vector<1x32xf32> to vector<16x32xf32>
    %450 = arith.addf %446, %449 : vector<16x32xf32>
    %451 = arith.addf %450, %434 : vector<16x32xf32>
    %c2_200 = arith.constant 2 : index
    %c0_201 = arith.constant 0 : index
    %c0_202 = arith.constant 0 : index
    %452 = vector.load %arg11[%c2_200, %c0_201, %c0_202] : memref<6x1x32xf32, #tpu.memory_space<vmem>>, vector<1x1x32xf32>
    %453 = vector.shape_cast %452 : vector<1x1x32xf32> to vector<1x32xf32>
    %c2_203 = arith.constant 2 : index
    %c0_204 = arith.constant 0 : index
    %c0_205 = arith.constant 0 : index
    %454 = vector.load %arg12[%c2_203, %c0_204, %c0_205] : memref<6x1x32xf32, #tpu.memory_space<vmem>>, vector<1x1x32xf32>
    %455 = vector.shape_cast %454 : vector<1x1x32xf32> to vector<1x32xf32>
    %cst_206 = arith.constant dense<0.000000e+00> : vector<16xf32>
    %456 = vector.multi_reduction <add>, %451, %cst_206 [1] : vector<16x32xf32> to vector<16xf32>
    %457 = vector.shape_cast %456 : vector<16xf32> to vector<16x1xf32>
    %cst_207 = arith.constant 3.200000e+01 : f32
    %458 = vector.broadcast %cst_207 : f32 to vector<16x1xf32>
    %459 = arith.divf %457, %458 : vector<16x1xf32>
    %460 = vector.broadcast %459 : vector<16x1xf32> to vector<16x32xf32>
    %461 = arith.subf %451, %460 : vector<16x32xf32>
    %462 = arith.mulf %461, %461 : vector<16x32xf32>
    %cst_208 = arith.constant dense<0.000000e+00> : vector<16xf32>
    %463 = vector.multi_reduction <add>, %462, %cst_208 [1] : vector<16x32xf32> to vector<16xf32>
    %464 = vector.shape_cast %463 : vector<16xf32> to vector<16x1xf32>
    %cst_209 = arith.constant 3.200000e+01 : f32
    %465 = vector.broadcast %cst_209 : f32 to vector<16x1xf32>
    %466 = arith.divf %464, %465 : vector<16x1xf32>
    %467 = vector.broadcast %459 : vector<16x1xf32> to vector<16x32xf32>
    %468 = arith.subf %451, %467 : vector<16x32xf32>
    %cst_210 = arith.constant 9.99999974E-6 : f32
    %469 = vector.broadcast %cst_210 : f32 to vector<16x1xf32>
    %470 = arith.addf %466, %469 : vector<16x1xf32>
    %471 = math.rsqrt %470 : vector<16x1xf32>
    %472 = vector.broadcast %471 : vector<16x1xf32> to vector<16x32xf32>
    %473 = arith.mulf %468, %472 : vector<16x32xf32>
    %474 = vector.broadcast %453 : vector<1x32xf32> to vector<16x32xf32>
    %475 = arith.mulf %473, %474 : vector<16x32xf32>
    %476 = vector.broadcast %455 : vector<1x32xf32> to vector<16x32xf32>
    %477 = arith.addf %475, %476 : vector<16x32xf32>
    %c3 = arith.constant 3 : index
    %c0_211 = arith.constant 0 : index
    %c0_212 = arith.constant 0 : index
    %478 = vector.load %arg1[%c3, %c0_211, %c0_212] : memref<6x32x96xf32, #tpu.memory_space<vmem>>, vector<1x32x96xf32>
    %479 = vector.shape_cast %478 : vector<1x32x96xf32> to vector<32x96xf32>
    %cst_213 = arith.constant dense<0.000000e+00> : vector<16x96xf32>
    %480 = tpu.matmul %477, %479, %cst_213 {dimension_numbers = #tpu.dot_dimension_numbers<[1], [0], [0], [1], [0, 0, 1, 1], [], []>} : vector<16x32xf32>, vector<32x96xf32>, vector<16x96xf32> -> vector<16x96xf32>
    %c3_214 = arith.constant 3 : index
    %c0_215 = arith.constant 0 : index
    %c0_216 = arith.constant 0 : index
    %481 = vector.load %arg2[%c3_214, %c0_215, %c0_216] : memref<6x1x96xf32, #tpu.memory_space<vmem>>, vector<1x1x96xf32>
    %482 = vector.shape_cast %481 : vector<1x1x96xf32> to vector<1x96xf32>
    %483 = vector.broadcast %482 : vector<1x96xf32> to vector<16x96xf32>
    %484 = arith.addf %480, %483 : vector<16x96xf32>
    %485 = vector.shape_cast %484 : vector<16x96xf32> to vector<2x8x96xf32>
    %c3_217 = arith.constant 3 : index
    %c0_218 = arith.constant 0 : index
    %c0_219 = arith.constant 0 : index
    %c0_220 = arith.constant 0 : index
    %486 = vector.load %arg3[%c3_217, %c0_218, %c0_219, %c0_220] : memref<6x4x8x32xf32, #tpu.memory_space<vmem>>, vector<1x4x8x32xf32>
    %487 = vector.shape_cast %486 : vector<1x4x8x32xf32> to vector<4x8x32xf32>
    %488 = vector.extract_strided_slice %485 {offsets = [0, 0, 0], sizes = [2, 8, 8], strides = [1, 1, 1]} : vector<2x8x96xf32> to vector<2x8x8xf32>
    %489 = vector.extract_strided_slice %485 {offsets = [0, 0, 8], sizes = [2, 8, 8], strides = [1, 1, 1]} : vector<2x8x96xf32> to vector<2x8x8xf32>
    %490 = vector.extract_strided_slice %485 {offsets = [0, 0, 16], sizes = [2, 8, 8], strides = [1, 1, 1]} : vector<2x8x96xf32> to vector<2x8x8xf32>
    "tpu.trace_start"() <{level = 10 : i32, message = "bqd,bkd->bqk"}> : () -> ()
    %cst_221 = arith.constant dense<0.000000e+00> : vector<2x8x8xf32>
    %491 = tpu.matmul %488, %489, %cst_221 {dimension_numbers = #tpu.dot_dimension_numbers<[2], [2], [1], [1], [0, 0, 0, 1, 1, 1], [0], [0]>} : vector<2x8x8xf32>, vector<2x8x8xf32>, vector<2x8x8xf32> -> vector<2x8x8xf32>
    "tpu.trace_stop"() : () -> ()
    %cst_222 = arith.constant dense<0xFF800000> : vector<2x8xf32>
    %492 = vector.multi_reduction <maximumf>, %491, %cst_222 [2] : vector<2x8x8xf32> to vector<2x8xf32>
    %493 = vector.shape_cast %492 : vector<2x8xf32> to vector<2x8x1xf32>
    %494 = vector.broadcast %493 : vector<2x8x1xf32> to vector<2x8x8xf32>
    %495 = arith.subf %491, %494 : vector<2x8x8xf32>
    %496 = math.exp %495 : vector<2x8x8xf32>
    %cst_223 = arith.constant dense<0.000000e+00> : vector<2x8xf32>
    %497 = vector.multi_reduction <add>, %496, %cst_223 [2] : vector<2x8x8xf32> to vector<2x8xf32>
    %498 = vector.shape_cast %497 : vector<2x8xf32> to vector<2x8x1xf32>
    %499 = vector.broadcast %498 : vector<2x8x1xf32> to vector<2x8x8xf32>
    %500 = arith.divf %496, %499 : vector<2x8x8xf32>
    "tpu.trace_start"() <{level = 10 : i32, message = "bqk,bkd->bqd"}> : () -> ()
    %cst_224 = arith.constant dense<0.000000e+00> : vector<2x8x8xf32>
    %501 = tpu.matmul %500, %490, %cst_224 {dimension_numbers = #tpu.dot_dimension_numbers<[2], [1], [1], [2], [0, 0, 0, 1, 1, 2], [0], [0]>} : vector<2x8x8xf32>, vector<2x8x8xf32>, vector<2x8x8xf32> -> vector<2x8x8xf32>
    "tpu.trace_stop"() : () -> ()
    %502 = vector.shape_cast %501 : vector<2x8x8xf32> to vector<16x8xf32>
    %503 = vector.extract_strided_slice %487 {offsets = [0, 0, 0], sizes = [1, 8, 32], strides = [1, 1, 1]} : vector<4x8x32xf32> to vector<1x8x32xf32>
    %504 = vector.shape_cast %503 : vector<1x8x32xf32> to vector<8x32xf32>
    %cst_225 = arith.constant dense<0.000000e+00> : vector<16x32xf32>
    %505 = tpu.matmul %502, %504, %cst_225 {dimension_numbers = #tpu.dot_dimension_numbers<[1], [0], [0], [1], [0, 0, 1, 1], [], []>} : vector<16x8xf32>, vector<8x32xf32>, vector<16x32xf32> -> vector<16x32xf32>
    %506 = vector.extract_strided_slice %485 {offsets = [0, 0, 24], sizes = [2, 8, 8], strides = [1, 1, 1]} : vector<2x8x96xf32> to vector<2x8x8xf32>
    %507 = vector.extract_strided_slice %485 {offsets = [0, 0, 32], sizes = [2, 8, 8], strides = [1, 1, 1]} : vector<2x8x96xf32> to vector<2x8x8xf32>
    %508 = vector.extract_strided_slice %485 {offsets = [0, 0, 40], sizes = [2, 8, 8], strides = [1, 1, 1]} : vector<2x8x96xf32> to vector<2x8x8xf32>
    "tpu.trace_start"() <{level = 10 : i32, message = "bqd,bkd->bqk"}> : () -> ()
    %cst_226 = arith.constant dense<0.000000e+00> : vector<2x8x8xf32>
    %509 = tpu.matmul %506, %507, %cst_226 {dimension_numbers = #tpu.dot_dimension_numbers<[2], [2], [1], [1], [0, 0, 0, 1, 1, 1], [0], [0]>} : vector<2x8x8xf32>, vector<2x8x8xf32>, vector<2x8x8xf32> -> vector<2x8x8xf32>
    "tpu.trace_stop"() : () -> ()
    %cst_227 = arith.constant dense<0xFF800000> : vector<2x8xf32>
    %510 = vector.multi_reduction <maximumf>, %509, %cst_227 [2] : vector<2x8x8xf32> to vector<2x8xf32>
    %511 = vector.shape_cast %510 : vector<2x8xf32> to vector<2x8x1xf32>
    %512 = vector.broadcast %511 : vector<2x8x1xf32> to vector<2x8x8xf32>
    %513 = arith.subf %509, %512 : vector<2x8x8xf32>
    %514 = math.exp %513 : vector<2x8x8xf32>
    %cst_228 = arith.constant dense<0.000000e+00> : vector<2x8xf32>
    %515 = vector.multi_reduction <add>, %514, %cst_228 [2] : vector<2x8x8xf32> to vector<2x8xf32>
    %516 = vector.shape_cast %515 : vector<2x8xf32> to vector<2x8x1xf32>
    %517 = vector.broadcast %516 : vector<2x8x1xf32> to vector<2x8x8xf32>
    %518 = arith.divf %514, %517 : vector<2x8x8xf32>
    "tpu.trace_start"() <{level = 10 : i32, message = "bqk,bkd->bqd"}> : () -> ()
    %cst_229 = arith.constant dense<0.000000e+00> : vector<2x8x8xf32>
    %519 = tpu.matmul %518, %508, %cst_229 {dimension_numbers = #tpu.dot_dimension_numbers<[2], [1], [1], [2], [0, 0, 0, 1, 1, 2], [0], [0]>} : vector<2x8x8xf32>, vector<2x8x8xf32>, vector<2x8x8xf32> -> vector<2x8x8xf32>
    "tpu.trace_stop"() : () -> ()
    %520 = vector.shape_cast %519 : vector<2x8x8xf32> to vector<16x8xf32>
    %521 = vector.extract_strided_slice %487 {offsets = [1, 0, 0], sizes = [1, 8, 32], strides = [1, 1, 1]} : vector<4x8x32xf32> to vector<1x8x32xf32>
    %522 = vector.shape_cast %521 : vector<1x8x32xf32> to vector<8x32xf32>
    %cst_230 = arith.constant dense<0.000000e+00> : vector<16x32xf32>
    %523 = tpu.matmul %520, %522, %cst_230 {dimension_numbers = #tpu.dot_dimension_numbers<[1], [0], [0], [1], [0, 0, 1, 1], [], []>} : vector<16x8xf32>, vector<8x32xf32>, vector<16x32xf32> -> vector<16x32xf32>
    %524 = arith.addf %505, %523 : vector<16x32xf32>
    %525 = vector.extract_strided_slice %485 {offsets = [0, 0, 48], sizes = [2, 8, 8], strides = [1, 1, 1]} : vector<2x8x96xf32> to vector<2x8x8xf32>
    %526 = vector.extract_strided_slice %485 {offsets = [0, 0, 56], sizes = [2, 8, 8], strides = [1, 1, 1]} : vector<2x8x96xf32> to vector<2x8x8xf32>
    %527 = vector.extract_strided_slice %485 {offsets = [0, 0, 64], sizes = [2, 8, 8], strides = [1, 1, 1]} : vector<2x8x96xf32> to vector<2x8x8xf32>
    "tpu.trace_start"() <{level = 10 : i32, message = "bqd,bkd->bqk"}> : () -> ()
    %cst_231 = arith.constant dense<0.000000e+00> : vector<2x8x8xf32>
    %528 = tpu.matmul %525, %526, %cst_231 {dimension_numbers = #tpu.dot_dimension_numbers<[2], [2], [1], [1], [0, 0, 0, 1, 1, 1], [0], [0]>} : vector<2x8x8xf32>, vector<2x8x8xf32>, vector<2x8x8xf32> -> vector<2x8x8xf32>
    "tpu.trace_stop"() : () -> ()
    %cst_232 = arith.constant dense<0xFF800000> : vector<2x8xf32>
    %529 = vector.multi_reduction <maximumf>, %528, %cst_232 [2] : vector<2x8x8xf32> to vector<2x8xf32>
    %530 = vector.shape_cast %529 : vector<2x8xf32> to vector<2x8x1xf32>
    %531 = vector.broadcast %530 : vector<2x8x1xf32> to vector<2x8x8xf32>
    %532 = arith.subf %528, %531 : vector<2x8x8xf32>
    %533 = math.exp %532 : vector<2x8x8xf32>
    %cst_233 = arith.constant dense<0.000000e+00> : vector<2x8xf32>
    %534 = vector.multi_reduction <add>, %533, %cst_233 [2] : vector<2x8x8xf32> to vector<2x8xf32>
    %535 = vector.shape_cast %534 : vector<2x8xf32> to vector<2x8x1xf32>
    %536 = vector.broadcast %535 : vector<2x8x1xf32> to vector<2x8x8xf32>
    %537 = arith.divf %533, %536 : vector<2x8x8xf32>
    "tpu.trace_start"() <{level = 10 : i32, message = "bqk,bkd->bqd"}> : () -> ()
    %cst_234 = arith.constant dense<0.000000e+00> : vector<2x8x8xf32>
    %538 = tpu.matmul %537, %527, %cst_234 {dimension_numbers = #tpu.dot_dimension_numbers<[2], [1], [1], [2], [0, 0, 0, 1, 1, 2], [0], [0]>} : vector<2x8x8xf32>, vector<2x8x8xf32>, vector<2x8x8xf32> -> vector<2x8x8xf32>
    "tpu.trace_stop"() : () -> ()
    %539 = vector.shape_cast %538 : vector<2x8x8xf32> to vector<16x8xf32>
    %540 = vector.extract_strided_slice %487 {offsets = [2, 0, 0], sizes = [1, 8, 32], strides = [1, 1, 1]} : vector<4x8x32xf32> to vector<1x8x32xf32>
    %541 = vector.shape_cast %540 : vector<1x8x32xf32> to vector<8x32xf32>
    %cst_235 = arith.constant dense<0.000000e+00> : vector<16x32xf32>
    %542 = tpu.matmul %539, %541, %cst_235 {dimension_numbers = #tpu.dot_dimension_numbers<[1], [0], [0], [1], [0, 0, 1, 1], [], []>} : vector<16x8xf32>, vector<8x32xf32>, vector<16x32xf32> -> vector<16x32xf32>
    %543 = arith.addf %524, %542 : vector<16x32xf32>
    %544 = vector.extract_strided_slice %485 {offsets = [0, 0, 72], sizes = [2, 8, 8], strides = [1, 1, 1]} : vector<2x8x96xf32> to vector<2x8x8xf32>
    %545 = vector.extract_strided_slice %485 {offsets = [0, 0, 80], sizes = [2, 8, 8], strides = [1, 1, 1]} : vector<2x8x96xf32> to vector<2x8x8xf32>
    %546 = vector.extract_strided_slice %485 {offsets = [0, 0, 88], sizes = [2, 8, 8], strides = [1, 1, 1]} : vector<2x8x96xf32> to vector<2x8x8xf32>
    "tpu.trace_start"() <{level = 10 : i32, message = "bqd,bkd->bqk"}> : () -> ()
    %cst_236 = arith.constant dense<0.000000e+00> : vector<2x8x8xf32>
    %547 = tpu.matmul %544, %545, %cst_236 {dimension_numbers = #tpu.dot_dimension_numbers<[2], [2], [1], [1], [0, 0, 0, 1, 1, 1], [0], [0]>} : vector<2x8x8xf32>, vector<2x8x8xf32>, vector<2x8x8xf32> -> vector<2x8x8xf32>
    "tpu.trace_stop"() : () -> ()
    %cst_237 = arith.constant dense<0xFF800000> : vector<2x8xf32>
    %548 = vector.multi_reduction <maximumf>, %547, %cst_237 [2] : vector<2x8x8xf32> to vector<2x8xf32>
    %549 = vector.shape_cast %548 : vector<2x8xf32> to vector<2x8x1xf32>
    %550 = vector.broadcast %549 : vector<2x8x1xf32> to vector<2x8x8xf32>
    %551 = arith.subf %547, %550 : vector<2x8x8xf32>
    %552 = math.exp %551 : vector<2x8x8xf32>
    %cst_238 = arith.constant dense<0.000000e+00> : vector<2x8xf32>
    %553 = vector.multi_reduction <add>, %552, %cst_238 [2] : vector<2x8x8xf32> to vector<2x8xf32>
    %554 = vector.shape_cast %553 : vector<2x8xf32> to vector<2x8x1xf32>
    %555 = vector.broadcast %554 : vector<2x8x1xf32> to vector<2x8x8xf32>
    %556 = arith.divf %552, %555 : vector<2x8x8xf32>
    "tpu.trace_start"() <{level = 10 : i32, message = "bqk,bkd->bqd"}> : () -> ()
    %cst_239 = arith.constant dense<0.000000e+00> : vector<2x8x8xf32>
    %557 = tpu.matmul %556, %546, %cst_239 {dimension_numbers = #tpu.dot_dimension_numbers<[2], [1], [1], [2], [0, 0, 0, 1, 1, 2], [0], [0]>} : vector<2x8x8xf32>, vector<2x8x8xf32>, vector<2x8x8xf32> -> vector<2x8x8xf32>
    "tpu.trace_stop"() : () -> ()
    %558 = vector.shape_cast %557 : vector<2x8x8xf32> to vector<16x8xf32>
    %559 = vector.extract_strided_slice %487 {offsets = [3, 0, 0], sizes = [1, 8, 32], strides = [1, 1, 1]} : vector<4x8x32xf32> to vector<1x8x32xf32>
    %560 = vector.shape_cast %559 : vector<1x8x32xf32> to vector<8x32xf32>
    %cst_240 = arith.constant dense<0.000000e+00> : vector<16x32xf32>
    %561 = tpu.matmul %558, %560, %cst_240 {dimension_numbers = #tpu.dot_dimension_numbers<[1], [0], [0], [1], [0, 0, 1, 1], [], []>} : vector<16x8xf32>, vector<8x32xf32>, vector<16x32xf32> -> vector<16x32xf32>
    %562 = arith.addf %543, %561 : vector<16x32xf32>
    %c3_241 = arith.constant 3 : index
    %c0_242 = arith.constant 0 : index
    %c0_243 = arith.constant 0 : index
    %563 = vector.load %arg4[%c3_241, %c0_242, %c0_243] : memref<6x1x32xf32, #tpu.memory_space<vmem>>, vector<1x1x32xf32>
    %564 = vector.shape_cast %563 : vector<1x1x32xf32> to vector<1x32xf32>
    %565 = vector.broadcast %564 : vector<1x32xf32> to vector<16x32xf32>
    %566 = arith.addf %562, %565 : vector<16x32xf32>
    %567 = arith.addf %566, %477 : vector<16x32xf32>
    %c3_244 = arith.constant 3 : index
    %c0_245 = arith.constant 0 : index
    %c0_246 = arith.constant 0 : index
    %568 = vector.load %arg5[%c3_244, %c0_245, %c0_246] : memref<6x1x32xf32, #tpu.memory_space<vmem>>, vector<1x1x32xf32>
    %569 = vector.shape_cast %568 : vector<1x1x32xf32> to vector<1x32xf32>
    %c3_247 = arith.constant 3 : index
    %c0_248 = arith.constant 0 : index
    %c0_249 = arith.constant 0 : index
    %570 = vector.load %arg6[%c3_247, %c0_248, %c0_249] : memref<6x1x32xf32, #tpu.memory_space<vmem>>, vector<1x1x32xf32>
    %571 = vector.shape_cast %570 : vector<1x1x32xf32> to vector<1x32xf32>
    %cst_250 = arith.constant dense<0.000000e+00> : vector<16xf32>
    %572 = vector.multi_reduction <add>, %567, %cst_250 [1] : vector<16x32xf32> to vector<16xf32>
    %573 = vector.shape_cast %572 : vector<16xf32> to vector<16x1xf32>
    %cst_251 = arith.constant 3.200000e+01 : f32
    %574 = vector.broadcast %cst_251 : f32 to vector<16x1xf32>
    %575 = arith.divf %573, %574 : vector<16x1xf32>
    %576 = vector.broadcast %575 : vector<16x1xf32> to vector<16x32xf32>
    %577 = arith.subf %567, %576 : vector<16x32xf32>
    %578 = arith.mulf %577, %577 : vector<16x32xf32>
    %cst_252 = arith.constant dense<0.000000e+00> : vector<16xf32>
    %579 = vector.multi_reduction <add>, %578, %cst_252 [1] : vector<16x32xf32> to vector<16xf32>
    %580 = vector.shape_cast %579 : vector<16xf32> to vector<16x1xf32>
    %cst_253 = arith.constant 3.200000e+01 : f32
    %581 = vector.broadcast %cst_253 : f32 to vector<16x1xf32>
    %582 = arith.divf %580, %581 : vector<16x1xf32>
    %583 = vector.broadcast %575 : vector<16x1xf32> to vector<16x32xf32>
    %584 = arith.subf %567, %583 : vector<16x32xf32>
    %cst_254 = arith.constant 9.99999974E-6 : f32
    %585 = vector.broadcast %cst_254 : f32 to vector<16x1xf32>
    %586 = arith.addf %582, %585 : vector<16x1xf32>
    %587 = math.rsqrt %586 : vector<16x1xf32>
    %588 = vector.broadcast %587 : vector<16x1xf32> to vector<16x32xf32>
    %589 = arith.mulf %584, %588 : vector<16x32xf32>
    %590 = vector.broadcast %569 : vector<1x32xf32> to vector<16x32xf32>
    %591 = arith.mulf %589, %590 : vector<16x32xf32>
    %592 = vector.broadcast %571 : vector<1x32xf32> to vector<16x32xf32>
    %593 = arith.addf %591, %592 : vector<16x32xf32>
    %c3_255 = arith.constant 3 : index
    %c0_256 = arith.constant 0 : index
    %c0_257 = arith.constant 0 : index
    %594 = vector.load %arg7[%c3_255, %c0_256, %c0_257] : memref<6x32x64xf32, #tpu.memory_space<vmem>>, vector<1x32x64xf32>
    %595 = vector.shape_cast %594 : vector<1x32x64xf32> to vector<32x64xf32>
    %cst_258 = arith.constant dense<0.000000e+00> : vector<16x64xf32>
    %596 = tpu.matmul %593, %595, %cst_258 {dimension_numbers = #tpu.dot_dimension_numbers<[1], [0], [0], [1], [0, 0, 1, 1], [], []>} : vector<16x32xf32>, vector<32x64xf32>, vector<16x64xf32> -> vector<16x64xf32>
    %c3_259 = arith.constant 3 : index
    %c0_260 = arith.constant 0 : index
    %c0_261 = arith.constant 0 : index
    %597 = vector.load %arg8[%c3_259, %c0_260, %c0_261] : memref<6x1x64xf32, #tpu.memory_space<vmem>>, vector<1x1x64xf32>
    %598 = vector.shape_cast %597 : vector<1x1x64xf32> to vector<1x64xf32>
    %599 = vector.broadcast %598 : vector<1x64xf32> to vector<16x64xf32>
    %600 = arith.addf %596, %599 : vector<16x64xf32>
    %cst_262 = arith.constant 0.000000e+00 : f32
    %601 = vector.broadcast %cst_262 : f32 to vector<16x64xf32>
    %602 = arith.maximumf %600, %601 : vector<16x64xf32>
    %c3_263 = arith.constant 3 : index
    %c0_264 = arith.constant 0 : index
    %c0_265 = arith.constant 0 : index
    %603 = vector.load %arg9[%c3_263, %c0_264, %c0_265] : memref<6x64x32xf32, #tpu.memory_space<vmem>>, vector<1x64x32xf32>
    %604 = vector.shape_cast %603 : vector<1x64x32xf32> to vector<64x32xf32>
    %cst_266 = arith.constant dense<0.000000e+00> : vector<16x32xf32>
    %605 = tpu.matmul %602, %604, %cst_266 {dimension_numbers = #tpu.dot_dimension_numbers<[1], [0], [0], [1], [0, 0, 1, 1], [], []>} : vector<16x64xf32>, vector<64x32xf32>, vector<16x32xf32> -> vector<16x32xf32>
    %c3_267 = arith.constant 3 : index
    %c0_268 = arith.constant 0 : index
    %c0_269 = arith.constant 0 : index
    %606 = vector.load %arg10[%c3_267, %c0_268, %c0_269] : memref<6x1x32xf32, #tpu.memory_space<vmem>>, vector<1x1x32xf32>
    %607 = vector.shape_cast %606 : vector<1x1x32xf32> to vector<1x32xf32>
    %608 = vector.broadcast %607 : vector<1x32xf32> to vector<16x32xf32>
    %609 = arith.addf %605, %608 : vector<16x32xf32>
    %610 = arith.addf %609, %593 : vector<16x32xf32>
    %c3_270 = arith.constant 3 : index
    %c0_271 = arith.constant 0 : index
    %c0_272 = arith.constant 0 : index
    %611 = vector.load %arg11[%c3_270, %c0_271, %c0_272] : memref<6x1x32xf32, #tpu.memory_space<vmem>>, vector<1x1x32xf32>
    %612 = vector.shape_cast %611 : vector<1x1x32xf32> to vector<1x32xf32>
    %c3_273 = arith.constant 3 : index
    %c0_274 = arith.constant 0 : index
    %c0_275 = arith.constant 0 : index
    %613 = vector.load %arg12[%c3_273, %c0_274, %c0_275] : memref<6x1x32xf32, #tpu.memory_space<vmem>>, vector<1x1x32xf32>
    %614 = vector.shape_cast %613 : vector<1x1x32xf32> to vector<1x32xf32>
    %cst_276 = arith.constant dense<0.000000e+00> : vector<16xf32>
    %615 = vector.multi_reduction <add>, %610, %cst_276 [1] : vector<16x32xf32> to vector<16xf32>
    %616 = vector.shape_cast %615 : vector<16xf32> to vector<16x1xf32>
    %cst_277 = arith.constant 3.200000e+01 : f32
    %617 = vector.broadcast %cst_277 : f32 to vector<16x1xf32>
    %618 = arith.divf %616, %617 : vector<16x1xf32>
    %619 = vector.broadcast %618 : vector<16x1xf32> to vector<16x32xf32>
    %620 = arith.subf %610, %619 : vector<16x32xf32>
    %621 = arith.mulf %620, %620 : vector<16x32xf32>
    %cst_278 = arith.constant dense<0.000000e+00> : vector<16xf32>
    %622 = vector.multi_reduction <add>, %621, %cst_278 [1] : vector<16x32xf32> to vector<16xf32>
    %623 = vector.shape_cast %622 : vector<16xf32> to vector<16x1xf32>
    %cst_279 = arith.constant 3.200000e+01 : f32
    %624 = vector.broadcast %cst_279 : f32 to vector<16x1xf32>
    %625 = arith.divf %623, %624 : vector<16x1xf32>
    %626 = vector.broadcast %618 : vector<16x1xf32> to vector<16x32xf32>
    %627 = arith.subf %610, %626 : vector<16x32xf32>
    %cst_280 = arith.constant 9.99999974E-6 : f32
    %628 = vector.broadcast %cst_280 : f32 to vector<16x1xf32>
    %629 = arith.addf %625, %628 : vector<16x1xf32>
    %630 = math.rsqrt %629 : vector<16x1xf32>
    %631 = vector.broadcast %630 : vector<16x1xf32> to vector<16x32xf32>
    %632 = arith.mulf %627, %631 : vector<16x32xf32>
    %633 = vector.broadcast %612 : vector<1x32xf32> to vector<16x32xf32>
    %634 = arith.mulf %632, %633 : vector<16x32xf32>
    %635 = vector.broadcast %614 : vector<1x32xf32> to vector<16x32xf32>
    %636 = arith.addf %634, %635 : vector<16x32xf32>
    %c4 = arith.constant 4 : index
    %c0_281 = arith.constant 0 : index
    %c0_282 = arith.constant 0 : index
    %637 = vector.load %arg1[%c4, %c0_281, %c0_282] : memref<6x32x96xf32, #tpu.memory_space<vmem>>, vector<1x32x96xf32>
    %638 = vector.shape_cast %637 : vector<1x32x96xf32> to vector<32x96xf32>
    %cst_283 = arith.constant dense<0.000000e+00> : vector<16x96xf32>
    %639 = tpu.matmul %636, %638, %cst_283 {dimension_numbers = #tpu.dot_dimension_numbers<[1], [0], [0], [1], [0, 0, 1, 1], [], []>} : vector<16x32xf32>, vector<32x96xf32>, vector<16x96xf32> -> vector<16x96xf32>
    %c4_284 = arith.constant 4 : index
    %c0_285 = arith.constant 0 : index
    %c0_286 = arith.constant 0 : index
    %640 = vector.load %arg2[%c4_284, %c0_285, %c0_286] : memref<6x1x96xf32, #tpu.memory_space<vmem>>, vector<1x1x96xf32>
    %641 = vector.shape_cast %640 : vector<1x1x96xf32> to vector<1x96xf32>
    %642 = vector.broadcast %641 : vector<1x96xf32> to vector<16x96xf32>
    %643 = arith.addf %639, %642 : vector<16x96xf32>
    %644 = vector.shape_cast %643 : vector<16x96xf32> to vector<2x8x96xf32>
    %c4_287 = arith.constant 4 : index
    %c0_288 = arith.constant 0 : index
    %c0_289 = arith.constant 0 : index
    %c0_290 = arith.constant 0 : index
    %645 = vector.load %arg3[%c4_287, %c0_288, %c0_289, %c0_290] : memref<6x4x8x32xf32, #tpu.memory_space<vmem>>, vector<1x4x8x32xf32>
    %646 = vector.shape_cast %645 : vector<1x4x8x32xf32> to vector<4x8x32xf32>
    %647 = vector.extract_strided_slice %644 {offsets = [0, 0, 0], sizes = [2, 8, 8], strides = [1, 1, 1]} : vector<2x8x96xf32> to vector<2x8x8xf32>
    %648 = vector.extract_strided_slice %644 {offsets = [0, 0, 8], sizes = [2, 8, 8], strides = [1, 1, 1]} : vector<2x8x96xf32> to vector<2x8x8xf32>
    %649 = vector.extract_strided_slice %644 {offsets = [0, 0, 16], sizes = [2, 8, 8], strides = [1, 1, 1]} : vector<2x8x96xf32> to vector<2x8x8xf32>
    "tpu.trace_start"() <{level = 10 : i32, message = "bqd,bkd->bqk"}> : () -> ()
    %cst_291 = arith.constant dense<0.000000e+00> : vector<2x8x8xf32>
    %650 = tpu.matmul %647, %648, %cst_291 {dimension_numbers = #tpu.dot_dimension_numbers<[2], [2], [1], [1], [0, 0, 0, 1, 1, 1], [0], [0]>} : vector<2x8x8xf32>, vector<2x8x8xf32>, vector<2x8x8xf32> -> vector<2x8x8xf32>
    "tpu.trace_stop"() : () -> ()
    %cst_292 = arith.constant dense<0xFF800000> : vector<2x8xf32>
    %651 = vector.multi_reduction <maximumf>, %650, %cst_292 [2] : vector<2x8x8xf32> to vector<2x8xf32>
    %652 = vector.shape_cast %651 : vector<2x8xf32> to vector<2x8x1xf32>
    %653 = vector.broadcast %652 : vector<2x8x1xf32> to vector<2x8x8xf32>
    %654 = arith.subf %650, %653 : vector<2x8x8xf32>
    %655 = math.exp %654 : vector<2x8x8xf32>
    %cst_293 = arith.constant dense<0.000000e+00> : vector<2x8xf32>
    %656 = vector.multi_reduction <add>, %655, %cst_293 [2] : vector<2x8x8xf32> to vector<2x8xf32>
    %657 = vector.shape_cast %656 : vector<2x8xf32> to vector<2x8x1xf32>
    %658 = vector.broadcast %657 : vector<2x8x1xf32> to vector<2x8x8xf32>
    %659 = arith.divf %655, %658 : vector<2x8x8xf32>
    "tpu.trace_start"() <{level = 10 : i32, message = "bqk,bkd->bqd"}> : () -> ()
    %cst_294 = arith.constant dense<0.000000e+00> : vector<2x8x8xf32>
    %660 = tpu.matmul %659, %649, %cst_294 {dimension_numbers = #tpu.dot_dimension_numbers<[2], [1], [1], [2], [0, 0, 0, 1, 1, 2], [0], [0]>} : vector<2x8x8xf32>, vector<2x8x8xf32>, vector<2x8x8xf32> -> vector<2x8x8xf32>
    "tpu.trace_stop"() : () -> ()
    %661 = vector.shape_cast %660 : vector<2x8x8xf32> to vector<16x8xf32>
    %662 = vector.extract_strided_slice %646 {offsets = [0, 0, 0], sizes = [1, 8, 32], strides = [1, 1, 1]} : vector<4x8x32xf32> to vector<1x8x32xf32>
    %663 = vector.shape_cast %662 : vector<1x8x32xf32> to vector<8x32xf32>
    %cst_295 = arith.constant dense<0.000000e+00> : vector<16x32xf32>
    %664 = tpu.matmul %661, %663, %cst_295 {dimension_numbers = #tpu.dot_dimension_numbers<[1], [0], [0], [1], [0, 0, 1, 1], [], []>} : vector<16x8xf32>, vector<8x32xf32>, vector<16x32xf32> -> vector<16x32xf32>
    %665 = vector.extract_strided_slice %644 {offsets = [0, 0, 24], sizes = [2, 8, 8], strides = [1, 1, 1]} : vector<2x8x96xf32> to vector<2x8x8xf32>
    %666 = vector.extract_strided_slice %644 {offsets = [0, 0, 32], sizes = [2, 8, 8], strides = [1, 1, 1]} : vector<2x8x96xf32> to vector<2x8x8xf32>
    %667 = vector.extract_strided_slice %644 {offsets = [0, 0, 40], sizes = [2, 8, 8], strides = [1, 1, 1]} : vector<2x8x96xf32> to vector<2x8x8xf32>
    "tpu.trace_start"() <{level = 10 : i32, message = "bqd,bkd->bqk"}> : () -> ()
    %cst_296 = arith.constant dense<0.000000e+00> : vector<2x8x8xf32>
    %668 = tpu.matmul %665, %666, %cst_296 {dimension_numbers = #tpu.dot_dimension_numbers<[2], [2], [1], [1], [0, 0, 0, 1, 1, 1], [0], [0]>} : vector<2x8x8xf32>, vector<2x8x8xf32>, vector<2x8x8xf32> -> vector<2x8x8xf32>
    "tpu.trace_stop"() : () -> ()
    %cst_297 = arith.constant dense<0xFF800000> : vector<2x8xf32>
    %669 = vector.multi_reduction <maximumf>, %668, %cst_297 [2] : vector<2x8x8xf32> to vector<2x8xf32>
    %670 = vector.shape_cast %669 : vector<2x8xf32> to vector<2x8x1xf32>
    %671 = vector.broadcast %670 : vector<2x8x1xf32> to vector<2x8x8xf32>
    %672 = arith.subf %668, %671 : vector<2x8x8xf32>
    %673 = math.exp %672 : vector<2x8x8xf32>
    %cst_298 = arith.constant dense<0.000000e+00> : vector<2x8xf32>
    %674 = vector.multi_reduction <add>, %673, %cst_298 [2] : vector<2x8x8xf32> to vector<2x8xf32>
    %675 = vector.shape_cast %674 : vector<2x8xf32> to vector<2x8x1xf32>
    %676 = vector.broadcast %675 : vector<2x8x1xf32> to vector<2x8x8xf32>
    %677 = arith.divf %673, %676 : vector<2x8x8xf32>
    "tpu.trace_start"() <{level = 10 : i32, message = "bqk,bkd->bqd"}> : () -> ()
    %cst_299 = arith.constant dense<0.000000e+00> : vector<2x8x8xf32>
    %678 = tpu.matmul %677, %667, %cst_299 {dimension_numbers = #tpu.dot_dimension_numbers<[2], [1], [1], [2], [0, 0, 0, 1, 1, 2], [0], [0]>} : vector<2x8x8xf32>, vector<2x8x8xf32>, vector<2x8x8xf32> -> vector<2x8x8xf32>
    "tpu.trace_stop"() : () -> ()
    %679 = vector.shape_cast %678 : vector<2x8x8xf32> to vector<16x8xf32>
    %680 = vector.extract_strided_slice %646 {offsets = [1, 0, 0], sizes = [1, 8, 32], strides = [1, 1, 1]} : vector<4x8x32xf32> to vector<1x8x32xf32>
    %681 = vector.shape_cast %680 : vector<1x8x32xf32> to vector<8x32xf32>
    %cst_300 = arith.constant dense<0.000000e+00> : vector<16x32xf32>
    %682 = tpu.matmul %679, %681, %cst_300 {dimension_numbers = #tpu.dot_dimension_numbers<[1], [0], [0], [1], [0, 0, 1, 1], [], []>} : vector<16x8xf32>, vector<8x32xf32>, vector<16x32xf32> -> vector<16x32xf32>
    %683 = arith.addf %664, %682 : vector<16x32xf32>
    %684 = vector.extract_strided_slice %644 {offsets = [0, 0, 48], sizes = [2, 8, 8], strides = [1, 1, 1]} : vector<2x8x96xf32> to vector<2x8x8xf32>
    %685 = vector.extract_strided_slice %644 {offsets = [0, 0, 56], sizes = [2, 8, 8], strides = [1, 1, 1]} : vector<2x8x96xf32> to vector<2x8x8xf32>
    %686 = vector.extract_strided_slice %644 {offsets = [0, 0, 64], sizes = [2, 8, 8], strides = [1, 1, 1]} : vector<2x8x96xf32> to vector<2x8x8xf32>
    "tpu.trace_start"() <{level = 10 : i32, message = "bqd,bkd->bqk"}> : () -> ()
    %cst_301 = arith.constant dense<0.000000e+00> : vector<2x8x8xf32>
    %687 = tpu.matmul %684, %685, %cst_301 {dimension_numbers = #tpu.dot_dimension_numbers<[2], [2], [1], [1], [0, 0, 0, 1, 1, 1], [0], [0]>} : vector<2x8x8xf32>, vector<2x8x8xf32>, vector<2x8x8xf32> -> vector<2x8x8xf32>
    "tpu.trace_stop"() : () -> ()
    %cst_302 = arith.constant dense<0xFF800000> : vector<2x8xf32>
    %688 = vector.multi_reduction <maximumf>, %687, %cst_302 [2] : vector<2x8x8xf32> to vector<2x8xf32>
    %689 = vector.shape_cast %688 : vector<2x8xf32> to vector<2x8x1xf32>
    %690 = vector.broadcast %689 : vector<2x8x1xf32> to vector<2x8x8xf32>
    %691 = arith.subf %687, %690 : vector<2x8x8xf32>
    %692 = math.exp %691 : vector<2x8x8xf32>
    %cst_303 = arith.constant dense<0.000000e+00> : vector<2x8xf32>
    %693 = vector.multi_reduction <add>, %692, %cst_303 [2] : vector<2x8x8xf32> to vector<2x8xf32>
    %694 = vector.shape_cast %693 : vector<2x8xf32> to vector<2x8x1xf32>
    %695 = vector.broadcast %694 : vector<2x8x1xf32> to vector<2x8x8xf32>
    %696 = arith.divf %692, %695 : vector<2x8x8xf32>
    "tpu.trace_start"() <{level = 10 : i32, message = "bqk,bkd->bqd"}> : () -> ()
    %cst_304 = arith.constant dense<0.000000e+00> : vector<2x8x8xf32>
    %697 = tpu.matmul %696, %686, %cst_304 {dimension_numbers = #tpu.dot_dimension_numbers<[2], [1], [1], [2], [0, 0, 0, 1, 1, 2], [0], [0]>} : vector<2x8x8xf32>, vector<2x8x8xf32>, vector<2x8x8xf32> -> vector<2x8x8xf32>
    "tpu.trace_stop"() : () -> ()
    %698 = vector.shape_cast %697 : vector<2x8x8xf32> to vector<16x8xf32>
    %699 = vector.extract_strided_slice %646 {offsets = [2, 0, 0], sizes = [1, 8, 32], strides = [1, 1, 1]} : vector<4x8x32xf32> to vector<1x8x32xf32>
    %700 = vector.shape_cast %699 : vector<1x8x32xf32> to vector<8x32xf32>
    %cst_305 = arith.constant dense<0.000000e+00> : vector<16x32xf32>
    %701 = tpu.matmul %698, %700, %cst_305 {dimension_numbers = #tpu.dot_dimension_numbers<[1], [0], [0], [1], [0, 0, 1, 1], [], []>} : vector<16x8xf32>, vector<8x32xf32>, vector<16x32xf32> -> vector<16x32xf32>
    %702 = arith.addf %683, %701 : vector<16x32xf32>
    %703 = vector.extract_strided_slice %644 {offsets = [0, 0, 72], sizes = [2, 8, 8], strides = [1, 1, 1]} : vector<2x8x96xf32> to vector<2x8x8xf32>
    %704 = vector.extract_strided_slice %644 {offsets = [0, 0, 80], sizes = [2, 8, 8], strides = [1, 1, 1]} : vector<2x8x96xf32> to vector<2x8x8xf32>
    %705 = vector.extract_strided_slice %644 {offsets = [0, 0, 88], sizes = [2, 8, 8], strides = [1, 1, 1]} : vector<2x8x96xf32> to vector<2x8x8xf32>
    "tpu.trace_start"() <{level = 10 : i32, message = "bqd,bkd->bqk"}> : () -> ()
    %cst_306 = arith.constant dense<0.000000e+00> : vector<2x8x8xf32>
    %706 = tpu.matmul %703, %704, %cst_306 {dimension_numbers = #tpu.dot_dimension_numbers<[2], [2], [1], [1], [0, 0, 0, 1, 1, 1], [0], [0]>} : vector<2x8x8xf32>, vector<2x8x8xf32>, vector<2x8x8xf32> -> vector<2x8x8xf32>
    "tpu.trace_stop"() : () -> ()
    %cst_307 = arith.constant dense<0xFF800000> : vector<2x8xf32>
    %707 = vector.multi_reduction <maximumf>, %706, %cst_307 [2] : vector<2x8x8xf32> to vector<2x8xf32>
    %708 = vector.shape_cast %707 : vector<2x8xf32> to vector<2x8x1xf32>
    %709 = vector.broadcast %708 : vector<2x8x1xf32> to vector<2x8x8xf32>
    %710 = arith.subf %706, %709 : vector<2x8x8xf32>
    %711 = math.exp %710 : vector<2x8x8xf32>
    %cst_308 = arith.constant dense<0.000000e+00> : vector<2x8xf32>
    %712 = vector.multi_reduction <add>, %711, %cst_308 [2] : vector<2x8x8xf32> to vector<2x8xf32>
    %713 = vector.shape_cast %712 : vector<2x8xf32> to vector<2x8x1xf32>
    %714 = vector.broadcast %713 : vector<2x8x1xf32> to vector<2x8x8xf32>
    %715 = arith.divf %711, %714 : vector<2x8x8xf32>
    "tpu.trace_start"() <{level = 10 : i32, message = "bqk,bkd->bqd"}> : () -> ()
    %cst_309 = arith.constant dense<0.000000e+00> : vector<2x8x8xf32>
    %716 = tpu.matmul %715, %705, %cst_309 {dimension_numbers = #tpu.dot_dimension_numbers<[2], [1], [1], [2], [0, 0, 0, 1, 1, 2], [0], [0]>} : vector<2x8x8xf32>, vector<2x8x8xf32>, vector<2x8x8xf32> -> vector<2x8x8xf32>
    "tpu.trace_stop"() : () -> ()
    %717 = vector.shape_cast %716 : vector<2x8x8xf32> to vector<16x8xf32>
    %718 = vector.extract_strided_slice %646 {offsets = [3, 0, 0], sizes = [1, 8, 32], strides = [1, 1, 1]} : vector<4x8x32xf32> to vector<1x8x32xf32>
    %719 = vector.shape_cast %718 : vector<1x8x32xf32> to vector<8x32xf32>
    %cst_310 = arith.constant dense<0.000000e+00> : vector<16x32xf32>
    %720 = tpu.matmul %717, %719, %cst_310 {dimension_numbers = #tpu.dot_dimension_numbers<[1], [0], [0], [1], [0, 0, 1, 1], [], []>} : vector<16x8xf32>, vector<8x32xf32>, vector<16x32xf32> -> vector<16x32xf32>
    %721 = arith.addf %702, %720 : vector<16x32xf32>
    %c4_311 = arith.constant 4 : index
    %c0_312 = arith.constant 0 : index
    %c0_313 = arith.constant 0 : index
    %722 = vector.load %arg4[%c4_311, %c0_312, %c0_313] : memref<6x1x32xf32, #tpu.memory_space<vmem>>, vector<1x1x32xf32>
    %723 = vector.shape_cast %722 : vector<1x1x32xf32> to vector<1x32xf32>
    %724 = vector.broadcast %723 : vector<1x32xf32> to vector<16x32xf32>
    %725 = arith.addf %721, %724 : vector<16x32xf32>
    %726 = arith.addf %725, %636 : vector<16x32xf32>
    %c4_314 = arith.constant 4 : index
    %c0_315 = arith.constant 0 : index
    %c0_316 = arith.constant 0 : index
    %727 = vector.load %arg5[%c4_314, %c0_315, %c0_316] : memref<6x1x32xf32, #tpu.memory_space<vmem>>, vector<1x1x32xf32>
    %728 = vector.shape_cast %727 : vector<1x1x32xf32> to vector<1x32xf32>
    %c4_317 = arith.constant 4 : index
    %c0_318 = arith.constant 0 : index
    %c0_319 = arith.constant 0 : index
    %729 = vector.load %arg6[%c4_317, %c0_318, %c0_319] : memref<6x1x32xf32, #tpu.memory_space<vmem>>, vector<1x1x32xf32>
    %730 = vector.shape_cast %729 : vector<1x1x32xf32> to vector<1x32xf32>
    %cst_320 = arith.constant dense<0.000000e+00> : vector<16xf32>
    %731 = vector.multi_reduction <add>, %726, %cst_320 [1] : vector<16x32xf32> to vector<16xf32>
    %732 = vector.shape_cast %731 : vector<16xf32> to vector<16x1xf32>
    %cst_321 = arith.constant 3.200000e+01 : f32
    %733 = vector.broadcast %cst_321 : f32 to vector<16x1xf32>
    %734 = arith.divf %732, %733 : vector<16x1xf32>
    %735 = vector.broadcast %734 : vector<16x1xf32> to vector<16x32xf32>
    %736 = arith.subf %726, %735 : vector<16x32xf32>
    %737 = arith.mulf %736, %736 : vector<16x32xf32>
    %cst_322 = arith.constant dense<0.000000e+00> : vector<16xf32>
    %738 = vector.multi_reduction <add>, %737, %cst_322 [1] : vector<16x32xf32> to vector<16xf32>
    %739 = vector.shape_cast %738 : vector<16xf32> to vector<16x1xf32>
    %cst_323 = arith.constant 3.200000e+01 : f32
    %740 = vector.broadcast %cst_323 : f32 to vector<16x1xf32>
    %741 = arith.divf %739, %740 : vector<16x1xf32>
    %742 = vector.broadcast %734 : vector<16x1xf32> to vector<16x32xf32>
    %743 = arith.subf %726, %742 : vector<16x32xf32>
    %cst_324 = arith.constant 9.99999974E-6 : f32
    %744 = vector.broadcast %cst_324 : f32 to vector<16x1xf32>
    %745 = arith.addf %741, %744 : vector<16x1xf32>
    %746 = math.rsqrt %745 : vector<16x1xf32>
    %747 = vector.broadcast %746 : vector<16x1xf32> to vector<16x32xf32>
    %748 = arith.mulf %743, %747 : vector<16x32xf32>
    %749 = vector.broadcast %728 : vector<1x32xf32> to vector<16x32xf32>
    %750 = arith.mulf %748, %749 : vector<16x32xf32>
    %751 = vector.broadcast %730 : vector<1x32xf32> to vector<16x32xf32>
    %752 = arith.addf %750, %751 : vector<16x32xf32>
    %c4_325 = arith.constant 4 : index
    %c0_326 = arith.constant 0 : index
    %c0_327 = arith.constant 0 : index
    %753 = vector.load %arg7[%c4_325, %c0_326, %c0_327] : memref<6x32x64xf32, #tpu.memory_space<vmem>>, vector<1x32x64xf32>
    %754 = vector.shape_cast %753 : vector<1x32x64xf32> to vector<32x64xf32>
    %cst_328 = arith.constant dense<0.000000e+00> : vector<16x64xf32>
    %755 = tpu.matmul %752, %754, %cst_328 {dimension_numbers = #tpu.dot_dimension_numbers<[1], [0], [0], [1], [0, 0, 1, 1], [], []>} : vector<16x32xf32>, vector<32x64xf32>, vector<16x64xf32> -> vector<16x64xf32>
    %c4_329 = arith.constant 4 : index
    %c0_330 = arith.constant 0 : index
    %c0_331 = arith.constant 0 : index
    %756 = vector.load %arg8[%c4_329, %c0_330, %c0_331] : memref<6x1x64xf32, #tpu.memory_space<vmem>>, vector<1x1x64xf32>
    %757 = vector.shape_cast %756 : vector<1x1x64xf32> to vector<1x64xf32>
    %758 = vector.broadcast %757 : vector<1x64xf32> to vector<16x64xf32>
    %759 = arith.addf %755, %758 : vector<16x64xf32>
    %cst_332 = arith.constant 0.000000e+00 : f32
    %760 = vector.broadcast %cst_332 : f32 to vector<16x64xf32>
    %761 = arith.maximumf %759, %760 : vector<16x64xf32>
    %c4_333 = arith.constant 4 : index
    %c0_334 = arith.constant 0 : index
    %c0_335 = arith.constant 0 : index
    %762 = vector.load %arg9[%c4_333, %c0_334, %c0_335] : memref<6x64x32xf32, #tpu.memory_space<vmem>>, vector<1x64x32xf32>
    %763 = vector.shape_cast %762 : vector<1x64x32xf32> to vector<64x32xf32>
    %cst_336 = arith.constant dense<0.000000e+00> : vector<16x32xf32>
    %764 = tpu.matmul %761, %763, %cst_336 {dimension_numbers = #tpu.dot_dimension_numbers<[1], [0], [0], [1], [0, 0, 1, 1], [], []>} : vector<16x64xf32>, vector<64x32xf32>, vector<16x32xf32> -> vector<16x32xf32>
    %c4_337 = arith.constant 4 : index
    %c0_338 = arith.constant 0 : index
    %c0_339 = arith.constant 0 : index
    %765 = vector.load %arg10[%c4_337, %c0_338, %c0_339] : memref<6x1x32xf32, #tpu.memory_space<vmem>>, vector<1x1x32xf32>
    %766 = vector.shape_cast %765 : vector<1x1x32xf32> to vector<1x32xf32>
    %767 = vector.broadcast %766 : vector<1x32xf32> to vector<16x32xf32>
    %768 = arith.addf %764, %767 : vector<16x32xf32>
    %769 = arith.addf %768, %752 : vector<16x32xf32>
    %c4_340 = arith.constant 4 : index
    %c0_341 = arith.constant 0 : index
    %c0_342 = arith.constant 0 : index
    %770 = vector.load %arg11[%c4_340, %c0_341, %c0_342] : memref<6x1x32xf32, #tpu.memory_space<vmem>>, vector<1x1x32xf32>
    %771 = vector.shape_cast %770 : vector<1x1x32xf32> to vector<1x32xf32>
    %c4_343 = arith.constant 4 : index
    %c0_344 = arith.constant 0 : index
    %c0_345 = arith.constant 0 : index
    %772 = vector.load %arg12[%c4_343, %c0_344, %c0_345] : memref<6x1x32xf32, #tpu.memory_space<vmem>>, vector<1x1x32xf32>
    %773 = vector.shape_cast %772 : vector<1x1x32xf32> to vector<1x32xf32>
    %cst_346 = arith.constant dense<0.000000e+00> : vector<16xf32>
    %774 = vector.multi_reduction <add>, %769, %cst_346 [1] : vector<16x32xf32> to vector<16xf32>
    %775 = vector.shape_cast %774 : vector<16xf32> to vector<16x1xf32>
    %cst_347 = arith.constant 3.200000e+01 : f32
    %776 = vector.broadcast %cst_347 : f32 to vector<16x1xf32>
    %777 = arith.divf %775, %776 : vector<16x1xf32>
    %778 = vector.broadcast %777 : vector<16x1xf32> to vector<16x32xf32>
    %779 = arith.subf %769, %778 : vector<16x32xf32>
    %780 = arith.mulf %779, %779 : vector<16x32xf32>
    %cst_348 = arith.constant dense<0.000000e+00> : vector<16xf32>
    %781 = vector.multi_reduction <add>, %780, %cst_348 [1] : vector<16x32xf32> to vector<16xf32>
    %782 = vector.shape_cast %781 : vector<16xf32> to vector<16x1xf32>
    %cst_349 = arith.constant 3.200000e+01 : f32
    %783 = vector.broadcast %cst_349 : f32 to vector<16x1xf32>
    %784 = arith.divf %782, %783 : vector<16x1xf32>
    %785 = vector.broadcast %777 : vector<16x1xf32> to vector<16x32xf32>
    %786 = arith.subf %769, %785 : vector<16x32xf32>
    %cst_350 = arith.constant 9.99999974E-6 : f32
    %787 = vector.broadcast %cst_350 : f32 to vector<16x1xf32>
    %788 = arith.addf %784, %787 : vector<16x1xf32>
    %789 = math.rsqrt %788 : vector<16x1xf32>
    %790 = vector.broadcast %789 : vector<16x1xf32> to vector<16x32xf32>
    %791 = arith.mulf %786, %790 : vector<16x32xf32>
    %792 = vector.broadcast %771 : vector<1x32xf32> to vector<16x32xf32>
    %793 = arith.mulf %791, %792 : vector<16x32xf32>
    %794 = vector.broadcast %773 : vector<1x32xf32> to vector<16x32xf32>
    %795 = arith.addf %793, %794 : vector<16x32xf32>
    %c5 = arith.constant 5 : index
    %c0_351 = arith.constant 0 : index
    %c0_352 = arith.constant 0 : index
    %796 = vector.load %arg1[%c5, %c0_351, %c0_352] : memref<6x32x96xf32, #tpu.memory_space<vmem>>, vector<1x32x96xf32>
    %797 = vector.shape_cast %796 : vector<1x32x96xf32> to vector<32x96xf32>
    %cst_353 = arith.constant dense<0.000000e+00> : vector<16x96xf32>
    %798 = tpu.matmul %795, %797, %cst_353 {dimension_numbers = #tpu.dot_dimension_numbers<[1], [0], [0], [1], [0, 0, 1, 1], [], []>} : vector<16x32xf32>, vector<32x96xf32>, vector<16x96xf32> -> vector<16x96xf32>
    %c5_354 = arith.constant 5 : index
    %c0_355 = arith.constant 0 : index
    %c0_356 = arith.constant 0 : index
    %799 = vector.load %arg2[%c5_354, %c0_355, %c0_356] : memref<6x1x96xf32, #tpu.memory_space<vmem>>, vector<1x1x96xf32>
    %800 = vector.shape_cast %799 : vector<1x1x96xf32> to vector<1x96xf32>
    %801 = vector.broadcast %800 : vector<1x96xf32> to vector<16x96xf32>
    %802 = arith.addf %798, %801 : vector<16x96xf32>
    %803 = vector.shape_cast %802 : vector<16x96xf32> to vector<2x8x96xf32>
    %c5_357 = arith.constant 5 : index
    %c0_358 = arith.constant 0 : index
    %c0_359 = arith.constant 0 : index
    %c0_360 = arith.constant 0 : index
    %804 = vector.load %arg3[%c5_357, %c0_358, %c0_359, %c0_360] : memref<6x4x8x32xf32, #tpu.memory_space<vmem>>, vector<1x4x8x32xf32>
    %805 = vector.shape_cast %804 : vector<1x4x8x32xf32> to vector<4x8x32xf32>
    %806 = vector.extract_strided_slice %803 {offsets = [0, 0, 0], sizes = [2, 8, 8], strides = [1, 1, 1]} : vector<2x8x96xf32> to vector<2x8x8xf32>
    %807 = vector.extract_strided_slice %803 {offsets = [0, 0, 8], sizes = [2, 8, 8], strides = [1, 1, 1]} : vector<2x8x96xf32> to vector<2x8x8xf32>
    %808 = vector.extract_strided_slice %803 {offsets = [0, 0, 16], sizes = [2, 8, 8], strides = [1, 1, 1]} : vector<2x8x96xf32> to vector<2x8x8xf32>
    "tpu.trace_start"() <{level = 10 : i32, message = "bqd,bkd->bqk"}> : () -> ()
    %cst_361 = arith.constant dense<0.000000e+00> : vector<2x8x8xf32>
    %809 = tpu.matmul %806, %807, %cst_361 {dimension_numbers = #tpu.dot_dimension_numbers<[2], [2], [1], [1], [0, 0, 0, 1, 1, 1], [0], [0]>} : vector<2x8x8xf32>, vector<2x8x8xf32>, vector<2x8x8xf32> -> vector<2x8x8xf32>
    "tpu.trace_stop"() : () -> ()
    %cst_362 = arith.constant dense<0xFF800000> : vector<2x8xf32>
    %810 = vector.multi_reduction <maximumf>, %809, %cst_362 [2] : vector<2x8x8xf32> to vector<2x8xf32>
    %811 = vector.shape_cast %810 : vector<2x8xf32> to vector<2x8x1xf32>
    %812 = vector.broadcast %811 : vector<2x8x1xf32> to vector<2x8x8xf32>
    %813 = arith.subf %809, %812 : vector<2x8x8xf32>
    %814 = math.exp %813 : vector<2x8x8xf32>
    %cst_363 = arith.constant dense<0.000000e+00> : vector<2x8xf32>
    %815 = vector.multi_reduction <add>, %814, %cst_363 [2] : vector<2x8x8xf32> to vector<2x8xf32>
    %816 = vector.shape_cast %815 : vector<2x8xf32> to vector<2x8x1xf32>
    %817 = vector.broadcast %816 : vector<2x8x1xf32> to vector<2x8x8xf32>
    %818 = arith.divf %814, %817 : vector<2x8x8xf32>
    "tpu.trace_start"() <{level = 10 : i32, message = "bqk,bkd->bqd"}> : () -> ()
    %cst_364 = arith.constant dense<0.000000e+00> : vector<2x8x8xf32>
    %819 = tpu.matmul %818, %808, %cst_364 {dimension_numbers = #tpu.dot_dimension_numbers<[2], [1], [1], [2], [0, 0, 0, 1, 1, 2], [0], [0]>} : vector<2x8x8xf32>, vector<2x8x8xf32>, vector<2x8x8xf32> -> vector<2x8x8xf32>
    "tpu.trace_stop"() : () -> ()
    %820 = vector.shape_cast %819 : vector<2x8x8xf32> to vector<16x8xf32>
    %821 = vector.extract_strided_slice %805 {offsets = [0, 0, 0], sizes = [1, 8, 32], strides = [1, 1, 1]} : vector<4x8x32xf32> to vector<1x8x32xf32>
    %822 = vector.shape_cast %821 : vector<1x8x32xf32> to vector<8x32xf32>
    %cst_365 = arith.constant dense<0.000000e+00> : vector<16x32xf32>
    %823 = tpu.matmul %820, %822, %cst_365 {dimension_numbers = #tpu.dot_dimension_numbers<[1], [0], [0], [1], [0, 0, 1, 1], [], []>} : vector<16x8xf32>, vector<8x32xf32>, vector<16x32xf32> -> vector<16x32xf32>
    %824 = vector.extract_strided_slice %803 {offsets = [0, 0, 24], sizes = [2, 8, 8], strides = [1, 1, 1]} : vector<2x8x96xf32> to vector<2x8x8xf32>
    %825 = vector.extract_strided_slice %803 {offsets = [0, 0, 32], sizes = [2, 8, 8], strides = [1, 1, 1]} : vector<2x8x96xf32> to vector<2x8x8xf32>
    %826 = vector.extract_strided_slice %803 {offsets = [0, 0, 40], sizes = [2, 8, 8], strides = [1, 1, 1]} : vector<2x8x96xf32> to vector<2x8x8xf32>
    "tpu.trace_start"() <{level = 10 : i32, message = "bqd,bkd->bqk"}> : () -> ()
    %cst_366 = arith.constant dense<0.000000e+00> : vector<2x8x8xf32>
    %827 = tpu.matmul %824, %825, %cst_366 {dimension_numbers = #tpu.dot_dimension_numbers<[2], [2], [1], [1], [0, 0, 0, 1, 1, 1], [0], [0]>} : vector<2x8x8xf32>, vector<2x8x8xf32>, vector<2x8x8xf32> -> vector<2x8x8xf32>
    "tpu.trace_stop"() : () -> ()
    %cst_367 = arith.constant dense<0xFF800000> : vector<2x8xf32>
    %828 = vector.multi_reduction <maximumf>, %827, %cst_367 [2] : vector<2x8x8xf32> to vector<2x8xf32>
    %829 = vector.shape_cast %828 : vector<2x8xf32> to vector<2x8x1xf32>
    %830 = vector.broadcast %829 : vector<2x8x1xf32> to vector<2x8x8xf32>
    %831 = arith.subf %827, %830 : vector<2x8x8xf32>
    %832 = math.exp %831 : vector<2x8x8xf32>
    %cst_368 = arith.constant dense<0.000000e+00> : vector<2x8xf32>
    %833 = vector.multi_reduction <add>, %832, %cst_368 [2] : vector<2x8x8xf32> to vector<2x8xf32>
    %834 = vector.shape_cast %833 : vector<2x8xf32> to vector<2x8x1xf32>
    %835 = vector.broadcast %834 : vector<2x8x1xf32> to vector<2x8x8xf32>
    %836 = arith.divf %832, %835 : vector<2x8x8xf32>
    "tpu.trace_start"() <{level = 10 : i32, message = "bqk,bkd->bqd"}> : () -> ()
    %cst_369 = arith.constant dense<0.000000e+00> : vector<2x8x8xf32>
    %837 = tpu.matmul %836, %826, %cst_369 {dimension_numbers = #tpu.dot_dimension_numbers<[2], [1], [1], [2], [0, 0, 0, 1, 1, 2], [0], [0]>} : vector<2x8x8xf32>, vector<2x8x8xf32>, vector<2x8x8xf32> -> vector<2x8x8xf32>
    "tpu.trace_stop"() : () -> ()
    %838 = vector.shape_cast %837 : vector<2x8x8xf32> to vector<16x8xf32>
    %839 = vector.extract_strided_slice %805 {offsets = [1, 0, 0], sizes = [1, 8, 32], strides = [1, 1, 1]} : vector<4x8x32xf32> to vector<1x8x32xf32>
    %840 = vector.shape_cast %839 : vector<1x8x32xf32> to vector<8x32xf32>
    %cst_370 = arith.constant dense<0.000000e+00> : vector<16x32xf32>
    %841 = tpu.matmul %838, %840, %cst_370 {dimension_numbers = #tpu.dot_dimension_numbers<[1], [0], [0], [1], [0, 0, 1, 1], [], []>} : vector<16x8xf32>, vector<8x32xf32>, vector<16x32xf32> -> vector<16x32xf32>
    %842 = arith.addf %823, %841 : vector<16x32xf32>
    %843 = vector.extract_strided_slice %803 {offsets = [0, 0, 48], sizes = [2, 8, 8], strides = [1, 1, 1]} : vector<2x8x96xf32> to vector<2x8x8xf32>
    %844 = vector.extract_strided_slice %803 {offsets = [0, 0, 56], sizes = [2, 8, 8], strides = [1, 1, 1]} : vector<2x8x96xf32> to vector<2x8x8xf32>
    %845 = vector.extract_strided_slice %803 {offsets = [0, 0, 64], sizes = [2, 8, 8], strides = [1, 1, 1]} : vector<2x8x96xf32> to vector<2x8x8xf32>
    "tpu.trace_start"() <{level = 10 : i32, message = "bqd,bkd->bqk"}> : () -> ()
    %cst_371 = arith.constant dense<0.000000e+00> : vector<2x8x8xf32>
    %846 = tpu.matmul %843, %844, %cst_371 {dimension_numbers = #tpu.dot_dimension_numbers<[2], [2], [1], [1], [0, 0, 0, 1, 1, 1], [0], [0]>} : vector<2x8x8xf32>, vector<2x8x8xf32>, vector<2x8x8xf32> -> vector<2x8x8xf32>
    "tpu.trace_stop"() : () -> ()
    %cst_372 = arith.constant dense<0xFF800000> : vector<2x8xf32>
    %847 = vector.multi_reduction <maximumf>, %846, %cst_372 [2] : vector<2x8x8xf32> to vector<2x8xf32>
    %848 = vector.shape_cast %847 : vector<2x8xf32> to vector<2x8x1xf32>
    %849 = vector.broadcast %848 : vector<2x8x1xf32> to vector<2x8x8xf32>
    %850 = arith.subf %846, %849 : vector<2x8x8xf32>
    %851 = math.exp %850 : vector<2x8x8xf32>
    %cst_373 = arith.constant dense<0.000000e+00> : vector<2x8xf32>
    %852 = vector.multi_reduction <add>, %851, %cst_373 [2] : vector<2x8x8xf32> to vector<2x8xf32>
    %853 = vector.shape_cast %852 : vector<2x8xf32> to vector<2x8x1xf32>
    %854 = vector.broadcast %853 : vector<2x8x1xf32> to vector<2x8x8xf32>
    %855 = arith.divf %851, %854 : vector<2x8x8xf32>
    "tpu.trace_start"() <{level = 10 : i32, message = "bqk,bkd->bqd"}> : () -> ()
    %cst_374 = arith.constant dense<0.000000e+00> : vector<2x8x8xf32>
    %856 = tpu.matmul %855, %845, %cst_374 {dimension_numbers = #tpu.dot_dimension_numbers<[2], [1], [1], [2], [0, 0, 0, 1, 1, 2], [0], [0]>} : vector<2x8x8xf32>, vector<2x8x8xf32>, vector<2x8x8xf32> -> vector<2x8x8xf32>
    "tpu.trace_stop"() : () -> ()
    %857 = vector.shape_cast %856 : vector<2x8x8xf32> to vector<16x8xf32>
    %858 = vector.extract_strided_slice %805 {offsets = [2, 0, 0], sizes = [1, 8, 32], strides = [1, 1, 1]} : vector<4x8x32xf32> to vector<1x8x32xf32>
    %859 = vector.shape_cast %858 : vector<1x8x32xf32> to vector<8x32xf32>
    %cst_375 = arith.constant dense<0.000000e+00> : vector<16x32xf32>
    %860 = tpu.matmul %857, %859, %cst_375 {dimension_numbers = #tpu.dot_dimension_numbers<[1], [0], [0], [1], [0, 0, 1, 1], [], []>} : vector<16x8xf32>, vector<8x32xf32>, vector<16x32xf32> -> vector<16x32xf32>
    %861 = arith.addf %842, %860 : vector<16x32xf32>
    %862 = vector.extract_strided_slice %803 {offsets = [0, 0, 72], sizes = [2, 8, 8], strides = [1, 1, 1]} : vector<2x8x96xf32> to vector<2x8x8xf32>
    %863 = vector.extract_strided_slice %803 {offsets = [0, 0, 80], sizes = [2, 8, 8], strides = [1, 1, 1]} : vector<2x8x96xf32> to vector<2x8x8xf32>
    %864 = vector.extract_strided_slice %803 {offsets = [0, 0, 88], sizes = [2, 8, 8], strides = [1, 1, 1]} : vector<2x8x96xf32> to vector<2x8x8xf32>
    "tpu.trace_start"() <{level = 10 : i32, message = "bqd,bkd->bqk"}> : () -> ()
    %cst_376 = arith.constant dense<0.000000e+00> : vector<2x8x8xf32>
    %865 = tpu.matmul %862, %863, %cst_376 {dimension_numbers = #tpu.dot_dimension_numbers<[2], [2], [1], [1], [0, 0, 0, 1, 1, 1], [0], [0]>} : vector<2x8x8xf32>, vector<2x8x8xf32>, vector<2x8x8xf32> -> vector<2x8x8xf32>
    "tpu.trace_stop"() : () -> ()
    %cst_377 = arith.constant dense<0xFF800000> : vector<2x8xf32>
    %866 = vector.multi_reduction <maximumf>, %865, %cst_377 [2] : vector<2x8x8xf32> to vector<2x8xf32>
    %867 = vector.shape_cast %866 : vector<2x8xf32> to vector<2x8x1xf32>
    %868 = vector.broadcast %867 : vector<2x8x1xf32> to vector<2x8x8xf32>
    %869 = arith.subf %865, %868 : vector<2x8x8xf32>
    %870 = math.exp %869 : vector<2x8x8xf32>
    %cst_378 = arith.constant dense<0.000000e+00> : vector<2x8xf32>
    %871 = vector.multi_reduction <add>, %870, %cst_378 [2] : vector<2x8x8xf32> to vector<2x8xf32>
    %872 = vector.shape_cast %871 : vector<2x8xf32> to vector<2x8x1xf32>
    %873 = vector.broadcast %872 : vector<2x8x1xf32> to vector<2x8x8xf32>
    %874 = arith.divf %870, %873 : vector<2x8x8xf32>
    "tpu.trace_start"() <{level = 10 : i32, message = "bqk,bkd->bqd"}> : () -> ()
    %cst_379 = arith.constant dense<0.000000e+00> : vector<2x8x8xf32>
    %875 = tpu.matmul %874, %864, %cst_379 {dimension_numbers = #tpu.dot_dimension_numbers<[2], [1], [1], [2], [0, 0, 0, 1, 1, 2], [0], [0]>} : vector<2x8x8xf32>, vector<2x8x8xf32>, vector<2x8x8xf32> -> vector<2x8x8xf32>
    "tpu.trace_stop"() : () -> ()
    %876 = vector.shape_cast %875 : vector<2x8x8xf32> to vector<16x8xf32>
    %877 = vector.extract_strided_slice %805 {offsets = [3, 0, 0], sizes = [1, 8, 32], strides = [1, 1, 1]} : vector<4x8x32xf32> to vector<1x8x32xf32>
    %878 = vector.shape_cast %877 : vector<1x8x32xf32> to vector<8x32xf32>
    %cst_380 = arith.constant dense<0.000000e+00> : vector<16x32xf32>
    %879 = tpu.matmul %876, %878, %cst_380 {dimension_numbers = #tpu.dot_dimension_numbers<[1], [0], [0], [1], [0, 0, 1, 1], [], []>} : vector<16x8xf32>, vector<8x32xf32>, vector<16x32xf32> -> vector<16x32xf32>
    %880 = arith.addf %861, %879 : vector<16x32xf32>
    %c5_381 = arith.constant 5 : index
    %c0_382 = arith.constant 0 : index
    %c0_383 = arith.constant 0 : index
    %881 = vector.load %arg4[%c5_381, %c0_382, %c0_383] : memref<6x1x32xf32, #tpu.memory_space<vmem>>, vector<1x1x32xf32>
    %882 = vector.shape_cast %881 : vector<1x1x32xf32> to vector<1x32xf32>
    %883 = vector.broadcast %882 : vector<1x32xf32> to vector<16x32xf32>
    %884 = arith.addf %880, %883 : vector<16x32xf32>
    %885 = arith.addf %884, %795 : vector<16x32xf32>
    %c5_384 = arith.constant 5 : index
    %c0_385 = arith.constant 0 : index
    %c0_386 = arith.constant 0 : index
    %886 = vector.load %arg5[%c5_384, %c0_385, %c0_386] : memref<6x1x32xf32, #tpu.memory_space<vmem>>, vector<1x1x32xf32>
    %887 = vector.shape_cast %886 : vector<1x1x32xf32> to vector<1x32xf32>
    %c5_387 = arith.constant 5 : index
    %c0_388 = arith.constant 0 : index
    %c0_389 = arith.constant 0 : index
    %888 = vector.load %arg6[%c5_387, %c0_388, %c0_389] : memref<6x1x32xf32, #tpu.memory_space<vmem>>, vector<1x1x32xf32>
    %889 = vector.shape_cast %888 : vector<1x1x32xf32> to vector<1x32xf32>
    %cst_390 = arith.constant dense<0.000000e+00> : vector<16xf32>
    %890 = vector.multi_reduction <add>, %885, %cst_390 [1] : vector<16x32xf32> to vector<16xf32>
    %891 = vector.shape_cast %890 : vector<16xf32> to vector<16x1xf32>
    %cst_391 = arith.constant 3.200000e+01 : f32
    %892 = vector.broadcast %cst_391 : f32 to vector<16x1xf32>
    %893 = arith.divf %891, %892 : vector<16x1xf32>
    %894 = vector.broadcast %893 : vector<16x1xf32> to vector<16x32xf32>
    %895 = arith.subf %885, %894 : vector<16x32xf32>
    %896 = arith.mulf %895, %895 : vector<16x32xf32>
    %cst_392 = arith.constant dense<0.000000e+00> : vector<16xf32>
    %897 = vector.multi_reduction <add>, %896, %cst_392 [1] : vector<16x32xf32> to vector<16xf32>
    %898 = vector.shape_cast %897 : vector<16xf32> to vector<16x1xf32>
    %cst_393 = arith.constant 3.200000e+01 : f32
    %899 = vector.broadcast %cst_393 : f32 to vector<16x1xf32>
    %900 = arith.divf %898, %899 : vector<16x1xf32>
    %901 = vector.broadcast %893 : vector<16x1xf32> to vector<16x32xf32>
    %902 = arith.subf %885, %901 : vector<16x32xf32>
    %cst_394 = arith.constant 9.99999974E-6 : f32
    %903 = vector.broadcast %cst_394 : f32 to vector<16x1xf32>
    %904 = arith.addf %900, %903 : vector<16x1xf32>
    %905 = math.rsqrt %904 : vector<16x1xf32>
    %906 = vector.broadcast %905 : vector<16x1xf32> to vector<16x32xf32>
    %907 = arith.mulf %902, %906 : vector<16x32xf32>
    %908 = vector.broadcast %887 : vector<1x32xf32> to vector<16x32xf32>
    %909 = arith.mulf %907, %908 : vector<16x32xf32>
    %910 = vector.broadcast %889 : vector<1x32xf32> to vector<16x32xf32>
    %911 = arith.addf %909, %910 : vector<16x32xf32>
    %c5_395 = arith.constant 5 : index
    %c0_396 = arith.constant 0 : index
    %c0_397 = arith.constant 0 : index
    %912 = vector.load %arg7[%c5_395, %c0_396, %c0_397] : memref<6x32x64xf32, #tpu.memory_space<vmem>>, vector<1x32x64xf32>
    %913 = vector.shape_cast %912 : vector<1x32x64xf32> to vector<32x64xf32>
    %cst_398 = arith.constant dense<0.000000e+00> : vector<16x64xf32>
    %914 = tpu.matmul %911, %913, %cst_398 {dimension_numbers = #tpu.dot_dimension_numbers<[1], [0], [0], [1], [0, 0, 1, 1], [], []>} : vector<16x32xf32>, vector<32x64xf32>, vector<16x64xf32> -> vector<16x64xf32>
    %c5_399 = arith.constant 5 : index
    %c0_400 = arith.constant 0 : index
    %c0_401 = arith.constant 0 : index
    %915 = vector.load %arg8[%c5_399, %c0_400, %c0_401] : memref<6x1x64xf32, #tpu.memory_space<vmem>>, vector<1x1x64xf32>
    %916 = vector.shape_cast %915 : vector<1x1x64xf32> to vector<1x64xf32>
    %917 = vector.broadcast %916 : vector<1x64xf32> to vector<16x64xf32>
    %918 = arith.addf %914, %917 : vector<16x64xf32>
    %cst_402 = arith.constant 0.000000e+00 : f32
    %919 = vector.broadcast %cst_402 : f32 to vector<16x64xf32>
    %920 = arith.maximumf %918, %919 : vector<16x64xf32>
    %c5_403 = arith.constant 5 : index
    %c0_404 = arith.constant 0 : index
    %c0_405 = arith.constant 0 : index
    %921 = vector.load %arg9[%c5_403, %c0_404, %c0_405] : memref<6x64x32xf32, #tpu.memory_space<vmem>>, vector<1x64x32xf32>
    %922 = vector.shape_cast %921 : vector<1x64x32xf32> to vector<64x32xf32>
    %cst_406 = arith.constant dense<0.000000e+00> : vector<16x32xf32>
    %923 = tpu.matmul %920, %922, %cst_406 {dimension_numbers = #tpu.dot_dimension_numbers<[1], [0], [0], [1], [0, 0, 1, 1], [], []>} : vector<16x64xf32>, vector<64x32xf32>, vector<16x32xf32> -> vector<16x32xf32>
    %c5_407 = arith.constant 5 : index
    %c0_408 = arith.constant 0 : index
    %c0_409 = arith.constant 0 : index
    %924 = vector.load %arg10[%c5_407, %c0_408, %c0_409] : memref<6x1x32xf32, #tpu.memory_space<vmem>>, vector<1x1x32xf32>
    %925 = vector.shape_cast %924 : vector<1x1x32xf32> to vector<1x32xf32>
    %926 = vector.broadcast %925 : vector<1x32xf32> to vector<16x32xf32>
    %927 = arith.addf %923, %926 : vector<16x32xf32>
    %928 = arith.addf %927, %911 : vector<16x32xf32>
    %c5_410 = arith.constant 5 : index
    %c0_411 = arith.constant 0 : index
    %c0_412 = arith.constant 0 : index
    %929 = vector.load %arg11[%c5_410, %c0_411, %c0_412] : memref<6x1x32xf32, #tpu.memory_space<vmem>>, vector<1x1x32xf32>
    %930 = vector.shape_cast %929 : vector<1x1x32xf32> to vector<1x32xf32>
    %c5_413 = arith.constant 5 : index
    %c0_414 = arith.constant 0 : index
    %c0_415 = arith.constant 0 : index
    %931 = vector.load %arg12[%c5_413, %c0_414, %c0_415] : memref<6x1x32xf32, #tpu.memory_space<vmem>>, vector<1x1x32xf32>
    %932 = vector.shape_cast %931 : vector<1x1x32xf32> to vector<1x32xf32>
    %cst_416 = arith.constant dense<0.000000e+00> : vector<16xf32>
    %933 = vector.multi_reduction <add>, %928, %cst_416 [1] : vector<16x32xf32> to vector<16xf32>
    %934 = vector.shape_cast %933 : vector<16xf32> to vector<16x1xf32>
    %cst_417 = arith.constant 3.200000e+01 : f32
    %935 = vector.broadcast %cst_417 : f32 to vector<16x1xf32>
    %936 = arith.divf %934, %935 : vector<16x1xf32>
    %937 = vector.broadcast %936 : vector<16x1xf32> to vector<16x32xf32>
    %938 = arith.subf %928, %937 : vector<16x32xf32>
    %939 = arith.mulf %938, %938 : vector<16x32xf32>
    %cst_418 = arith.constant dense<0.000000e+00> : vector<16xf32>
    %940 = vector.multi_reduction <add>, %939, %cst_418 [1] : vector<16x32xf32> to vector<16xf32>
    %941 = vector.shape_cast %940 : vector<16xf32> to vector<16x1xf32>
    %cst_419 = arith.constant 3.200000e+01 : f32
    %942 = vector.broadcast %cst_419 : f32 to vector<16x1xf32>
    %943 = arith.divf %941, %942 : vector<16x1xf32>
    %944 = vector.broadcast %936 : vector<16x1xf32> to vector<16x32xf32>
    %945 = arith.subf %928, %944 : vector<16x32xf32>
    %cst_420 = arith.constant 9.99999974E-6 : f32
    %946 = vector.broadcast %cst_420 : f32 to vector<16x1xf32>
    %947 = arith.addf %943, %946 : vector<16x1xf32>
    %948 = math.rsqrt %947 : vector<16x1xf32>
    %949 = vector.broadcast %948 : vector<16x1xf32> to vector<16x32xf32>
    %950 = arith.mulf %945, %949 : vector<16x32xf32>
    %951 = vector.broadcast %930 : vector<1x32xf32> to vector<16x32xf32>
    %952 = arith.mulf %950, %951 : vector<16x32xf32>
    %953 = vector.broadcast %932 : vector<1x32xf32> to vector<16x32xf32>
    %954 = arith.addf %952, %953 : vector<16x32xf32>
    %c0_421 = arith.constant 0 : index
    %c0_422 = arith.constant 0 : index
    %955 = vector.load %arg13[%c0_421, %c0_422] : memref<16x32xf32, #tpu.memory_space<vmem>>, vector<16x32xf32>
    tpu.vector_store %arg13[%c0_421, %c0_422], %954 {strides = array<i32>} : memref<16x32xf32, #tpu.memory_space<vmem>>, vector<16x32xf32>,
    return
  }
}

</mosaic_0001>

<bundles_post_ra>
// kernel: tpu_custom_call.1
= control target key start
LH: loop header
LB: loop body
LE: loop exit
PB: predicated region body
PF: predicated region fallthrough
CT: control target
= control target key end

     0   :  { %18 = vsyncpa [#allocation3], 0  ;;  %s16234_s0 = inlined_call_operand.hbm [shape: f32[16,32], index: 0, kind: input, shape index: {}]   ;;  %s16235_s1 = inlined_call_operand.vmem [shape: f32[6,32,96], index: 1, kind: input, shape index: {}]   ;;  %s16236_s2 = inlined_call_operand.vmem [shape: f32[6,1,96], index: 2, kind: input, shape index: {}]   ;;  %s16237_s3 = inlined_call_operand.vmem [shape: f32[6,4,8,32], index: 3, kind: input, shape index: {}]   ;;  %s16238_s4 = inlined_call_operand.vmem [shape: f32[6,1,32], index: 4, kind: input, shape index: {}]   ;;  %s16239_s5 = inlined_call_operand.hbm [shape: f32[6,1,32], index: 5, kind: input, shape index: {}]   ;;  %s16240_s6 = inlined_call_operand.vmem [shape: f32[6,1,32], index: 6, kind: input, shape index: {}]   ;;  %s16241_s7 = inlined_call_operand.vmem [shape: f32[6,32,64], index: 7, kind: input, shape index: {}]   ;;  %s16242_s8 = inlined_call_operand.vmem [shape: f32[6,1,64], index: 8, kind: input, shape index: {}]   ;;  %s16243_s9 = inlined_call_operand.vmem [shape: f32[6,64,32], index: 9, kind: input, shape index: {}]   ;;  %s16244_s10 = inlined_call_operand.vmem [shape: f32[6,1,32], index: 10, kind: input, shape index: {}]   ;;  %s16245_s11 = inlined_call_operand.vmem [shape: f32[6,1,32], index: 11, kind: input, shape index: {}]   ;;  %s16246_s12 = inlined_call_operand.vmem [shape: f32[6,1,32], index: 12, kind: input, shape index: {}]   ;;  %s16247_s13 = inlined_call_operand.hbm [shape: f32[16,32], index: 13, kind: output, shape index: {}]  }
   0x1   :  { %19 = vsyncpa [#allocation6], 0 }
   0x2   :  { %20 = vsyncpa [#allocation4], 0  ;;  %s14570_s25 = smov [#allocation2]   ;;  %s14498_s29 = scalar_lea.hbm %s16234_s0, 256 }
   0x3   :  { %s26_s26 = sshll.u32 %s14570_s25, 4  ;;  %p14499_p0 = scmp.ne.s32.totalorder %s16234_s0, %s14498_s29  ;;  %s27_s26 = int_to_ptr.vmem [resolvable:$true] %s26_s26 }
   0x4   :  { %p14502_p1 = scmp.lt.u32.totalorder %s14498_s29, %s16234_s0 }
   0x6   :  { %p14504_p2 = pnand %p14502_p1, %p14499_p0 }
   0x8   :  { %14507 = shalt.err (!%p14504_p2)
}
   0x9   :  { %s14508_s17 = scalar_lea.vmem %s27_s26, 256  ;;  %p14513_p4 = scmp.lt.s32.totalorder %s27_s26, %s27_s26 }
   0xa   :  { %p14509_p3 = scmp.ne.s32.totalorder %s27_s26, %s14508_s17  ;;  %p14514_p5 = scmp.lt.s32.totalorder %s14508_s17, %s14508_s17 }
   0xc   :  { %p14515_p6 = por %p14514_p5, %p14513_p4 }
   0xe   :  { %p14516_p7 = pnand %p14515_p6, %p14509_p3 }
  0x10   :  { %14519 = shalt.err (!%p14516_p7)
}
  0x11   :  { %s16248_s18 = smov 128   ;;  %s16249_s19 = smov 8  }
  0x12   :  { %32 = dma.hbm_to_vmem [thread:$0]  %s16234_s0, 256, %s27_s26, [#allocation3], %s16248_s18, %s16248_s18, %s16249_s19  }
  0x13   :  { %s14573_s22 = smov [#allocation5]   ;;  %s14520_s27 = scalar_lea.hbm %s16239_s5, 96 }
  0x14   :  { %s46_s23 = sshll.u32 %s14573_s22, 4  ;;  %p14521_p8 = scmp.ne.s32.totalorder %s16239_s5, %s14520_s27  ;;  %s47_s23 = int_to_ptr.vmem [resolvable:$true] %s46_s23 }
  0x15   :  { %p14524_p9 = scmp.lt.u32.totalorder %s14520_s27, %s16239_s5 }
  0x17   :  { %p14526_p10 = pnand %p14524_p9, %p14521_p8 }
  0x19   :  { %14529 = shalt.err (!%p14526_p10)
}
  0x1a   :  { %s14530_s15 = scalar_lea.vmem %s47_s23, 96  ;;  %p14535_p12 = scmp.lt.s32.totalorder %s47_s23, %s47_s23 }
  0x1b   :  { %p14531_p11 = scmp.ne.s32.totalorder %s47_s23, %s14530_s15  ;;  %p14536_p13 = scmp.lt.s32.totalorder %s14530_s15, %s14530_s15 }
  0x1d   :  { %p14537_p0 = por %p14536_p13, %p14535_p12 }
  0x1f   :  { %p14538_p1 = pnand %p14537_p0, %p14531_p11 }
  0x21   :  { %14541 = shalt.err (!%p14538_p1)
}
  0x22   :  { %s14574_s0 = smov 16   ;;  %s14575_s26 = smov 1  }
  0x23   :  { %52 = dma.hbm_to_vmem [thread:$0]  %s16239_s5, 96, %s47_s23, [#allocation6], %s14574_s0, %s14574_s0, %s14575_s26  }
  0x24   :  { %14564 = dma.done.wait [#allocation3], 256  }
  0x25   :  { %14565 = vsyncadd [#allocation3], 4294967040 }
  0x26   :  { %14566 = dma.done.wait [#allocation6], 96  }
  0x27   :  { %14567 = vsyncadd [#allocation6], 4294967200  ;;  %vm86_vm0 = vcmask 261120   ;;  %v75_v0 = vld [vmem:[%s16235_s1] sm:$0xff]  ;;  %v76_v1 = vld [vmem:[%s16235_s1 + $0x8] sm:$0xff]  ;;  %v14576_v8 = vmov 0.0  }
  0x28   :  { %v77_v2 = vld [vmem:[%s16235_s1 + $0x10] sm:$0xff]  ;;  %v14010_v3 = vpack.c.bf16 %v76_v1, %v75_v0  ;;  %v78_v4 = vld [vmem:[%s16235_s1 + $0x18] sm:$0xff]  ;;  %v14699_v5 = vld [vmem:[#allocation2] sm:$0xff]  ;;  %13185 = vmatprep.subr.mxu0 %v14576_v8  ;;  %vm14577_vm1 = vmmov 0   ;;  %s14578_s30 = smov 120   ;;  %s16264_s14 = smov 112  }
  0x29   :  { %v14014_v6 = vpack.c.bf16 %v78_v4, %v77_v2  ;;  %13172 = vmatprep.mubr.msk.f32.mxu1 %vm86_vm0, %v14699_v5  ;;  %v14703_v7 = vld [vmem:[#allocation2 + $0x8] sm:$0xff]  ;;  %13187 = vmatprep.mubr.msk.f32.mxu0 %vm14577_vm1, %v14576_v8  ;;  %v12357_v9 = vld [vmem:[%s16236_s2] ss:$0 sm:$0xff]  ;;  %s16266_s15 = smov 104   ;;  %vm175_vm2 = vcmask 64512   ;;  %s16268_s0 = smov 96  }
  0x2a   :  { %14011 = vmatprep.subr.bf16.mxu1 %v14010_v3  ;;  %s16262_s26 = smov 72   ;;  %s16258_s16 = smov 88   ;;  %vm1984_vm3 = vcmask 523264  }
  0x2b   :  { %14013 = vmatpush3.bf16.msra.mxu1 %v14010_v3  ;;  %s16260_s17 = smov 80   ;;  %s16256_s20 = smov 64  }
  0x2c   :  { %14015 = vmatprep.subr.bf16.mxu1 %v14014_v6  ;;  %s16254_s21 = smov 48   ;;  %s16252_s22 = smov 56  }
  0x2d   :  { %s16250_s29 = smov 40   ;;  %s16270_s27 = smov 56  }
  0x2e   :  { %s16272_s24 = smov 64   ;;  %s16273_s25 = smov 48  }
  0x2f   :  { %14017 = vmatpush3.bf16.msra.mxu1 %v14014_v6  ;;  %s16274_s23 = smov 80   ;;  %s14589_s5 = smov [#allocation7]  }
  0x30   :  { %13175 = vmatprep.subr.mxu1 %v14576_v8 }
  0x32   :  { %13173 = vmatmul.mubr.msk.f32.vlgmr.msra.gmra.mrb[0].mxu1 %vm86_vm0, %v14703_v7 }
  0x33   :  { %13177 = vmatprep.mubr.msk.f32.mxu1 %vm14577_vm1, %v14576_v8 }
 0x105   :  { %v13174_v10 = vpop.f32.mrb[0].mxu1 }
 0x106   :  { %v159_v11 = vpop.f32.mrb[1].mxu1  ;;  %v14720_v13 = vadd.f32 %v13174_v10, %v12357_v9 }
 0x107   :  { %v14716_v12 = vadd.f32 %v12357_v9, %v159_v11 }
 0x109   :  { %173 = vrot.lane.b32.xlu0 %v14716_v12, %s14578_s30 }
 0x10d   :  { %251 = vrot.lane.b32.xlu0 %v14720_v13, %s14578_s30 }
 0x111   :  { %425 = vrot.lane.b32.xlu0 %v14720_v13, %s16264_s14 }
 0x115   :  { %579 = vrot.lane.b32.xlu0 %v14720_v13, %s16266_s15 }
 0x17b   :  { %v174_v14 = vpop.permute.xlu0 %173 }
 0x17c   :  { %13176 = vmatpush3.xpose.msk.msra.mxu1 %vm175_vm2, %v174_v14 }
 0x17d   :  { %13180 = vmatprep.subr.mxu1 %v14576_v8 }
 0x17f   :  { %13178 = vmatmul.mubr.msk.f32.vlgmr.msra.gmra.mrb[2].mxu1 %vm175_vm2, %v14716_v12  ;;  %v252_v15 = vpop.permute.xlu0 %251 }
 0x180   :  { %13181 = vmatpush3.xpose.msk.msra.mxu1 %vm175_vm2, %v252_v15  ;;  %13182 = vmatprep.mubr.msk.f32.mxu1 %vm14577_vm1, %v14576_v8 }
 0x181   :  { %13190 = vmatprep.subr.mxu1 %v14576_v8 }
 0x183   :  { %13183 = vmatmul.mubr.msk.f32.vlgmr.msra.gmra.mrb[4].mxu1 %vm175_vm2, %v14720_v13  ;;  %v426_v16 = vpop.permute.xlu0 %425 }
 0x184   :  { %13191 = vmatpush3.msra.mxu1 %v426_v16  ;;  %13192 = vmatprep.mubr.msk.f32.mxu1 %vm14577_vm1, %v14576_v8 }
 0x185   :  { %13200 = vmatprep.subr.mxu1 %v14576_v8 }
 0x187   :  { %v580_v23 = vpop.permute.xlu0 %579 }
 0x252   :  { %v246_v17 = vpop.f32.mrb[2].mxu1 }
 0x253   :  { %v13179_v18 = vpop.f32.mrb[3].mxu1  ;;  %v327_v19 = vsel %vm175_vm2, %v246_v17, -inf }
 0x254   :  { %328 = vmax.xlane.f32.xlu0 %v327_v19  ;;  %v168_v18 = vld [vmem:[%s16237_s3] sm:$0xff] }
 0x256   :  { %v323_v20 = vpop.f32.mrb[4].mxu1 }
 0x257   :  { %v13184_v21 = vpop.f32.mrb[5].mxu1  ;;  %v330_v22 = vsel %vm175_vm2, %v323_v20, -inf }
 0x258   :  { %331 = vmax.xlane.f32.xlu1 %v330_v22 }
 0x26a   :  { %349 = vrot.lane.b32.xlu0 %v14716_v12, %s16264_s14 }
 0x26e   :  { %501 = vrot.lane.b32.xlu0 %v14716_v12, %s16266_s15 }
 0x2e1   :  { %v329_v24 = vpop.xlane.xlu0 %328 }
 0x2e2   :  { %v333_v31 = vsub.f32 %v246_v17, %v329_v24  ;;  %v169_v17 = vld [vmem:[%s16237_s3 + $0x8] sm:$0xff] }
 0x2e4   :  { %v335_v32 = vmul.f32 1.442695, %v333_v31 }
 0x2e5   :  { %v332_v25 = vpop.xlane.xlu1 %331  ;;  %v350_v26 = vpop.permute.xlu0 %349 }
 0x2e6   :  { %v334_v27 = vsub.f32 %v323_v20, %v332_v25  ;;  %13186 = vmatpush3.msra.mxu0 %v350_v26 }
 0x2e7   :  { %13195 = vmatprep.subr.mxu0 %v14576_v8 }
 0x2e8   :  { %v337_v28 = vmul.f32 1.442695, %v334_v27 }
 0x2e9   :  { %v502_v43 = vpop.permute.xlu0 %501 }
 0x2ea   :  { %14258 = vpow2.f32 %v337_v28 }
 0x2eb   :  { %14260 = vpow2.f32 %v335_v32 }
 0x2f4   :  { %v14259_v29 = vpop.eup %14258 }
 0x2f5   :  { %v342_v30 = vsel %vm175_vm2, %v14259_v29, 0.0  ;;  %v14261_v33 = vpop.eup %14260 }
 0x2f6   :  { %343 = vadd.xlane.f32.xlu1 %v342_v30  ;;  %v339_v34 = vsel %vm175_vm2, %v14261_v33, 0.0 }
 0x307   :  { %581 = vrot.lane.b32.xlu1 %v14720_v13, %s16268_s0 }
 0x32b   :  { %340 = vadd.xlane.f32.xlu1 %v339_v34 }
 0x33c   :  { %503 = vrot.lane.b32.xlu1 %v14716_v12, %s16268_s0 }
 0x340   :  { %995 = vrot.lane.b32.xlu1 %v14716_v12, %s16262_s26 }
 0x383   :  { %v344_v35 = vpop.xlane.xlu1 %343 }
 0x384   :  { %14262 = vrcp.f32 %v344_v35 }
 0x387   :  { %v582_v38 = vpop.permute.xlu1 %581 }
 0x38e   :  { %v14263_v36 = vpop.eup %14262 }
 0x38f   :  { %v348_v37 = vmul.f32 %v14263_v36, %v14259_v29 }
 0x391   :  { %13193 = vmatmul.mubr.msk.f32.vlgmr.msra.gmra.mrb[6].mxu1 %vm175_vm2, %v348_v37 }
 0x392   :  { %13201 = vmatpush3.xpose.msk.msra.mxu1 %vm175_vm2, %v582_v38  ;;  %13202 = vmatprep.mubr.msk.f32.mxu1 %vm14577_vm1, %v14576_v8 }
 0x393   :  { %13210 = vmatprep.subr.mxu1 %v14576_v8 }
 0x395   :  { %13203 = vmatmul.mubr.msk.f32.vlgmr.msra.gmra.mrb[8].mxu1 %vm175_vm2, %v580_v23 }
 0x396   :  { %13212 = vmatprep.mubr.msk.f32.mxu1 %vm14577_vm1, %v14576_v8 }
 0x3b8   :  { %v341_v39 = vpop.xlane.xlu1 %340 }
 0x3b9   :  { %14264 = vrcp.f32 %v341_v39 }
 0x3bc   :  { %v504_v42 = vpop.permute.xlu1 %503 }
 0x3c0   :  { %v996_v4 = vpop.permute.xlu1 %995 }
 0x3c3   :  { %v14265_v40 = vpop.eup %14264 }
 0x3c4   :  { %v346_v41 = vmul.f32 %v14265_v40, %v14261_v33  ;;  %v170_v40 = vld [vmem:[%s16237_s3 + $0x10] sm:$0xff] }
 0x3c6   :  { %13188 = vmatmul.mubr.msk.f32.vlgmr.msra.gmra.mrb[0].mxu0 %vm175_vm2, %v346_v41 }
 0x3c7   :  { %13196 = vmatpush3.xpose.msk.msra.mxu0 %vm175_vm2, %v504_v42  ;;  %13197 = vmatprep.mubr.msk.f32.mxu0 %vm14577_vm1, %v14576_v8 }
 0x3c8   :  { %13205 = vmatprep.subr.mxu0 %v14576_v8 }
 0x3ca   :  { %13198 = vmatmul.mubr.msk.f32.vlgmr.msra.gmra.mrb[2].mxu0 %vm175_vm2, %v502_v43 }
 0x3cb   :  { %13207 = vmatprep.mubr.msk.f32.mxu0 %vm14577_vm1, %v14576_v8 }
 0x464   :  { %v14772_v44 = vpop.f32.mrb[6].mxu1 }
 0x465   :  { %v13194_v45 = vpop.f32.mrb[7].mxu1 }
 0x468   :  { %v653_v46 = vpop.f32.mrb[8].mxu1 }
 0x469   :  { %v13204_v47 = vpop.f32.mrb[9].mxu1  ;;  %v660_v48 = vsel %vm175_vm2, %v653_v46, -inf }
 0x46a   :  { %661 = vmax.xlane.f32.xlu0 %v660_v48 }
 0x480   :  { %755 = vrot.lane.b32.xlu0 %v14720_v13, %s16258_s16 }
 0x484   :  { %993 = vrot.lane.b32.xlu0 %v14716_v12, %s16260_s17 }
 0x488   :  { %1073 = vrot.lane.b32.xlu0 %v14720_v13, %s16262_s26 }
 0x499   :  { %v14781_v49 = vpop.f32.mrb[0].mxu0 }
 0x49a   :  { %v13189_v50 = vpop.f32.mrb[1].mxu0 }
 0x49d   :  { %v575_v51 = vpop.f32.mrb[2].mxu0 }
 0x49e   :  { %v13199_v52 = vpop.f32.mrb[3].mxu0  ;;  %v657_v53 = vsel %vm175_vm2, %v575_v51, -inf }
 0x4a7   :  { %658 = vmax.xlane.f32.xlu0 %v657_v53 }
 0x4bd   :  { %679 = vrot.lane.b32.xlu0 %v14716_v12, %s16258_s16 }
 0x4c1   :  { %1171 = vrot.lane.b32.xlu0 %v14716_v12, %s16256_s20 }
 0x4c5   :  { %1408 = vrot.lane.b32.xlu0 %v14716_v12, %s16254_s21 }
 0x4c9   :  { %1486 = vrot.lane.b32.xlu0 %v14720_v13, %s16254_s21 }
 0x4cd   :  { %1406 = vrot.lane.b32.xlu0 %v14716_v12, %s16252_s22 }
 0x4d1   :  { %1484 = vrot.lane.b32.xlu0 %v14720_v13, %s16252_s22  ;;  %s16275_s22 = smov 88  }
 0x4f7   :  { %v662_v54 = vpop.xlane.xlu0 %661 }
 0x4f8   :  { %v664_v55 = vsub.f32 %v653_v46, %v662_v54 }
 0x4fa   :  { %v667_v56 = vmul.f32 1.442695, %v664_v55 }
 0x4fb   :  { %v756_v57 = vpop.permute.xlu0 %755 }
 0x4fc   :  { %14266 = vpow2.f32 %v667_v56  ;;  %13211 = vmatpush3.msra.mxu1 %v756_v57 }
 0x4fd   :  { %13225 = vmatprep.subr.mxu1 %v14576_v8 }
 0x4ff   :  { %v994_v60 = vpop.permute.xlu0 %993 }
 0x503   :  { %v1074_v61 = vpop.permute.xlu0 %1073 }
 0x506   :  { %v14267_v58 = vpop.eup %14266 }
 0x507   :  { %v672_v59 = vsel %vm175_vm2, %v14267_v58, 0.0 }
 0x508   :  { %673 = vadd.xlane.f32.xlu1 %v672_v59 }
 0x519   :  { %1071 = vrot.lane.b32.xlu1 %v14720_v13, %s16260_s17 }
 0x534   :  { %v659_v62 = vpop.xlane.xlu0 %658 }
 0x535   :  { %v663_v63 = vsub.f32 %v575_v51, %v659_v62 }
 0x537   :  { %v665_v0 = vmul.f32 1.442695, %v663_v63 }
 0x538   :  { %v680_v1 = vpop.permute.xlu0 %679 }
 0x539   :  { %14268 = vpow2.f32 %v665_v0  ;;  %13206 = vmatpush3.msra.mxu0 %v680_v1 }
 0x53a   :  { %13215 = vmatprep.subr.mxu0 %v169_v17 }
 0x53c   :  { %v1172_v29 = vpop.permute.xlu0 %1171 }
 0x543   :  { %v14269_v2 = vpop.eup %14268 }
 0x544   :  { %v669_v3 = vsel %vm175_vm2, %v14269_v2, 0.0 }
 0x545   :  { %670 = vadd.xlane.f32.xlu1 %v669_v3 }
 0x595   :  { %v674_v6 = vpop.xlane.xlu1 %673 }
 0x596   :  { %14270 = vrcp.f32 %v674_v6 }
 0x599   :  { %v1072_v11 = vpop.permute.xlu1 %1071 }
 0x5a0   :  { %v14271_v9 = vpop.eup %14270 }
 0x5a1   :  { %v678_v10 = vmul.f32 %v14271_v9, %v14267_v58 }
 0x5a3   :  { %13213 = vmatmul.mubr.msk.f32.vlgmr.msra.gmra.mrb[10].mxu1 %vm175_vm2, %v678_v10 }
 0x5a4   :  { %13226 = vmatpush3.xpose.msk.msra.mxu1 %vm175_vm2, %v996_v4  ;;  %13227 = vmatprep.mubr.msk.f32.mxu1 %vm14577_vm1, %v14576_v8 }
 0x5a5   :  { %13230 = vmatprep.subr.mxu1 %v14576_v8 }
 0x5a7   :  { %13228 = vmatmul.mubr.msk.f32.vlgmr.msra.gmra.mrb[12].mxu1 %vm175_vm2, %v994_v60 }
 0x5a8   :  { %13231 = vmatpush3.xpose.msk.msra.mxu1 %vm175_vm2, %v1074_v61  ;;  %13232 = vmatprep.mubr.msk.f32.mxu1 %vm14577_vm1, %v14576_v8 }
 0x5a9   :  { %13240 = vmatprep.subr.mxu1 %v14576_v8 }
 0x5ab   :  { %13233 = vmatmul.mubr.msk.f32.vlgmr.msra.gmra.mrb[14].mxu1 %vm175_vm2, %v1072_v11 }
 0x5ac   :  { %13242 = vmatprep.mubr.msk.f32.mxu1 %vm14577_vm1, %v14576_v8 }
 0x5d2   :  { %v671_v14 = vpop.xlane.xlu1 %670 }
 0x5d3   :  { %14272 = vrcp.f32 %v671_v14 }
 0x5dd   :  { %v14273_v15 = vpop.eup %14272 }
 0x5de   :  { %v676_v16 = vmul.f32 %v14273_v15, %v14269_v2 }
 0x5e0   :  { %13208 = vmatmul.mubr.msk.f32.vlgmr.msra.gmra.mrb[4].mxu0 %vm175_vm2, %v676_v16 }
 0x5e1   :  { %13216 = vmatpush3.msra.mxu0 %v169_v17  ;;  %v171_v17 = vld [vmem:[%s16237_s3 + $0x18] sm:$0xff] }
 0x5e2   :  { %13220 = vmatprep.subr.mxu0 %v168_v18 }
 0x676   :  { %v827_v19 = vpop.f32.mrb[10].mxu1 }
 0x677   :  { %v13214_v20 = vpop.f32.mrb[11].mxu1 }
 0x67a   :  { %v1067_v21 = vpop.f32.mrb[12].mxu1 }
 0x67b   :  { %v13229_v22 = vpop.f32.mrb[13].mxu1  ;;  %v1149_v23 = vsel %vm175_vm2, %v1067_v21, -inf }
 0x67c   :  { %1150 = vmax.xlane.f32.xlu1 %v1149_v23 }
 0x67e   :  { %v1145_v24 = vpop.f32.mrb[14].mxu1 }
 0x67f   :  { %v13234_v25 = vpop.f32.mrb[15].mxu1  ;;  %v1152_v26 = vsel %vm175_vm2, %v1145_v24, -inf }
 0x680   :  { %1153 = vmax.xlane.f32.xlu1 %v1152_v26 }
 0x6b3   :  { %v751_v27 = vpop.f32.mrb[4].mxu0 }
 0x6b4   :  { %v13209_v28 = vpop.f32.mrb[5].mxu0  ;;  %13217 = vmatprep.mubr.msk.f32.mxu0 %vm175_vm2, %v751_v27 }
 0x6b5   :  { %13218 = vmatmul.mubr.msk.f32.vlgmr.msra.gmra.mrb[6].mxu0 %vm175_vm2, %v827_v19 }
 0x6b6   :  { %13222 = vmatprep.mubr.msk.f32.mxu0 %vm175_vm2, %v14781_v49  ;;  %13221 = vmatpush3.msra.mxu0 %v168_v18 }
 0x6b7   :  { %13235 = vmatprep.subr.mxu0 %v14576_v8 }
 0x6bd   :  { %13223 = vmatmul.mubr.msk.f32.vlgmr.msra.gmra.mrb[6].mxu0 %vm175_vm2, %v14772_v44  ;;  %v1409_v44 = vpop.permute.xlu0 %1408 }
 0x6be   :  { %13236 = vmatpush3.msra.mxu0 %v1172_v29  ;;  %13237 = vmatprep.mubr.msk.f32.mxu0 %vm14577_vm1, %v14576_v8 }
 0x6bf   :  { %13245 = vmatprep.subr.mxu0 %v170_v40 }
 0x6c1   :  { %v1487_v48 = vpop.permute.xlu0 %1486 }
 0x6c5   :  { %v1407_v50 = vpop.permute.xlu0 %1406 }
 0x6c9   :  { %v1485_v55 = vpop.permute.xlu0 %1484 }
 0x709   :  { %v1151_v30 = vpop.xlane.xlu1 %1150 }
 0x70a   :  { %v1155_v31 = vsub.f32 %v1067_v21, %v1151_v30 }
 0x70c   :  { %v1157_v32 = vmul.f32 1.442695, %v1155_v31 }
 0x70d   :  { %v1154_v33 = vpop.xlane.xlu1 %1153 }
 0x70e   :  { %14274 = vpow2.f32 %v1157_v32  ;;  %v1156_v34 = vsub.f32 %v1145_v24, %v1154_v33  ;;  %v12392_v24 = vld [vmem:[%s16238_s4] ss:$0 sm:$0xff] }
 0x710   :  { %v1159_v35 = vmul.f32 1.442695, %v1156_v34 }
 0x712   :  { %14276 = vpow2.f32 %v1159_v35 }
 0x718   :  { %v14275_v36 = vpop.eup %14274 }
 0x719   :  { %v1161_v37 = vsel %vm175_vm2, %v14275_v36, 0.0 }
 0x71a   :  { %1162 = vadd.xlane.f32.xlu1 %v1161_v37 }
 0x71c   :  { %v14277_v38 = vpop.eup %14276 }
 0x71d   :  { %v1164_v39 = vsel %vm175_vm2, %v14277_v38, 0.0 }
 0x71e   :  { %1165 = vadd.xlane.f32.xlu1 %v1164_v39 }
 0x72f   :  { %1247 = vrot.lane.b32.xlu1 %v14720_v13, %s16256_s20 }
 0x7a7   :  { %v1163_v41 = vpop.xlane.xlu1 %1162 }
 0x7a8   :  { %14278 = vrcp.f32 %v1163_v41 }
 0x7ab   :  { %v1166_v42 = vpop.xlane.xlu1 %1165 }
 0x7ac   :  { %14280 = vrcp.f32 %v1166_v42  ;;  %v1876_v42 = vld [vmem:[%s16241_s7 + $0x8] sm:$0xff] }
 0x7af   :  { %v1248_v43 = vpop.permute.xlu1 %1247 }
 0x7b0   :  { %13241 = vmatpush3.msra.mxu1 %v1248_v43  ;;  %v1877_v43 = vld [vmem:[%s16241_s7 + $0x10] sm:$0xff] }
 0x7b1   :  { %13250 = vmatprep.subr.mxu1 %v14576_v8 }
 0x7b2   :  { %v14279_v45 = vpop.eup %14278 }
 0x7b3   :  { %v1168_v46 = vmul.f32 %v14279_v45, %v14275_v36  ;;  %v1878_v45 = vld [vmem:[%s16241_s7 + $0x18] sm:$0xff] }
 0x7b5   :  { %13238 = vmatmul.mubr.msk.f32.vlgmr.msra.gmra.mrb[8].mxu0 %vm175_vm2, %v1168_v46  ;;  %v14022_v46 = vpack.c.bf16 %v1878_v45, %v1877_v43 }
 0x7b6   :  { %v14281_v47 = vpop.eup %14280  ;;  %13246 = vmatpush3.msra.mxu0 %v170_v40 }
 0x7b7   :  { %v1170_v49 = vmul.f32 %v14281_v47, %v14277_v38  ;;  %13255 = vmatprep.subr.mxu0 %v14576_v8  ;;  %v1969_v47 = vld [vmem:[%s16243_s9] sm:$0xff] }
 0x7b9   :  { %13243 = vmatmul.mubr.msk.f32.vlgmr.msra.gmra.mrb[16].mxu1 %vm175_vm2, %v1170_v49  ;;  %v1971_v49 = vld [vmem:[%s16243_s9 + $0x10] sm:$0xff] }
 0x7ba   :  { %13251 = vmatpush3.xpose.msk.msra.mxu1 %vm175_vm2, %v1409_v44  ;;  %13252 = vmatprep.mubr.msk.f32.mxu1 %vm14577_vm1, %v14576_v8 }
 0x7bb   :  { %13260 = vmatprep.subr.mxu1 %v14576_v8 }
 0x7bd   :  { %13253 = vmatmul.mubr.msk.f32.vlgmr.msra.gmra.mrb[18].mxu1 %vm175_vm2, %v1407_v50 }
 0x7be   :  { %13262 = vmatprep.mubr.msk.f32.mxu1 %vm14577_vm1, %v14576_v8 }
 0x888   :  { %v1243_v51 = vpop.f32.mrb[8].mxu0 }
 0x889   :  { %v13239_v52 = vpop.f32.mrb[9].mxu0  ;;  %13247 = vmatprep.mubr.msk.f32.mxu0 %vm175_vm2, %v1243_v51  ;;  %v1972_v51 = vld [vmem:[%s16243_s9 + $0x18] sm:$0xff] }
 0x88a   :  { %v14030_v52 = vpack.c.bf16 %v1972_v51, %v1971_v49  ;;  %v12401_v51 = vld [vmem:[%s16245_s11] ss:$0 sm:$0xff] }
 0x88c   :  { %v1319_v53 = vpop.f32.mrb[16].mxu1 }
 0x88d   :  { %v13244_v54 = vpop.f32.mrb[17].mxu1  ;;  %13248 = vmatmul.mubr.msk.f32.vlgmr.msra.gmra.mrb[6].mxu0 %vm175_vm2, %v1319_v53  ;;  %v1973_v53 = vld [vmem:[%s16243_s9 + $0x20] sm:$0xff] }
 0x88e   :  { %13256 = vmatpush3.xpose.msk.msra.mxu0 %vm175_vm2, %v1487_v48  ;;  %13257 = vmatprep.mubr.msk.f32.mxu0 %vm14577_vm1, %v14576_v8  ;;  %v1970_v48 = vld [vmem:[%s16243_s9 + $0x8] sm:$0xff] }
 0x88f   :  { %13265 = vmatprep.subr.mxu0 %v14576_v8  ;;  %v14026_v50 = vpack.c.bf16 %v1970_v48, %v1969_v47  ;;  %v1974_v54 = vld [vmem:[%s16243_s9 + $0x28] sm:$0xff] }
 0x890   :  { %v1480_v56 = vpop.f32.mrb[18].mxu1 }
 0x891   :  { %v13254_v57 = vpop.f32.mrb[19].mxu1  ;;  %13258 = vmatmul.mubr.msk.f32.vlgmr.msra.gmra.mrb[10].mxu0 %vm175_vm2, %v1485_v55  ;;  %v1562_v58 = vsel %vm175_vm2, %v1480_v56, -inf  ;;  %v14034_v55 = vpack.c.bf16 %v1974_v54, %v1973_v53 }
 0x892   :  { %1563 = vmax.xlane.f32.xlu1 %v1562_v58  ;;  %13267 = vmatprep.mubr.msk.f32.mxu0 %vm14577_vm1, %v14576_v8 }
 0x91f   :  { %v1564_v59 = vpop.xlane.xlu1 %1563 }
 0x920   :  { %v1568_v60 = vsub.f32 %v1480_v56, %v1564_v59 }
 0x922   :  { %v1570_v61 = vmul.f32 1.442695, %v1568_v60 }
 0x924   :  { %14282 = vpow2.f32 %v1570_v61 }
 0x92e   :  { %v14283_v1 = vpop.eup %14282 }
 0x92f   :  { %v1574_v2 = vsel %vm175_vm2, %v14283_v1, 0.0 }
 0x964   :  { %v1558_v62 = vpop.f32.mrb[10].mxu0 }
 0x965   :  { %v13259_v63 = vpop.f32.mrb[11].mxu0  ;;  %v1565_v0 = vsel %vm175_vm2, %v1558_v62, -inf }
 0x966   :  { %1566 = vmax.xlane.f32.xlu0 %v1565_v0  ;;  %v12393_v63 = vld [vmem:[#allocation5] ss:$0 sm:$0xff] }
 0x96a   :  { %1575 = vadd.xlane.f32.xlu0 %v1574_v2 }
 0x980   :  { %1584 = vrot.lane.b32.xlu0 %v14716_v12, %s16250_s29 }
 0x9f3   :  { %v1567_v3 = vpop.xlane.xlu0 %1566 }
 0x9f4   :  { %v1569_v4 = vsub.f32 %v1558_v62, %v1567_v3  ;;  %v12394_v3 = vld [vmem:[%s16240_s6] ss:$0 sm:$0xff] }
 0x9f6   :  { %v1572_v6 = vmul.f32 1.442695, %v1569_v4 }
 0x9f7   :  { %v1576_v9 = vpop.xlane.xlu0 %1575 }
 0x9f8   :  { %14284 = vpow2.f32 %v1572_v6 }
 0x9f9   :  { %14286 = vrcp.f32 %v1576_v9 }
 0x9fb   :  { %v1585_v10 = vpop.permute.xlu0 %1584 }
 0x9fc   :  { %13261 = vmatpush3.msra.mxu1 %v1585_v10 }
 0xa02   :  { %v14285_v11 = vpop.eup %14284 }
 0xa03   :  { %v14287_v14 = vpop.eup %14286  ;;  %v1577_v15 = vsel %vm175_vm2, %v14285_v11, 0.0 }
 0xa04   :  { %1578 = vadd.xlane.f32.xlu1 %v1577_v15  ;;  %v1581_v16 = vmul.f32 %v14287_v14, %v14283_v1  ;;  %v1976_v14 = vld [vmem:[%s16243_s9 + $0x38] sm:$0xff] }
 0xa06   :  { %13263 = vmatmul.mubr.msk.f32.vlgmr.msra.gmra.mrb[20].mxu1 %vm175_vm2, %v1581_v16  ;;  %v12395_v16 = vld [vmem:[%s16242_s8] ss:$0 sm:$0xff] }
 0xa15   :  { %1660 = vrot.lane.b32.xlu1 %v14720_v13, %s16250_s29  ;;  %s16271_s29 = smov 40  }
 0xa91   :  { %v1579_v12 = vpop.xlane.xlu1 %1578 }
 0xa92   :  { %14288 = vrcp.f32 %v1579_v12 }
 0xa95   :  { %v1661_v18 = vpop.permute.xlu1 %1660 }
 0xa96   :  { %13266 = vmatpush3.msra.mxu0 %v1661_v18 }
 0xa97   :  { %13270 = vmatprep.subr.mxu0 %v171_v17 }
 0xa9c   :  { %v14289_v19 = vpop.eup %14288 }
 0xa9d   :  { %v1583_v20 = vmul.f32 %v14289_v19, %v14285_v11  ;;  %v1975_v11 = vld [vmem:[%s16243_s9 + $0x30] sm:$0xff] }
 0xa9e   :  { %v14038_v15 = vpack.c.bf16 %v1976_v14, %v1975_v11 }
 0xa9f   :  { %13268 = vmatmul.mubr.msk.f32.vlgmr.msra.gmra.mrb[12].mxu0 %vm175_vm2, %v1583_v20 }
 0xaa0   :  { %13271 = vmatpush3.msra.mxu0 %v171_v17 }
 0xaa1   :  { %14027 = vmatprep.subr.bf16.mxu0 %v14026_v50 }
 0xad9   :  { %v1656_v21 = vpop.f32.mrb[20].mxu1 }
 0xada   :  { %v13264_v22 = vpop.f32.mrb[21].mxu1  ;;  %13272 = vmatprep.mubr.msk.f32.mxu0 %vm175_vm2, %v1656_v21 }
 0xadb   :  { %v12398_v22 = vld [vmem:[%s16244_s10] ss:$0 sm:$0xff] }
 0xb72   :  { %v1732_v23 = vpop.f32.mrb[12].mxu0 }
 0xb73   :  { %v13269_v13 = vpop.f32.mrb[13].mxu0  ;;  %13273 = vmatmul.mubr.msk.f32.vlgmr.msra.gmra.mrb[6].mxu0 %vm175_vm2, %v1732_v23 }
 0xb74   :  { %14029 = vmatpush3.bf16.msra.mxu0 %v14026_v50 }
 0xb75   :  { %14031 = vmatprep.subr.bf16.mxu0 %v14030_v52 }
 0xb78   :  { %14033 = vmatpush3.bf16.msra.mxu0 %v14030_v52 }
 0xb79   :  { %14035 = vmatprep.subr.bf16.mxu0 %v14034_v55 }
 0xb7c   :  { %14037 = vmatpush3.bf16.msra.mxu0 %v14034_v55  ;;  %v12402_v55 = vld [vmem:[%s16246_s12] ss:$0 sm:$0xff] }
 0xb7d   :  { %14039 = vmatprep.subr.bf16.mxu0 %v14038_v15 }
 0xb80   :  { %14041 = vmatpush3.bf16.msra.mxu0 %v14038_v15 }
 0xb81   :  { %13326 = vmatprep.subr.mxu0 %v14576_v8 }
 0xc46   :  { %v13274_v25 = vpop.f32.mrb[6].mxu0 }
 0xc47   :  { %v1827_v26 = vadd.f32 %v13274_v25, %v12392_v24  ;;  %v1808_v27 = vpop.f32.mrb[7].mxu0 }
 0xc48   :  { %v1826_v28 = vadd.f32 %v12392_v24, %v1808_v27 }
 0xc49   :  { %v1829_v29 = vadd.f32 %v1827_v26, %v14703_v7 }
 0xc4a   :  { %v1828_v30 = vadd.f32 %v1826_v28, %v14699_v5  ;;  %v1875_v5 = vld [vmem:[%s16241_s7] sm:$0xff] }
 0xc4b   :  { %v1835_v31 = vsel %vm86_vm0, %v1829_v29, 0.0  ;;  %v14018_v44 = vpack.c.bf16 %v1876_v42, %v1875_v5  ;;  %v12406_v42 = vld [vmem:[%s16235_s1 + $0x38] sm:$0xff] }
 0xc4c   :  { %1836 = vadd.xlane.f32.xlu0 %v1835_v31  ;;  %v1832_v32 = vsel %vm86_vm0, %v1828_v30, 0.0 }
 0xc4d   :  { %1833 = vadd.xlane.f32.xlu1 %v1832_v32  ;;  %14019 = vmatprep.subr.bf16.mxu1 %v14018_v44 }
 0xc4e   :  { %14021 = vmatpush3.bf16.msra.mxu1 %v14018_v44 }
 0xc4f   :  { %14023 = vmatprep.subr.bf16.mxu1 %v14022_v46 }
 0xc52   :  { %14025 = vmatpush3.bf16.msra.mxu1 %v14022_v46 }
 0xcd9   :  { %v1837_v33 = vpop.xlane.xlu0 %1836 }
 0xcda   :  { %v1840_v34 = vmul.f32 0.03125, %v1837_v33  ;;  %v1834_v35 = vpop.xlane.xlu1 %1833 }
 0xcdb   :  { %v1839_v36 = vmul.f32 0.03125, %v1834_v35 }
 0xcdc   :  { %v1842_v37 = vsub.f32 %v1829_v29, %v1840_v34 }
 0xcdd   :  { %v1841_v38 = vsub.f32 %v1828_v30, %v1839_v36 }
 0xcde   :  { %v1844_v39 = vmul.f32 %v1842_v37, %v1842_v37 }
 0xcdf   :  { %v1843_v40 = vmul.f32 %v1841_v38, %v1841_v38 }
 0xce0   :  { %v1848_v41 = vsel %vm86_vm0, %v1844_v39, 0.0 }
 0xce1   :  { %1849 = vadd.xlane.f32.xlu1 %v1848_v41  ;;  %v1845_v7 = vsel %vm86_vm0, %v1843_v40, 0.0  ;;  %v12403_v40 = vld [vmem:[%s16235_s1 + $0x20] sm:$0xff]  ;;  %v12404_v41 = vld [vmem:[%s16235_s1 + $0x28] sm:$0xff] }
 0xce2   :  { %1846 = vadd.xlane.f32.xlu0 %v1845_v7  ;;  %v12405_v7 = vld [vmem:[%s16235_s1 + $0x30] sm:$0xff]  ;;  %v14042_v5 = vpack.c.bf16 %v12404_v41, %v12403_v40 }
 0xce3   :  { %v14046_v43 = vpack.c.bf16 %v12406_v42, %v12405_v7 }
 0xce4   :  { %14043 = vmatprep.subr.bf16.mxu1 %v14042_v5 }
 0xd6e   :  { %v1850_v56 = vpop.xlane.xlu1 %1849 }
 0xd6f   :  { %v1852_v57 = vmul.f32 0.03125, %v1850_v56  ;;  %v1847_v58 = vpop.xlane.xlu0 %1846 }
 0xd70   :  { %v1851_v59 = vmul.f32 0.03125, %v1847_v58 }
 0xd71   :  { %v1854_v60 = vadd.f32 1e-05, %v1852_v57 }
 0xd72   :  { %v1853_v61 = vadd.f32 1e-05, %v1851_v59 }
 0xd73   :  { %14290 = vrsqrt.f32 %v1854_v60  ;;  %v12408_v60 = vld [vmem:[%s16236_s2 + $0x1] ss:$0 sm:$0xff] }
 0xd74   :  { %14292 = vrsqrt.f32 %v1853_v61 }
 0xd7d   :  { %v14291_v62 = vpop.eup %14290 }
 0xd7e   :  { %v14293_v0 = vpop.eup %14292  ;;  %v1858_v1 = vmul.f32 %v14291_v62, %v1842_v37 }
 0xd7f   :  { %v1857_v2 = vmul.f32 %v14293_v0, %v1841_v38 }
 0xd80   :  { %v1866_v4 = vmul.f32 %v12393_v63, %v1858_v1 }
 0xd81   :  { %v1865_v6 = vmul.f32 %v12393_v63, %v1857_v2 }
 0xd82   :  { %v1874_v10 = vadd.f32 %v12394_v3, %v1866_v4 }
 0xd83   :  { %v1873_v9 = vadd.f32 %v12394_v3, %v1865_v6 }
 0xd85   :  { %13283 = vmatprep.mubr.msk.f32.mxu1 %vm86_vm0, %v1873_v9 }
 0xd86   :  { %13284 = vmatmul.mubr.msk.f32.vlgmr.msra.gmra.mrb[22].mxu1 %vm86_vm0, %v1874_v10 }
 0xd87   :  { %14045 = vmatpush3.bf16.msra.mxu1 %v14042_v5 }
 0xd88   :  { %14047 = vmatprep.subr.bf16.mxu1 %v14046_v43 }
 0xd8b   :  { %14049 = vmatpush3.bf16.msra.mxu1 %v14046_v43 }
 0xd8c   :  { %13316 = vmatprep.subr.mxu1 %v14576_v8 }
 0xe59   :  { %v13285_v12 = vpop.f32.mrb[22].mxu1 }
 0xe5a   :  { %v1964_v17 = vadd.f32 %v13285_v12, %v12395_v16  ;;  %v1958_v18 = vpop.f32.mrb[23].mxu1 }
 0xe5b   :  { %v1959_v19 = vadd.f32 %v12395_v16, %v1958_v18 }
 0xe5c   :  { %v1968_v21 = vmax.f32 %v1964_v17, 0.0 }
 0xe5d   :  { %v1967_v20 = vmax.f32 %v1959_v19, 0.0 }
 0xe5f   :  { %13302 = vmatprep.mubr.msk.f32.mxu0 %vm1984_vm3, %v1967_v20 }
 0xe60   :  { %13303 = vmatmul.mubr.msk.f32.vlgmr.msra.gmra.mrb[14].mxu0 %vm1984_vm3, %v1968_v21 }
 0xe61   :  { %13328 = vmatprep.mubr.msk.f32.mxu0 %vm14577_vm1, %v14576_v8 }
 0xf33   :  { %v13304_v23 = vpop.f32.mrb[14].mxu0 }
 0xf34   :  { %v2063_v13 = vadd.f32 %v13304_v23, %v12398_v22  ;;  %v2057_v24 = vpop.f32.mrb[15].mxu0 }
 0xf35   :  { %v2058_v25 = vadd.f32 %v12398_v22, %v2057_v24 }
 0xf36   :  { %v2067_v26 = vadd.f32 %v2063_v13, %v1874_v10 }
 0xf37   :  { %v2066_v27 = vadd.f32 %v2058_v25, %v1873_v9 }
 0xf38   :  { %v2073_v28 = vsel %vm86_vm0, %v2067_v26, 0.0 }
 0xf39   :  { %2074 = vadd.xlane.f32.xlu1 %v2073_v28  ;;  %v2070_v29 = vsel %vm86_vm0, %v2066_v27, 0.0 }
 0xf3a   :  { %2071 = vadd.xlane.f32.xlu0 %v2070_v29 }
 0xfc6   :  { %v2075_v30 = vpop.xlane.xlu1 %2074 }
 0xfc7   :  { %v2077_v31 = vmul.f32 0.03125, %v2075_v30  ;;  %v2072_v32 = vpop.xlane.xlu0 %2071 }
 0xfc8   :  { %v2076_v33 = vmul.f32 0.03125, %v2072_v32 }
 0xfc9   :  { %v2079_v34 = vsub.f32 %v2067_v26, %v2077_v31 }
 0xfca   :  { %v2078_v35 = vsub.f32 %v2066_v27, %v2076_v33 }
 0xfcb   :  { %v2081_v36 = vmul.f32 %v2079_v34, %v2079_v34 }
 0xfcc   :  { %v2080_v37 = vmul.f32 %v2078_v35, %v2078_v35 }
 0xfcd   :  { %v2085_v38 = vsel %vm86_vm0, %v2081_v36, 0.0 }
 0xfce   :  { %2086 = vadd.xlane.f32.xlu1 %v2085_v38  ;;  %v2082_v39 = vsel %vm86_vm0, %v2080_v37, 0.0 }
 0xfcf   :  { %2083 = vadd.xlane.f32.xlu0 %v2082_v39 }
0x105b   :  { %v2087_v44 = vpop.xlane.xlu1 %2086 }
0x105c   :  { %v2089_v45 = vmul.f32 0.03125, %v2087_v44  ;;  %v2084_v46 = vpop.xlane.xlu0 %2083 }
0x105d   :  { %v2088_v47 = vmul.f32 0.03125, %v2084_v46 }
0x105e   :  { %v2091_v48 = vadd.f32 1e-05, %v2089_v45 }
0x105f   :  { %v2090_v49 = vadd.f32 1e-05, %v2088_v47 }
0x1060   :  { %14294 = vrsqrt.f32 %v2091_v48 }
0x1061   :  { %14296 = vrsqrt.f32 %v2090_v49 }
0x106a   :  { %v14295_v50 = vpop.eup %14294 }
0x106b   :  { %v14297_v52 = vpop.eup %14296  ;;  %v2095_v53 = vmul.f32 %v14295_v50, %v2079_v34 }
0x106c   :  { %v2094_v54 = vmul.f32 %v14297_v52, %v2078_v35 }
0x106d   :  { %v2103_v56 = vmul.f32 %v12401_v51, %v2095_v53 }
0x106e   :  { %v2102_v57 = vmul.f32 %v12401_v51, %v2094_v54 }
0x106f   :  { %v14960_v59 = vadd.f32 %v12402_v55, %v2103_v56 }
0x1070   :  { %v14958_v58 = vadd.f32 %v12402_v55, %v2102_v57 }
0x1072   :  { %13313 = vmatprep.mubr.msk.f32.mxu1 %vm86_vm0, %v14958_v58 }
0x1073   :  { %13314 = vmatmul.mubr.msk.f32.vlgmr.msra.gmra.mrb[24].mxu1 %vm86_vm0, %v14960_v59 }
0x1074   :  { %13318 = vmatprep.mubr.msk.f32.mxu1 %vm14577_vm1, %v14576_v8 }
0x1146   :  { %v13315_v61 = vpop.f32.mrb[24].mxu1 }
0x1147   :  { %v14971_v62 = vadd.f32 %v13315_v61, %v12408_v60  ;;  %v2197_v63 = vpop.f32.mrb[25].mxu1 }
0x1148   :  { %v14973_v0 = vadd.f32 %v12408_v60, %v2197_v63 }
0x1149   :  { %2289 = vrot.lane.b32.xlu1 %v14971_v62, %s14578_s30 }
0x114a   :  { %2212 = vrot.lane.b32.xlu0 %v14973_v0, %s14578_s30 }
0x11bb   :  { %v2290_v2 = vpop.permute.xlu1 %2289 }
0x11bc   :  { %v2213_v1 = vpop.permute.xlu0 %2212 }
0x11bd   :  { %13317 = vmatpush3.xpose.msk.msra.mxu1 %vm175_vm2, %v2213_v1 }
0x11be   :  { %13321 = vmatprep.subr.mxu1 %v14576_v8 }
0x11c0   :  { %13319 = vmatmul.mubr.msk.f32.vlgmr.msra.gmra.mrb[26].mxu1 %vm175_vm2, %v14973_v0 }
0x11c1   :  { %13322 = vmatpush3.xpose.msk.msra.mxu1 %vm175_vm2, %v2290_v2  ;;  %13323 = vmatprep.mubr.msk.f32.mxu1 %vm14577_vm1, %v14576_v8 }
0x11c2   :  { %13331 = vmatprep.subr.mxu1 %v14576_v8 }
0x11c4   :  { %13324 = vmatmul.mubr.msk.f32.vlgmr.msra.gmra.mrb[28].mxu1 %vm175_vm2, %v14971_v62 }
0x11c5   :  { %13333 = vmatprep.mubr.msk.f32.mxu1 %vm14577_vm1, %v14576_v8 }
0x1293   :  { %v2284_v3 = vpop.f32.mrb[26].mxu1 }
0x1294   :  { %v13320_v4 = vpop.f32.mrb[27].mxu1  ;;  %v2365_v17 = vsel %vm175_vm2, %v2284_v3, -inf }
0x1297   :  { %v2361_v6 = vpop.f32.mrb[28].mxu1 }
0x1298   :  { %v13325_v9 = vpop.f32.mrb[29].mxu1  ;;  %v2368_v10 = vsel %vm175_vm2, %v2361_v6, -inf }
0x1299   :  { %2369 = vmax.xlane.f32.xlu1 %v2368_v10 }
0x12aa   :  { %2619 = vrot.lane.b32.xlu1 %v14971_v62, %s16268_s0 }
0x12ae   :  { %2617 = vrot.lane.b32.xlu1 %v14971_v62, %s16266_s15 }
0x1326   :  { %v2370_v11 = vpop.xlane.xlu1 %2369 }
0x1327   :  { %v2372_v14 = vsub.f32 %v2361_v6, %v2370_v11 }
0x1329   :  { %v2375_v15 = vmul.f32 1.442695, %v2372_v14 }
0x132a   :  { %v2620_v21 = vpop.permute.xlu1 %2619 }
0x132b   :  { %14298 = vpow2.f32 %v2375_v15 }
0x132e   :  { %v2618_v23 = vpop.permute.xlu1 %2617 }
0x1335   :  { %v14299_v16 = vpop.eup %14298 }
0x1336   :  { %v2380_v12 = vsel %vm175_vm2, %v14299_v16, 0.0 }
0x1337   :  { %2381 = vadd.xlane.f32.xlu0 %v2380_v12  ;;  %v12412_v12 = vld [vmem:[%s16237_s3 + $0x28] sm:$0xff] }
0x134d   :  { %2463 = vrot.lane.b32.xlu0 %v14971_v62, %s16264_s14 }
0x136c   :  { %2366 = vmax.xlane.f32.xlu0 %v2365_v17  ;;  %v12411_v17 = vld [vmem:[%s16237_s3 + $0x20] sm:$0xff] }
0x1382   :  { %2387 = vrot.lane.b32.xlu0 %v14973_v0, %s16264_s14 }
0x1386   :  { %2539 = vrot.lane.b32.xlu0 %v14973_v0, %s16266_s15 }
0x13c4   :  { %v2382_v18 = vpop.xlane.xlu0 %2381 }
0x13c5   :  { %14300 = vrcp.f32 %v2382_v18 }
0x13c8   :  { %v2464_v19 = vpop.permute.xlu0 %2463 }
0x13c9   :  { %13332 = vmatpush3.msra.mxu1 %v2464_v19 }
0x13ca   :  { %13341 = vmatprep.subr.mxu1 %v14576_v8 }
0x13cf   :  { %v14301_v20 = vpop.eup %14300 }
0x13d0   :  { %v2386_v22 = vmul.f32 %v14301_v20, %v14299_v16 }
0x13d2   :  { %13334 = vmatmul.mubr.msk.f32.vlgmr.msra.gmra.mrb[30].mxu1 %vm175_vm2, %v2386_v22 }
0x13d3   :  { %13342 = vmatpush3.xpose.msk.msra.mxu1 %vm175_vm2, %v2620_v21  ;;  %13343 = vmatprep.mubr.msk.f32.mxu1 %vm14577_vm1, %v14576_v8 }
0x13d4   :  { %13351 = vmatprep.subr.mxu1 %v14576_v8 }
0x13d6   :  { %13344 = vmatmul.mubr.msk.f32.vlgmr.msra.gmra.mrb[32].mxu1 %vm175_vm2, %v2618_v23 }
0x13d7   :  { %13353 = vmatprep.mubr.msk.f32.mxu1 %vm14577_vm1, %v14576_v8 }
0x13f9   :  { %v2367_v13 = vpop.xlane.xlu0 %2366 }
0x13fa   :  { %v2371_v24 = vsub.f32 %v2284_v3, %v2367_v13 }
0x13fc   :  { %v2373_v25 = vmul.f32 1.442695, %v2371_v24 }
0x13fd   :  { %v2388_v26 = vpop.permute.xlu0 %2387 }
0x13fe   :  { %14302 = vpow2.f32 %v2373_v25  ;;  %13327 = vmatpush3.msra.mxu0 %v2388_v26 }
0x13ff   :  { %13336 = vmatprep.subr.mxu0 %v14576_v8 }
0x1401   :  { %v2540_v35 = vpop.permute.xlu0 %2539 }
0x1408   :  { %v14303_v27 = vpop.eup %14302 }
0x1409   :  { %v2377_v28 = vsel %vm175_vm2, %v14303_v27, 0.0 }
0x140a   :  { %2378 = vadd.xlane.f32.xlu1 %v2377_v28 }
0x141b   :  { %2541 = vrot.lane.b32.xlu1 %v14973_v0, %s16268_s0 }
0x1497   :  { %v2379_v29 = vpop.xlane.xlu1 %2378 }
0x1498   :  { %14304 = vrcp.f32 %v2379_v29  ;;  %v12413_v29 = vld [vmem:[%s16237_s3 + $0x30] sm:$0xff] }
0x149b   :  { %v2542_v32 = vpop.permute.xlu1 %2541 }
0x14a2   :  { %v14305_v30 = vpop.eup %14304 }
0x14a3   :  { %v2384_v31 = vmul.f32 %v14305_v30, %v14303_v27 }
0x14a5   :  { %13329 = vmatmul.mubr.msk.f32.vlgmr.msra.gmra.mrb[16].mxu0 %vm175_vm2, %v2384_v31  ;;  %v15018_v33 = vpop.f32.mrb[30].mxu1 }
0x14a6   :  { %13337 = vmatpush3.xpose.msk.msra.mxu0 %vm175_vm2, %v2542_v32  ;;  %v13335_v34 = vpop.f32.mrb[31].mxu1  ;;  %13338 = vmatprep.mubr.msk.f32.mxu0 %vm14577_vm1, %v14576_v8 }
0x14a7   :  { %13346 = vmatprep.subr.mxu0 %v14576_v8 }
0x14a9   :  { %13339 = vmatmul.mubr.msk.f32.vlgmr.msra.gmra.mrb[18].mxu0 %vm175_vm2, %v2540_v35  ;;  %v2691_v36 = vpop.f32.mrb[32].mxu1 }
0x14aa   :  { %v13345_v37 = vpop.f32.mrb[33].mxu1  ;;  %v2698_v38 = vsel %vm175_vm2, %v2691_v36, -inf  ;;  %13348 = vmatprep.mubr.msk.f32.mxu0 %vm14577_vm1, %v14576_v8 }
0x14ab   :  { %2699 = vmax.xlane.f32.xlu1 %v2698_v38 }
0x14bc   :  { %3033 = vrot.lane.b32.xlu1 %v14973_v0, %s16262_s26 }
0x14c0   :  { %3031 = vrot.lane.b32.xlu1 %v14973_v0, %s16260_s17 }
0x14c4   :  { %3109 = vrot.lane.b32.xlu1 %v14971_v62, %s16260_s17 }
0x1538   :  { %v2700_v39 = vpop.xlane.xlu1 %2699 }
0x1539   :  { %v2702_v40 = vsub.f32 %v2691_v36, %v2700_v39 }
0x153b   :  { %v2705_v41 = vmul.f32 1.442695, %v2702_v40 }
0x153c   :  { %v3034_v49 = vpop.permute.xlu1 %3033 }
0x153d   :  { %14306 = vpow2.f32 %v2705_v41 }
0x1540   :  { %v3032_v52 = vpop.permute.xlu1 %3031 }
0x1544   :  { %v3110_v54 = vpop.permute.xlu1 %3109 }
0x1547   :  { %v14307_v7 = vpop.eup %14306 }
0x1548   :  { %v2710_v5 = vsel %vm175_vm2, %v14307_v7, 0.0 }
0x1549   :  { %2711 = vadd.xlane.f32.xlu0 %v2710_v5 }
0x155f   :  { %2793 = vrot.lane.b32.xlu0 %v14971_v62, %s16258_s16 }
0x1563   :  { %3111 = vrot.lane.b32.xlu0 %v14971_v62, %s16262_s26 }
0x1578   :  { %v15039_v42 = vpop.f32.mrb[16].mxu0 }
0x1579   :  { %v13330_v43 = vpop.f32.mrb[17].mxu0 }
0x157c   :  { %v2613_v44 = vpop.f32.mrb[18].mxu0 }
0x157d   :  { %v13340_v45 = vpop.f32.mrb[19].mxu0  ;;  %v2695_v46 = vsel %vm175_vm2, %v2613_v44, -inf }
0x1582   :  { %2696 = vmax.xlane.f32.xlu0 %v2695_v46 }
0x1598   :  { %2717 = vrot.lane.b32.xlu0 %v14973_v0, %s16258_s16 }
0x159c   :  { %3209 = vrot.lane.b32.xlu0 %v14973_v0, %s16256_s20 }
0x15a0   :  { %3446 = vrot.lane.b32.xlu0 %v14973_v0, %s16254_s21 }
0x15a4   :  { %3524 = vrot.lane.b32.xlu0 %v14971_v62, %s16254_s21  ;;  %s16277_s21 = smov 72  }
0x15a8   :  { %3444 = vrot.lane.b32.xlu0 %v14973_v0, %s16270_s27 }
0x15ac   :  { %3522 = vrot.lane.b32.xlu0 %v14971_v62, %s16270_s27 }
0x15d6   :  { %v2712_v47 = vpop.xlane.xlu0 %2711 }
0x15d7   :  { %14308 = vrcp.f32 %v2712_v47 }
0x15da   :  { %v2794_v48 = vpop.permute.xlu0 %2793 }
0x15db   :  { %13352 = vmatpush3.msra.mxu1 %v2794_v48 }
0x15dc   :  { %13366 = vmatprep.subr.mxu1 %v14576_v8 }
0x15de   :  { %v3112_v53 = vpop.permute.xlu0 %3111 }
0x15e1   :  { %v14309_v50 = vpop.eup %14308 }
0x15e2   :  { %v2716_v51 = vmul.f32 %v14309_v50, %v14307_v7 }
0x15e4   :  { %13354 = vmatmul.mubr.msk.f32.vlgmr.msra.gmra.mrb[34].mxu1 %vm175_vm2, %v2716_v51 }
0x15e5   :  { %13367 = vmatpush3.xpose.msk.msra.mxu1 %vm175_vm2, %v3034_v49  ;;  %13368 = vmatprep.mubr.msk.f32.mxu1 %vm14577_vm1, %v14576_v8 }
0x15e6   :  { %13371 = vmatprep.subr.mxu1 %v14576_v8 }
0x15e8   :  { %13369 = vmatmul.mubr.msk.f32.vlgmr.msra.gmra.mrb[36].mxu1 %vm175_vm2, %v3032_v52 }
0x15e9   :  { %13372 = vmatpush3.xpose.msk.msra.mxu1 %vm175_vm2, %v3112_v53  ;;  %13373 = vmatprep.mubr.msk.f32.mxu1 %vm14577_vm1, %v14576_v8 }
0x15ea   :  { %13381 = vmatprep.subr.mxu1 %v14576_v8 }
0x15ec   :  { %13374 = vmatmul.mubr.msk.f32.vlgmr.msra.gmra.mrb[38].mxu1 %vm175_vm2, %v3110_v54 }
0x15ed   :  { %13383 = vmatprep.mubr.msk.f32.mxu1 %vm14577_vm1, %v14576_v8 }
0x160f   :  { %v2697_v55 = vpop.xlane.xlu0 %2696 }
0x1610   :  { %v2701_v56 = vsub.f32 %v2613_v44, %v2697_v55 }
0x1612   :  { %v2703_v57 = vmul.f32 1.442695, %v2701_v56 }
0x1613   :  { %v2718_v60 = vpop.permute.xlu0 %2717 }
0x1614   :  { %14310 = vpow2.f32 %v2703_v57  ;;  %13347 = vmatpush3.msra.mxu0 %v2718_v60 }
0x1615   :  { %13356 = vmatprep.subr.mxu0 %v12412_v12 }
0x1617   :  { %v3210_v30 = vpop.permute.xlu0 %3209 }
0x161b   :  { %v3447_v35 = vpop.permute.xlu0 %3446 }
0x161e   :  { %v14311_v61 = vpop.eup %14310 }
0x161f   :  { %v2707_v63 = vsel %vm175_vm2, %v14311_v61, 0.0 }
0x1620   :  { %2708 = vadd.xlane.f32.xlu1 %v2707_v63 }
0x16ad   :  { %v2709_v1 = vpop.xlane.xlu1 %2708 }
0x16ae   :  { %14312 = vrcp.f32 %v2709_v1 }
0x16b7   :  { %v2865_v2 = vpop.f32.mrb[34].mxu1 }
0x16b8   :  { %v14313_v3 = vpop.eup %14312  ;;  %v13355_v4 = vpop.f32.mrb[35].mxu1 }
0x16b9   :  { %v2714_v6 = vmul.f32 %v14313_v3, %v14311_v61  ;;  %v12414_v4 = vld [vmem:[%s16237_s3 + $0x38] sm:$0xff] }
0x16bb   :  { %13349 = vmatmul.mubr.msk.f32.vlgmr.msra.gmra.mrb[20].mxu0 %vm175_vm2, %v2714_v6  ;;  %v3105_v9 = vpop.f32.mrb[36].mxu1 }
0x16bc   :  { %v13370_v10 = vpop.f32.mrb[37].mxu1  ;;  %v3187_v11 = vsel %vm175_vm2, %v3105_v9, -inf  ;;  %13357 = vmatpush3.msra.mxu0 %v12412_v12 }
0x16bd   :  { %3188 = vmax.xlane.f32.xlu1 %v3187_v11  ;;  %13361 = vmatprep.subr.mxu0 %v12411_v17 }
0x16bf   :  { %v3183_v14 = vpop.f32.mrb[38].mxu1 }
0x16c0   :  { %v13375_v15 = vpop.f32.mrb[39].mxu1  ;;  %v3190_v16 = vsel %vm175_vm2, %v3183_v14, -inf }
0x16c1   :  { %3191 = vmax.xlane.f32.xlu1 %v3190_v16  ;;  %v12448_v16 = vld [vmem:[%s16238_s4 + $0x1] ss:$0 sm:$0xff] }
0x174a   :  { %v3189_v18 = vpop.xlane.xlu1 %3188 }
0x174b   :  { %v3193_v19 = vsub.f32 %v3105_v9, %v3189_v18 }
0x174d   :  { %v3195_v20 = vmul.f32 1.442695, %v3193_v19 }
0x174e   :  { %v3192_v21 = vpop.xlane.xlu1 %3191 }
0x174f   :  { %14314 = vpow2.f32 %v3195_v20  ;;  %v3194_v22 = vsub.f32 %v3183_v14, %v3192_v21 }
0x1751   :  { %v3197_v23 = vmul.f32 1.442695, %v3194_v22 }
0x1753   :  { %14316 = vpow2.f32 %v3197_v23 }
0x1759   :  { %v14315_v13 = vpop.eup %14314 }
0x175a   :  { %v3199_v24 = vsel %vm175_vm2, %v14315_v13, 0.0 }
0x175b   :  { %3200 = vadd.xlane.f32.xlu1 %v3199_v24 }
0x175d   :  { %v14317_v25 = vpop.eup %14316 }
0x175e   :  { %v3202_v26 = vsel %vm175_vm2, %v14317_v25, 0.0 }
0x175f   :  { %3203 = vadd.xlane.f32.xlu1 %v3202_v26 }
0x1770   :  { %3285 = vrot.lane.b32.xlu1 %v14971_v62, %s16256_s20  ;;  %s16276_s20 = smov 112  }
0x178e   :  { %v2789_v27 = vpop.f32.mrb[20].mxu0 }
0x178f   :  { %v13350_v28 = vpop.f32.mrb[21].mxu0  ;;  %13358 = vmatprep.mubr.msk.f32.mxu0 %vm175_vm2, %v2789_v27 }
0x1790   :  { %13359 = vmatmul.mubr.msk.f32.vlgmr.msra.gmra.mrb[22].mxu0 %vm175_vm2, %v2865_v2 }
0x1791   :  { %13363 = vmatprep.mubr.msk.f32.mxu0 %vm175_vm2, %v15039_v42  ;;  %13362 = vmatpush3.msra.mxu0 %v12411_v17 }
0x1792   :  { %13376 = vmatprep.subr.mxu0 %v14576_v8 }
0x1798   :  { %13364 = vmatmul.mubr.msk.f32.vlgmr.msra.gmra.mrb[22].mxu0 %vm175_vm2, %v15018_v33  ;;  %v3525_v33 = vpop.permute.xlu0 %3524 }
0x1799   :  { %13377 = vmatpush3.msra.mxu0 %v3210_v30  ;;  %13378 = vmatprep.mubr.msk.f32.mxu0 %vm14577_vm1, %v14576_v8 }
0x179a   :  { %13386 = vmatprep.subr.mxu0 %v12413_v29 }
0x179c   :  { %v3445_v40 = vpop.permute.xlu0 %3444 }
0x17a0   :  { %v3523_v43 = vpop.permute.xlu0 %3522 }
0x17e8   :  { %v3201_v31 = vpop.xlane.xlu1 %3200 }
0x17e9   :  { %14318 = vrcp.f32 %v3201_v31 }
0x17ec   :  { %v3204_v32 = vpop.xlane.xlu1 %3203 }
0x17ed   :  { %14320 = vrcp.f32 %v3204_v32  ;;  %v12453_v32 = vld [vmem:[%s16241_s7 + $0x28] sm:$0xff] }
0x17f0   :  { %v3286_v34 = vpop.permute.xlu1 %3285 }
0x17f1   :  { %13382 = vmatpush3.msra.mxu1 %v3286_v34  ;;  %v12454_v34 = vld [vmem:[%s16241_s7 + $0x30] sm:$0xff] }
0x17f2   :  { %13391 = vmatprep.subr.mxu1 %v14576_v8 }
0x17f3   :  { %v14319_v36 = vpop.eup %14318 }
0x17f4   :  { %v3206_v37 = vmul.f32 %v14319_v36, %v14315_v13  ;;  %v12455_v36 = vld [vmem:[%s16241_s7 + $0x38] sm:$0xff] }
0x17f6   :  { %13379 = vmatmul.mubr.msk.f32.vlgmr.msra.gmra.mrb[24].mxu0 %vm175_vm2, %v3206_v37  ;;  %v14054_v37 = vpack.c.bf16 %v12455_v36, %v12454_v34 }
0x17f7   :  { %v14321_v38 = vpop.eup %14320  ;;  %13387 = vmatpush3.msra.mxu0 %v12413_v29 }
0x17f8   :  { %v3208_v39 = vmul.f32 %v14321_v38, %v14317_v25  ;;  %13396 = vmatprep.subr.mxu0 %v14576_v8  ;;  %v12460_v38 = vld [vmem:[%s16243_s9 + $0x40] sm:$0xff] }
0x17fa   :  { %13384 = vmatmul.mubr.msk.f32.vlgmr.msra.gmra.mrb[40].mxu1 %vm175_vm2, %v3208_v39  ;;  %v12462_v39 = vld [vmem:[%s16243_s9 + $0x50] sm:$0xff] }
0x17fb   :  { %13392 = vmatpush3.xpose.msk.msra.mxu1 %vm175_vm2, %v3447_v35  ;;  %13393 = vmatprep.mubr.msk.f32.mxu1 %vm14577_vm1, %v14576_v8 }
0x17fc   :  { %13401 = vmatprep.subr.mxu1 %v14576_v8 }
0x17fe   :  { %13394 = vmatmul.mubr.msk.f32.vlgmr.msra.gmra.mrb[42].mxu1 %vm175_vm2, %v3445_v40 }
0x17ff   :  { %13403 = vmatprep.mubr.msk.f32.mxu1 %vm14577_vm1, %v14576_v8 }
0x18c9   :  { %v3281_v41 = vpop.f32.mrb[24].mxu0 }
0x18ca   :  { %v13380_v7 = vpop.f32.mrb[25].mxu0  ;;  %13388 = vmatprep.mubr.msk.f32.mxu0 %vm175_vm2, %v3281_v41  ;;  %v12463_v41 = vld [vmem:[%s16243_s9 + $0x58] sm:$0xff] }
0x18cb   :  { %v14062_v7 = vpack.c.bf16 %v12463_v41, %v12462_v39  ;;  %v12474_v41 = vld [vmem:[%s16245_s11 + $0x1] ss:$0 sm:$0xff] }
0x18cd   :  { %v3357_v5 = vpop.f32.mrb[40].mxu1 }
0x18ce   :  { %v13385_v42 = vpop.f32.mrb[41].mxu1  ;;  %13389 = vmatmul.mubr.msk.f32.vlgmr.msra.gmra.mrb[22].mxu0 %vm175_vm2, %v3357_v5  ;;  %v12464_v5 = vld [vmem:[%s16243_s9 + $0x60] sm:$0xff] }
0x18cf   :  { %13397 = vmatpush3.xpose.msk.msra.mxu0 %vm175_vm2, %v3525_v33  ;;  %13398 = vmatprep.mubr.msk.f32.mxu0 %vm14577_vm1, %v14576_v8  ;;  %v12461_v33 = vld [vmem:[%s16243_s9 + $0x48] sm:$0xff] }
0x18d0   :  { %13406 = vmatprep.subr.mxu0 %v14576_v8  ;;  %v14058_v40 = vpack.c.bf16 %v12461_v33, %v12460_v38  ;;  %v12465_v42 = vld [vmem:[%s16243_s9 + $0x68] sm:$0xff] }
0x18d1   :  { %v3518_v44 = vpop.f32.mrb[42].mxu1 }
0x18d2   :  { %v13395_v45 = vpop.f32.mrb[43].mxu1  ;;  %13399 = vmatmul.mubr.msk.f32.vlgmr.msra.gmra.mrb[26].mxu0 %vm175_vm2, %v3523_v43  ;;  %v3600_v46 = vsel %vm175_vm2, %v3518_v44, -inf  ;;  %v14066_v43 = vpack.c.bf16 %v12465_v42, %v12464_v5 }
0x18d3   :  { %3601 = vmax.xlane.f32.xlu1 %v3600_v46  ;;  %13408 = vmatprep.mubr.msk.f32.mxu0 %vm14577_vm1, %v14576_v8 }
0x1960   :  { %v3602_v47 = vpop.xlane.xlu1 %3601 }
0x1961   :  { %v3606_v48 = vsub.f32 %v3518_v44, %v3602_v47 }
0x1963   :  { %v3608_v49 = vmul.f32 1.442695, %v3606_v48 }
0x1965   :  { %14322 = vpow2.f32 %v3608_v49 }
0x196f   :  { %v14323_v53 = vpop.eup %14322 }
0x1970   :  { %v3612_v54 = vsel %vm175_vm2, %v14323_v53, 0.0 }
0x19a5   :  { %v3596_v50 = vpop.f32.mrb[26].mxu0 }
0x19a6   :  { %v13400_v51 = vpop.f32.mrb[27].mxu0  ;;  %v3603_v52 = vsel %vm175_vm2, %v3596_v50, -inf }
0x19a7   :  { %3604 = vmax.xlane.f32.xlu0 %v3603_v52  ;;  %v12450_v51 = vld [vmem:[#allocation5 + $0x1] ss:$0 sm:$0xff] }
0x19ab   :  { %3613 = vadd.xlane.f32.xlu0 %v3612_v54 }
0x19c1   :  { %3622 = vrot.lane.b32.xlu0 %v14973_v0, %s16271_s29 }
0x1a34   :  { %v3605_v55 = vpop.xlane.xlu0 %3604 }
0x1a35   :  { %v3607_v56 = vsub.f32 %v3596_v50, %v3605_v55  ;;  %v12451_v55 = vld [vmem:[%s16240_s6 + $0x1] ss:$0 sm:$0xff] }
0x1a37   :  { %v3610_v57 = vmul.f32 1.442695, %v3607_v56 }
0x1a38   :  { %v3614_v60 = vpop.xlane.xlu0 %3613 }
0x1a39   :  { %14324 = vpow2.f32 %v3610_v57 }
0x1a3a   :  { %14326 = vrcp.f32 %v3614_v60 }
0x1a3c   :  { %v3623_v61 = vpop.permute.xlu0 %3622 }
0x1a3d   :  { %13402 = vmatpush3.msra.mxu1 %v3623_v61 }
0x1a43   :  { %v14325_v63 = vpop.eup %14324 }
0x1a44   :  { %v14327_v1 = vpop.eup %14326  ;;  %v3615_v2 = vsel %vm175_vm2, %v14325_v63, 0.0 }
0x1a45   :  { %3616 = vadd.xlane.f32.xlu1 %v3615_v2  ;;  %v3619_v3 = vmul.f32 %v14327_v1, %v14323_v53  ;;  %v12467_v1 = vld [vmem:[%s16243_s9 + $0x78] sm:$0xff] }
0x1a47   :  { %13404 = vmatmul.mubr.msk.f32.vlgmr.msra.gmra.mrb[44].mxu1 %vm175_vm2, %v3619_v3  ;;  %v12457_v3 = vld [vmem:[%s16242_s8 + $0x1] ss:$0 sm:$0xff] }
0x1a56   :  { %3698 = vrot.lane.b32.xlu1 %v14971_v62, %s16271_s29 }
0x1ad2   :  { %v3617_v0 = vpop.xlane.xlu1 %3616 }
0x1ad3   :  { %14328 = vrcp.f32 %v3617_v0 }
0x1ad6   :  { %v3699_v6 = vpop.permute.xlu1 %3698 }
0x1ad7   :  { %13407 = vmatpush3.msra.mxu0 %v3699_v6 }
0x1ad8   :  { %13411 = vmatprep.subr.mxu0 %v12414_v4 }
0x1add   :  { %v14329_v9 = vpop.eup %14328 }
0x1ade   :  { %v3621_v10 = vmul.f32 %v14329_v9, %v14325_v63  ;;  %v12466_v63 = vld [vmem:[%s16243_s9 + $0x70] sm:$0xff] }
0x1adf   :  { %v14070_v2 = vpack.c.bf16 %v12467_v1, %v12466_v63 }
0x1ae0   :  { %13409 = vmatmul.mubr.msk.f32.vlgmr.msra.gmra.mrb[28].mxu0 %vm175_vm2, %v3621_v10 }
0x1ae1   :  { %13412 = vmatpush3.msra.mxu0 %v12414_v4 }
0x1ae2   :  { %14059 = vmatprep.subr.bf16.mxu0 %v14058_v40 }
0x1b1a   :  { %v3694_v11 = vpop.f32.mrb[44].mxu1 }
0x1b1b   :  { %v13405_v14 = vpop.f32.mrb[45].mxu1  ;;  %13413 = vmatprep.mubr.msk.f32.mxu0 %vm175_vm2, %v3694_v11 }
0x1b1c   :  { %v12469_v14 = vld [vmem:[%s16244_s10 + $0x1] ss:$0 sm:$0xff] }
0x1bb3   :  { %v3770_v15 = vpop.f32.mrb[28].mxu0 }
0x1bb4   :  { %v13410_v62 = vpop.f32.mrb[29].mxu0  ;;  %13414 = vmatmul.mubr.msk.f32.vlgmr.msra.gmra.mrb[22].mxu0 %vm175_vm2, %v3770_v15 }
0x1bb5   :  { %14061 = vmatpush3.bf16.msra.mxu0 %v14058_v40 }
0x1bb6   :  { %14063 = vmatprep.subr.bf16.mxu0 %v14062_v7 }
0x1bb9   :  { %14065 = vmatpush3.bf16.msra.mxu0 %v14062_v7 }
0x1bba   :  { %14067 = vmatprep.subr.bf16.mxu0 %v14066_v43 }
0x1bbd   :  { %14069 = vmatpush3.bf16.msra.mxu0 %v14066_v43  ;;  %v12475_v43 = vld [vmem:[%s16246_s12 + $0x1] ss:$0 sm:$0xff] }
0x1bbe   :  { %14071 = vmatprep.subr.bf16.mxu0 %v14070_v2 }
0x1bc1   :  { %14073 = vmatpush3.bf16.msra.mxu0 %v14070_v2 }
0x1bc2   :  { %13467 = vmatprep.subr.mxu0 %v14576_v8 }
0x1c87   :  { %v13415_v12 = vpop.f32.mrb[22].mxu0 }
0x1c88   :  { %v3866_v17 = vadd.f32 %v13415_v12, %v12448_v16  ;;  %v3846_v18 = vpop.f32.mrb[23].mxu0 }
0x1c89   :  { %v3865_v19 = vadd.f32 %v12448_v16, %v3846_v18 }
0x1c8a   :  { %v3868_v20 = vadd.f32 %v3866_v17, %v14960_v59 }
0x1c8b   :  { %v3867_v21 = vadd.f32 %v3865_v19, %v14958_v58  ;;  %v12452_v58 = vld [vmem:[%s16241_s7 + $0x20] sm:$0xff] }
0x1c8c   :  { %v3876_v22 = vsel %vm86_vm0, %v3868_v20, 0.0  ;;  %v14050_v35 = vpack.c.bf16 %v12453_v32, %v12452_v58  ;;  %v12479_v32 = vld [vmem:[%s16235_s1 + $0x58] sm:$0xff] }
0x1c8d   :  { %3877 = vadd.xlane.f32.xlu0 %v3876_v22  ;;  %v3873_v23 = vsel %vm86_vm0, %v3867_v21, 0.0 }
0x1c8e   :  { %3874 = vadd.xlane.f32.xlu1 %v3873_v23  ;;  %14051 = vmatprep.subr.bf16.mxu1 %v14050_v35 }
0x1c8f   :  { %14053 = vmatpush3.bf16.msra.mxu1 %v14050_v35 }
0x1c90   :  { %14055 = vmatprep.subr.bf16.mxu1 %v14054_v37 }
0x1c93   :  { %14057 = vmatpush3.bf16.msra.mxu1 %v14054_v37 }
0x1d1a   :  { %v3878_v13 = vpop.xlane.xlu0 %3877 }
0x1d1b   :  { %v3880_v24 = vmul.f32 0.03125, %v3878_v13  ;;  %v3875_v25 = vpop.xlane.xlu1 %3874 }
0x1d1c   :  { %v3879_v26 = vmul.f32 0.03125, %v3875_v25 }
0x1d1d   :  { %v3882_v27 = vsub.f32 %v3868_v20, %v3880_v24 }
0x1d1e   :  { %v3881_v28 = vsub.f32 %v3867_v21, %v3879_v26 }
0x1d1f   :  { %v3884_v29 = vmul.f32 %v3882_v27, %v3882_v27 }
0x1d20   :  { %v3883_v30 = vmul.f32 %v3881_v28, %v3881_v28 }
0x1d21   :  { %v3888_v31 = vsel %vm86_vm0, %v3884_v29, 0.0 }
0x1d22   :  { %3889 = vadd.xlane.f32.xlu1 %v3888_v31  ;;  %v3885_v59 = vsel %vm86_vm0, %v3883_v30, 0.0  ;;  %v12476_v30 = vld [vmem:[%s16235_s1 + $0x40] sm:$0xff]  ;;  %v12477_v31 = vld [vmem:[%s16235_s1 + $0x48] sm:$0xff] }
0x1d23   :  { %3886 = vadd.xlane.f32.xlu0 %v3885_v59  ;;  %v12478_v59 = vld [vmem:[%s16235_s1 + $0x50] sm:$0xff]  ;;  %v14074_v58 = vpack.c.bf16 %v12477_v31, %v12476_v30 }
0x1d24   :  { %v14078_v34 = vpack.c.bf16 %v12479_v32, %v12478_v59 }
0x1d25   :  { %14075 = vmatprep.subr.bf16.mxu1 %v14074_v58 }
0x1daf   :  { %v3890_v44 = vpop.xlane.xlu1 %3889 }
0x1db0   :  { %v3892_v45 = vmul.f32 0.03125, %v3890_v44  ;;  %v3887_v46 = vpop.xlane.xlu0 %3886 }
0x1db1   :  { %v3891_v47 = vmul.f32 0.03125, %v3887_v46 }
0x1db2   :  { %v3894_v48 = vadd.f32 1e-05, %v3892_v45 }
0x1db3   :  { %v3893_v49 = vadd.f32 1e-05, %v3891_v47 }
0x1db4   :  { %14330 = vrsqrt.f32 %v3894_v48  ;;  %v12481_v48 = vld [vmem:[%s16236_s2 + $0x2] ss:$0 sm:$0xff] }
0x1db5   :  { %14332 = vrsqrt.f32 %v3893_v49 }
0x1dbe   :  { %v14331_v50 = vpop.eup %14330 }
0x1dbf   :  { %v14333_v52 = vpop.eup %14332  ;;  %v3898_v53 = vmul.f32 %v14331_v50, %v3882_v27 }
0x1dc0   :  { %v3897_v54 = vmul.f32 %v14333_v52, %v3881_v28 }
0x1dc1   :  { %v3906_v56 = vmul.f32 %v12450_v51, %v3898_v53 }
0x1dc2   :  { %v3905_v57 = vmul.f32 %v12450_v51, %v3897_v54 }
0x1dc3   :  { %v3914_v61 = vadd.f32 %v12451_v55, %v3906_v56 }
0x1dc4   :  { %v3913_v60 = vadd.f32 %v12451_v55, %v3905_v57 }
0x1dc6   :  { %13424 = vmatprep.mubr.msk.f32.mxu1 %vm86_vm0, %v3913_v60 }
0x1dc7   :  { %13425 = vmatmul.mubr.msk.f32.vlgmr.msra.gmra.mrb[46].mxu1 %vm86_vm0, %v3914_v61 }
0x1dc8   :  { %14077 = vmatpush3.bf16.msra.mxu1 %v14074_v58 }
0x1dc9   :  { %14079 = vmatprep.subr.bf16.mxu1 %v14078_v34 }
0x1dcc   :  { %14081 = vmatpush3.bf16.msra.mxu1 %v14078_v34 }
0x1dcd   :  { %13457 = vmatprep.subr.mxu1 %v14576_v8 }
0x1e9a   :  { %v13426_v0 = vpop.f32.mrb[46].mxu1 }
0x1e9b   :  { %v4006_v4 = vadd.f32 %v13426_v0, %v12457_v3  ;;  %v4000_v6 = vpop.f32.mrb[47].mxu1 }
0x1e9c   :  { %v4001_v9 = vadd.f32 %v12457_v3, %v4000_v6 }
0x1e9d   :  { %v4010_v11 = vmax.f32 %v4006_v4, 0.0 }
0x1e9e   :  { %v4009_v10 = vmax.f32 %v4001_v9, 0.0 }
0x1ea0   :  { %13443 = vmatprep.mubr.msk.f32.mxu0 %vm1984_vm3, %v4009_v10 }
0x1ea1   :  { %13444 = vmatmul.mubr.msk.f32.vlgmr.msra.gmra.mrb[30].mxu0 %vm1984_vm3, %v4010_v11 }
0x1ea2   :  { %13469 = vmatprep.mubr.msk.f32.mxu0 %vm14577_vm1, %v14576_v8 }
0x1f74   :  { %v13445_v15 = vpop.f32.mrb[30].mxu0 }
0x1f75   :  { %v4106_v62 = vadd.f32 %v13445_v15, %v12469_v14  ;;  %v4100_v16 = vpop.f32.mrb[31].mxu0 }
0x1f76   :  { %v4101_v12 = vadd.f32 %v12469_v14, %v4100_v16 }
0x1f77   :  { %v4110_v17 = vadd.f32 %v4106_v62, %v3914_v61 }
0x1f78   :  { %v4109_v18 = vadd.f32 %v4101_v12, %v3913_v60 }
0x1f79   :  { %v4118_v19 = vsel %vm86_vm0, %v4110_v17, 0.0 }
0x1f7a   :  { %4119 = vadd.xlane.f32.xlu1 %v4118_v19  ;;  %v4115_v20 = vsel %vm86_vm0, %v4109_v18, 0.0 }
0x1f7b   :  { %4116 = vadd.xlane.f32.xlu0 %v4115_v20 }
0x2007   :  { %v4120_v21 = vpop.xlane.xlu1 %4119 }
0x2008   :  { %v4122_v22 = vmul.f32 0.03125, %v4120_v21  ;;  %v4117_v23 = vpop.xlane.xlu0 %4116 }
0x2009   :  { %v4121_v13 = vmul.f32 0.03125, %v4117_v23 }
0x200a   :  { %v4124_v24 = vsub.f32 %v4110_v17, %v4122_v22 }
0x200b   :  { %v4123_v25 = vsub.f32 %v4109_v18, %v4121_v13 }
0x200c   :  { %v4126_v26 = vmul.f32 %v4124_v24, %v4124_v24 }
0x200d   :  { %v4125_v27 = vmul.f32 %v4123_v25, %v4123_v25 }
0x200e   :  { %v4130_v28 = vsel %vm86_vm0, %v4126_v26, 0.0 }
0x200f   :  { %4131 = vadd.xlane.f32.xlu1 %v4130_v28  ;;  %v4127_v29 = vsel %vm86_vm0, %v4125_v27, 0.0 }
0x2010   :  { %4128 = vadd.xlane.f32.xlu0 %v4127_v29 }
0x209c   :  { %v4132_v35 = vpop.xlane.xlu1 %4131 }
0x209d   :  { %v4134_v36 = vmul.f32 0.03125, %v4132_v35  ;;  %v4129_v37 = vpop.xlane.xlu0 %4128 }
0x209e   :  { %v4133_v38 = vmul.f32 0.03125, %v4129_v37 }
0x209f   :  { %v4136_v33 = vadd.f32 1e-05, %v4134_v36 }
0x20a0   :  { %v4135_v39 = vadd.f32 1e-05, %v4133_v38 }
0x20a1   :  { %14334 = vrsqrt.f32 %v4136_v33 }
0x20a2   :  { %14336 = vrsqrt.f32 %v4135_v39 }
0x20ab   :  { %v14335_v40 = vpop.eup %14334 }
0x20ac   :  { %v14337_v7 = vpop.eup %14336  ;;  %v4140_v5 = vmul.f32 %v14335_v40, %v4124_v24 }
0x20ad   :  { %v4139_v42 = vmul.f32 %v14337_v7, %v4123_v25 }
0x20ae   :  { %v4148_v44 = vmul.f32 %v12474_v41, %v4140_v5 }
0x20af   :  { %v4147_v45 = vmul.f32 %v12474_v41, %v4139_v42 }
0x20b0   :  { %v15215_v47 = vadd.f32 %v12475_v43, %v4148_v44 }
0x20b1   :  { %v15213_v46 = vadd.f32 %v12475_v43, %v4147_v45 }
0x20b3   :  { %13454 = vmatprep.mubr.msk.f32.mxu1 %vm86_vm0, %v15213_v46 }
0x20b4   :  { %13455 = vmatmul.mubr.msk.f32.vlgmr.msra.gmra.mrb[48].mxu1 %vm86_vm0, %v15215_v47 }
0x20b5   :  { %13459 = vmatprep.mubr.msk.f32.mxu1 %vm14577_vm1, %v14576_v8 }
0x2187   :  { %v13456_v49 = vpop.f32.mrb[48].mxu1 }
0x2188   :  { %v15226_v50 = vadd.f32 %v13456_v49, %v12481_v48  ;;  %v4242_v51 = vpop.f32.mrb[49].mxu1 }
0x2189   :  { %v15228_v52 = vadd.f32 %v12481_v48, %v4242_v51 }
0x218a   :  { %4334 = vrot.lane.b32.xlu1 %v15226_v50, %s14578_s30 }
0x218b   :  { %4257 = vrot.lane.b32.xlu0 %v15228_v52, %s14578_s30 }
0x21fc   :  { %v4335_v54 = vpop.permute.xlu1 %4334 }
0x21fd   :  { %v4258_v53 = vpop.permute.xlu0 %4257 }
0x21fe   :  { %13458 = vmatpush3.xpose.msk.msra.mxu1 %vm175_vm2, %v4258_v53 }
0x21ff   :  { %13462 = vmatprep.subr.mxu1 %v14576_v8 }
0x2201   :  { %13460 = vmatmul.mubr.msk.f32.vlgmr.msra.gmra.mrb[50].mxu1 %vm175_vm2, %v15228_v52 }
0x2202   :  { %13463 = vmatpush3.xpose.msk.msra.mxu1 %vm175_vm2, %v4335_v54  ;;  %13464 = vmatprep.mubr.msk.f32.mxu1 %vm14577_vm1, %v14576_v8 }
0x2203   :  { %13472 = vmatprep.subr.mxu1 %v14576_v8 }
0x2205   :  { %13465 = vmatmul.mubr.msk.f32.vlgmr.msra.gmra.mrb[52].mxu1 %vm175_vm2, %v15226_v50 }
0x2206   :  { %13474 = vmatprep.mubr.msk.f32.mxu1 %vm14577_vm1, %v14576_v8 }
0x22d4   :  { %v4329_v55 = vpop.f32.mrb[50].mxu1 }
0x22d5   :  { %v13461_v56 = vpop.f32.mrb[51].mxu1  ;;  %v4410_v4 = vsel %vm175_vm2, %v4329_v55, -inf }
0x22d8   :  { %v4406_v57 = vpop.f32.mrb[52].mxu1 }
0x22d9   :  { %v13466_v60 = vpop.f32.mrb[53].mxu1  ;;  %v4413_v61 = vsel %vm175_vm2, %v4406_v57, -inf }
0x22da   :  { %4414 = vmax.xlane.f32.xlu1 %v4413_v61 }
0x22eb   :  { %4664 = vrot.lane.b32.xlu1 %v15226_v50, %s16268_s0 }
0x22ef   :  { %4662 = vrot.lane.b32.xlu1 %v15226_v50, %s16266_s15 }
0x2367   :  { %v4415_v63 = vpop.xlane.xlu1 %4414 }
0x2368   :  { %v4417_v1 = vsub.f32 %v4406_v57, %v4415_v63 }
0x236a   :  { %v4420_v2 = vmul.f32 1.442695, %v4417_v1 }
0x236b   :  { %v4665_v11 = vpop.permute.xlu1 %4664 }
0x236c   :  { %14338 = vpow2.f32 %v4420_v2 }
0x236f   :  { %v4663_v15 = vpop.permute.xlu1 %4662 }
0x2376   :  { %v14339_v3 = vpop.eup %14338 }
0x2377   :  { %v4425_v0 = vsel %vm175_vm2, %v14339_v3, 0.0 }
0x2378   :  { %4426 = vadd.xlane.f32.xlu0 %v4425_v0  ;;  %v12485_v0 = vld [vmem:[%s16237_s3 + $0x48] sm:$0xff] }
0x238e   :  { %4508 = vrot.lane.b32.xlu0 %v15226_v50, %s16264_s14 }
0x23ad   :  { %4411 = vmax.xlane.f32.xlu0 %v4410_v4  ;;  %v12484_v4 = vld [vmem:[%s16237_s3 + $0x40] sm:$0xff] }
0x23c3   :  { %4432 = vrot.lane.b32.xlu0 %v15228_v52, %s16264_s14 }
0x23c7   :  { %4584 = vrot.lane.b32.xlu0 %v15228_v52, %s16266_s15 }
0x2405   :  { %v4427_v6 = vpop.xlane.xlu0 %4426 }
0x2406   :  { %14340 = vrcp.f32 %v4427_v6 }
0x2409   :  { %v4509_v9 = vpop.permute.xlu0 %4508 }
0x240a   :  { %13473 = vmatpush3.msra.mxu1 %v4509_v9 }
0x240b   :  { %13482 = vmatprep.subr.mxu1 %v14576_v8 }
0x2410   :  { %v14341_v10 = vpop.eup %14340 }
0x2411   :  { %v4431_v14 = vmul.f32 %v14341_v10, %v14339_v3 }
0x2413   :  { %13475 = vmatmul.mubr.msk.f32.vlgmr.msra.gmra.mrb[54].mxu1 %vm175_vm2, %v4431_v14 }
0x2414   :  { %13483 = vmatpush3.xpose.msk.msra.mxu1 %vm175_vm2, %v4665_v11  ;;  %13484 = vmatprep.mubr.msk.f32.mxu1 %vm14577_vm1, %v14576_v8 }
0x2415   :  { %13492 = vmatprep.subr.mxu1 %v14576_v8 }
0x2417   :  { %13485 = vmatmul.mubr.msk.f32.vlgmr.msra.gmra.mrb[56].mxu1 %vm175_vm2, %v4663_v15 }
0x2418   :  { %13494 = vmatprep.mubr.msk.f32.mxu1 %vm14577_vm1, %v14576_v8 }
0x243a   :  { %v4412_v62 = vpop.xlane.xlu0 %4411 }
0x243b   :  { %v4416_v16 = vsub.f32 %v4329_v55, %v4412_v62 }
0x243d   :  { %v4418_v12 = vmul.f32 1.442695, %v4416_v16 }
0x243e   :  { %v4433_v17 = vpop.permute.xlu0 %4432 }
0x243f   :  { %14342 = vpow2.f32 %v4418_v12  ;;  %13468 = vmatpush3.msra.mxu0 %v4433_v17 }
0x2440   :  { %13477 = vmatprep.subr.mxu0 %v14576_v8 }
0x2442   :  { %v4585_v25 = vpop.permute.xlu0 %4584 }
0x2449   :  { %v14343_v18 = vpop.eup %14342 }
0x244a   :  { %v4422_v19 = vsel %vm175_vm2, %v14343_v18, 0.0 }
0x244b   :  { %4423 = vadd.xlane.f32.xlu1 %v4422_v19 }
0x245c   :  { %4586 = vrot.lane.b32.xlu1 %v15228_v52, %s16268_s0 }
0x24d8   :  { %v4424_v20 = vpop.xlane.xlu1 %4423 }
0x24d9   :  { %14344 = vrcp.f32 %v4424_v20  ;;  %v12486_v20 = vld [vmem:[%s16237_s3 + $0x50] sm:$0xff] }
0x24dc   :  { %v4587_v23 = vpop.permute.xlu1 %4586 }
0x24e3   :  { %v14345_v21 = vpop.eup %14344 }
0x24e4   :  { %v4429_v22 = vmul.f32 %v14345_v21, %v14343_v18 }
0x24e6   :  { %13470 = vmatmul.mubr.msk.f32.vlgmr.msra.gmra.mrb[32].mxu0 %vm175_vm2, %v4429_v22  ;;  %v15273_v13 = vpop.f32.mrb[54].mxu1 }
0x24e7   :  { %13478 = vmatpush3.xpose.msk.msra.mxu0 %vm175_vm2, %v4587_v23  ;;  %v13476_v24 = vpop.f32.mrb[55].mxu1  ;;  %13479 = vmatprep.mubr.msk.f32.mxu0 %vm14577_vm1, %v14576_v8 }
0x24e8   :  { %13487 = vmatprep.subr.mxu0 %v14576_v8 }
0x24ea   :  { %13480 = vmatmul.mubr.msk.f32.vlgmr.msra.gmra.mrb[34].mxu0 %vm175_vm2, %v4585_v25  ;;  %v4736_v26 = vpop.f32.mrb[56].mxu1 }
0x24eb   :  { %v13486_v27 = vpop.f32.mrb[57].mxu1  ;;  %v4743_v28 = vsel %vm175_vm2, %v4736_v26, -inf  ;;  %13489 = vmatprep.mubr.msk.f32.mxu0 %vm14577_vm1, %v14576_v8 }
0x24ec   :  { %4744 = vmax.xlane.f32.xlu1 %v4743_v28 }
0x24fd   :  { %5078 = vrot.lane.b32.xlu1 %v15228_v52, %s16262_s26 }
0x2501   :  { %5076 = vrot.lane.b32.xlu1 %v15228_v52, %s16260_s17 }
0x2505   :  { %5154 = vrot.lane.b32.xlu1 %v15226_v50, %s16260_s17 }
0x2579   :  { %v4745_v29 = vpop.xlane.xlu1 %4744 }
0x257a   :  { %v4747_v30 = vsub.f32 %v4736_v26, %v4745_v29 }
0x257c   :  { %v4750_v31 = vmul.f32 1.442695, %v4747_v30 }
0x257d   :  { %v5079_v39 = vpop.permute.xlu1 %5078 }
0x257e   :  { %14346 = vpow2.f32 %v4750_v31 }
0x2581   :  { %v5077_v7 = vpop.permute.xlu1 %5076 }
0x2585   :  { %v5155_v42 = vpop.permute.xlu1 %5154 }
0x2588   :  { %v14347_v59 = vpop.eup %14346 }
0x2589   :  { %v4755_v58 = vsel %vm175_vm2, %v14347_v59, 0.0 }
0x258a   :  { %4756 = vadd.xlane.f32.xlu0 %v4755_v58 }
0x25a0   :  { %4838 = vrot.lane.b32.xlu0 %v15226_v50, %s16258_s16 }
0x25a4   :  { %5156 = vrot.lane.b32.xlu0 %v15226_v50, %s16262_s26 }
0x25b9   :  { %v15294_v32 = vpop.f32.mrb[32].mxu0 }
0x25ba   :  { %v13471_v34 = vpop.f32.mrb[33].mxu0 }
0x25bd   :  { %v4658_v35 = vpop.f32.mrb[34].mxu0 }
0x25be   :  { %v13481_v36 = vpop.f32.mrb[35].mxu0  ;;  %v4740_v37 = vsel %vm175_vm2, %v4658_v35, -inf }
0x25c3   :  { %4741 = vmax.xlane.f32.xlu0 %v4740_v37 }
0x25d9   :  { %4762 = vrot.lane.b32.xlu0 %v15228_v52, %s16258_s16 }
0x25dd   :  { %5254 = vrot.lane.b32.xlu0 %v15228_v52, %s16272_s24 }
0x25e1   :  { %5491 = vrot.lane.b32.xlu0 %v15228_v52, %s16273_s25 }
0x25e5   :  { %5569 = vrot.lane.b32.xlu0 %v15226_v50, %s16273_s25 }
0x25e9   :  { %5489 = vrot.lane.b32.xlu0 %v15228_v52, %s16270_s27 }
0x25ed   :  { %5567 = vrot.lane.b32.xlu0 %v15226_v50, %s16270_s27 }
0x2617   :  { %v4757_v38 = vpop.xlane.xlu0 %4756 }
0x2618   :  { %14348 = vrcp.f32 %v4757_v38 }
0x261b   :  { %v4839_v33 = vpop.permute.xlu0 %4838 }
0x261c   :  { %13493 = vmatpush3.msra.mxu1 %v4839_v33 }
0x261d   :  { %13507 = vmatprep.subr.mxu1 %v14576_v8 }
0x261f   :  { %v5157_v5 = vpop.permute.xlu0 %5156 }
0x2622   :  { %v14349_v40 = vpop.eup %14348 }
0x2623   :  { %v4761_v41 = vmul.f32 %v14349_v40, %v14347_v59 }
0x2625   :  { %13495 = vmatmul.mubr.msk.f32.vlgmr.msra.gmra.mrb[58].mxu1 %vm175_vm2, %v4761_v41 }
0x2626   :  { %13508 = vmatpush3.xpose.msk.msra.mxu1 %vm175_vm2, %v5079_v39  ;;  %13509 = vmatprep.mubr.msk.f32.mxu1 %vm14577_vm1, %v14576_v8 }
0x2627   :  { %13512 = vmatprep.subr.mxu1 %v14576_v8 }
0x2629   :  { %13510 = vmatmul.mubr.msk.f32.vlgmr.msra.gmra.mrb[60].mxu1 %vm175_vm2, %v5077_v7 }
0x262a   :  { %13513 = vmatpush3.xpose.msk.msra.mxu1 %vm175_vm2, %v5157_v5  ;;  %13514 = vmatprep.mubr.msk.f32.mxu1 %vm14577_vm1, %v14576_v8 }
0x262b   :  { %13522 = vmatprep.subr.mxu1 %v14576_v8 }
0x262d   :  { %13515 = vmatmul.mubr.msk.f32.vlgmr.msra.gmra.mrb[62].mxu1 %vm175_vm2, %v5155_v42 }
0x262e   :  { %13524 = vmatprep.mubr.msk.f32.mxu1 %vm14577_vm1, %v14576_v8 }
0x2650   :  { %v4742_v43 = vpop.xlane.xlu0 %4741 }
0x2651   :  { %v4746_v44 = vsub.f32 %v4658_v35, %v4742_v43 }
0x2653   :  { %v4748_v45 = vmul.f32 1.442695, %v4746_v44 }
0x2654   :  { %v4763_v48 = vpop.permute.xlu0 %4762 }
0x2655   :  { %14350 = vpow2.f32 %v4748_v45  ;;  %13488 = vmatpush3.msra.mxu0 %v4763_v48 }
0x2656   :  { %13497 = vmatprep.subr.mxu0 %v12485_v0 }
0x2658   :  { %v5255_v21 = vpop.permute.xlu0 %5254 }
0x265c   :  { %v5492_v25 = vpop.permute.xlu0 %5491 }
0x265f   :  { %v14351_v49 = vpop.eup %14350 }
0x2660   :  { %v4752_v51 = vsel %vm175_vm2, %v14351_v49, 0.0 }
0x2661   :  { %4753 = vadd.xlane.f32.xlu1 %v4752_v51 }
0x26ee   :  { %v4754_v53 = vpop.xlane.xlu1 %4753 }
0x26ef   :  { %14352 = vrcp.f32 %v4754_v53 }
0x26f8   :  { %v4910_v54 = vpop.f32.mrb[58].mxu1 }
0x26f9   :  { %v14353_v55 = vpop.eup %14352  ;;  %v13496_v56 = vpop.f32.mrb[59].mxu1 }
0x26fa   :  { %v4759_v57 = vmul.f32 %v14353_v55, %v14351_v49  ;;  %v12487_v56 = vld [vmem:[%s16237_s3 + $0x58] sm:$0xff] }
0x26fc   :  { %13490 = vmatmul.mubr.msk.f32.vlgmr.msra.gmra.mrb[36].mxu0 %vm175_vm2, %v4759_v57  ;;  %v5150_v60 = vpop.f32.mrb[60].mxu1 }
0x26fd   :  { %v13511_v61 = vpop.f32.mrb[61].mxu1  ;;  %v5232_v63 = vsel %vm175_vm2, %v5150_v60, -inf  ;;  %13498 = vmatpush3.msra.mxu0 %v12485_v0 }
0x26fe   :  { %5233 = vmax.xlane.f32.xlu1 %v5232_v63  ;;  %13502 = vmatprep.subr.mxu0 %v12484_v4 }
0x2700   :  { %v5228_v1 = vpop.f32.mrb[62].mxu1 }
0x2701   :  { %v13516_v2 = vpop.f32.mrb[63].mxu1  ;;  %v5235_v3 = vsel %vm175_vm2, %v5228_v1, -inf }
0x2702   :  { %5236 = vmax.xlane.f32.xlu1 %v5235_v3  ;;  %v12521_v3 = vld [vmem:[%s16238_s4 + $0x2] ss:$0 sm:$0xff] }
0x278b   :  { %v5234_v6 = vpop.xlane.xlu1 %5233 }
0x278c   :  { %v5238_v9 = vsub.f32 %v5150_v60, %v5234_v6 }
0x278e   :  { %v5240_v10 = vmul.f32 1.442695, %v5238_v9 }
0x278f   :  { %v5237_v11 = vpop.xlane.xlu1 %5236 }
0x2790   :  { %14354 = vpow2.f32 %v5240_v10  ;;  %v5239_v14 = vsub.f32 %v5228_v1, %v5237_v11 }
0x2792   :  { %v5242_v15 = vmul.f32 1.442695, %v5239_v14 }
0x2794   :  { %14356 = vpow2.f32 %v5242_v15 }
0x279a   :  { %v14355_v62 = vpop.eup %14354 }
0x279b   :  { %v5244_v16 = vsel %vm175_vm2, %v14355_v62, 0.0 }
0x279c   :  { %5245 = vadd.xlane.f32.xlu1 %v5244_v16 }
0x279e   :  { %v14357_v12 = vpop.eup %14356 }
0x279f   :  { %v5247_v17 = vsel %vm175_vm2, %v14357_v12, 0.0 }
0x27a0   :  { %5248 = vadd.xlane.f32.xlu1 %v5247_v17 }
0x27b1   :  { %5330 = vrot.lane.b32.xlu1 %v15226_v50, %s16272_s24 }
0x27cf   :  { %v4834_v18 = vpop.f32.mrb[36].mxu0 }
0x27d0   :  { %v13491_v19 = vpop.f32.mrb[37].mxu0  ;;  %13499 = vmatprep.mubr.msk.f32.mxu0 %vm175_vm2, %v4834_v18 }
0x27d1   :  { %13500 = vmatmul.mubr.msk.f32.vlgmr.msra.gmra.mrb[38].mxu0 %vm175_vm2, %v4910_v54 }
0x27d2   :  { %13504 = vmatprep.mubr.msk.f32.mxu0 %vm175_vm2, %v15294_v32  ;;  %13503 = vmatpush3.msra.mxu0 %v12484_v4 }
0x27d3   :  { %13517 = vmatprep.subr.mxu0 %v14576_v8 }
0x27d9   :  { %13505 = vmatmul.mubr.msk.f32.vlgmr.msra.gmra.mrb[38].mxu0 %vm175_vm2, %v15273_v13  ;;  %v5570_v13 = vpop.permute.xlu0 %5569 }
0x27da   :  { %13518 = vmatpush3.msra.mxu0 %v5255_v21  ;;  %13519 = vmatprep.mubr.msk.f32.mxu0 %vm14577_vm1, %v14576_v8 }
0x27db   :  { %13527 = vmatprep.subr.mxu0 %v12486_v20 }
0x27dd   :  { %v5490_v30 = vpop.permute.xlu0 %5489 }
0x27e1   :  { %v5568_v34 = vpop.permute.xlu0 %5567 }
0x2829   :  { %v5246_v22 = vpop.xlane.xlu1 %5245 }
0x282a   :  { %14358 = vrcp.f32 %v5246_v22 }
0x282d   :  { %v5249_v23 = vpop.xlane.xlu1 %5248 }
0x282e   :  { %14360 = vrcp.f32 %v5249_v23  ;;  %v12526_v23 = vld [vmem:[%s16241_s7 + $0x48] sm:$0xff] }
0x2831   :  { %v5331_v24 = vpop.permute.xlu1 %5330 }
0x2832   :  { %13523 = vmatpush3.msra.mxu1 %v5331_v24  ;;  %v12527_v24 = vld [vmem:[%s16241_s7 + $0x50] sm:$0xff] }
0x2833   :  { %13532 = vmatprep.subr.mxu1 %v14576_v8 }
0x2834   :  { %v14359_v26 = vpop.eup %14358 }
0x2835   :  { %v5251_v27 = vmul.f32 %v14359_v26, %v14355_v62  ;;  %v12528_v26 = vld [vmem:[%s16241_s7 + $0x58] sm:$0xff] }
0x2837   :  { %13520 = vmatmul.mubr.msk.f32.vlgmr.msra.gmra.mrb[40].mxu0 %vm175_vm2, %v5251_v27  ;;  %v14086_v27 = vpack.c.bf16 %v12528_v26, %v12527_v24 }
0x2838   :  { %v14361_v28 = vpop.eup %14360  ;;  %13528 = vmatpush3.msra.mxu0 %v12486_v20 }
0x2839   :  { %v5253_v29 = vmul.f32 %v14361_v28, %v14357_v12  ;;  %13537 = vmatprep.subr.mxu0 %v14576_v8  ;;  %v12533_v28 = vld [vmem:[%s16243_s9 + $0x80] sm:$0xff] }
0x283b   :  { %13525 = vmatmul.mubr.msk.f32.vlgmr.msra.gmra.mrb[64].mxu1 %vm175_vm2, %v5253_v29  ;;  %v12535_v29 = vld [vmem:[%s16243_s9 + $0x90] sm:$0xff] }
0x283c   :  { %13533 = vmatpush3.xpose.msk.msra.mxu1 %vm175_vm2, %v5492_v25  ;;  %13534 = vmatprep.mubr.msk.f32.mxu1 %vm14577_vm1, %v14576_v8 }
0x283d   :  { %13542 = vmatprep.subr.mxu1 %v14576_v8 }
0x283f   :  { %13535 = vmatmul.mubr.msk.f32.vlgmr.msra.gmra.mrb[66].mxu1 %vm175_vm2, %v5490_v30 }
0x2840   :  { %13544 = vmatprep.mubr.msk.f32.mxu1 %vm14577_vm1, %v14576_v8 }
0x290a   :  { %v5326_v31 = vpop.f32.mrb[40].mxu0 }
0x290b   :  { %v13521_v59 = vpop.f32.mrb[41].mxu0  ;;  %13529 = vmatprep.mubr.msk.f32.mxu0 %vm175_vm2, %v5326_v31  ;;  %v12536_v31 = vld [vmem:[%s16243_s9 + $0x98] sm:$0xff] }
0x290c   :  { %v14094_v59 = vpack.c.bf16 %v12536_v31, %v12535_v29  ;;  %v12547_v31 = vld [vmem:[%s16245_s11 + $0x2] ss:$0 sm:$0xff] }
0x290e   :  { %v5402_v58 = vpop.f32.mrb[64].mxu1 }
0x290f   :  { %v13526_v32 = vpop.f32.mrb[65].mxu1  ;;  %13530 = vmatmul.mubr.msk.f32.vlgmr.msra.gmra.mrb[38].mxu0 %vm175_vm2, %v5402_v58  ;;  %v12537_v58 = vld [vmem:[%s16243_s9 + $0xa0] sm:$0xff] }
0x2910   :  { %13538 = vmatpush3.xpose.msk.msra.mxu0 %vm175_vm2, %v5570_v13  ;;  %13539 = vmatprep.mubr.msk.f32.mxu0 %vm14577_vm1, %v14576_v8  ;;  %v12534_v13 = vld [vmem:[%s16243_s9 + $0x88] sm:$0xff] }
0x2911   :  { %13547 = vmatprep.subr.mxu0 %v14576_v8  ;;  %v14090_v30 = vpack.c.bf16 %v12534_v13, %v12533_v28  ;;  %v12538_v32 = vld [vmem:[%s16243_s9 + $0xa8] sm:$0xff] }
0x2912   :  { %v5563_v35 = vpop.f32.mrb[66].mxu1 }
0x2913   :  { %v13536_v36 = vpop.f32.mrb[67].mxu1  ;;  %13540 = vmatmul.mubr.msk.f32.vlgmr.msra.gmra.mrb[42].mxu0 %vm175_vm2, %v5568_v34  ;;  %v5645_v37 = vsel %vm175_vm2, %v5563_v35, -inf  ;;  %v14098_v34 = vpack.c.bf16 %v12538_v32, %v12537_v58 }
0x2914   :  { %5646 = vmax.xlane.f32.xlu1 %v5645_v37  ;;  %13549 = vmatprep.mubr.msk.f32.mxu0 %vm14577_vm1, %v14576_v8 }
0x29a1   :  { %v5647_v38 = vpop.xlane.xlu1 %5646 }
0x29a2   :  { %v5651_v33 = vsub.f32 %v5563_v35, %v5647_v38 }
0x29a4   :  { %v5653_v39 = vmul.f32 1.442695, %v5651_v33 }
0x29a6   :  { %14362 = vpow2.f32 %v5653_v39 }
0x29b0   :  { %v14363_v5 = vpop.eup %14362 }
0x29b1   :  { %v5657_v42 = vsel %vm175_vm2, %v14363_v5, 0.0 }
0x29e6   :  { %v5641_v40 = vpop.f32.mrb[42].mxu0 }
0x29e7   :  { %v13541_v41 = vpop.f32.mrb[43].mxu0  ;;  %v5648_v7 = vsel %vm175_vm2, %v5641_v40, -inf }
0x29e8   :  { %5649 = vmax.xlane.f32.xlu0 %v5648_v7  ;;  %v12523_v41 = vld [vmem:[#allocation5 + $0x2] ss:$0 sm:$0xff] }
0x29ec   :  { %5658 = vadd.xlane.f32.xlu0 %v5657_v42 }
0x2a02   :  { %5667 = vrot.lane.b32.xlu0 %v15228_v52, %s16271_s29 }
0x2a75   :  { %v5650_v43 = vpop.xlane.xlu0 %5649 }
0x2a76   :  { %v5652_v44 = vsub.f32 %v5641_v40, %v5650_v43  ;;  %v12524_v43 = vld [vmem:[%s16240_s6 + $0x2] ss:$0 sm:$0xff] }
0x2a78   :  { %v5655_v45 = vmul.f32 1.442695, %v5652_v44 }
0x2a79   :  { %v5659_v48 = vpop.xlane.xlu0 %5658 }
0x2a7a   :  { %14364 = vpow2.f32 %v5655_v45 }
0x2a7b   :  { %14366 = vrcp.f32 %v5659_v48 }
0x2a7d   :  { %v5668_v49 = vpop.permute.xlu0 %5667 }
0x2a7e   :  { %13543 = vmatpush3.msra.mxu1 %v5668_v49 }
0x2a84   :  { %v14365_v51 = vpop.eup %14364 }
0x2a85   :  { %v14367_v53 = vpop.eup %14366  ;;  %v5660_v54 = vsel %vm175_vm2, %v14365_v51, 0.0 }
0x2a86   :  { %5661 = vadd.xlane.f32.xlu1 %v5660_v54  ;;  %v5664_v55 = vmul.f32 %v14367_v53, %v14363_v5  ;;  %v12540_v53 = vld [vmem:[%s16243_s9 + $0xb8] sm:$0xff] }
0x2a88   :  { %13545 = vmatmul.mubr.msk.f32.vlgmr.msra.gmra.mrb[68].mxu1 %vm175_vm2, %v5664_v55  ;;  %v12530_v55 = vld [vmem:[%s16242_s8 + $0x2] ss:$0 sm:$0xff] }
0x2a97   :  { %5743 = vrot.lane.b32.xlu1 %v15226_v50, %s16271_s29 }
0x2b13   :  { %v5662_v52 = vpop.xlane.xlu1 %5661 }
0x2b14   :  { %14368 = vrcp.f32 %v5662_v52 }
0x2b17   :  { %v5744_v57 = vpop.permute.xlu1 %5743 }
0x2b18   :  { %13548 = vmatpush3.msra.mxu0 %v5744_v57 }
0x2b19   :  { %13552 = vmatprep.subr.mxu0 %v12487_v56 }
0x2b1e   :  { %v14369_v60 = vpop.eup %14368 }
0x2b1f   :  { %v5666_v61 = vmul.f32 %v14369_v60, %v14365_v51  ;;  %v12539_v51 = vld [vmem:[%s16243_s9 + $0xb0] sm:$0xff] }
0x2b20   :  { %v14102_v54 = vpack.c.bf16 %v12540_v53, %v12539_v51 }
0x2b21   :  { %13550 = vmatmul.mubr.msk.f32.vlgmr.msra.gmra.mrb[44].mxu0 %vm175_vm2, %v5666_v61 }
0x2b22   :  { %13553 = vmatpush3.msra.mxu0 %v12487_v56 }
0x2b23   :  { %14091 = vmatprep.subr.bf16.mxu0 %v14090_v30 }
0x2b5b   :  { %v5739_v63 = vpop.f32.mrb[68].mxu1 }
0x2b5c   :  { %v13546_v1 = vpop.f32.mrb[69].mxu1  ;;  %13554 = vmatprep.mubr.msk.f32.mxu0 %vm175_vm2, %v5739_v63 }
0x2b5d   :  { %v12542_v1 = vld [vmem:[%s16244_s10 + $0x2] ss:$0 sm:$0xff] }
0x2bf4   :  { %v5815_v2 = vpop.f32.mrb[44].mxu0 }
0x2bf5   :  { %v13551_v50 = vpop.f32.mrb[45].mxu0  ;;  %13555 = vmatmul.mubr.msk.f32.vlgmr.msra.gmra.mrb[38].mxu0 %vm175_vm2, %v5815_v2 }
0x2bf6   :  { %14093 = vmatpush3.bf16.msra.mxu0 %v14090_v30 }
0x2bf7   :  { %14095 = vmatprep.subr.bf16.mxu0 %v14094_v59 }
0x2bfa   :  { %14097 = vmatpush3.bf16.msra.mxu0 %v14094_v59 }
0x2bfb   :  { %14099 = vmatprep.subr.bf16.mxu0 %v14098_v34 }
0x2bfe   :  { %14101 = vmatpush3.bf16.msra.mxu0 %v14098_v34  ;;  %v12548_v34 = vld [vmem:[%s16246_s12 + $0x2] ss:$0 sm:$0xff] }
0x2bff   :  { %14103 = vmatprep.subr.bf16.mxu0 %v14102_v54 }
0x2c02   :  { %14105 = vmatpush3.bf16.msra.mxu0 %v14102_v54 }
0x2c03   :  { %13608 = vmatprep.subr.mxu0 %v14576_v8 }
0x2cc8   :  { %v13556_v0 = vpop.f32.mrb[38].mxu0 }
0x2cc9   :  { %v5911_v4 = vadd.f32 %v13556_v0, %v12521_v3  ;;  %v5891_v6 = vpop.f32.mrb[39].mxu0 }
0x2cca   :  { %v5910_v9 = vadd.f32 %v12521_v3, %v5891_v6 }
0x2ccb   :  { %v5913_v10 = vadd.f32 %v5911_v4, %v15215_v47 }
0x2ccc   :  { %v5912_v11 = vadd.f32 %v5910_v9, %v15213_v46  ;;  %v12525_v46 = vld [vmem:[%s16241_s7 + $0x40] sm:$0xff] }
0x2ccd   :  { %v5921_v14 = vsel %vm86_vm0, %v5913_v10, 0.0  ;;  %v14082_v25 = vpack.c.bf16 %v12526_v23, %v12525_v46  ;;  %v12552_v23 = vld [vmem:[%s16235_s1 + $0x78] sm:$0xff] }
0x2cce   :  { %5922 = vadd.xlane.f32.xlu0 %v5921_v14  ;;  %v5918_v15 = vsel %vm86_vm0, %v5912_v11, 0.0 }
0x2ccf   :  { %5919 = vadd.xlane.f32.xlu1 %v5918_v15  ;;  %14083 = vmatprep.subr.bf16.mxu1 %v14082_v25 }
0x2cd0   :  { %14085 = vmatpush3.bf16.msra.mxu1 %v14082_v25 }
0x2cd1   :  { %14087 = vmatprep.subr.bf16.mxu1 %v14086_v27 }
0x2cd4   :  { %14089 = vmatpush3.bf16.msra.mxu1 %v14086_v27 }
0x2d5b   :  { %v5923_v62 = vpop.xlane.xlu0 %5922 }
0x2d5c   :  { %v5925_v16 = vmul.f32 0.03125, %v5923_v62  ;;  %v5920_v12 = vpop.xlane.xlu1 %5919 }
0x2d5d   :  { %v5924_v17 = vmul.f32 0.03125, %v5920_v12 }
0x2d5e   :  { %v5927_v18 = vsub.f32 %v5913_v10, %v5925_v16 }
0x2d5f   :  { %v5926_v19 = vsub.f32 %v5912_v11, %v5924_v17 }
0x2d60   :  { %v5929_v20 = vmul.f32 %v5927_v18, %v5927_v18 }
0x2d61   :  { %v5928_v21 = vmul.f32 %v5926_v19, %v5926_v19 }
0x2d62   :  { %v5933_v22 = vsel %vm86_vm0, %v5929_v20, 0.0 }
0x2d63   :  { %5934 = vadd.xlane.f32.xlu1 %v5933_v22  ;;  %v5930_v47 = vsel %vm86_vm0, %v5928_v21, 0.0  ;;  %v12549_v21 = vld [vmem:[%s16235_s1 + $0x60] sm:$0xff]  ;;  %v12550_v22 = vld [vmem:[%s16235_s1 + $0x68] sm:$0xff] }
0x2d64   :  { %5931 = vadd.xlane.f32.xlu0 %v5930_v47  ;;  %v12551_v47 = vld [vmem:[%s16235_s1 + $0x70] sm:$0xff]  ;;  %v14106_v46 = vpack.c.bf16 %v12550_v22, %v12549_v21 }
0x2d65   :  { %v14110_v24 = vpack.c.bf16 %v12552_v23, %v12551_v47 }
0x2d66   :  { %14107 = vmatprep.subr.bf16.mxu1 %v14106_v46 }
0x2df0   :  { %v5935_v35 = vpop.xlane.xlu1 %5934 }
0x2df1   :  { %v5937_v36 = vmul.f32 0.03125, %v5935_v35  ;;  %v5932_v37 = vpop.xlane.xlu0 %5931 }
0x2df2   :  { %v5936_v38 = vmul.f32 0.03125, %v5932_v37 }
0x2df3   :  { %v5939_v33 = vadd.f32 1e-05, %v5937_v36 }
0x2df4   :  { %v5938_v39 = vadd.f32 1e-05, %v5936_v38 }
0x2df5   :  { %14370 = vrsqrt.f32 %v5939_v33  ;;  %v12554_v33 = vld [vmem:[%s16236_s2 + $0x3] ss:$0 sm:$0xff] }
0x2df6   :  { %14372 = vrsqrt.f32 %v5938_v39 }
0x2dff   :  { %v14371_v40 = vpop.eup %14370 }
0x2e00   :  { %v14373_v7 = vpop.eup %14372  ;;  %v5943_v5 = vmul.f32 %v14371_v40, %v5927_v18 }
0x2e01   :  { %v5942_v42 = vmul.f32 %v14373_v7, %v5926_v19 }
0x2e02   :  { %v5951_v44 = vmul.f32 %v12523_v41, %v5943_v5 }
0x2e03   :  { %v5950_v45 = vmul.f32 %v12523_v41, %v5942_v42 }
0x2e04   :  { %v5959_v49 = vadd.f32 %v12524_v43, %v5951_v44 }
0x2e05   :  { %v5958_v48 = vadd.f32 %v12524_v43, %v5950_v45 }
0x2e07   :  { %13565 = vmatprep.mubr.msk.f32.mxu1 %vm86_vm0, %v5958_v48 }
0x2e08   :  { %13566 = vmatmul.mubr.msk.f32.vlgmr.msra.gmra.mrb[70].mxu1 %vm86_vm0, %v5959_v49 }
0x2e09   :  { %14109 = vmatpush3.bf16.msra.mxu1 %v14106_v46 }
0x2e0a   :  { %14111 = vmatprep.subr.bf16.mxu1 %v14110_v24 }
0x2e0d   :  { %14113 = vmatpush3.bf16.msra.mxu1 %v14110_v24 }
0x2e0e   :  { %13598 = vmatprep.subr.mxu1 %v14576_v8 }
0x2edb   :  { %v13567_v52 = vpop.f32.mrb[70].mxu1 }
0x2edc   :  { %v6051_v56 = vadd.f32 %v13567_v52, %v12530_v55  ;;  %v6045_v57 = vpop.f32.mrb[71].mxu1 }
0x2edd   :  { %v6046_v60 = vadd.f32 %v12530_v55, %v6045_v57 }
0x2ede   :  { %v6055_v63 = vmax.f32 %v6051_v56, 0.0 }
0x2edf   :  { %v6054_v61 = vmax.f32 %v6046_v60, 0.0 }
0x2ee1   :  { %13584 = vmatprep.mubr.msk.f32.mxu0 %vm1984_vm3, %v6054_v61 }
0x2ee2   :  { %13585 = vmatmul.mubr.msk.f32.vlgmr.msra.gmra.mrb[46].mxu0 %vm1984_vm3, %v6055_v63 }
0x2ee3   :  { %13610 = vmatprep.mubr.msk.f32.mxu0 %vm14577_vm1, %v14576_v8 }
0x2fb5   :  { %v13586_v2 = vpop.f32.mrb[46].mxu0 }
0x2fb6   :  { %v6151_v50 = vadd.f32 %v13586_v2, %v12542_v1  ;;  %v6145_v3 = vpop.f32.mrb[47].mxu0 }
0x2fb7   :  { %v6146_v0 = vadd.f32 %v12542_v1, %v6145_v3 }
0x2fb8   :  { %v6155_v4 = vadd.f32 %v6151_v50, %v5959_v49 }
0x2fb9   :  { %v6154_v6 = vadd.f32 %v6146_v0, %v5958_v48 }
0x2fba   :  { %v6163_v9 = vsel %vm86_vm0, %v6155_v4, 0.0 }
0x2fbb   :  { %6164 = vadd.xlane.f32.xlu1 %v6163_v9  ;;  %v6160_v10 = vsel %vm86_vm0, %v6154_v6, 0.0 }
0x2fbc   :  { %6161 = vadd.xlane.f32.xlu0 %v6160_v10 }
0x3048   :  { %v6165_v11 = vpop.xlane.xlu1 %6164 }
0x3049   :  { %v6167_v14 = vmul.f32 0.03125, %v6165_v11  ;;  %v6162_v15 = vpop.xlane.xlu0 %6161 }
0x304a   :  { %v6166_v62 = vmul.f32 0.03125, %v6162_v15 }
0x304b   :  { %v6169_v16 = vsub.f32 %v6155_v4, %v6167_v14 }
0x304c   :  { %v6168_v12 = vsub.f32 %v6154_v6, %v6166_v62 }
0x304d   :  { %v6171_v17 = vmul.f32 %v6169_v16, %v6169_v16 }
0x304e   :  { %v6170_v18 = vmul.f32 %v6168_v12, %v6168_v12 }
0x304f   :  { %v6175_v19 = vsel %vm86_vm0, %v6171_v17, 0.0 }
0x3050   :  { %6176 = vadd.xlane.f32.xlu1 %v6175_v19  ;;  %v6172_v20 = vsel %vm86_vm0, %v6170_v18, 0.0 }
0x3051   :  { %6173 = vadd.xlane.f32.xlu0 %v6172_v20 }
0x30dd   :  { %v6177_v25 = vpop.xlane.xlu1 %6176 }
0x30de   :  { %v6179_v26 = vmul.f32 0.03125, %v6177_v25  ;;  %v6174_v27 = vpop.xlane.xlu0 %6173 }
0x30df   :  { %v6178_v28 = vmul.f32 0.03125, %v6174_v27 }
0x30e0   :  { %v6181_v13 = vadd.f32 1e-05, %v6179_v26 }
0x30e1   :  { %v6180_v29 = vadd.f32 1e-05, %v6178_v28 }
0x30e2   :  { %14374 = vrsqrt.f32 %v6181_v13 }
0x30e3   :  { %14376 = vrsqrt.f32 %v6180_v29 }
0x30ec   :  { %v14375_v30 = vpop.eup %14374 }
0x30ed   :  { %v14377_v59 = vpop.eup %14376  ;;  %v6185_v58 = vmul.f32 %v14375_v30, %v6169_v16 }
0x30ee   :  { %v6184_v32 = vmul.f32 %v14377_v59, %v6168_v12 }
0x30ef   :  { %v6193_v35 = vmul.f32 %v12547_v31, %v6185_v58 }
0x30f0   :  { %v6192_v36 = vmul.f32 %v12547_v31, %v6184_v32 }
0x30f1   :  { %v15470_v38 = vadd.f32 %v12548_v34, %v6193_v35 }
0x30f2   :  { %v15468_v37 = vadd.f32 %v12548_v34, %v6192_v36 }
0x30f4   :  { %13595 = vmatprep.mubr.msk.f32.mxu1 %vm86_vm0, %v15468_v37 }
0x30f5   :  { %13596 = vmatmul.mubr.msk.f32.vlgmr.msra.gmra.mrb[72].mxu1 %vm86_vm0, %v15470_v38 }
0x30f6   :  { %13600 = vmatprep.mubr.msk.f32.mxu1 %vm14577_vm1, %v14576_v8 }
0x31c8   :  { %v13597_v39 = vpop.f32.mrb[72].mxu1 }
0x31c9   :  { %v15481_v40 = vadd.f32 %v13597_v39, %v12554_v33  ;;  %v6287_v41 = vpop.f32.mrb[73].mxu1 }
0x31ca   :  { %v15483_v7 = vadd.f32 %v12554_v33, %v6287_v41 }
0x31cb   :  { %6379 = vrot.lane.b32.xlu1 %v15481_v40, %s14578_s30 }
0x31cc   :  { %6302 = vrot.lane.b32.xlu0 %v15483_v7, %s14578_s30 }
0x323d   :  { %v6380_v42 = vpop.permute.xlu1 %6379 }
0x323e   :  { %v6303_v5 = vpop.permute.xlu0 %6302 }
0x323f   :  { %13599 = vmatpush3.xpose.msk.msra.mxu1 %vm175_vm2, %v6303_v5 }
0x3240   :  { %13603 = vmatprep.subr.mxu1 %v14576_v8 }
0x3242   :  { %13601 = vmatmul.mubr.msk.f32.vlgmr.msra.gmra.mrb[74].mxu1 %vm175_vm2, %v15483_v7 }
0x3243   :  { %13604 = vmatpush3.xpose.msk.msra.mxu1 %vm175_vm2, %v6380_v42  ;;  %13605 = vmatprep.mubr.msk.f32.mxu1 %vm14577_vm1, %v14576_v8 }
0x3244   :  { %13613 = vmatprep.subr.mxu1 %v14576_v8 }
0x3246   :  { %13606 = vmatmul.mubr.msk.f32.vlgmr.msra.gmra.mrb[76].mxu1 %vm175_vm2, %v15481_v40 }
0x3247   :  { %13615 = vmatprep.mubr.msk.f32.mxu1 %vm14577_vm1, %v14576_v8 }
0x3315   :  { %v6374_v43 = vpop.f32.mrb[74].mxu1 }
0x3316   :  { %v13602_v44 = vpop.f32.mrb[75].mxu1  ;;  %v6455_v56 = vsel %vm175_vm2, %v6374_v43, -inf }
0x3319   :  { %v6451_v45 = vpop.f32.mrb[76].mxu1 }
0x331a   :  { %v13607_v48 = vpop.f32.mrb[77].mxu1  ;;  %v6458_v49 = vsel %vm175_vm2, %v6451_v45, -inf }
0x331b   :  { %6459 = vmax.xlane.f32.xlu1 %v6458_v49 }
0x332c   :  { %6709 = vrot.lane.b32.xlu1 %v15481_v40, %s16268_s0 }
0x3330   :  { %6707 = vrot.lane.b32.xlu1 %v15481_v40, %s16266_s15 }
0x33a8   :  { %v6460_v51 = vpop.xlane.xlu1 %6459 }
0x33a9   :  { %v6462_v53 = vsub.f32 %v6451_v45, %v6460_v51 }
0x33ab   :  { %v6465_v54 = vmul.f32 1.442695, %v6462_v53 }
0x33ac   :  { %v6710_v63 = vpop.permute.xlu1 %6709 }
0x33ad   :  { %14378 = vpow2.f32 %v6465_v54 }
0x33b0   :  { %v6708_v2 = vpop.permute.xlu1 %6707 }
0x33b7   :  { %v14379_v55 = vpop.eup %14378 }
0x33b8   :  { %v6470_v52 = vsel %vm175_vm2, %v14379_v55, 0.0 }
0x33b9   :  { %6471 = vadd.xlane.f32.xlu0 %v6470_v52  ;;  %v12558_v52 = vld [vmem:[%s16237_s3 + $0x68] sm:$0xff] }
0x33cf   :  { %6553 = vrot.lane.b32.xlu0 %v15481_v40, %s16264_s14 }
0x33ee   :  { %6456 = vmax.xlane.f32.xlu0 %v6455_v56  ;;  %v12557_v56 = vld [vmem:[%s16237_s3 + $0x60] sm:$0xff] }
0x3404   :  { %6477 = vrot.lane.b32.xlu0 %v15483_v7, %s16264_s14 }
0x3408   :  { %6629 = vrot.lane.b32.xlu0 %v15483_v7, %s16266_s15 }
0x3446   :  { %v6472_v57 = vpop.xlane.xlu0 %6471 }
0x3447   :  { %14380 = vrcp.f32 %v6472_v57 }
0x344a   :  { %v6554_v60 = vpop.permute.xlu0 %6553 }
0x344b   :  { %13614 = vmatpush3.msra.mxu1 %v6554_v60 }
0x344c   :  { %13623 = vmatprep.subr.mxu1 %v14576_v8 }
0x3451   :  { %v14381_v61 = vpop.eup %14380 }
0x3452   :  { %v6476_v1 = vmul.f32 %v14381_v61, %v14379_v55 }
0x3454   :  { %13616 = vmatmul.mubr.msk.f32.vlgmr.msra.gmra.mrb[78].mxu1 %vm175_vm2, %v6476_v1 }
0x3455   :  { %13624 = vmatpush3.xpose.msk.msra.mxu1 %vm175_vm2, %v6710_v63  ;;  %13625 = vmatprep.mubr.msk.f32.mxu1 %vm14577_vm1, %v14576_v8 }
0x3456   :  { %13633 = vmatprep.subr.mxu1 %v14576_v8 }
0x3458   :  { %13626 = vmatmul.mubr.msk.f32.vlgmr.msra.gmra.mrb[80].mxu1 %vm175_vm2, %v6708_v2 }
0x3459   :  { %13635 = vmatprep.mubr.msk.f32.mxu1 %vm14577_vm1, %v14576_v8 }
0x347b   :  { %v6457_v50 = vpop.xlane.xlu0 %6456 }
0x347c   :  { %v6461_v3 = vsub.f32 %v6374_v43, %v6457_v50 }
0x347e   :  { %v6463_v0 = vmul.f32 1.442695, %v6461_v3 }
0x347f   :  { %v6478_v4 = vpop.permute.xlu0 %6477 }
0x3480   :  { %14382 = vpow2.f32 %v6463_v0  ;;  %13609 = vmatpush3.msra.mxu0 %v6478_v4 }
0x3481   :  { %13618 = vmatprep.subr.mxu0 %v14576_v8 }
0x3483   :  { %v6630_v12 = vpop.permute.xlu0 %6629 }
0x348a   :  { %v14383_v6 = vpop.eup %14382 }
0x348b   :  { %v6467_v9 = vsel %vm175_vm2, %v14383_v6, 0.0 }
0x348c   :  { %6468 = vadd.xlane.f32.xlu1 %v6467_v9 }
0x349d   :  { %6631 = vrot.lane.b32.xlu1 %v15483_v7, %s16268_s0 }
0x3519   :  { %v6469_v10 = vpop.xlane.xlu1 %6468 }
0x351a   :  { %14384 = vrcp.f32 %v6469_v10  ;;  %v12559_v10 = vld [vmem:[%s16237_s3 + $0x70] sm:$0xff] }
0x351d   :  { %v6632_v15 = vpop.permute.xlu1 %6631 }
0x3524   :  { %v14385_v11 = vpop.eup %14384 }
0x3525   :  { %v6474_v14 = vmul.f32 %v14385_v11, %v14383_v6 }
0x3527   :  { %13611 = vmatmul.mubr.msk.f32.vlgmr.msra.gmra.mrb[48].mxu0 %vm175_vm2, %v6474_v14  ;;  %v15528_v62 = vpop.f32.mrb[78].mxu1 }
0x3528   :  { %13619 = vmatpush3.xpose.msk.msra.mxu0 %vm175_vm2, %v6632_v15  ;;  %v13617_v16 = vpop.f32.mrb[79].mxu1  ;;  %13620 = vmatprep.mubr.msk.f32.mxu0 %vm14577_vm1, %v14576_v8 }
0x3529   :  { %13628 = vmatprep.subr.mxu0 %v14576_v8 }
0x352b   :  { %13621 = vmatmul.mubr.msk.f32.vlgmr.msra.gmra.mrb[50].mxu0 %vm175_vm2, %v6630_v12  ;;  %v6781_v17 = vpop.f32.mrb[80].mxu1 }
0x352c   :  { %v13627_v18 = vpop.f32.mrb[81].mxu1  ;;  %v6788_v19 = vsel %vm175_vm2, %v6781_v17, -inf  ;;  %13630 = vmatprep.mubr.msk.f32.mxu0 %vm14577_vm1, %v14576_v8 }
0x352d   :  { %6789 = vmax.xlane.f32.xlu1 %v6788_v19 }
0x353e   :  { %7123 = vrot.lane.b32.xlu1 %v15483_v7, %s16262_s26 }
0x3542   :  { %7121 = vrot.lane.b32.xlu1 %v15483_v7, %s16274_s23 }
0x3546   :  { %7199 = vrot.lane.b32.xlu1 %v15481_v40, %s16274_s23 }
0x35ba   :  { %v6790_v20 = vpop.xlane.xlu1 %6789 }
0x35bb   :  { %v6792_v21 = vsub.f32 %v6781_v17, %v6790_v20 }
0x35bd   :  { %v6795_v22 = vmul.f32 1.442695, %v6792_v21 }
0x35be   :  { %v7124_v29 = vpop.permute.xlu1 %7123 }
0x35bf   :  { %14386 = vpow2.f32 %v6795_v22 }
0x35c2   :  { %v7122_v59 = vpop.permute.xlu1 %7121 }
0x35c6   :  { %v7200_v32 = vpop.permute.xlu1 %7199 }
0x35c9   :  { %v14387_v47 = vpop.eup %14386 }
0x35ca   :  { %v6800_v46 = vsel %vm175_vm2, %v14387_v47, 0.0 }
0x35cb   :  { %6801 = vadd.xlane.f32.xlu0 %v6800_v46 }
0x35e1   :  { %6883 = vrot.lane.b32.xlu0 %v15481_v40, %s16275_s22 }
0x35e5   :  { %7201 = vrot.lane.b32.xlu0 %v15481_v40, %s16262_s26 }
0x35fa   :  { %v15549_v23 = vpop.f32.mrb[48].mxu0 }
0x35fb   :  { %v13612_v24 = vpop.f32.mrb[49].mxu0 }
0x35fe   :  { %v6703_v25 = vpop.f32.mrb[50].mxu0 }
0x35ff   :  { %v13622_v26 = vpop.f32.mrb[51].mxu0  ;;  %v6785_v27 = vsel %vm175_vm2, %v6703_v25, -inf }
0x3604   :  { %6786 = vmax.xlane.f32.xlu0 %v6785_v27 }
0x361a   :  { %6807 = vrot.lane.b32.xlu0 %v15483_v7, %s16275_s22 }
0x361e   :  { %7299 = vrot.lane.b32.xlu0 %v15483_v7, %s16272_s24 }
0x3622   :  { %7536 = vrot.lane.b32.xlu0 %v15483_v7, %s16273_s25 }
0x3626   :  { %7614 = vrot.lane.b32.xlu0 %v15481_v40, %s16273_s25 }
0x362a   :  { %7534 = vrot.lane.b32.xlu0 %v15483_v7, %s16270_s27 }
0x362e   :  { %7612 = vrot.lane.b32.xlu0 %v15481_v40, %s16270_s27 }
0x3658   :  { %v6802_v28 = vpop.xlane.xlu0 %6801 }
0x3659   :  { %14388 = vrcp.f32 %v6802_v28 }
0x365c   :  { %v6884_v13 = vpop.permute.xlu0 %6883 }
0x365d   :  { %13634 = vmatpush3.msra.mxu1 %v6884_v13 }
0x365e   :  { %13648 = vmatprep.subr.mxu1 %v14576_v8 }
0x3660   :  { %v7202_v58 = vpop.permute.xlu0 %7201 }
0x3663   :  { %v14389_v30 = vpop.eup %14388 }
0x3664   :  { %v6806_v31 = vmul.f32 %v14389_v30, %v14387_v47 }
0x3666   :  { %13636 = vmatmul.mubr.msk.f32.vlgmr.msra.gmra.mrb[82].mxu1 %vm175_vm2, %v6806_v31 }
0x3667   :  { %13649 = vmatpush3.xpose.msk.msra.mxu1 %vm175_vm2, %v7124_v29  ;;  %13650 = vmatprep.mubr.msk.f32.mxu1 %vm14577_vm1, %v14576_v8 }
0x3668   :  { %13653 = vmatprep.subr.mxu1 %v14576_v8 }
0x366a   :  { %13651 = vmatmul.mubr.msk.f32.vlgmr.msra.gmra.mrb[84].mxu1 %vm175_vm2, %v7122_v59 }
0x366b   :  { %13654 = vmatpush3.xpose.msk.msra.mxu1 %vm175_vm2, %v7202_v58  ;;  %13655 = vmatprep.mubr.msk.f32.mxu1 %vm14577_vm1, %v14576_v8 }
0x366c   :  { %13663 = vmatprep.subr.mxu1 %v14576_v8 }
0x366e   :  { %13656 = vmatmul.mubr.msk.f32.vlgmr.msra.gmra.mrb[86].mxu1 %vm175_vm2, %v7200_v32 }
0x366f   :  { %13665 = vmatprep.mubr.msk.f32.mxu1 %vm14577_vm1, %v14576_v8 }
0x3691   :  { %v6787_v34 = vpop.xlane.xlu0 %6786 }
0x3692   :  { %v6791_v35 = vsub.f32 %v6703_v25, %v6787_v34 }
0x3694   :  { %v6793_v36 = vmul.f32 1.442695, %v6791_v35 }
0x3695   :  { %v6808_v33 = vpop.permute.xlu0 %6807 }
0x3696   :  { %14390 = vpow2.f32 %v6793_v36  ;;  %13629 = vmatpush3.msra.mxu0 %v6808_v33 }
0x3697   :  { %13638 = vmatprep.subr.mxu0 %v12558_v52 }
0x3699   :  { %v7300_v11 = vpop.permute.xlu0 %7299 }
0x369d   :  { %v7537_v12 = vpop.permute.xlu0 %7536 }
0x36a0   :  { %v14391_v39 = vpop.eup %14390 }
0x36a1   :  { %v6797_v41 = vsel %vm175_vm2, %v14391_v39, 0.0 }
0x36a2   :  { %6798 = vadd.xlane.f32.xlu1 %v6797_v41 }
0x372f   :  { %v6799_v5 = vpop.xlane.xlu1 %6798 }
0x3730   :  { %14392 = vrcp.f32 %v6799_v5 }
0x3739   :  { %v6955_v42 = vpop.f32.mrb[82].mxu1 }
0x373a   :  { %v14393_v43 = vpop.eup %14392  ;;  %v13637_v44 = vpop.f32.mrb[83].mxu1 }
0x373b   :  { %v6804_v45 = vmul.f32 %v14393_v43, %v14391_v39  ;;  %v12560_v44 = vld [vmem:[%s16237_s3 + $0x78] sm:$0xff] }
0x373d   :  { %13631 = vmatmul.mubr.msk.f32.vlgmr.msra.gmra.mrb[52].mxu0 %vm175_vm2, %v6804_v45  ;;  %v7195_v48 = vpop.f32.mrb[84].mxu1 }
0x373e   :  { %v13652_v49 = vpop.f32.mrb[85].mxu1  ;;  %v7277_v51 = vsel %vm175_vm2, %v7195_v48, -inf  ;;  %13639 = vmatpush3.msra.mxu0 %v12558_v52 }
0x373f   :  { %7278 = vmax.xlane.f32.xlu1 %v7277_v51  ;;  %13643 = vmatprep.subr.mxu0 %v12557_v56 }
0x3741   :  { %v7273_v53 = vpop.f32.mrb[86].mxu1 }
0x3742   :  { %v13657_v54 = vpop.f32.mrb[87].mxu1  ;;  %v7280_v55 = vsel %vm175_vm2, %v7273_v53, -inf }
0x3743   :  { %7281 = vmax.xlane.f32.xlu1 %v7280_v55  ;;  %v12594_v55 = vld [vmem:[%s16238_s4 + $0x3] ss:$0 sm:$0xff] }
0x37cc   :  { %v7279_v57 = vpop.xlane.xlu1 %7278 }
0x37cd   :  { %v7283_v60 = vsub.f32 %v7195_v48, %v7279_v57 }
0x37cf   :  { %v7285_v61 = vmul.f32 1.442695, %v7283_v60 }
0x37d0   :  { %v7282_v63 = vpop.xlane.xlu1 %7281 }
0x37d1   :  { %14394 = vpow2.f32 %v7285_v61  ;;  %v7284_v1 = vsub.f32 %v7273_v53, %v7282_v63 }
0x37d3   :  { %v7287_v2 = vmul.f32 1.442695, %v7284_v1 }
0x37d5   :  { %14396 = vpow2.f32 %v7287_v2 }
0x37db   :  { %v14395_v50 = vpop.eup %14394 }
0x37dc   :  { %v7289_v3 = vsel %vm175_vm2, %v14395_v50, 0.0 }
0x37dd   :  { %7290 = vadd.xlane.f32.xlu1 %v7289_v3 }
0x37df   :  { %v14397_v0 = vpop.eup %14396 }
0x37e0   :  { %v7292_v4 = vsel %vm175_vm2, %v14397_v0, 0.0 }
0x37e1   :  { %7293 = vadd.xlane.f32.xlu1 %v7292_v4 }
0x37f2   :  { %7375 = vrot.lane.b32.xlu1 %v15481_v40, %s16272_s24 }
0x3810   :  { %v6879_v6 = vpop.f32.mrb[52].mxu0 }
0x3811   :  { %v13632_v9 = vpop.f32.mrb[53].mxu0  ;;  %13640 = vmatprep.mubr.msk.f32.mxu0 %vm175_vm2, %v6879_v6 }
0x3812   :  { %13641 = vmatmul.mubr.msk.f32.vlgmr.msra.gmra.mrb[54].mxu0 %vm175_vm2, %v6955_v42 }
0x3813   :  { %13645 = vmatprep.mubr.msk.f32.mxu0 %vm175_vm2, %v15549_v23  ;;  %13644 = vmatpush3.msra.mxu0 %v12557_v56 }
0x3814   :  { %13658 = vmatprep.subr.mxu0 %v14576_v8 }
0x381a   :  { %13646 = vmatmul.mubr.msk.f32.vlgmr.msra.gmra.mrb[54].mxu0 %vm175_vm2, %v15528_v62  ;;  %v7615_v62 = vpop.permute.xlu0 %7614 }
0x381b   :  { %13659 = vmatpush3.msra.mxu0 %v7300_v11  ;;  %13660 = vmatprep.mubr.msk.f32.mxu0 %vm14577_vm1, %v14576_v8 }
0x381c   :  { %13668 = vmatprep.subr.mxu0 %v12559_v10 }
0x381e   :  { %v7535_v21 = vpop.permute.xlu0 %7534 }
0x3822   :  { %v7613_v24 = vpop.permute.xlu0 %7612 }
0x386a   :  { %v7291_v14 = vpop.xlane.xlu1 %7290 }
0x386b   :  { %14398 = vrcp.f32 %v7291_v14 }
0x386e   :  { %v7294_v15 = vpop.xlane.xlu1 %7293 }
0x386f   :  { %14400 = vrcp.f32 %v7294_v15  ;;  %v12599_v15 = vld [vmem:[%s16241_s7 + $0x68] sm:$0xff] }
0x3872   :  { %v7376_v16 = vpop.permute.xlu1 %7375 }
0x3873   :  { %13664 = vmatpush3.msra.mxu1 %v7376_v16 }
0x3874   :  { %13673 = vmatprep.subr.mxu1 %v14576_v8 }
0x3875   :  { %v14399_v17 = vpop.eup %14398 }
0x3876   :  { %v7296_v18 = vmul.f32 %v14399_v17, %v14395_v50  ;;  %v12601_v17 = vld [vmem:[%s16241_s7 + $0x78] sm:$0xff] }
0x3878   :  { %13661 = vmatmul.mubr.msk.f32.vlgmr.msra.gmra.mrb[56].mxu0 %vm175_vm2, %v7296_v18 }
0x3879   :  { %v14401_v19 = vpop.eup %14400  ;;  %13669 = vmatpush3.msra.mxu0 %v12559_v10 }
0x387a   :  { %v7298_v20 = vmul.f32 %v14401_v19, %v14397_v0  ;;  %13678 = vmatprep.subr.mxu0 %v14576_v8  ;;  %v12606_v19 = vld [vmem:[%s16243_s9 + $0xc0] sm:$0xff] }
0x387c   :  { %13666 = vmatmul.mubr.msk.f32.vlgmr.msra.gmra.mrb[88].mxu1 %vm175_vm2, %v7298_v20  ;;  %v12608_v20 = vld [vmem:[%s16243_s9 + $0xd0] sm:$0xff] }
0x387d   :  { %13674 = vmatpush3.xpose.msk.msra.mxu1 %vm175_vm2, %v7537_v12  ;;  %13675 = vmatprep.mubr.msk.f32.mxu1 %vm14577_vm1, %v14576_v8  ;;  %v12600_v12 = vld [vmem:[%s16241_s7 + $0x70] sm:$0xff] }
0x387e   :  { %13683 = vmatprep.subr.mxu1 %v14576_v8  ;;  %v14118_v18 = vpack.c.bf16 %v12601_v17, %v12600_v12 }
0x3880   :  { %13676 = vmatmul.mubr.msk.f32.vlgmr.msra.gmra.mrb[90].mxu1 %vm175_vm2, %v7535_v21 }
0x3881   :  { %13685 = vmatprep.mubr.msk.f32.mxu1 %vm14577_vm1, %v14576_v8 }
0x394b   :  { %v7371_v22 = vpop.f32.mrb[56].mxu0 }
0x394c   :  { %v13662_v47 = vpop.f32.mrb[57].mxu0  ;;  %13670 = vmatprep.mubr.msk.f32.mxu0 %vm175_vm2, %v7371_v22  ;;  %v12609_v22 = vld [vmem:[%s16243_s9 + $0xd8] sm:$0xff] }
0x394d   :  { %v14126_v47 = vpack.c.bf16 %v12609_v22, %v12608_v20  ;;  %v12620_v22 = vld [vmem:[%s16245_s11 + $0x3] ss:$0 sm:$0xff] }
0x394f   :  { %v7447_v46 = vpop.f32.mrb[88].mxu1 }
0x3950   :  { %v13667_v23 = vpop.f32.mrb[89].mxu1  ;;  %13671 = vmatmul.mubr.msk.f32.vlgmr.msra.gmra.mrb[54].mxu0 %vm175_vm2, %v7447_v46  ;;  %v12610_v46 = vld [vmem:[%s16243_s9 + $0xe0] sm:$0xff] }
0x3951   :  { %13679 = vmatpush3.xpose.msk.msra.mxu0 %vm175_vm2, %v7615_v62  ;;  %13680 = vmatprep.mubr.msk.f32.mxu0 %vm14577_vm1, %v14576_v8  ;;  %v12607_v62 = vld [vmem:[%s16243_s9 + $0xc8] sm:$0xff] }
0x3952   :  { %13688 = vmatprep.subr.mxu0 %v14576_v8  ;;  %v14122_v21 = vpack.c.bf16 %v12607_v62, %v12606_v19  ;;  %v12611_v23 = vld [vmem:[%s16243_s9 + $0xe8] sm:$0xff] }
0x3953   :  { %v7608_v25 = vpop.f32.mrb[90].mxu1 }
0x3954   :  { %v13677_v26 = vpop.f32.mrb[91].mxu1  ;;  %13681 = vmatmul.mubr.msk.f32.vlgmr.msra.gmra.mrb[58].mxu0 %vm175_vm2, %v7613_v24  ;;  %v7690_v27 = vsel %vm175_vm2, %v7608_v25, -inf  ;;  %v14130_v24 = vpack.c.bf16 %v12611_v23, %v12610_v46 }
0x3955   :  { %7691 = vmax.xlane.f32.xlu1 %v7690_v27  ;;  %13690 = vmatprep.mubr.msk.f32.mxu0 %vm14577_vm1, %v14576_v8 }
0x39e2   :  { %v7692_v28 = vpop.xlane.xlu1 %7691 }
0x39e3   :  { %v7696_v13 = vsub.f32 %v7608_v25, %v7692_v28 }
0x39e5   :  { %v7698_v29 = vmul.f32 1.442695, %v7696_v13 }
0x39e7   :  { %14402 = vpow2.f32 %v7698_v29 }
0x39f1   :  { %v14403_v58 = vpop.eup %14402 }
0x39f2   :  { %v7702_v32 = vsel %vm175_vm2, %v14403_v58, 0.0 }
0x3a27   :  { %v7686_v30 = vpop.f32.mrb[58].mxu0 }
0x3a28   :  { %v13682_v31 = vpop.f32.mrb[59].mxu0  ;;  %v7693_v59 = vsel %vm175_vm2, %v7686_v30, -inf }
0x3a29   :  { %7694 = vmax.xlane.f32.xlu0 %v7693_v59  ;;  %v12596_v31 = vld [vmem:[#allocation5 + $0x3] ss:$0 sm:$0xff] }
0x3a2d   :  { %7703 = vadd.xlane.f32.xlu0 %v7702_v32 }
0x3a43   :  { %7712 = vrot.lane.b32.xlu0 %v15483_v7, %s16271_s29 }
0x3ab6   :  { %v7695_v34 = vpop.xlane.xlu0 %7694 }
0x3ab7   :  { %v7697_v35 = vsub.f32 %v7686_v30, %v7695_v34  ;;  %v12597_v34 = vld [vmem:[%s16240_s6 + $0x3] ss:$0 sm:$0xff] }
0x3ab9   :  { %v7700_v36 = vmul.f32 1.442695, %v7697_v35 }
0x3aba   :  { %v7704_v33 = vpop.xlane.xlu0 %7703 }
0x3abb   :  { %14404 = vpow2.f32 %v7700_v36 }
0x3abc   :  { %14406 = vrcp.f32 %v7704_v33 }
0x3abe   :  { %v7713_v39 = vpop.permute.xlu0 %7712 }
0x3abf   :  { %13684 = vmatpush3.msra.mxu1 %v7713_v39 }
0x3ac5   :  { %v14405_v41 = vpop.eup %14404 }
0x3ac6   :  { %v14407_v5 = vpop.eup %14406  ;;  %v7705_v42 = vsel %vm175_vm2, %v14405_v41, 0.0 }
0x3ac7   :  { %7706 = vadd.xlane.f32.xlu1 %v7705_v42  ;;  %v7709_v43 = vmul.f32 %v14407_v5, %v14403_v58  ;;  %v12613_v5 = vld [vmem:[%s16243_s9 + $0xf8] sm:$0xff] }
0x3ac9   :  { %13686 = vmatmul.mubr.msk.f32.vlgmr.msra.gmra.mrb[92].mxu1 %vm175_vm2, %v7709_v43  ;;  %v12603_v43 = vld [vmem:[%s16242_s8 + $0x3] ss:$0 sm:$0xff] }
0x3ad8   :  { %7788 = vrot.lane.b32.xlu1 %v15481_v40, %s16271_s29 }
0x3b54   :  { %v7707_v7 = vpop.xlane.xlu1 %7706 }
0x3b55   :  { %14408 = vrcp.f32 %v7707_v7 }
0x3b58   :  { %v7789_v45 = vpop.permute.xlu1 %7788 }
0x3b59   :  { %13689 = vmatpush3.msra.mxu0 %v7789_v45 }
0x3b5a   :  { %13693 = vmatprep.subr.mxu0 %v12560_v44 }
0x3b5f   :  { %v14409_v48 = vpop.eup %14408 }
0x3b60   :  { %v7711_v49 = vmul.f32 %v14409_v48, %v14405_v41  ;;  %v12612_v41 = vld [vmem:[%s16243_s9 + $0xf0] sm:$0xff] }
0x3b61   :  { %v14134_v42 = vpack.c.bf16 %v12613_v5, %v12612_v41 }
0x3b62   :  { %13691 = vmatmul.mubr.msk.f32.vlgmr.msra.gmra.mrb[60].mxu0 %vm175_vm2, %v7711_v49 }
0x3b63   :  { %13694 = vmatpush3.msra.mxu0 %v12560_v44 }
0x3b64   :  { %14123 = vmatprep.subr.bf16.mxu0 %v14122_v21 }
0x3b9c   :  { %v7784_v51 = vpop.f32.mrb[92].mxu1 }
0x3b9d   :  { %v13687_v53 = vpop.f32.mrb[93].mxu1  ;;  %13695 = vmatprep.mubr.msk.f32.mxu0 %vm175_vm2, %v7784_v51 }
0x3b9e   :  { %v12615_v53 = vld [vmem:[%s16244_s10 + $0x3] ss:$0 sm:$0xff] }
0x3c35   :  { %v7860_v54 = vpop.f32.mrb[60].mxu0 }
0x3c36   :  { %v13692_v40 = vpop.f32.mrb[61].mxu0  ;;  %13696 = vmatmul.mubr.msk.f32.vlgmr.msra.gmra.mrb[54].mxu0 %vm175_vm2, %v7860_v54 }
0x3c37   :  { %14125 = vmatpush3.bf16.msra.mxu0 %v14122_v21 }
0x3c38   :  { %14127 = vmatprep.subr.bf16.mxu0 %v14126_v47 }
0x3c3b   :  { %14129 = vmatpush3.bf16.msra.mxu0 %v14126_v47 }
0x3c3c   :  { %14131 = vmatprep.subr.bf16.mxu0 %v14130_v24 }
0x3c3f   :  { %14133 = vmatpush3.bf16.msra.mxu0 %v14130_v24  ;;  %v12621_v24 = vld [vmem:[%s16246_s12 + $0x3] ss:$0 sm:$0xff] }
0x3c40   :  { %14135 = vmatprep.subr.bf16.mxu0 %v14134_v42 }
0x3c43   :  { %14137 = vmatpush3.bf16.msra.mxu0 %v14134_v42 }
0x3c44   :  { %13749 = vmatprep.subr.mxu0 %v14576_v8 }
0x3d09   :  { %v13697_v52 = vpop.f32.mrb[54].mxu0 }
0x3d0a   :  { %v7956_v56 = vadd.f32 %v13697_v52, %v12594_v55  ;;  %v7936_v57 = vpop.f32.mrb[55].mxu0 }
0x3d0b   :  { %v7955_v60 = vadd.f32 %v12594_v55, %v7936_v57 }
0x3d0c   :  { %v7958_v61 = vadd.f32 %v7956_v56, %v15470_v38 }
0x3d0d   :  { %v7957_v63 = vadd.f32 %v7955_v60, %v15468_v37  ;;  %v12598_v37 = vld [vmem:[%s16241_s7 + $0x60] sm:$0xff] }
0x3d0e   :  { %v7966_v1 = vsel %vm86_vm0, %v7958_v61, 0.0  ;;  %v14114_v16 = vpack.c.bf16 %v12599_v15, %v12598_v37  ;;  %v12624_v37 = vld [vmem:[%s16235_s1 + $0x90] sm:$0xff]  ;;  %v12625_v15 = vld [vmem:[%s16235_s1 + $0x98] sm:$0xff] }
0x3d0f   :  { %7967 = vadd.xlane.f32.xlu0 %v7966_v1  ;;  %v7963_v2 = vsel %vm86_vm0, %v7957_v63, 0.0 }
0x3d10   :  { %7964 = vadd.xlane.f32.xlu1 %v7963_v2  ;;  %14115 = vmatprep.subr.bf16.mxu1 %v14114_v16 }
0x3d11   :  { %14117 = vmatpush3.bf16.msra.mxu1 %v14114_v16  ;;  %v14142_v16 = vpack.c.bf16 %v12625_v15, %v12624_v37 }
0x3d12   :  { %14119 = vmatprep.subr.bf16.mxu1 %v14118_v18 }
0x3d15   :  { %14121 = vmatpush3.bf16.msra.mxu1 %v14118_v18 }
0x3d9c   :  { %v7968_v50 = vpop.xlane.xlu0 %7967 }
0x3d9d   :  { %v7970_v3 = vmul.f32 0.03125, %v7968_v50  ;;  %v7965_v0 = vpop.xlane.xlu1 %7964 }
0x3d9e   :  { %v7969_v4 = vmul.f32 0.03125, %v7965_v0 }
0x3d9f   :  { %v7972_v6 = vsub.f32 %v7958_v61, %v7970_v3 }
0x3da0   :  { %v7971_v9 = vsub.f32 %v7957_v63, %v7969_v4 }
0x3da1   :  { %v7974_v10 = vmul.f32 %v7972_v6, %v7972_v6 }
0x3da2   :  { %v7973_v11 = vmul.f32 %v7971_v9, %v7971_v9 }
0x3da3   :  { %v7978_v14 = vsel %vm86_vm0, %v7974_v10, 0.0 }
0x3da4   :  { %7979 = vadd.xlane.f32.xlu1 %v7978_v14  ;;  %v7975_v38 = vsel %vm86_vm0, %v7973_v11, 0.0  ;;  %v12622_v11 = vld [vmem:[%s16235_s1 + $0x80] sm:$0xff]  ;;  %v12623_v14 = vld [vmem:[%s16235_s1 + $0x88] sm:$0xff] }
0x3da5   :  { %7976 = vadd.xlane.f32.xlu0 %v7975_v38  ;;  %v14138_v38 = vpack.c.bf16 %v12623_v14, %v12622_v11 }
0x3da7   :  { %14139 = vmatprep.subr.bf16.mxu1 %v14138_v38 }
0x3e31   :  { %v7980_v25 = vpop.xlane.xlu1 %7979 }
0x3e32   :  { %v7982_v26 = vmul.f32 0.03125, %v7980_v25  ;;  %v7977_v27 = vpop.xlane.xlu0 %7976 }
0x3e33   :  { %v7981_v28 = vmul.f32 0.03125, %v7977_v27 }
0x3e34   :  { %v7984_v13 = vadd.f32 1e-05, %v7982_v26 }
0x3e35   :  { %v7983_v29 = vadd.f32 1e-05, %v7981_v28 }
0x3e36   :  { %14410 = vrsqrt.f32 %v7984_v13  ;;  %v12627_v13 = vld [vmem:[%s16236_s2 + $0x4] ss:$0 sm:$0xff] }
0x3e37   :  { %14412 = vrsqrt.f32 %v7983_v29 }
0x3e40   :  { %v14411_v30 = vpop.eup %14410 }
0x3e41   :  { %v14413_v59 = vpop.eup %14412  ;;  %v7988_v58 = vmul.f32 %v14411_v30, %v7972_v6 }
0x3e42   :  { %v7987_v32 = vmul.f32 %v14413_v59, %v7971_v9 }
0x3e43   :  { %v7996_v35 = vmul.f32 %v12596_v31, %v7988_v58 }
0x3e44   :  { %v7995_v36 = vmul.f32 %v12596_v31, %v7987_v32 }
0x3e45   :  { %v8004_v39 = vadd.f32 %v12597_v34, %v7996_v35 }
0x3e46   :  { %v8003_v33 = vadd.f32 %v12597_v34, %v7995_v36 }
0x3e48   :  { %13706 = vmatprep.mubr.msk.f32.mxu1 %vm86_vm0, %v8003_v33 }
0x3e49   :  { %13707 = vmatmul.mubr.msk.f32.vlgmr.msra.gmra.mrb[94].mxu1 %vm86_vm0, %v8004_v39 }
0x3e4a   :  { %14141 = vmatpush3.bf16.msra.mxu1 %v14138_v38 }
0x3e4b   :  { %14143 = vmatprep.subr.bf16.mxu1 %v14142_v16 }
0x3e4e   :  { %14145 = vmatpush3.bf16.msra.mxu1 %v14142_v16 }
0x3e4f   :  { %13739 = vmatprep.subr.mxu1 %v14576_v8 }
0x3f1c   :  { %v13708_v7 = vpop.f32.mrb[94].mxu1 }
0x3f1d   :  { %v8096_v44 = vadd.f32 %v13708_v7, %v12603_v43  ;;  %v8090_v45 = vpop.f32.mrb[95].mxu1 }
0x3f1e   :  { %v8091_v48 = vadd.f32 %v12603_v43, %v8090_v45 }
0x3f1f   :  { %v8100_v51 = vmax.f32 %v8096_v44, 0.0 }
0x3f20   :  { %v8099_v49 = vmax.f32 %v8091_v48, 0.0 }
0x3f22   :  { %13725 = vmatprep.mubr.msk.f32.mxu0 %vm1984_vm3, %v8099_v49 }
0x3f23   :  { %13726 = vmatmul.mubr.msk.f32.vlgmr.msra.gmra.mrb[62].mxu0 %vm1984_vm3, %v8100_v51 }
0x3f24   :  { %13751 = vmatprep.mubr.msk.f32.mxu0 %vm14577_vm1, %v14576_v8 }
0x3ff6   :  { %v13727_v54 = vpop.f32.mrb[62].mxu0 }
0x3ff7   :  { %v8196_v40 = vadd.f32 %v13727_v54, %v12615_v53  ;;  %v8190_v55 = vpop.f32.mrb[63].mxu0 }
0x3ff8   :  { %v8191_v52 = vadd.f32 %v12615_v53, %v8190_v55 }
0x3ff9   :  { %v8200_v56 = vadd.f32 %v8196_v40, %v8004_v39 }
0x3ffa   :  { %v8199_v57 = vadd.f32 %v8191_v52, %v8003_v33 }
0x3ffb   :  { %v8208_v60 = vsel %vm86_vm0, %v8200_v56, 0.0 }
0x3ffc   :  { %8209 = vadd.xlane.f32.xlu1 %v8208_v60  ;;  %v8205_v61 = vsel %vm86_vm0, %v8199_v57, 0.0 }
0x3ffd   :  { %8206 = vadd.xlane.f32.xlu0 %v8205_v61 }
0x4089   :  { %v8210_v63 = vpop.xlane.xlu1 %8209 }
0x408a   :  { %v8212_v1 = vmul.f32 0.03125, %v8210_v63  ;;  %v8207_v2 = vpop.xlane.xlu0 %8206 }
0x408b   :  { %v8211_v50 = vmul.f32 0.03125, %v8207_v2 }
0x408c   :  { %v8214_v3 = vsub.f32 %v8200_v56, %v8212_v1 }
0x408d   :  { %v8213_v0 = vsub.f32 %v8199_v57, %v8211_v50 }
0x408e   :  { %v8216_v4 = vmul.f32 %v8214_v3, %v8214_v3 }
0x408f   :  { %v8215_v6 = vmul.f32 %v8213_v0, %v8213_v0 }
0x4090   :  { %v8220_v9 = vsel %vm86_vm0, %v8216_v4, 0.0 }
0x4091   :  { %8221 = vadd.xlane.f32.xlu1 %v8220_v9  ;;  %v8217_v10 = vsel %vm86_vm0, %v8215_v6, 0.0 }
0x4092   :  { %8218 = vadd.xlane.f32.xlu0 %v8217_v10 }
0x411e   :  { %v8222_v12 = vpop.xlane.xlu1 %8221 }
0x411f   :  { %v8224_v17 = vmul.f32 0.03125, %v8222_v12  ;;  %v8219_v18 = vpop.xlane.xlu0 %8218 }
0x4120   :  { %v8223_v19 = vmul.f32 0.03125, %v8219_v18 }
0x4121   :  { %v8226_v62 = vadd.f32 1e-05, %v8224_v17 }
0x4122   :  { %v8225_v20 = vadd.f32 1e-05, %v8223_v19 }
0x4123   :  { %14414 = vrsqrt.f32 %v8226_v62 }
0x4124   :  { %14416 = vrsqrt.f32 %v8225_v20 }
0x412d   :  { %v14415_v21 = vpop.eup %14414 }
0x412e   :  { %v14417_v47 = vpop.eup %14416  ;;  %v8230_v46 = vmul.f32 %v14415_v21, %v8214_v3 }
0x412f   :  { %v8229_v23 = vmul.f32 %v14417_v47, %v8213_v0 }
0x4130   :  { %v8238_v25 = vmul.f32 %v12620_v22, %v8230_v46 }
0x4131   :  { %v8237_v26 = vmul.f32 %v12620_v22, %v8229_v23 }
0x4132   :  { %v15725_v28 = vadd.f32 %v12621_v24, %v8238_v25 }
0x4133   :  { %v15723_v27 = vadd.f32 %v12621_v24, %v8237_v26 }
0x4135   :  { %13736 = vmatprep.mubr.msk.f32.mxu1 %vm86_vm0, %v15723_v27 }
0x4136   :  { %13737 = vmatmul.mubr.msk.f32.vlgmr.msra.gmra.mrb[96].mxu1 %vm86_vm0, %v15725_v28 }
0x4137   :  { %13741 = vmatprep.mubr.msk.f32.mxu1 %vm14577_vm1, %v14576_v8 }
0x4209   :  { %v13738_v29 = vpop.f32.mrb[96].mxu1 }
0x420a   :  { %v15736_v30 = vadd.f32 %v13738_v29, %v12627_v13  ;;  %v8332_v31 = vpop.f32.mrb[97].mxu1 }
0x420b   :  { %v15738_v59 = vadd.f32 %v12627_v13, %v8332_v31 }
0x420c   :  { %8424 = vrot.lane.b32.xlu1 %v15736_v30, %s14578_s30 }
0x420d   :  { %8347 = vrot.lane.b32.xlu0 %v15738_v59, %s14578_s30 }
0x427e   :  { %v8425_v32 = vpop.permute.xlu1 %8424 }
0x427f   :  { %v8348_v58 = vpop.permute.xlu0 %8347 }
0x4280   :  { %13740 = vmatpush3.xpose.msk.msra.mxu1 %vm175_vm2, %v8348_v58 }
0x4281   :  { %13744 = vmatprep.subr.mxu1 %v14576_v8 }
0x4283   :  { %13742 = vmatmul.mubr.msk.f32.vlgmr.msra.gmra.mrb[98].mxu1 %vm175_vm2, %v15738_v59 }
0x4284   :  { %13745 = vmatpush3.xpose.msk.msra.mxu1 %vm175_vm2, %v8425_v32  ;;  %13746 = vmatprep.mubr.msk.f32.mxu1 %vm14577_vm1, %v14576_v8 }
0x4285   :  { %13754 = vmatprep.subr.mxu1 %v14576_v8 }
0x4287   :  { %13747 = vmatmul.mubr.msk.f32.vlgmr.msra.gmra.mrb[100].mxu1 %vm175_vm2, %v15736_v30 }
0x4288   :  { %13756 = vmatprep.mubr.msk.f32.mxu1 %vm14577_vm1, %v14576_v8 }
0x4356   :  { %v8419_v34 = vpop.f32.mrb[98].mxu1 }
0x4357   :  { %v13743_v35 = vpop.f32.mrb[99].mxu1  ;;  %v8500_v44 = vsel %vm175_vm2, %v8419_v34, -inf }
0x435a   :  { %v8496_v36 = vpop.f32.mrb[100].mxu1 }
0x435b   :  { %v13748_v33 = vpop.f32.mrb[101].mxu1  ;;  %v8503_v39 = vsel %vm175_vm2, %v8496_v36, -inf }
0x435c   :  { %8504 = vmax.xlane.f32.xlu1 %v8503_v39 }
0x436d   :  { %8754 = vrot.lane.b32.xlu1 %v15736_v30, %s16268_s0 }
0x4371   :  { %8752 = vrot.lane.b32.xlu1 %v15736_v30, %s16266_s15 }
0x43e9   :  { %v8505_v41 = vpop.xlane.xlu1 %8504 }
0x43ea   :  { %v8507_v5 = vsub.f32 %v8496_v36, %v8505_v41 }
0x43ec   :  { %v8510_v42 = vmul.f32 1.442695, %v8507_v5 }
0x43ed   :  { %v8755_v51 = vpop.permute.xlu1 %8754 }
0x43ee   :  { %14418 = vpow2.f32 %v8510_v42 }
0x43f1   :  { %v8753_v54 = vpop.permute.xlu1 %8752 }
0x43f8   :  { %v14419_v43 = vpop.eup %14418 }
0x43f9   :  { %v8515_v7 = vsel %vm175_vm2, %v14419_v43, 0.0 }
0x43fa   :  { %8516 = vadd.xlane.f32.xlu0 %v8515_v7  ;;  %v12631_v7 = vld [vmem:[%s16237_s3 + $0x88] sm:$0xff] }
0x4410   :  { %8598 = vrot.lane.b32.xlu0 %v15736_v30, %s16276_s20 }
0x442f   :  { %8501 = vmax.xlane.f32.xlu0 %v8500_v44  ;;  %v12630_v44 = vld [vmem:[%s16237_s3 + $0x80] sm:$0xff] }
0x4445   :  { %8522 = vrot.lane.b32.xlu0 %v15738_v59, %s16276_s20 }
0x4449   :  { %8674 = vrot.lane.b32.xlu0 %v15738_v59, %s16266_s15 }
0x4487   :  { %v8517_v45 = vpop.xlane.xlu0 %8516 }
0x4488   :  { %14420 = vrcp.f32 %v8517_v45 }
0x448b   :  { %v8599_v48 = vpop.permute.xlu0 %8598 }
0x448c   :  { %13755 = vmatpush3.msra.mxu1 %v8599_v48 }
0x448d   :  { %13764 = vmatprep.subr.mxu1 %v14576_v8 }
0x4492   :  { %v14421_v49 = vpop.eup %14420 }
0x4493   :  { %v8521_v53 = vmul.f32 %v14421_v49, %v14419_v43 }
0x4495   :  { %13757 = vmatmul.mubr.msk.f32.vlgmr.msra.gmra.mrb[102].mxu1 %vm175_vm2, %v8521_v53 }
0x4496   :  { %13765 = vmatpush3.xpose.msk.msra.mxu1 %vm175_vm2, %v8755_v51  ;;  %13766 = vmatprep.mubr.msk.f32.mxu1 %vm14577_vm1, %v14576_v8 }
0x4497   :  { %13774 = vmatprep.subr.mxu1 %v14576_v8 }
0x4499   :  { %13767 = vmatmul.mubr.msk.f32.vlgmr.msra.gmra.mrb[104].mxu1 %vm175_vm2, %v8753_v54 }
0x449a   :  { %13776 = vmatprep.mubr.msk.f32.mxu1 %vm14577_vm1, %v14576_v8 }
0x44bc   :  { %v8502_v40 = vpop.xlane.xlu0 %8501 }
0x44bd   :  { %v8506_v55 = vsub.f32 %v8419_v34, %v8502_v40 }
0x44bf   :  { %v8508_v52 = vmul.f32 1.442695, %v8506_v55 }
0x44c0   :  { %v8523_v56 = vpop.permute.xlu0 %8522 }
0x44c1   :  { %14422 = vpow2.f32 %v8508_v52  ;;  %13750 = vmatpush3.msra.mxu0 %v8523_v56 }
0x44c2   :  { %13759 = vmatprep.subr.mxu0 %v14576_v8 }
0x44c4   :  { %v8675_v0 = vpop.permute.xlu0 %8674 }
0x44cb   :  { %v14423_v57 = vpop.eup %14422 }
0x44cc   :  { %v8512_v60 = vsel %vm175_vm2, %v14423_v57, 0.0 }
0x44cd   :  { %8513 = vadd.xlane.f32.xlu1 %v8512_v60 }
0x44de   :  { %8676 = vrot.lane.b32.xlu1 %v15738_v59, %s16268_s0 }
0x455a   :  { %v8514_v61 = vpop.xlane.xlu1 %8513 }
0x455b   :  { %14424 = vrcp.f32 %v8514_v61  ;;  %v12632_v61 = vld [vmem:[%s16237_s3 + $0x90] sm:$0xff] }
0x455e   :  { %v8677_v2 = vpop.permute.xlu1 %8676 }
0x4565   :  { %v14425_v63 = vpop.eup %14424 }
0x4566   :  { %v8519_v1 = vmul.f32 %v14425_v63, %v14423_v57 }
0x4568   :  { %13752 = vmatmul.mubr.msk.f32.vlgmr.msra.gmra.mrb[64].mxu0 %vm175_vm2, %v8519_v1  ;;  %v15783_v50 = vpop.f32.mrb[102].mxu1 }
0x4569   :  { %13760 = vmatpush3.xpose.msk.msra.mxu0 %vm175_vm2, %v8677_v2  ;;  %v13758_v3 = vpop.f32.mrb[103].mxu1  ;;  %13761 = vmatprep.mubr.msk.f32.mxu0 %vm14577_vm1, %v14576_v8 }
0x456a   :  { %13769 = vmatprep.subr.mxu0 %v14576_v8 }
0x456c   :  { %13762 = vmatmul.mubr.msk.f32.vlgmr.msra.gmra.mrb[66].mxu0 %vm175_vm2, %v8675_v0  ;;  %v8826_v4 = vpop.f32.mrb[104].mxu1 }
0x456d   :  { %v13768_v6 = vpop.f32.mrb[105].mxu1  ;;  %v8833_v9 = vsel %vm175_vm2, %v8826_v4, -inf  ;;  %13771 = vmatprep.mubr.msk.f32.mxu0 %vm14577_vm1, %v14576_v8 }
0x456e   :  { %8834 = vmax.xlane.f32.xlu1 %v8833_v9 }
0x457f   :  { %9168 = vrot.lane.b32.xlu1 %v15738_v59, %s16277_s21 }
0x4583   :  { %9166 = vrot.lane.b32.xlu1 %v15738_v59, %s16274_s23 }
0x4587   :  { %9244 = vrot.lane.b32.xlu1 %v15736_v30, %s16274_s23 }
0x45fb   :  { %v8835_v10 = vpop.xlane.xlu1 %8834 }
0x45fc   :  { %v8837_v11 = vsub.f32 %v8826_v4, %v8835_v10 }
0x45fe   :  { %v8840_v14 = vmul.f32 1.442695, %v8837_v11 }
0x45ff   :  { %v9169_v20 = vpop.permute.xlu1 %9168 }
0x4600   :  { %14426 = vpow2.f32 %v8840_v14 }
0x4603   :  { %v9167_v47 = vpop.permute.xlu1 %9166 }
0x4607   :  { %v9245_v23 = vpop.permute.xlu1 %9244 }
0x460a   :  { %v14427_v38 = vpop.eup %14426 }
0x460b   :  { %v8845_v37 = vsel %vm175_vm2, %v14427_v38, 0.0 }
0x460c   :  { %8846 = vadd.xlane.f32.xlu0 %v8845_v37 }
0x4622   :  { %8928 = vrot.lane.b32.xlu0 %v15736_v30, %s16275_s22 }
0x4626   :  { %9246 = vrot.lane.b32.xlu0 %v15736_v30, %s16277_s21 }
0x463b   :  { %v15804_v15 = vpop.f32.mrb[64].mxu0 }
0x463c   :  { %v13753_v16 = vpop.f32.mrb[65].mxu0 }
0x463f   :  { %v8748_v12 = vpop.f32.mrb[66].mxu0 }
0x4640   :  { %v13763_v17 = vpop.f32.mrb[67].mxu0  ;;  %v8830_v18 = vsel %vm175_vm2, %v8748_v12, -inf }
0x4645   :  { %8831 = vmax.xlane.f32.xlu0 %v8830_v18 }
0x465b   :  { %8852 = vrot.lane.b32.xlu0 %v15738_v59, %s16275_s22 }
0x465f   :  { %9344 = vrot.lane.b32.xlu0 %v15738_v59, %s16272_s24 }
0x4663   :  { %9581 = vrot.lane.b32.xlu0 %v15738_v59, %s16273_s25 }
0x4667   :  { %9659 = vrot.lane.b32.xlu0 %v15736_v30, %s16273_s25 }
0x466b   :  { %9579 = vrot.lane.b32.xlu0 %v15738_v59, %s16270_s27 }
0x466f   :  { %9657 = vrot.lane.b32.xlu0 %v15736_v30, %s16270_s27 }
0x4699   :  { %v8847_v19 = vpop.xlane.xlu0 %8846 }
0x469a   :  { %14428 = vrcp.f32 %v8847_v19 }
0x469d   :  { %v8929_v62 = vpop.permute.xlu0 %8928 }
0x469e   :  { %13775 = vmatpush3.msra.mxu1 %v8929_v62 }
0x469f   :  { %13789 = vmatprep.subr.mxu1 %v14576_v8 }
0x46a1   :  { %v9247_v46 = vpop.permute.xlu0 %9246 }
0x46a4   :  { %v14429_v21 = vpop.eup %14428 }
0x46a5   :  { %v8851_v22 = vmul.f32 %v14429_v21, %v14427_v38 }
0x46a7   :  { %13777 = vmatmul.mubr.msk.f32.vlgmr.msra.gmra.mrb[106].mxu1 %vm175_vm2, %v8851_v22 }
0x46a8   :  { %13790 = vmatpush3.xpose.msk.msra.mxu1 %vm175_vm2, %v9169_v20  ;;  %13791 = vmatprep.mubr.msk.f32.mxu1 %vm14577_vm1, %v14576_v8 }
0x46a9   :  { %13794 = vmatprep.subr.mxu1 %v14576_v8 }
0x46ab   :  { %13792 = vmatmul.mubr.msk.f32.vlgmr.msra.gmra.mrb[108].mxu1 %vm175_vm2, %v9167_v47 }
0x46ac   :  { %13795 = vmatpush3.xpose.msk.msra.mxu1 %vm175_vm2, %v9247_v46  ;;  %13796 = vmatprep.mubr.msk.f32.mxu1 %vm14577_vm1, %v14576_v8 }
0x46ad   :  { %13804 = vmatprep.subr.mxu1 %v14576_v8 }
0x46af   :  { %13797 = vmatmul.mubr.msk.f32.vlgmr.msra.gmra.mrb[110].mxu1 %vm175_vm2, %v9245_v23 }
0x46b0   :  { %13806 = vmatprep.mubr.msk.f32.mxu1 %vm14577_vm1, %v14576_v8 }
0x46d2   :  { %v8832_v24 = vpop.xlane.xlu0 %8831 }
0x46d3   :  { %v8836_v25 = vsub.f32 %v8748_v12, %v8832_v24 }
0x46d5   :  { %v8838_v26 = vmul.f32 1.442695, %v8836_v25 }
0x46d6   :  { %v8853_v13 = vpop.permute.xlu0 %8852 }
0x46d7   :  { %14430 = vpow2.f32 %v8838_v26  ;;  %13770 = vmatpush3.msra.mxu0 %v8853_v13 }
0x46d8   :  { %13779 = vmatprep.subr.mxu0 %v12631_v7 }
0x46da   :  { %v9345_v63 = vpop.permute.xlu0 %9344 }
0x46de   :  { %v9582_v0 = vpop.permute.xlu0 %9581 }
0x46e1   :  { %v14431_v29 = vpop.eup %14430 }
0x46e2   :  { %v8842_v31 = vsel %vm175_vm2, %v14431_v29, 0.0 }
0x46e3   :  { %8843 = vadd.xlane.f32.xlu1 %v8842_v31 }
0x4770   :  { %v8844_v58 = vpop.xlane.xlu1 %8843 }
0x4771   :  { %14432 = vrcp.f32 %v8844_v58 }
0x477a   :  { %v9000_v32 = vpop.f32.mrb[106].mxu1 }
0x477b   :  { %v14433_v34 = vpop.eup %14432  ;;  %v13778_v35 = vpop.f32.mrb[107].mxu1 }
0x477c   :  { %v8849_v36 = vmul.f32 %v14433_v34, %v14431_v29  ;;  %v12633_v35 = vld [vmem:[%s16237_s3 + $0x98] sm:$0xff] }
0x477e   :  { %13772 = vmatmul.mubr.msk.f32.vlgmr.msra.gmra.mrb[68].mxu0 %vm175_vm2, %v8849_v36  ;;  %v9240_v33 = vpop.f32.mrb[108].mxu1 }
0x477f   :  { %v13793_v39 = vpop.f32.mrb[109].mxu1  ;;  %v9322_v41 = vsel %vm175_vm2, %v9240_v33, -inf  ;;  %13780 = vmatpush3.msra.mxu0 %v12631_v7 }
0x4780   :  { %9323 = vmax.xlane.f32.xlu1 %v9322_v41  ;;  %13784 = vmatprep.subr.mxu0 %v12630_v44 }
0x4782   :  { %v9318_v5 = vpop.f32.mrb[110].mxu1 }
0x4783   :  { %v13798_v42 = vpop.f32.mrb[111].mxu1  ;;  %v9325_v43 = vsel %vm175_vm2, %v9318_v5, -inf }
0x4784   :  { %9326 = vmax.xlane.f32.xlu1 %v9325_v43  ;;  %v12667_v43 = vld [vmem:[%s16238_s4 + $0x4] ss:$0 sm:$0xff] }
0x480d   :  { %v9324_v45 = vpop.xlane.xlu1 %9323 }
0x480e   :  { %v9328_v48 = vsub.f32 %v9240_v33, %v9324_v45 }
0x4810   :  { %v9330_v49 = vmul.f32 1.442695, %v9328_v48 }
0x4811   :  { %v9327_v51 = vpop.xlane.xlu1 %9326 }
0x4812   :  { %14434 = vpow2.f32 %v9330_v49  ;;  %v9329_v53 = vsub.f32 %v9318_v5, %v9327_v51 }
0x4814   :  { %v9332_v54 = vmul.f32 1.442695, %v9329_v53 }
0x4816   :  { %14436 = vpow2.f32 %v9332_v54 }
0x481c   :  { %v14435_v40 = vpop.eup %14434 }
0x481d   :  { %v9334_v55 = vsel %vm175_vm2, %v14435_v40, 0.0 }
0x481e   :  { %9335 = vadd.xlane.f32.xlu1 %v9334_v55 }
0x4820   :  { %v14437_v52 = vpop.eup %14436 }
0x4821   :  { %v9337_v56 = vsel %vm175_vm2, %v14437_v52, 0.0 }
0x4822   :  { %9338 = vadd.xlane.f32.xlu1 %v9337_v56 }
0x4833   :  { %9420 = vrot.lane.b32.xlu1 %v15736_v30, %s16272_s24 }
0x4851   :  { %v8924_v57 = vpop.f32.mrb[68].mxu0 }
0x4852   :  { %v13773_v60 = vpop.f32.mrb[69].mxu0  ;;  %13781 = vmatprep.mubr.msk.f32.mxu0 %vm175_vm2, %v8924_v57 }
0x4853   :  { %13782 = vmatmul.mubr.msk.f32.vlgmr.msra.gmra.mrb[70].mxu0 %vm175_vm2, %v9000_v32 }
0x4854   :  { %13786 = vmatprep.mubr.msk.f32.mxu0 %vm175_vm2, %v15804_v15  ;;  %13785 = vmatpush3.msra.mxu0 %v12630_v44 }
0x4855   :  { %13799 = vmatprep.subr.mxu0 %v14576_v8 }
0x485b   :  { %13787 = vmatmul.mubr.msk.f32.vlgmr.msra.gmra.mrb[70].mxu0 %vm175_vm2, %v15783_v50  ;;  %v9660_v50 = vpop.permute.xlu0 %9659 }
0x485c   :  { %13800 = vmatpush3.msra.mxu0 %v9345_v63  ;;  %13801 = vmatprep.mubr.msk.f32.mxu0 %vm14577_vm1, %v14576_v8 }
0x485d   :  { %13809 = vmatprep.subr.mxu0 %v12632_v61 }
0x485f   :  { %v9580_v11 = vpop.permute.xlu0 %9579 }
0x4863   :  { %v9658_v16 = vpop.permute.xlu0 %9657 }
0x48ab   :  { %v9336_v1 = vpop.xlane.xlu1 %9335 }
0x48ac   :  { %14438 = vrcp.f32 %v9336_v1 }
0x48af   :  { %v9339_v2 = vpop.xlane.xlu1 %9338 }
0x48b0   :  { %14440 = vrcp.f32 %v9339_v2  ;;  %v12672_v2 = vld [vmem:[%s16241_s7 + $0x88] sm:$0xff] }
0x48b3   :  { %v9421_v3 = vpop.permute.xlu1 %9420 }
0x48b4   :  { %13805 = vmatpush3.msra.mxu1 %v9421_v3 }
0x48b5   :  { %13814 = vmatprep.subr.mxu1 %v14576_v8 }
0x48b6   :  { %v14439_v4 = vpop.eup %14438 }
0x48b7   :  { %v9341_v6 = vmul.f32 %v14439_v4, %v14435_v40  ;;  %v12674_v4 = vld [vmem:[%s16241_s7 + $0x98] sm:$0xff] }
0x48b9   :  { %13802 = vmatmul.mubr.msk.f32.vlgmr.msra.gmra.mrb[72].mxu0 %vm175_vm2, %v9341_v6 }
0x48ba   :  { %v14441_v9 = vpop.eup %14440  ;;  %13810 = vmatpush3.msra.mxu0 %v12632_v61 }
0x48bb   :  { %v9343_v10 = vmul.f32 %v14441_v9, %v14437_v52  ;;  %13819 = vmatprep.subr.mxu0 %v14576_v8  ;;  %v12679_v9 = vld [vmem:[%s16243_s9 + $0x100] sm:$0xff] }
0x48bd   :  { %13807 = vmatmul.mubr.msk.f32.vlgmr.msra.gmra.mrb[112].mxu1 %vm175_vm2, %v9343_v10  ;;  %v12681_v10 = vld [vmem:[%s16243_s9 + $0x110] sm:$0xff] }
0x48be   :  { %13815 = vmatpush3.xpose.msk.msra.mxu1 %vm175_vm2, %v9582_v0  ;;  %13816 = vmatprep.mubr.msk.f32.mxu1 %vm14577_vm1, %v14576_v8  ;;  %v12673_v0 = vld [vmem:[%s16241_s7 + $0x90] sm:$0xff] }
0x48bf   :  { %13824 = vmatprep.subr.mxu1 %v14576_v8  ;;  %v14150_v6 = vpack.c.bf16 %v12674_v4, %v12673_v0 }
0x48c1   :  { %13817 = vmatmul.mubr.msk.f32.vlgmr.msra.gmra.mrb[114].mxu1 %vm175_vm2, %v9580_v11 }
0x48c2   :  { %13826 = vmatprep.mubr.msk.f32.mxu1 %vm14577_vm1, %v14576_v8 }
0x498c   :  { %v9416_v14 = vpop.f32.mrb[72].mxu0 }
0x498d   :  { %v13803_v38 = vpop.f32.mrb[73].mxu0  ;;  %13811 = vmatprep.mubr.msk.f32.mxu0 %vm175_vm2, %v9416_v14  ;;  %v12682_v14 = vld [vmem:[%s16243_s9 + $0x118] sm:$0xff] }
0x498e   :  { %v14158_v38 = vpack.c.bf16 %v12682_v14, %v12681_v10  ;;  %v12693_v14 = vld [vmem:[%s16245_s11 + $0x4] ss:$0 sm:$0xff] }
0x4990   :  { %v9492_v37 = vpop.f32.mrb[112].mxu1 }
0x4991   :  { %v13808_v15 = vpop.f32.mrb[113].mxu1  ;;  %13812 = vmatmul.mubr.msk.f32.vlgmr.msra.gmra.mrb[70].mxu0 %vm175_vm2, %v9492_v37  ;;  %v12683_v37 = vld [vmem:[%s16243_s9 + $0x120] sm:$0xff] }
0x4992   :  { %13820 = vmatpush3.xpose.msk.msra.mxu0 %vm175_vm2, %v9660_v50  ;;  %13821 = vmatprep.mubr.msk.f32.mxu0 %vm14577_vm1, %v14576_v8  ;;  %v12680_v50 = vld [vmem:[%s16243_s9 + $0x108] sm:$0xff] }
0x4993   :  { %13829 = vmatprep.subr.mxu0 %v14576_v8  ;;  %v14154_v11 = vpack.c.bf16 %v12680_v50, %v12679_v9  ;;  %v12684_v15 = vld [vmem:[%s16243_s9 + $0x128] sm:$0xff] }
0x4994   :  { %v9653_v12 = vpop.f32.mrb[114].mxu1 }
0x4995   :  { %v13818_v17 = vpop.f32.mrb[115].mxu1  ;;  %13822 = vmatmul.mubr.msk.f32.vlgmr.msra.gmra.mrb[74].mxu0 %vm175_vm2, %v9658_v16  ;;  %v9735_v18 = vsel %vm175_vm2, %v9653_v12, -inf  ;;  %v14162_v16 = vpack.c.bf16 %v12684_v15, %v12683_v37 }
0x4996   :  { %9736 = vmax.xlane.f32.xlu1 %v9735_v18  ;;  %13831 = vmatprep.mubr.msk.f32.mxu0 %vm14577_vm1, %v14576_v8 }
0x4a23   :  { %v9737_v19 = vpop.xlane.xlu1 %9736 }
0x4a24   :  { %v9741_v62 = vsub.f32 %v9653_v12, %v9737_v19 }
0x4a26   :  { %v9743_v20 = vmul.f32 1.442695, %v9741_v62 }
0x4a28   :  { %14442 = vpow2.f32 %v9743_v20 }
0x4a32   :  { %v14443_v46 = vpop.eup %14442 }
0x4a33   :  { %v9747_v23 = vsel %vm175_vm2, %v14443_v46, 0.0 }
0x4a68   :  { %v9731_v21 = vpop.f32.mrb[74].mxu0 }
0x4a69   :  { %v13823_v22 = vpop.f32.mrb[75].mxu0  ;;  %v9738_v47 = vsel %vm175_vm2, %v9731_v21, -inf }
0x4a6a   :  { %9739 = vmax.xlane.f32.xlu0 %v9738_v47  ;;  %v12669_v22 = vld [vmem:[#allocation5 + $0x4] ss:$0 sm:$0xff] }
0x4a6e   :  { %9748 = vadd.xlane.f32.xlu0 %v9747_v23 }
0x4a84   :  { %9757 = vrot.lane.b32.xlu0 %v15738_v59, %s16271_s29 }
0x4af7   :  { %v9740_v24 = vpop.xlane.xlu0 %9739 }
0x4af8   :  { %v9742_v25 = vsub.f32 %v9731_v21, %v9740_v24  ;;  %v12670_v24 = vld [vmem:[%s16240_s6 + $0x4] ss:$0 sm:$0xff] }
0x4afa   :  { %v9745_v26 = vmul.f32 1.442695, %v9742_v25 }
0x4afb   :  { %v9749_v13 = vpop.xlane.xlu0 %9748 }
0x4afc   :  { %14444 = vpow2.f32 %v9745_v26 }
0x4afd   :  { %14446 = vrcp.f32 %v9749_v13 }
0x4aff   :  { %v9758_v29 = vpop.permute.xlu0 %9757 }
0x4b00   :  { %13825 = vmatpush3.msra.mxu1 %v9758_v29 }
0x4b06   :  { %v14445_v31 = vpop.eup %14444 }
0x4b07   :  { %v14447_v58 = vpop.eup %14446  ;;  %v9750_v32 = vsel %vm175_vm2, %v14445_v31, 0.0 }
0x4b08   :  { %v9754_v34 = vmul.f32 %v14447_v58, %v14443_v46  ;;  %9751 = vadd.xlane.f32.xlu1 %v9750_v32  ;;  %v12686_v58 = vld [vmem:[%s16243_s9 + $0x138] sm:$0xff] }
0x4b0a   :  { %13827 = vmatmul.mubr.msk.f32.vlgmr.msra.gmra.mrb[116].mxu1 %vm175_vm2, %v9754_v34  ;;  %v12676_v34 = vld [vmem:[%s16242_s8 + $0x4] ss:$0 sm:$0xff] }
0x4b19   :  { %9833 = vrot.lane.b32.xlu1 %v15736_v30, %s16271_s29 }
0x4b95   :  { %v9752_v59 = vpop.xlane.xlu1 %9751 }
0x4b96   :  { %14448 = vrcp.f32 %v9752_v59 }
0x4b99   :  { %v9834_v36 = vpop.permute.xlu1 %9833 }
0x4b9a   :  { %13830 = vmatpush3.msra.mxu0 %v9834_v36 }
0x4b9b   :  { %13834 = vmatprep.subr.mxu0 %v12633_v35 }
0x4ba0   :  { %v14449_v33 = vpop.eup %14448 }
0x4ba1   :  { %v9756_v39 = vmul.f32 %v14449_v33, %v14445_v31  ;;  %v12685_v31 = vld [vmem:[%s16243_s9 + $0x130] sm:$0xff] }
0x4ba2   :  { %v14166_v32 = vpack.c.bf16 %v12686_v58, %v12685_v31 }
0x4ba3   :  { %13832 = vmatmul.mubr.msk.f32.vlgmr.msra.gmra.mrb[76].mxu0 %vm175_vm2, %v9756_v39 }
0x4ba4   :  { %13835 = vmatpush3.msra.mxu0 %v12633_v35 }
0x4ba5   :  { %14155 = vmatprep.subr.bf16.mxu0 %v14154_v11 }
0x4bdd   :  { %v9829_v41 = vpop.f32.mrb[116].mxu1 }
0x4bde   :  { %v13828_v5 = vpop.f32.mrb[117].mxu1  ;;  %13836 = vmatprep.mubr.msk.f32.mxu0 %vm175_vm2, %v9829_v41 }
0x4bdf   :  { %v12688_v5 = vld [vmem:[%s16244_s10 + $0x4] ss:$0 sm:$0xff] }
0x4c76   :  { %v9905_v42 = vpop.f32.mrb[76].mxu0 }
0x4c77   :  { %v13833_v30 = vpop.f32.mrb[77].mxu0  ;;  %13837 = vmatmul.mubr.msk.f32.vlgmr.msra.gmra.mrb[70].mxu0 %vm175_vm2, %v9905_v42 }
0x4c78   :  { %14157 = vmatpush3.bf16.msra.mxu0 %v14154_v11 }
0x4c79   :  { %14159 = vmatprep.subr.bf16.mxu0 %v14158_v38 }
0x4c7c   :  { %14161 = vmatpush3.bf16.msra.mxu0 %v14158_v38 }
0x4c7d   :  { %14163 = vmatprep.subr.bf16.mxu0 %v14162_v16 }
0x4c80   :  { %14165 = vmatpush3.bf16.msra.mxu0 %v14162_v16  ;;  %v12694_v16 = vld [vmem:[%s16246_s12 + $0x4] ss:$0 sm:$0xff] }
0x4c81   :  { %14167 = vmatprep.subr.bf16.mxu0 %v14166_v32 }
0x4c84   :  { %14169 = vmatpush3.bf16.msra.mxu0 %v14166_v32 }
0x4c85   :  { %13890 = vmatprep.subr.mxu0 %v14576_v8 }
0x4d4a   :  { %v13838_v7 = vpop.f32.mrb[70].mxu0 }
0x4d4b   :  { %v10001_v44 = vadd.f32 %v13838_v7, %v12667_v43  ;;  %v9981_v45 = vpop.f32.mrb[71].mxu0 }
0x4d4c   :  { %v10000_v48 = vadd.f32 %v12667_v43, %v9981_v45 }
0x4d4d   :  { %v10003_v49 = vadd.f32 %v10001_v44, %v15725_v28 }
0x4d4e   :  { %v10002_v51 = vadd.f32 %v10000_v48, %v15723_v27  ;;  %v12671_v27 = vld [vmem:[%s16241_s7 + $0x80] sm:$0xff] }
0x4d4f   :  { %v10011_v53 = vsel %vm86_vm0, %v10003_v49, 0.0  ;;  %v14146_v3 = vpack.c.bf16 %v12672_v2, %v12671_v27  ;;  %v12697_v27 = vld [vmem:[%s16235_s1 + $0xb0] sm:$0xff]  ;;  %v12698_v2 = vld [vmem:[%s16235_s1 + $0xb8] sm:$0xff] }
0x4d50   :  { %10012 = vadd.xlane.f32.xlu0 %v10011_v53  ;;  %v10008_v54 = vsel %vm86_vm0, %v10002_v51, 0.0 }
0x4d51   :  { %10009 = vadd.xlane.f32.xlu1 %v10008_v54  ;;  %14147 = vmatprep.subr.bf16.mxu1 %v14146_v3 }
0x4d52   :  { %14149 = vmatpush3.bf16.msra.mxu1 %v14146_v3  ;;  %v14174_v3 = vpack.c.bf16 %v12698_v2, %v12697_v27 }
0x4d53   :  { %14151 = vmatprep.subr.bf16.mxu1 %v14150_v6 }
0x4d56   :  { %14153 = vmatpush3.bf16.msra.mxu1 %v14150_v6 }
0x4ddd   :  { %v10013_v40 = vpop.xlane.xlu0 %10012 }
0x4dde   :  { %v10015_v55 = vmul.f32 0.03125, %v10013_v40  ;;  %v10010_v52 = vpop.xlane.xlu1 %10009 }
0x4ddf   :  { %v10014_v56 = vmul.f32 0.03125, %v10010_v52 }
0x4de0   :  { %v10017_v57 = vsub.f32 %v10003_v49, %v10015_v55 }
0x4de1   :  { %v10016_v60 = vsub.f32 %v10002_v51, %v10014_v56 }
0x4de2   :  { %v10019_v61 = vmul.f32 %v10017_v57, %v10017_v57 }
0x4de3   :  { %v10018_v63 = vmul.f32 %v10016_v60, %v10016_v60 }
0x4de4   :  { %v10023_v1 = vsel %vm86_vm0, %v10019_v61, 0.0 }
0x4de5   :  { %10024 = vadd.xlane.f32.xlu1 %v10023_v1  ;;  %v10020_v28 = vsel %vm86_vm0, %v10018_v63, 0.0  ;;  %v12695_v63 = vld [vmem:[%s16235_s1 + $0xa0] sm:$0xff]  ;;  %v12696_v1 = vld [vmem:[%s16235_s1 + $0xa8] sm:$0xff]  ;;  %s12344_s1 = sshll.u32 %s14589_s5, 4  ;;  %s12345_s1 = int_to_ptr.vmem [resolvable:$true] %s12344_s1 }
0x4de6   :  { %10021 = vadd.xlane.f32.xlu0 %v10020_v28  ;;  %v14170_v28 = vpack.c.bf16 %v12696_v1, %v12695_v63  ;;  %s14542_s15 = scalar_lea.vmem %s12345_s1, 256  ;;  %p14547_p3 = scmp.lt.s32.totalorder %s12345_s1, %s12345_s1 }
0x4de7   :  { %p14543_p2 = scmp.ne.s32.totalorder %s12345_s1, %s14542_s15  ;;  %p14548_p4 = scmp.lt.s32.totalorder %s14542_s15, %s14542_s15 }
0x4de8   :  { %14171 = vmatprep.subr.bf16.mxu1 %v14170_v28 }
0x4de9   :  { %p14549_p5 = por %p14548_p4, %p14547_p3 }
0x4deb   :  { %p14550_p6 = pnand %p14549_p5, %p14543_p2 }
0x4e72   :  { %v10025_v12 = vpop.xlane.xlu1 %10024 }
0x4e73   :  { %v10027_v17 = vmul.f32 0.03125, %v10025_v12  ;;  %v10022_v18 = vpop.xlane.xlu0 %10021 }
0x4e74   :  { %v10026_v19 = vmul.f32 0.03125, %v10022_v18 }
0x4e75   :  { %v10029_v62 = vadd.f32 1e-05, %v10027_v17 }
0x4e76   :  { %v10028_v20 = vadd.f32 1e-05, %v10026_v19 }
0x4e77   :  { %14450 = vrsqrt.f32 %v10029_v62  ;;  %v12700_v62 = vld [vmem:[%s16236_s2 + $0x5] ss:$0 sm:$0xff]  ;;  %s16278_s2 = smov 96  }
0x4e78   :  { %14452 = vrsqrt.f32 %v10028_v20 }
0x4e81   :  { %v14451_v21 = vpop.eup %14450 }
0x4e82   :  { %v14453_v47 = vpop.eup %14452  ;;  %v10033_v46 = vmul.f32 %v14451_v21, %v10017_v57 }
0x4e83   :  { %v10032_v23 = vmul.f32 %v14453_v47, %v10016_v60 }
0x4e84   :  { %v10041_v25 = vmul.f32 %v12669_v22, %v10033_v46 }
0x4e85   :  { %v10040_v26 = vmul.f32 %v12669_v22, %v10032_v23 }
0x4e86   :  { %v10049_v29 = vadd.f32 %v12670_v24, %v10041_v25 }
0x4e87   :  { %v10048_v13 = vadd.f32 %v12670_v24, %v10040_v26 }
0x4e89   :  { %13847 = vmatprep.mubr.msk.f32.mxu1 %vm86_vm0, %v10048_v13 }
0x4e8a   :  { %13848 = vmatmul.mubr.msk.f32.vlgmr.msra.gmra.mrb[118].mxu1 %vm86_vm0, %v10049_v29 }
0x4e8b   :  { %14173 = vmatpush3.bf16.msra.mxu1 %v14170_v28 }
0x4e8c   :  { %14175 = vmatprep.subr.bf16.mxu1 %v14174_v3 }
0x4e8f   :  { %14177 = vmatpush3.bf16.msra.mxu1 %v14174_v3 }
0x4e90   :  { %13880 = vmatprep.subr.mxu1 %v14576_v8 }
0x4f5d   :  { %v13849_v59 = vpop.f32.mrb[118].mxu1 }
0x4f5e   :  { %v10141_v35 = vadd.f32 %v13849_v59, %v12676_v34  ;;  %v10135_v36 = vpop.f32.mrb[119].mxu1 }
0x4f5f   :  { %v10136_v33 = vadd.f32 %v12676_v34, %v10135_v36 }
0x4f60   :  { %v10145_v41 = vmax.f32 %v10141_v35, 0.0 }
0x4f61   :  { %v10144_v39 = vmax.f32 %v10136_v33, 0.0 }
0x4f63   :  { %13866 = vmatprep.mubr.msk.f32.mxu0 %vm1984_vm3, %v10144_v39 }
0x4f64   :  { %13867 = vmatmul.mubr.msk.f32.vlgmr.msra.gmra.mrb[78].mxu0 %vm1984_vm3, %v10145_v41 }
0x4f65   :  { %13892 = vmatprep.mubr.msk.f32.mxu0 %vm14577_vm1, %v14576_v8 }
0x5037   :  { %v13868_v42 = vpop.f32.mrb[78].mxu0 }
0x5038   :  { %v10241_v30 = vadd.f32 %v13868_v42, %v12688_v5  ;;  %v10235_v43 = vpop.f32.mrb[79].mxu0 }
0x5039   :  { %v10236_v7 = vadd.f32 %v12688_v5, %v10235_v43 }
0x503a   :  { %v10245_v44 = vadd.f32 %v10241_v30, %v10049_v29 }
0x503b   :  { %v10244_v45 = vadd.f32 %v10236_v7, %v10048_v13 }
0x503c   :  { %v10253_v48 = vsel %vm86_vm0, %v10245_v44, 0.0 }
0x503d   :  { %10254 = vadd.xlane.f32.xlu1 %v10253_v48  ;;  %v10250_v49 = vsel %vm86_vm0, %v10244_v45, 0.0 }
0x503e   :  { %10251 = vadd.xlane.f32.xlu0 %v10250_v49 }
0x50ca   :  { %v10255_v51 = vpop.xlane.xlu1 %10254 }
0x50cb   :  { %v10257_v53 = vmul.f32 0.03125, %v10255_v51  ;;  %v10252_v54 = vpop.xlane.xlu0 %10251 }
0x50cc   :  { %v10256_v40 = vmul.f32 0.03125, %v10252_v54 }
0x50cd   :  { %v10259_v55 = vsub.f32 %v10245_v44, %v10257_v53 }
0x50ce   :  { %v10258_v52 = vsub.f32 %v10244_v45, %v10256_v40 }
0x50cf   :  { %v10261_v56 = vmul.f32 %v10259_v55, %v10259_v55 }
0x50d0   :  { %v10260_v57 = vmul.f32 %v10258_v52, %v10258_v52 }
0x50d1   :  { %v10265_v60 = vsel %vm86_vm0, %v10261_v56, 0.0 }
0x50d2   :  { %10266 = vadd.xlane.f32.xlu1 %v10265_v60  ;;  %v10262_v61 = vsel %vm86_vm0, %v10260_v57, 0.0 }
0x50d3   :  { %10263 = vadd.xlane.f32.xlu0 %v10262_v61 }
0x515f   :  { %v10267_v0 = vpop.xlane.xlu1 %10266 }
0x5160   :  { %v10269_v4 = vmul.f32 0.03125, %v10267_v0  ;;  %v10264_v6 = vpop.xlane.xlu0 %10263 }
0x5161   :  { %v10268_v9 = vmul.f32 0.03125, %v10264_v6 }
0x5162   :  { %v10271_v50 = vadd.f32 1e-05, %v10269_v4 }
0x5163   :  { %v10270_v10 = vadd.f32 1e-05, %v10268_v9 }
0x5164   :  { %14454 = vrsqrt.f32 %v10271_v50 }
0x5165   :  { %14456 = vrsqrt.f32 %v10270_v10 }
0x516e   :  { %v14455_v11 = vpop.eup %14454 }
0x516f   :  { %v14457_v38 = vpop.eup %14456  ;;  %v10275_v37 = vmul.f32 %v14455_v11, %v10259_v55 }
0x5170   :  { %v10274_v15 = vmul.f32 %v14457_v38, %v10258_v52 }
0x5171   :  { %v10283_v12 = vmul.f32 %v12693_v14, %v10275_v37 }
0x5172   :  { %v10282_v17 = vmul.f32 %v12693_v14, %v10274_v15 }
0x5173   :  { %v15980_v19 = vadd.f32 %v12694_v16, %v10283_v12 }
0x5174   :  { %v15978_v18 = vadd.f32 %v12694_v16, %v10282_v17 }
0x5176   :  { %13877 = vmatprep.mubr.msk.f32.mxu1 %vm86_vm0, %v15978_v18 }
0x5177   :  { %13878 = vmatmul.mubr.msk.f32.vlgmr.msra.gmra.mrb[120].mxu1 %vm86_vm0, %v15980_v19 }
0x5178   :  { %13882 = vmatprep.mubr.msk.f32.mxu1 %vm14577_vm1, %v14576_v8 }
0x524a   :  { %v13879_v20 = vpop.f32.mrb[120].mxu1 }
0x524b   :  { %v15991_v21 = vadd.f32 %v13879_v20, %v12700_v62  ;;  %v10377_v22 = vpop.f32.mrb[121].mxu1 }
0x524c   :  { %v15993_v47 = vadd.f32 %v12700_v62, %v10377_v22 }
0x524d   :  { %10469 = vrot.lane.b32.xlu1 %v15991_v21, %s14578_s30 }
0x524e   :  { %10392 = vrot.lane.b32.xlu0 %v15993_v47, %s14578_s30  ;;  %s16279_s30 = smov 104  }
0x52bf   :  { %v10470_v23 = vpop.permute.xlu1 %10469 }
0x52c0   :  { %v10393_v46 = vpop.permute.xlu0 %10392 }
0x52c1   :  { %13881 = vmatpush3.xpose.msk.msra.mxu1 %vm175_vm2, %v10393_v46 }
0x52c2   :  { %13885 = vmatprep.subr.mxu1 %v14576_v8 }
0x52c4   :  { %13883 = vmatmul.mubr.msk.f32.vlgmr.msra.gmra.mrb[122].mxu1 %vm175_vm2, %v15993_v47 }
0x52c5   :  { %13886 = vmatpush3.xpose.msk.msra.mxu1 %vm175_vm2, %v10470_v23  ;;  %13887 = vmatprep.mubr.msk.f32.mxu1 %vm14577_vm1, %v14576_v8 }
0x52c6   :  { %13895 = vmatprep.subr.mxu1 %v14576_v8 }
0x52c8   :  { %13888 = vmatmul.mubr.msk.f32.vlgmr.msra.gmra.mrb[124].mxu1 %vm175_vm2, %v15991_v21 }
0x52c9   :  { %13897 = vmatprep.mubr.msk.f32.mxu1 %vm14577_vm1, %v14576_v8 }
0x5397   :  { %v10464_v24 = vpop.f32.mrb[122].mxu1 }
0x5398   :  { %v13884_v25 = vpop.f32.mrb[123].mxu1  ;;  %v10545_v35 = vsel %vm175_vm2, %v10464_v24, -inf }
0x539b   :  { %v10541_v26 = vpop.f32.mrb[124].mxu1 }
0x539c   :  { %v13889_v13 = vpop.f32.mrb[125].mxu1  ;;  %v10548_v29 = vsel %vm175_vm2, %v10541_v26, -inf }
0x539d   :  { %10549 = vmax.xlane.f32.xlu1 %v10548_v29 }
0x53ae   :  { %10799 = vrot.lane.b32.xlu1 %v15991_v21, %s16278_s2 }
0x53b2   :  { %10797 = vrot.lane.b32.xlu1 %v15991_v21, %s16279_s30 }
0x542a   :  { %v10550_v31 = vpop.xlane.xlu1 %10549 }
0x542b   :  { %v10552_v58 = vsub.f32 %v10541_v26, %v10550_v31 }
0x542d   :  { %v10555_v32 = vmul.f32 1.442695, %v10552_v58 }
0x542e   :  { %v10800_v41 = vpop.permute.xlu1 %10799 }
0x542f   :  { %14458 = vpow2.f32 %v10555_v32 }
0x5432   :  { %v10798_v42 = vpop.permute.xlu1 %10797 }
0x5439   :  { %v14459_v34 = vpop.eup %14458 }
0x543a   :  { %v10560_v59 = vsel %vm175_vm2, %v14459_v34, 0.0 }
0x543b   :  { %10561 = vadd.xlane.f32.xlu0 %v10560_v59  ;;  %v12704_v59 = vld [vmem:[%s16237_s3 + $0xa8] sm:$0xff] }
0x5451   :  { %10643 = vrot.lane.b32.xlu0 %v15991_v21, %s16276_s20 }
0x5470   :  { %10546 = vmax.xlane.f32.xlu0 %v10545_v35  ;;  %v12703_v35 = vld [vmem:[%s16237_s3 + $0xa0] sm:$0xff] }
0x5486   :  { %10567 = vrot.lane.b32.xlu0 %v15993_v47, %s16276_s20 }
0x548a   :  { %10719 = vrot.lane.b32.xlu0 %v15993_v47, %s16279_s30 }
0x54c8   :  { %v10562_v36 = vpop.xlane.xlu0 %10561 }
0x54c9   :  { %14460 = vrcp.f32 %v10562_v36 }
0x54cc   :  { %v10644_v33 = vpop.permute.xlu0 %10643 }
0x54cd   :  { %13896 = vmatpush3.msra.mxu1 %v10644_v33 }
0x54ce   :  { %13905 = vmatprep.subr.mxu1 %v14576_v8 }
0x54d3   :  { %v14461_v39 = vpop.eup %14460 }
0x54d4   :  { %v10566_v5 = vmul.f32 %v14461_v39, %v14459_v34 }
0x54d6   :  { %13898 = vmatmul.mubr.msk.f32.vlgmr.msra.gmra.mrb[126].mxu1 %vm175_vm2, %v10566_v5 }
0x54d7   :  { %13906 = vmatpush3.xpose.msk.msra.mxu1 %vm175_vm2, %v10800_v41  ;;  %13907 = vmatprep.mubr.msk.f32.mxu1 %vm14577_vm1, %v14576_v8 }
0x54d8   :  { %13915 = vmatprep.subr.mxu1 %v14576_v8 }
0x54da   :  { %13908 = vmatmul.mubr.msk.f32.vlgmr.msra.gmra.mrb[128].mxu1 %vm175_vm2, %v10798_v42 }
0x54db   :  { %13917 = vmatprep.mubr.msk.f32.mxu1 %vm14577_vm1, %v14576_v8 }
0x54fd   :  { %v10547_v30 = vpop.xlane.xlu0 %10546 }
0x54fe   :  { %v10551_v43 = vsub.f32 %v10464_v24, %v10547_v30 }
0x5500   :  { %v10553_v7 = vmul.f32 1.442695, %v10551_v43 }
0x5501   :  { %v10568_v44 = vpop.permute.xlu0 %10567 }
0x5502   :  { %14462 = vpow2.f32 %v10553_v7  ;;  %13891 = vmatpush3.msra.mxu0 %v10568_v44 }
0x5503   :  { %13900 = vmatprep.subr.mxu0 %v14576_v8 }
0x5505   :  { %v10720_v52 = vpop.permute.xlu0 %10719 }
0x550c   :  { %v14463_v45 = vpop.eup %14462 }
0x550d   :  { %v10557_v48 = vsel %vm175_vm2, %v14463_v45, 0.0 }
0x550e   :  { %10558 = vadd.xlane.f32.xlu1 %v10557_v48 }
0x551f   :  { %10721 = vrot.lane.b32.xlu1 %v15993_v47, %s16278_s2 }
0x559b   :  { %v10559_v49 = vpop.xlane.xlu1 %10558 }
0x559c   :  { %14464 = vrcp.f32 %v10559_v49  ;;  %v12705_v49 = vld [vmem:[%s16237_s3 + $0xb0] sm:$0xff] }
0x559f   :  { %v10722_v54 = vpop.permute.xlu1 %10721 }
0x55a6   :  { %v14465_v51 = vpop.eup %14464 }
0x55a7   :  { %v10564_v53 = vmul.f32 %v14465_v51, %v14463_v45 }
0x55a9   :  { %13893 = vmatmul.mubr.msk.f32.vlgmr.msra.gmra.mrb[80].mxu0 %vm175_vm2, %v10564_v53  ;;  %v16038_v40 = vpop.f32.mrb[126].mxu1 }
0x55aa   :  { %13901 = vmatpush3.xpose.msk.msra.mxu0 %vm175_vm2, %v10722_v54  ;;  %v13899_v55 = vpop.f32.mrb[127].mxu1  ;;  %13902 = vmatprep.mubr.msk.f32.mxu0 %vm14577_vm1, %v14576_v8 }
0x55ab   :  { %13910 = vmatprep.subr.mxu0 %v14576_v8 }
0x55ad   :  { %13903 = vmatmul.mubr.msk.f32.vlgmr.msra.gmra.mrb[82].mxu0 %vm175_vm2, %v10720_v52  ;;  %v10871_v56 = vpop.f32.mrb[128].mxu1 }
0x55ae   :  { %v13909_v57 = vpop.f32.mrb[129].mxu1  ;;  %v10878_v60 = vsel %vm175_vm2, %v10871_v56, -inf  ;;  %13912 = vmatprep.mubr.msk.f32.mxu0 %vm14577_vm1, %v14576_v8 }
0x55af   :  { %10879 = vmax.xlane.f32.xlu1 %v10878_v60 }
0x55c0   :  { %11213 = vrot.lane.b32.xlu1 %v15993_v47, %s16277_s21 }
0x55c4   :  { %11211 = vrot.lane.b32.xlu1 %v15993_v47, %s16274_s23 }
0x55c8   :  { %11289 = vrot.lane.b32.xlu1 %v15991_v21, %s16274_s23 }
0x563c   :  { %v10880_v61 = vpop.xlane.xlu1 %10879 }
0x563d   :  { %v10882_v63 = vsub.f32 %v10871_v56, %v10880_v61 }
0x563f   :  { %v10885_v1 = vmul.f32 1.442695, %v10882_v63 }
0x5640   :  { %v11214_v10 = vpop.permute.xlu1 %11213 }
0x5641   :  { %14466 = vpow2.f32 %v10885_v1 }
0x5644   :  { %v11212_v38 = vpop.permute.xlu1 %11211 }
0x5648   :  { %v11290_v15 = vpop.permute.xlu1 %11289 }
0x564b   :  { %v14467_v28 = vpop.eup %14466 }
0x564c   :  { %v10890_v27 = vsel %vm175_vm2, %v14467_v28, 0.0 }
0x564d   :  { %10891 = vadd.xlane.f32.xlu0 %v10890_v27 }
0x5663   :  { %10973 = vrot.lane.b32.xlu0 %v15991_v21, %s16275_s22 }
0x5667   :  { %11291 = vrot.lane.b32.xlu0 %v15991_v21, %s16277_s21 }
0x567c   :  { %v16059_v2 = vpop.f32.mrb[80].mxu0 }
0x567d   :  { %v13894_v3 = vpop.f32.mrb[81].mxu0 }
0x5680   :  { %v10793_v0 = vpop.f32.mrb[82].mxu0 }
0x5681   :  { %v13904_v4 = vpop.f32.mrb[83].mxu0  ;;  %v10875_v6 = vsel %vm175_vm2, %v10793_v0, -inf }
0x5686   :  { %10876 = vmax.xlane.f32.xlu0 %v10875_v6 }
0x569c   :  { %10897 = vrot.lane.b32.xlu0 %v15993_v47, %s16275_s22 }
0x56a0   :  { %11389 = vrot.lane.b32.xlu0 %v15993_v47, %s16272_s24 }
0x56a4   :  { %11626 = vrot.lane.b32.xlu0 %v15993_v47, %s16273_s25 }
0x56a8   :  { %11704 = vrot.lane.b32.xlu0 %v15991_v21, %s16273_s25 }
0x56ac   :  { %11624 = vrot.lane.b32.xlu0 %v15993_v47, %s16270_s27 }
0x56b0   :  { %11702 = vrot.lane.b32.xlu0 %v15991_v21, %s16270_s27 }
0x56da   :  { %v10892_v9 = vpop.xlane.xlu0 %10891 }
0x56db   :  { %14468 = vrcp.f32 %v10892_v9 }
0x56de   :  { %v10974_v50 = vpop.permute.xlu0 %10973 }
0x56df   :  { %13916 = vmatpush3.msra.mxu1 %v10974_v50 }
0x56e0   :  { %13930 = vmatprep.subr.mxu1 %v14576_v8 }
0x56e2   :  { %v11292_v37 = vpop.permute.xlu0 %11291 }
0x56e5   :  { %v14469_v11 = vpop.eup %14468 }
0x56e6   :  { %v10896_v14 = vmul.f32 %v14469_v11, %v14467_v28 }
0x56e8   :  { %13918 = vmatmul.mubr.msk.f32.vlgmr.msra.gmra.mrb[130].mxu1 %vm175_vm2, %v10896_v14 }
0x56e9   :  { %13931 = vmatpush3.xpose.msk.msra.mxu1 %vm175_vm2, %v11214_v10  ;;  %13932 = vmatprep.mubr.msk.f32.mxu1 %vm14577_vm1, %v14576_v8 }
0x56ea   :  { %13935 = vmatprep.subr.mxu1 %v14576_v8 }
0x56ec   :  { %13933 = vmatmul.mubr.msk.f32.vlgmr.msra.gmra.mrb[132].mxu1 %vm175_vm2, %v11212_v38 }
0x56ed   :  { %13936 = vmatpush3.xpose.msk.msra.mxu1 %vm175_vm2, %v11292_v37  ;;  %13937 = vmatprep.mubr.msk.f32.mxu1 %vm14577_vm1, %v14576_v8 }
0x56ee   :  { %13945 = vmatprep.subr.mxu1 %v14576_v8 }
0x56f0   :  { %13938 = vmatmul.mubr.msk.f32.vlgmr.msra.gmra.mrb[134].mxu1 %vm175_vm2, %v11290_v15 }
0x56f1   :  { %13947 = vmatprep.mubr.msk.f32.mxu1 %vm14577_vm1, %v14576_v8 }
0x5713   :  { %v10877_v16 = vpop.xlane.xlu0 %10876 }
0x5714   :  { %v10881_v12 = vsub.f32 %v10793_v0, %v10877_v16 }
0x5716   :  { %v10883_v17 = vmul.f32 1.442695, %v10881_v12 }
0x5717   :  { %v10898_v62 = vpop.permute.xlu0 %10897 }
0x5718   :  { %14470 = vpow2.f32 %v10883_v17  ;;  %13911 = vmatpush3.msra.mxu0 %v10898_v62 }
0x5719   :  { %13920 = vmatprep.subr.mxu0 %v12704_v59 }
0x571b   :  { %v11390_v51 = vpop.permute.xlu0 %11389 }
0x571f   :  { %v11627_v52 = vpop.permute.xlu0 %11626 }
0x5722   :  { %v14471_v20 = vpop.eup %14470 }
0x5723   :  { %v10887_v22 = vsel %vm175_vm2, %v14471_v20, 0.0 }
0x5724   :  { %10888 = vadd.xlane.f32.xlu1 %v10887_v22 }
0x57b1   :  { %v10889_v46 = vpop.xlane.xlu1 %10888 }
0x57b2   :  { %14472 = vrcp.f32 %v10889_v46 }
0x57bb   :  { %v11045_v23 = vpop.f32.mrb[130].mxu1 }
0x57bc   :  { %v14473_v24 = vpop.eup %14472  ;;  %v13919_v25 = vpop.f32.mrb[131].mxu1 }
0x57bd   :  { %v10894_v26 = vmul.f32 %v14473_v24, %v14471_v20  ;;  %v12706_v24 = vld [vmem:[%s16237_s3 + $0xb8] sm:$0xff] }
0x57bf   :  { %13913 = vmatmul.mubr.msk.f32.vlgmr.msra.gmra.mrb[84].mxu0 %vm175_vm2, %v10894_v26  ;;  %v11285_v13 = vpop.f32.mrb[132].mxu1 }
0x57c0   :  { %v13934_v29 = vpop.f32.mrb[133].mxu1  ;;  %v11367_v31 = vsel %vm175_vm2, %v11285_v13, -inf  ;;  %13921 = vmatpush3.msra.mxu0 %v12704_v59 }
0x57c1   :  { %11368 = vmax.xlane.f32.xlu1 %v11367_v31  ;;  %13925 = vmatprep.subr.mxu0 %v12703_v35 }
0x57c3   :  { %v11363_v58 = vpop.f32.mrb[134].mxu1 }
0x57c4   :  { %v13939_v32 = vpop.f32.mrb[135].mxu1  ;;  %v11370_v34 = vsel %vm175_vm2, %v11363_v58, -inf }
0x57c5   :  { %11371 = vmax.xlane.f32.xlu1 %v11370_v34  ;;  %v12740_v32 = vld [vmem:[%s16238_s4 + $0x5] ss:$0 sm:$0xff] }
0x584e   :  { %v11369_v36 = vpop.xlane.xlu1 %11368 }
0x584f   :  { %v11373_v33 = vsub.f32 %v11285_v13, %v11369_v36 }
0x5851   :  { %v11375_v39 = vmul.f32 1.442695, %v11373_v33 }
0x5852   :  { %v11372_v41 = vpop.xlane.xlu1 %11371 }
0x5853   :  { %14474 = vpow2.f32 %v11375_v39  ;;  %v11374_v5 = vsub.f32 %v11363_v58, %v11372_v41 }
0x5855   :  { %v11377_v42 = vmul.f32 1.442695, %v11374_v5 }
0x5857   :  { %14476 = vpow2.f32 %v11377_v42 }
0x585d   :  { %v14475_v30 = vpop.eup %14474 }
0x585e   :  { %v11379_v43 = vsel %vm175_vm2, %v14475_v30, 0.0 }
0x585f   :  { %11380 = vadd.xlane.f32.xlu1 %v11379_v43 }
0x5861   :  { %v14477_v7 = vpop.eup %14476 }
0x5862   :  { %v11382_v44 = vsel %vm175_vm2, %v14477_v7, 0.0 }
0x5863   :  { %11383 = vadd.xlane.f32.xlu1 %v11382_v44 }
0x5874   :  { %11465 = vrot.lane.b32.xlu1 %v15991_v21, %s16272_s24 }
0x5892   :  { %v10969_v45 = vpop.f32.mrb[84].mxu0 }
0x5893   :  { %v13914_v48 = vpop.f32.mrb[85].mxu0  ;;  %13922 = vmatprep.mubr.msk.f32.mxu0 %vm175_vm2, %v10969_v45 }
0x5894   :  { %13923 = vmatmul.mubr.msk.f32.vlgmr.msra.gmra.mrb[86].mxu0 %vm175_vm2, %v11045_v23 }
0x5895   :  { %13927 = vmatprep.mubr.msk.f32.mxu0 %vm175_vm2, %v16059_v2  ;;  %13926 = vmatpush3.msra.mxu0 %v12703_v35 }
0x5896   :  { %13940 = vmatprep.subr.mxu0 %v14576_v8 }
0x589c   :  { %13928 = vmatmul.mubr.msk.f32.vlgmr.msra.gmra.mrb[86].mxu0 %vm175_vm2, %v16038_v40  ;;  %v11705_v40 = vpop.permute.xlu0 %11704 }
0x589d   :  { %13941 = vmatpush3.msra.mxu0 %v11390_v51  ;;  %13942 = vmatprep.mubr.msk.f32.mxu0 %vm14577_vm1, %v14576_v8 }
0x589e   :  { %13950 = vmatprep.subr.mxu0 %v12705_v49 }
0x58a0   :  { %v11625_v63 = vpop.permute.xlu0 %11624 }
0x58a4   :  { %v11703_v3 = vpop.permute.xlu0 %11702 }
0x58ec   :  { %v11381_v53 = vpop.xlane.xlu1 %11380 }
0x58ed   :  { %14478 = vrcp.f32 %v11381_v53  ;;  %v12745_v53 = vld [vmem:[%s16241_s7 + $0xa8] sm:$0xff] }
0x58f0   :  { %v11384_v54 = vpop.xlane.xlu1 %11383 }
0x58f1   :  { %14480 = vrcp.f32 %v11384_v54 }
0x58f4   :  { %v11466_v55 = vpop.permute.xlu1 %11465 }
0x58f5   :  { %13946 = vmatpush3.msra.mxu1 %v11466_v55  ;;  %v12746_v55 = vld [vmem:[%s16241_s7 + $0xb0] sm:$0xff] }
0x58f6   :  { %13955 = vmatprep.subr.mxu1 %v14576_v8 }
0x58f7   :  { %v14479_v56 = vpop.eup %14478 }
0x58f8   :  { %v11386_v57 = vmul.f32 %v14479_v56, %v14475_v30 }
0x58fa   :  { %13943 = vmatmul.mubr.msk.f32.vlgmr.msra.gmra.mrb[88].mxu0 %vm175_vm2, %v11386_v57  ;;  %v12752_v57 = vld [vmem:[%s16243_s9 + $0x140] sm:$0xff] }
0x58fb   :  { %v14481_v60 = vpop.eup %14480  ;;  %13951 = vmatpush3.msra.mxu0 %v12705_v49 }
0x58fc   :  { %v11388_v61 = vmul.f32 %v14481_v60, %v14477_v7  ;;  %13960 = vmatprep.subr.mxu0 %v14576_v8  ;;  %v12753_v60 = vld [vmem:[%s16243_s9 + $0x148] sm:$0xff] }
0x58fe   :  { %13948 = vmatmul.mubr.msk.f32.vlgmr.msra.gmra.mrb[136].mxu1 %vm175_vm2, %v11388_v61  ;;  %v14186_v61 = vpack.c.bf16 %v12753_v60, %v12752_v57  ;;  %v12767_v60 = vld [vmem:[%s16246_s12 + $0x5] ss:$0 sm:$0xff] }
0x58ff   :  { %13956 = vmatpush3.xpose.msk.msra.mxu1 %vm175_vm2, %v11627_v52  ;;  %13957 = vmatprep.mubr.msk.f32.mxu1 %vm14577_vm1, %v14576_v8  ;;  %v12747_v52 = vld [vmem:[%s16241_s7 + $0xb8] sm:$0xff] }
0x5900   :  { %13965 = vmatprep.subr.mxu1 %v14576_v8  ;;  %v14182_v56 = vpack.c.bf16 %v12747_v52, %v12746_v55  ;;  %v12766_v55 = vld [vmem:[%s16245_s11 + $0x5] ss:$0 sm:$0xff] }
0x5902   :  { %13958 = vmatmul.mubr.msk.f32.vlgmr.msra.gmra.mrb[138].mxu1 %vm175_vm2, %v11625_v63  ;;  %v12755_v63 = vld [vmem:[%s16243_s9 + $0x158] sm:$0xff] }
0x5903   :  { %13967 = vmatprep.mubr.msk.f32.mxu1 %vm14577_vm1, %v14576_v8 }
0x59cd   :  { %v11461_v1 = vpop.f32.mrb[88].mxu0 }
0x59ce   :  { %v13944_v28 = vpop.f32.mrb[89].mxu0  ;;  %13952 = vmatprep.mubr.msk.f32.mxu0 %vm175_vm2, %v11461_v1 }
0x59cf   :  { %v12756_v28 = vld [vmem:[%s16243_s9 + $0x160] sm:$0xff] }
0x59d1   :  { %v11537_v27 = vpop.f32.mrb[136].mxu1 }
0x59d2   :  { %v13949_v2 = vpop.f32.mrb[137].mxu1  ;;  %13953 = vmatmul.mubr.msk.f32.vlgmr.msra.gmra.mrb[86].mxu0 %vm175_vm2, %v11537_v27  ;;  %v12757_v27 = vld [vmem:[%s16243_s9 + $0x168] sm:$0xff] }
0x59d3   :  { %13961 = vmatpush3.xpose.msk.msra.mxu0 %vm175_vm2, %v11705_v40  ;;  %13962 = vmatprep.mubr.msk.f32.mxu0 %vm14577_vm1, %v14576_v8  ;;  %v12754_v40 = vld [vmem:[%s16243_s9 + $0x150] sm:$0xff]  ;;  %v14194_v2 = vpack.c.bf16 %v12757_v27, %v12756_v28 }
0x59d4   :  { %13970 = vmatprep.subr.mxu0 %v14576_v8  ;;  %v14190_v1 = vpack.c.bf16 %v12755_v63, %v12754_v40 }
0x59d5   :  { %v11698_v0 = vpop.f32.mrb[138].mxu1 }
0x59d6   :  { %v13959_v4 = vpop.f32.mrb[139].mxu1  ;;  %13963 = vmatmul.mubr.msk.f32.vlgmr.msra.gmra.mrb[90].mxu0 %vm175_vm2, %v11703_v3  ;;  %v11780_v6 = vsel %vm175_vm2, %v11698_v0, -inf }
0x59d7   :  { %11781 = vmax.xlane.f32.xlu1 %v11780_v6  ;;  %13972 = vmatprep.mubr.msk.f32.mxu0 %vm14577_vm1, %v14576_v8 }
0x5a64   :  { %v11782_v9 = vpop.xlane.xlu1 %11781 }
0x5a65   :  { %v11786_v50 = vsub.f32 %v11698_v0, %v11782_v9 }
0x5a67   :  { %v11788_v10 = vmul.f32 1.442695, %v11786_v50 }
0x5a69   :  { %14482 = vpow2.f32 %v11788_v10 }
0x5a73   :  { %v14483_v37 = vpop.eup %14482 }
0x5a74   :  { %v11792_v15 = vsel %vm175_vm2, %v14483_v37, 0.0 }
0x5aa9   :  { %v11776_v11 = vpop.f32.mrb[90].mxu0 }
0x5aaa   :  { %v13964_v14 = vpop.f32.mrb[91].mxu0  ;;  %v11783_v38 = vsel %vm175_vm2, %v11776_v11, -inf }
0x5aab   :  { %11784 = vmax.xlane.f32.xlu0 %v11783_v38 }
0x5aaf   :  { %11793 = vadd.xlane.f32.xlu0 %v11792_v15  ;;  %v12743_v15 = vld [vmem:[%s16240_s6 + $0x5] ss:$0 sm:$0xff] }
0x5ac5   :  { %11802 = vrot.lane.b32.xlu0 %v15993_v47, %s16271_s29 }
0x5b38   :  { %v11785_v16 = vpop.xlane.xlu0 %11784 }
0x5b39   :  { %v11787_v12 = vsub.f32 %v11776_v11, %v11785_v16  ;;  %v12742_v11 = vld [vmem:[#allocation5 + $0x5] ss:$0 sm:$0xff] }
0x5b3b   :  { %v11790_v17 = vmul.f32 1.442695, %v11787_v12 }
0x5b3c   :  { %v11794_v8 = vpop.xlane.xlu0 %11793 }
0x5b3d   :  { %14484 = vpow2.f32 %v11790_v17 }
0x5b3e   :  { %14486 = vrcp.f32 %v11794_v8 }
0x5b40   :  { %v11803_v62 = vpop.permute.xlu0 %11802 }
0x5b41   :  { %13966 = vmatpush3.msra.mxu1 %v11803_v62  ;;  %v12758_v62 = vld [vmem:[%s16243_s9 + $0x170] sm:$0xff] }
0x5b47   :  { %v14485_v20 = vpop.eup %14484 }
0x5b48   :  { %v14487_v22 = vpop.eup %14486  ;;  %v11795_v46 = vsel %vm175_vm2, %v14485_v20, 0.0 }
0x5b49   :  { %v11799_v23 = vmul.f32 %v14487_v22, %v14483_v37  ;;  %11796 = vadd.xlane.f32.xlu1 %v11795_v46  ;;  %v12749_v46 = vld [vmem:[%s16242_s8 + $0x5] ss:$0 sm:$0xff] }
0x5b4b   :  { %13968 = vmatmul.mubr.msk.f32.vlgmr.msra.gmra.mrb[140].mxu1 %vm175_vm2, %v11799_v23 }
0x5b5a   :  { %11878 = vrot.lane.b32.xlu1 %v15991_v21, %s16271_s29 }
0x5bd6   :  { %v11797_v47 = vpop.xlane.xlu1 %11796 }
0x5bd7   :  { %14488 = vrcp.f32 %v11797_v47 }
0x5bda   :  { %v11879_v25 = vpop.permute.xlu1 %11878 }
0x5bdb   :  { %13971 = vmatpush3.msra.mxu0 %v11879_v25 }
0x5bdc   :  { %13975 = vmatprep.subr.mxu0 %v12706_v24 }
0x5be1   :  { %v14489_v26 = vpop.eup %14488 }
0x5be2   :  { %v11801_v13 = vmul.f32 %v14489_v26, %v14485_v20  ;;  %v12759_v20 = vld [vmem:[%s16243_s9 + $0x178] sm:$0xff] }
0x5be3   :  { %v14198_v22 = vpack.c.bf16 %v12759_v20, %v12758_v62 }
0x5be4   :  { %13973 = vmatmul.mubr.msk.f32.vlgmr.msra.gmra.mrb[92].mxu0 %vm175_vm2, %v11801_v13 }
0x5be5   :  { %13976 = vmatpush3.msra.mxu0 %v12706_v24 }
0x5be6   :  { %14187 = vmatprep.subr.bf16.mxu0 %v14186_v61 }
0x5c1e   :  { %v11874_v29 = vpop.f32.mrb[140].mxu1 }
0x5c1f   :  { %v13969_v31 = vpop.f32.mrb[141].mxu1  ;;  %13977 = vmatprep.mubr.msk.f32.mxu0 %vm175_vm2, %v11874_v29  ;;  %v12761_v29 = vld [vmem:[%s16244_s10 + $0x5] ss:$0 sm:$0xff] }
0x5cb7   :  { %v11950_v58 = vpop.f32.mrb[92].mxu0 }
0x5cb8   :  { %v13974_v21 = vpop.f32.mrb[93].mxu0  ;;  %13978 = vmatmul.mubr.msk.f32.vlgmr.msra.gmra.mrb[86].mxu0 %vm175_vm2, %v11950_v58 }
0x5cb9   :  { %14189 = vmatpush3.bf16.msra.mxu0 %v14186_v61 }
0x5cba   :  { %14191 = vmatprep.subr.bf16.mxu0 %v14190_v1 }
0x5cbd   :  { %14193 = vmatpush3.bf16.msra.mxu0 %v14190_v1 }
0x5cbe   :  { %14195 = vmatprep.subr.bf16.mxu0 %v14194_v2 }
0x5cc1   :  { %14197 = vmatpush3.bf16.msra.mxu0 %v14194_v2 }
0x5cc2   :  { %14199 = vmatprep.subr.bf16.mxu0 %v14198_v22 }
0x5cc5   :  { %14201 = vmatpush3.bf16.msra.mxu0 %v14198_v22 }
0x5d8b   :  { %v13979_v34 = vpop.f32.mrb[86].mxu0 }
0x5d8c   :  { %v12046_v59 = vadd.f32 %v13979_v34, %v12740_v32  ;;  %v12026_v35 = vpop.f32.mrb[87].mxu0 }
0x5d8d   :  { %v12045_v36 = vadd.f32 %v12740_v32, %v12026_v35 }
0x5d8e   :  { %v12048_v33 = vadd.f32 %v12046_v59, %v15980_v19 }
0x5d8f   :  { %v12047_v39 = vadd.f32 %v12045_v36, %v15978_v18  ;;  %v12744_v18 = vld [vmem:[%s16241_s7 + $0xa0] sm:$0xff] }
0x5d90   :  { %v12056_v41 = vsel %vm86_vm0, %v12048_v33, 0.0  ;;  %v14178_v54 = vpack.c.bf16 %v12745_v53, %v12744_v18 }
0x5d91   :  { %12057 = vadd.xlane.f32.xlu0 %v12056_v41  ;;  %v12053_v5 = vsel %vm86_vm0, %v12047_v39, 0.0 }
0x5d92   :  { %12054 = vadd.xlane.f32.xlu1 %v12053_v5  ;;  %14179 = vmatprep.subr.bf16.mxu1 %v14178_v54 }
0x5d93   :  { %14181 = vmatpush3.bf16.msra.mxu1 %v14178_v54 }
0x5d94   :  { %14183 = vmatprep.subr.bf16.mxu1 %v14182_v56 }
0x5d97   :  { %14185 = vmatpush3.bf16.msra.mxu1 %v14182_v56 }
0x5e1e   :  { %v12058_v42 = vpop.xlane.xlu0 %12057 }
0x5e1f   :  { %v12060_v30 = vmul.f32 0.03125, %v12058_v42  ;;  %v12055_v43 = vpop.xlane.xlu1 %12054 }
0x5e20   :  { %v12059_v7 = vmul.f32 0.03125, %v12055_v43 }
0x5e21   :  { %v12062_v44 = vsub.f32 %v12048_v33, %v12060_v30 }
0x5e22   :  { %v12061_v45 = vsub.f32 %v12047_v39, %v12059_v7 }
0x5e23   :  { %v12064_v48 = vmul.f32 %v12062_v44, %v12062_v44 }
0x5e24   :  { %v12063_v49 = vmul.f32 %v12061_v45, %v12061_v45 }
0x5e25   :  { %v12068_v51 = vsel %vm86_vm0, %v12064_v48, 0.0 }
0x5e26   :  { %12069 = vadd.xlane.f32.xlu1 %v12068_v51  ;;  %v12065_v19 = vsel %vm86_vm0, %v12063_v49, 0.0 }
0x5e27   :  { %12066 = vadd.xlane.f32.xlu0 %v12065_v19 }
0x5eb3   :  { %v12070_v3 = vpop.xlane.xlu1 %12069 }
0x5eb4   :  { %v12072_v0 = vmul.f32 0.03125, %v12070_v3  ;;  %v12067_v4 = vpop.xlane.xlu0 %12066 }
0x5eb5   :  { %v12071_v6 = vmul.f32 0.03125, %v12067_v4 }
0x5eb6   :  { %v12074_v9 = vadd.f32 1e-05, %v12072_v0 }
0x5eb7   :  { %v12073_v50 = vadd.f32 1e-05, %v12071_v6 }
0x5eb8   :  { %14490 = vrsqrt.f32 %v12074_v9 }
0x5eb9   :  { %14492 = vrsqrt.f32 %v12073_v50 }
0x5ec2   :  { %v14491_v10 = vpop.eup %14490 }
0x5ec3   :  { %v14493_v14 = vpop.eup %14492  ;;  %v12078_v38 = vmul.f32 %v14491_v10, %v12062_v44 }
0x5ec4   :  { %v12077_v37 = vmul.f32 %v14493_v14, %v12061_v45 }
0x5ec5   :  { %v12086_v16 = vmul.f32 %v12742_v11, %v12078_v38 }
0x5ec6   :  { %v12085_v12 = vmul.f32 %v12742_v11, %v12077_v37 }
0x5ec7   :  { %v12094_v8 = vadd.f32 %v12743_v15, %v12086_v16 }
0x5ec8   :  { %v12093_v17 = vadd.f32 %v12743_v15, %v12085_v12 }
0x5eca   :  { %13988 = vmatprep.mubr.msk.f32.mxu1 %vm86_vm0, %v12093_v17 }
0x5ecb   :  { %13989 = vmatmul.mubr.msk.f32.vlgmr.msra.gmra.mrb[142].mxu1 %vm86_vm0, %v12094_v8 }
0x5f9e   :  { %v13990_v23 = vpop.f32.mrb[142].mxu1 }
0x5f9f   :  { %v12186_v47 = vadd.f32 %v13990_v23, %v12749_v46  ;;  %v12180_v24 = vpop.f32.mrb[143].mxu1 }
0x5fa0   :  { %v12181_v25 = vadd.f32 %v12749_v46, %v12180_v24 }
0x5fa1   :  { %v12190_v13 = vmax.f32 %v12186_v47, 0.0 }
0x5fa2   :  { %v12189_v26 = vmax.f32 %v12181_v25, 0.0 }
0x5fa4   :  { %14007 = vmatprep.mubr.msk.f32.mxu0 %vm1984_vm3, %v12189_v26 }
0x5fa5   :  { %14008 = vmatmul.mubr.msk.f32.vlgmr.msra.gmra.mrb[94].mxu0 %vm1984_vm3, %v12190_v13 }
0x6078   :  { %v14009_v31 = vpop.f32.mrb[94].mxu0 }
0x6079   :  { %v12286_v58 = vadd.f32 %v14009_v31, %v12761_v29  ;;  %v12280_v21 = vpop.f32.mrb[95].mxu0 }
0x607a   :  { %v12281_v32 = vadd.f32 %v12761_v29, %v12280_v21 }
0x607b   :  { %v12290_v34 = vadd.f32 %v12286_v58, %v12094_v8 }
0x607c   :  { %v12289_v59 = vadd.f32 %v12281_v32, %v12093_v17 }
0x607d   :  { %v12298_v35 = vsel %vm86_vm0, %v12290_v34, 0.0 }
0x607e   :  { %12299 = vadd.xlane.f32.xlu1 %v12298_v35  ;;  %v12295_v36 = vsel %vm86_vm0, %v12289_v59, 0.0 }
0x607f   :  { %12296 = vadd.xlane.f32.xlu0 %v12295_v36 }
0x610b   :  { %v12300_v33 = vpop.xlane.xlu1 %12299 }
0x610c   :  { %v12302_v39 = vmul.f32 0.03125, %v12300_v33  ;;  %v12297_v41 = vpop.xlane.xlu0 %12296 }
0x610d   :  { %v12301_v5 = vmul.f32 0.03125, %v12297_v41 }
0x610e   :  { %v12304_v42 = vsub.f32 %v12290_v34, %v12302_v39 }
0x610f   :  { %v12303_v30 = vsub.f32 %v12289_v59, %v12301_v5 }
0x6110   :  { %v12306_v43 = vmul.f32 %v12304_v42, %v12304_v42 }
0x6111   :  { %v12305_v7 = vmul.f32 %v12303_v30, %v12303_v30 }
0x6112   :  { %v12310_v44 = vsel %vm86_vm0, %v12306_v43, 0.0 }
0x6113   :  { %12311 = vadd.xlane.f32.xlu1 %v12310_v44  ;;  %v12307_v45 = vsel %vm86_vm0, %v12305_v7, 0.0 }
0x6114   :  { %12308 = vadd.xlane.f32.xlu0 %v12307_v45 }
0x61a0   :  { %v12312_v48 = vpop.xlane.xlu1 %12311 }
0x61a1   :  { %v12314_v49 = vmul.f32 0.03125, %v12312_v48  ;;  %v12309_v51 = vpop.xlane.xlu0 %12308 }
0x61a2   :  { %v12313_v19 = vmul.f32 0.03125, %v12309_v51 }
0x61a3   :  { %v12316_v18 = vadd.f32 1e-05, %v12314_v49 }
0x61a4   :  { %v12315_v53 = vadd.f32 1e-05, %v12313_v19 }
0x61a5   :  { %14494 = vrsqrt.f32 %v12316_v18 }
0x61a6   :  { %14496 = vrsqrt.f32 %v12315_v53 }
0x61af   :  { %v14495_v54 = vpop.eup %14494 }
0x61b0   :  { %v14497_v52 = vpop.eup %14496  ;;  %v12320_v56 = vmul.f32 %v14495_v54, %v12304_v42 }
0x61b1   :  { %v12319_v57 = vmul.f32 %v14497_v52, %v12303_v30 }
0x61b2   :  { %v12328_v40 = vmul.f32 %v12766_v55, %v12320_v56 }
0x61b3   :  { %v12327_v61 = vmul.f32 %v12766_v55, %v12319_v57 }
0x61b4   :  { %v12336_v63 = vadd.f32 %v12767_v60, %v12328_v40 }
0x61b5   :  { %v12335_v1 = vadd.f32 %v12767_v60, %v12327_v61 }
0x61b6   :  { %12338 = vst.msk [vmem:[#allocation7 + $0x8] sm:$0xff] %vm86_vm0, %v12336_v63 }
0x61b7   :  { %12337 = vst.msk [vmem:[#allocation7] sm:$0xff] %vm86_vm0, %v12335_v1 }
0x61b8   :  { %14553 = shalt.err (!%p14550_p6)
}
0x61b9   :  { %s14554_s0 = scalar_lea.hbm %s16247_s13, 256 }
0x61ba   :  { %p14555_p7 = scmp.ne.s32.totalorder %s16247_s13, %s14554_s0  ;;  %p14558_p8 = scmp.lt.u32.totalorder %s14554_s0, %s16247_s13 }
0x61bc   :  { %p14560_p9 = pnand %p14558_p8, %p14555_p7 }
0x61be   :  { %14563 = shalt.err (!%p14560_p9)
}
0x61bf   :  { %s16280_s25 = smov 8   ;;  %s16281_s7 = smov 128  }
0x61c0   :  { %12350 = dma.vmem_to_hbm [thread:$0]  %s12345_s1, 256, %s16247_s13, [#allocation4], %s16281_s7, %s16281_s7, %s16280_s25  }
0x61c1   :  { %14568 = dma.done.wait [#allocation4], 256  }
0x61c2   :  { %14569 = vsyncadd [#allocation4], 4294967040 }
0x61c3   :  { %12354 = vsyncpa [#allocation3], 1 }
0x61c4   :  { %12355 = vsyncpa [#allocation6], 1 }
0x61c5   :  { %12356 = vsyncpa [#allocation4], 1 }

</bundles_post_ra>
